<compile_context>
chip_gen: v6e
topology: v6e:2x2x1
jax: 0.10.0
libtpu: 0.0.40
codegen_flags: <defaults>
</compile_context>

<pallas_src>
import functools

import jax
import jax.numpy as jnp
from jax import lax
from jax.experimental import pallas as pl
from jax.experimental.pallas import tpu as pltpu


# ----------------------------- in-kernel helpers -----------------------------

def _ln(x, g, b, eps=1e-5):
    # PyTorch LayerNorm (biased variance).
    mu = jnp.mean(x, axis=-1, keepdims=True)
    xc = x - mu
    var = jnp.mean(xc * xc, axis=-1, keepdims=True)
    return xc * lax.rsqrt(var + eps) * g + b


def _erf(x):
    # Abramowitz & Stegun 7.1.26 (|err| < 1.5e-7): exact-GELU (erf) semantics without
    # relying on an erf primitive lowering inside Mosaic.
    a1, a2, a3, a4, a5 = 0.254829592, -0.284496736, 1.421413741, -1.453152027, 1.061405429
    p = 0.3275911
    sgn = jnp.where(x >= 0.0, 1.0, -1.0)
    ax = jnp.abs(x)
    t = 1.0 / (1.0 + p * ax)
    poly = ((((a5 * t + a4) * t + a3) * t + a2) * t + a1) * t
    return sgn * (1.0 - poly * jnp.exp(-ax * ax))


def _gelu(x):
    # nn.GELU() default (exact erf form).
    return 0.5 * x * (1.0 + _erf(x * 0.7071067811865476))


def _softplus(x):
    # Numerically stable softplus using only exp/log/max.
    return jnp.maximum(x, 0.0) + jnp.log(1.0 + jnp.exp(-jnp.abs(x)))


# Per-layer (depth-stacked) parameter order — must match the kernel signature.
_LAYER_PARAM_NAMES = (
    "ln1_g", "ln1_b", "wq", "wk", "wv", "wo", "bo",
    "ln2_g", "ln2_b", "wf1", "bf1", "wf2", "bf2", "fln_g", "fln_b",
    "wr1", "br1", "wr2t", "br2",
    "ln3_g", "ln3_b", "wm1", "bm1", "wm2", "bm2",
)
_TAIL_PARAM_NAMES = ("norm_g", "norm_b", "head_w", "head_b")


# ------------------------- the fused whole-model kernel -------------------------

def _mesanet_kernel(
        x_emb_ref,
        ln1g_ref, ln1b_ref, wq_ref, wk_ref, wv_ref, wo_ref, bo_ref,
        ln2g_ref, ln2b_ref, wf1_ref, bf1_ref, wf2_ref, bf2_ref, flng_ref, flnb_ref,
        wr1_ref, br1_ref, wr2t_ref, br2_ref,
        ln3g_ref, ln3b_ref, wm1_ref, bm1_ref, wm2_ref, bm2_ref,
        nog_ref, nob_ref, wh_ref, bh_ref,
        logits_ref,          # output (written on the last grid step)
        xres_ref,            # VMEM scratch: residual stream, persists across layers
        *, batch, heads, cg_steps):
    layer = pl.program_id(0)
    M, D = xres_ref.shape
    T = M // batch
    hd = D // heads
    scale = float(hd) ** -0.5

    @pl.when(layer == 0)
    def _init():
        xres_ref[...] = x_emb_ref[...]

    x = xres_ref[...]

    # ------------- LN1 + full-width Q/K/V projections (3 MXU pushes) -------------
    h1 = _ln(x, ln1g_ref[...], ln1b_ref[...])
    q = jnp.dot(h1, wq_ref[...], preferred_element_type=jnp.float32)
    k = jnp.dot(h1, wk_ref[...], preferred_element_type=jnp.float32)
    v = jnp.dot(h1, wv_ref[...], preferred_element_type=jnp.float32)
    wo = wo_ref[...]
    bo = bo_ref[...]

    # Per-head lane masks (built once per step): VPU mul replaces per-head weight
    # views / activation lane slicing.
    lane = lax.broadcasted_iota(jnp.int32, (1, D), 1)
    head_masks = [jnp.logical_and(lane >= hh * hd, lane < (hh + 1) * hd).astype(jnp.float32)
                  for hh in range(heads)]

    # ------- dense softmax attention (T<=256 path), batch rows written directly -------
    # TODO(synk): no causal mask applied, matching the previous implementation of the
    # benchmark's dense-attention path; flip to masked scores if the reference is causal.
    ao_rows = []
    for b in range(batch):
        q_b = q[b * T:(b + 1) * T, :]
        k_b = k[b * T:(b + 1) * T, :]
        v_b = v[b * T:(b + 1) * T, :]
        oheads = jnp.zeros((T, D), jnp.float32)
        for hh in range(heads):
            mask = head_masks[hh]
            s = lax.dot_general(q_b * mask, k_b, (((1,), (1,)), ((), ())),
                                preferred_element_type=jnp.float32) * scale   # (T, T)
            e = jnp.exp(s - jnp.max(s, axis=-1, keepdims=True))
            probs = e * pl.reciprocal(jnp.sum(e, axis=-1, keepdims=True), approx=True)
            # masked V keeps head hh's lanes only -> summing over heads assembles (T, D)
            oheads = oheads + jnp.dot(probs, v_b * mask,
                                      preferred_element_type=jnp.float32)
        ao_b = jnp.dot(oheads, wo, preferred_element_type=jnp.float32) + bo    # (T, D)
        ao_rows.append(ao_b)
        xres_ref[b * T:(b + 1) * T, :] = x[b * T:(b + 1) * T, :] + ao_b        # x1 rows

    x1 = xres_ref[...]

    # --------------- LN2 + feature_net (all tokens at once) ---------------
    h2 = _ln(x1, ln2g_ref[...], ln2b_ref[...])
    f = _gelu(jnp.dot(h2, wf1_ref[...], preferred_element_type=jnp.float32) + bf1_ref[...])
    f = jnp.dot(f, wf2_ref[...], preferred_element_type=jnp.float32) + bf2_ref[...]
    feats = _ln(f, flng_ref[...], flnb_ref[...])

    wr1 = wr1_ref[...]
    br1 = br1_ref[...]
    wr2t = wr2t_ref[...]      # (1, 64): reg_net second layer as VPU mul + lane reduce
    br2 = br2_ref[...]        # (1, 1)

    eye = (lax.broadcasted_iota(jnp.int32, (D, D), 0) ==
           lax.broadcasted_iota(jnp.int32, (D, D), 1)).astype(jnp.float32)

    # ---- per-batch MesaNet: normal equations + CG solve + readout (rows written directly)
    for b in range(batch):
        fb = feats[b * T:(b + 1) * T, :]   # (T, D)
        tb = ao_rows[b]                    # target = attention output (pre-residual)

        # reg_net on the per-batch feature mean -> scalar ridge weight
        fmean = jnp.mean(fb, axis=0, keepdims=True)                                # (1, D)
        r1 = jnp.maximum(jnp.dot(fmean, wr1, preferred_element_type=jnp.float32) + br1, 0.0)
        reg = _softplus(jnp.sum(r1 * wr2t, axis=-1, keepdims=True) + br2)          # (1, 1)

        # A = F^T F + reg*I ;  b = Tgt^T F
        A = lax.dot_general(fb, fb, (((0,), (0,)), ((), ())),
                            preferred_element_type=jnp.float32) + eye * reg
        bmat = lax.dot_general(tb, fb, (((0,), (0,)), ((), ())),
                               preferred_element_type=jnp.float32)

        # conjugate gradient, x0 = 0 so r0 = b (fixed unroll; exact divides for alpha/beta)
        xw = jnp.zeros_like(bmat)
        r = bmat
        pvec = bmat
        for _ in range(cg_steps):
            Ap = lax.dot_general(pvec, A, (((1,), (1,)), ((), ())),
                                 preferred_element_type=jnp.float32)   # p @ A^T (A sym.)
            r_nsq = jnp.sum(r * r, axis=-1, keepdims=True)
            pAp = jnp.sum(pvec * Ap, axis=-1, keepdims=True)
            alpha = r_nsq / (pAp + 1e-8)
            xw = xw + alpha * pvec
            r_new = r - alpha * Ap
            beta = jnp.sum(r_new * r_new, axis=-1, keepdims=True) / (r_nsq + 1e-8)
            pvec = r_new + beta * pvec
            r = r_new
        # TODO(synk): reference CG breaks early when max ||r||^2 < 1e-6; fixed unroll here.

        mesa_b = lax.dot_general(fb, xw, (((1,), (1,)), ((), ())),
                                 preferred_element_type=jnp.float32)   # F @ W^T
        xres_ref[b * T:(b + 1) * T, :] = x1[b * T:(b + 1) * T, :] + mesa_b   # x2 rows

    x2 = xres_ref[...]

    # --------------------- LN3 + MLP + residual (all tokens) ---------------------
    h3 = _ln(x2, ln3g_ref[...], ln3b_ref[...])
    m = _gelu(jnp.dot(h3, wm1_ref[...], preferred_element_type=jnp.float32) + bm1_ref[...])
    m = jnp.dot(m, wm2_ref[...], preferred_element_type=jnp.float32) + bm2_ref[...]
    x3 = x2 + m
    xres_ref[...] = x3

    # --------------- final LN + vocab head, fused into the last layer ---------------
    @pl.when(layer == pl.num_programs(0) - 1)
    def _head():
        hn = _ln(x3, nog_ref[...], nob_ref[...])
        logits_ref[...] = (jnp.dot(hn, wh_ref[...], preferred_element_type=jnp.float32)
                           + bh_ref[...])


# ------------------------------ params / forward -------------------------------

def init_params(key, vocab_size, dim, depth, max_seq_len):
    keys = jax.random.split(key, 13)

    def nrm(k, shape):
        return jax.random.normal(k, shape, jnp.float32) * 0.02

    def ones(shape):
        return jnp.ones(shape, jnp.float32)

    def zeros(shape):
        return jnp.zeros(shape, jnp.float32)

    # All per-layer params are stacked on a leading depth axis so the fused kernel can
    # stream them via depth-indexed BlockSpecs.
    return {
        "token_embed": nrm(keys[0], (vocab_size, dim)),
        "pos_embed": nrm(keys[1], (1, max_seq_len, dim)),
        "ln1_g": ones((depth, 1, dim)), "ln1_b": zeros((depth, 1, dim)),
        "wq": nrm(keys[2], (depth, dim, dim)),
        "wk": nrm(keys[3], (depth, dim, dim)),
        "wv": nrm(keys[4], (depth, dim, dim)),
        "wo": nrm(keys[5], (depth, dim, dim)), "bo": zeros((depth, 1, dim)),
        "ln2_g": ones((depth, 1, dim)), "ln2_b": zeros((depth, 1, dim)),
        "wf1": nrm(keys[6], (depth, dim, 2 * dim)), "bf1": zeros((depth, 1, 2 * dim)),
        "wf2": nrm(keys[7], (depth, 2 * dim, dim)), "bf2": zeros((depth, 1, dim)),
        "fln_g": ones((depth, 1, dim)), "fln_b": zeros((depth, 1, dim)),
        "wr1": nrm(keys[8], (depth, dim, 64)), "br1": zeros((depth, 1, 64)),
        "wr2t": nrm(keys[9], (depth, 1, 64)), "br2": zeros((depth, 1, 1)),
        "ln3_g": ones((depth, 1, dim)), "ln3_b": zeros((depth, 1, dim)),
        "wm1": nrm(keys[10], (depth, dim, 4 * dim)), "bm1": zeros((depth, 1, 4 * dim)),
        "wm2": nrm(keys[11], (depth, 4 * dim, dim)), "bm2": zeros((depth, 1, dim)),
        "norm_g": ones((1, dim)), "norm_b": zeros((1, dim)),
        "head_w": nrm(keys[12], (dim, vocab_size)), "head_b": zeros((1, vocab_size)),
        # NOTE: LogLinearAttention.lambda_net output is unused on the T<=256 dense path;
        # MesaNetBlock momentum buffers are unused in forward.
    }


def _layer_spec(a):
    # (depth, r, c) -> kernel sees (r, c); block index = current layer.
    _, r, c = a.shape
    return pl.BlockSpec((None, r, c), lambda l: (l, 0, 0))


def _const_spec(a):
    zeros = (0,) * a.ndim
    return pl.BlockSpec(a.shape, lambda l, _z=zeros: _z)


def forward(params, tokens, *, heads, cg_steps=4):
    B, T = tokens.shape
    dim = params["token_embed"].shape[1]
    depth = params["wq"].shape[0]
    vocab = params["head_w"].shape[1]
    M = B * T

    x_emb = (jnp.take(params["token_embed"], tokens, axis=0)
             + params["pos_embed"][:, :T, :]).reshape(M, dim)

    layer_args = [params[n] for n in _LAYER_PARAM_NAMES]
    tail_args = [params[n] for n in _TAIL_PARAM_NAMES]

    in_specs = ([_const_spec(x_emb)]
                + [_layer_spec(a) for a in layer_args]
                + [_const_spec(a) for a in tail_args])

    logits = pl.pallas_call(
        functools.partial(_mesanet_kernel, batch=B, heads=heads, cg_steps=cg_steps),
        out_shape=jax.ShapeDtypeStruct((M, vocab), jnp.float32),
        grid=(depth,),
        in_specs=in_specs,
        out_specs=pl.BlockSpec((M, vocab), lambda l: (0, 0)),
        # Residual stream stays resident in VMEM across all layers (no HBM round-trips).
        scratch_shapes=[pltpu.VMEM((M, dim), jnp.float32)],
        # Layers are sequential (state carried in scratch) -> 'arbitrary'.  For v7x
        # scale-up, add a leading 'parallel' batch grid axis instead of the in-kernel
        # batch loop so both TensorCores get work.
        compiler_params=pltpu.CompilerParams(dimension_semantics=("arbitrary",)),
    )(x_emb, *layer_args, *tail_args)

    # TODO(synk): video_hint branch (MesaNet-conditioned ThinVAE ConvTranspose decoder)
    # not implemented; with video_hint=None the reference returns only logits.
    return logits.reshape(B, T, vocab)


if __name__ == "__main__":
    VOCAB, DIM, DEPTH, HEADS, MAX_LEN = 64, 32, 2, 8, 64
    B, T = 2, 16

    key = jax.random.PRNGKey(0)
    pkey, tkey = jax.random.split(key)
    params = init_params(pkey, VOCAB, DIM, DEPTH, MAX_LEN)
    tokens = jax.random.randint(tkey, (B, T), 0, VOCAB, dtype=jnp.int32)

    fwd = jax.jit(functools.partial(forward, heads=HEADS))
    logits = fwd(params, tokens)
    jax.block_until_ready(logits)
    assert logits.shape == (B, T, VOCAB)
    assert bool(jnp.all(jnp.isfinite(logits)))
    print("KERNEL_OK")
</pallas_src>

<mosaic_0001>
module attributes {stable_mosaic.version = 11 : i64} {
  func.func @_mesanet_kernel(%arg0: i32, %arg1: memref<32x32xf32, #tpu.memory_space<vmem>>, %arg2: memref<1x1x32xf32, #tpu.memory_space<vmem>>, %arg3: memref<1x1x32xf32, #tpu.memory_space<vmem>>, %arg4: memref<1x32x32xf32, #tpu.memory_space<vmem>>, %arg5: memref<1x32x32xf32, #tpu.memory_space<vmem>>, %arg6: memref<1x32x32xf32, #tpu.memory_space<vmem>>, %arg7: memref<1x32x32xf32, #tpu.memory_space<vmem>>, %arg8: memref<1x1x32xf32, #tpu.memory_space<vmem>>, %arg9: memref<1x1x32xf32, #tpu.memory_space<vmem>>, %arg10: memref<1x1x32xf32, #tpu.memory_space<vmem>>, %arg11: memref<1x32x64xf32, #tpu.memory_space<vmem>>, %arg12: memref<1x1x64xf32, #tpu.memory_space<vmem>>, %arg13: memref<1x64x32xf32, #tpu.memory_space<vmem>>, %arg14: memref<1x1x32xf32, #tpu.memory_space<vmem>>, %arg15: memref<1x1x32xf32, #tpu.memory_space<vmem>>, %arg16: memref<1x1x32xf32, #tpu.memory_space<vmem>>, %arg17: memref<1x32x64xf32, #tpu.memory_space<vmem>>, %arg18: memref<1x1x64xf32, #tpu.memory_space<vmem>>, %arg19: memref<1x1x64xf32, #tpu.memory_space<vmem>>, %arg20: memref<1x1x1xf32, #tpu.memory_space<vmem>>, %arg21: memref<1x1x32xf32, #tpu.memory_space<vmem>>, %arg22: memref<1x1x32xf32, #tpu.memory_space<vmem>>, %arg23: memref<1x32x128xf32, #tpu.memory_space<vmem>>, %arg24: memref<1x1x128xf32, #tpu.memory_space<vmem>>, %arg25: memref<1x128x32xf32, #tpu.memory_space<vmem>>, %arg26: memref<1x1x32xf32, #tpu.memory_space<vmem>>, %arg27: memref<1x32xf32, #tpu.memory_space<vmem>>, %arg28: memref<1x32xf32, #tpu.memory_space<vmem>>, %arg29: memref<32x64xf32, #tpu.memory_space<vmem>>, %arg30: memref<1x64xf32, #tpu.memory_space<vmem>>, %arg31: memref<32x64xf32, #tpu.memory_space<vmem>>, %arg32: memref<32x32xf32, #tpu.memory_space<vmem>>) attributes {dimension_semantics = [#tpu.dimension_semantics<arbitrary>], iteration_bounds = array<i64: 2>, scalar_prefetch = 0 : i64, scratch_operands = 1 : i64, tpu.core_type = #tpu.core_type<tc>, window_params = [{pipeline_mode = #tpu.pipeline_mode<synchronous>, transform_indices = @transform_0, window_bounds = array<i64: 32, 32>}, {transform_indices = @transform_1, window_bounds = array<i64: 1, 1, 32>}, {transform_indices = @transform_2, window_bounds = array<i64: 1, 1, 32>}, {transform_indices = @transform_3, window_bounds = array<i64: 1, 32, 32>}, {transform_indices = @transform_4, window_bounds = array<i64: 1, 32, 32>}, {transform_indices = @transform_5, window_bounds = array<i64: 1, 32, 32>}, {transform_indices = @transform_6, window_bounds = array<i64: 1, 32, 32>}, {transform_indices = @transform_7, window_bounds = array<i64: 1, 1, 32>}, {transform_indices = @transform_8, window_bounds = array<i64: 1, 1, 32>}, {transform_indices = @transform_9, window_bounds = array<i64: 1, 1, 32>}, {transform_indices = @transform_10, window_bounds = array<i64: 1, 32, 64>}, {transform_indices = @transform_11, window_bounds = array<i64: 1, 1, 64>}, {transform_indices = @transform_12, window_bounds = array<i64: 1, 64, 32>}, {transform_indices = @transform_13, window_bounds = array<i64: 1, 1, 32>}, {transform_indices = @transform_14, window_bounds = array<i64: 1, 1, 32>}, {transform_indices = @transform_15, window_bounds = array<i64: 1, 1, 32>}, {transform_indices = @transform_16, window_bounds = array<i64: 1, 32, 64>}, {transform_indices = @transform_17, window_bounds = array<i64: 1, 1, 64>}, {transform_indices = @transform_18, window_bounds = array<i64: 1, 1, 64>}, {transform_indices = @transform_19, window_bounds = array<i64: 1, 1, 1>}, {transform_indices = @transform_20, window_bounds = array<i64: 1, 1, 32>}, {transform_indices = @transform_21, window_bounds = array<i64: 1, 1, 32>}, {transform_indices = @transform_22, window_bounds = array<i64: 1, 32, 128>}, {transform_indices = @transform_23, window_bounds = array<i64: 1, 1, 128>}, {transform_indices = @transform_24, window_bounds = array<i64: 1, 128, 32>}, {transform_indices = @transform_25, window_bounds = array<i64: 1, 1, 32>}, {pipeline_mode = #tpu.pipeline_mode<synchronous>, transform_indices = @transform_26, window_bounds = array<i64: 1, 32>}, {pipeline_mode = #tpu.pipeline_mode<synchronous>, transform_indices = @transform_27, window_bounds = array<i64: 1, 32>}, {pipeline_mode = #tpu.pipeline_mode<synchronous>, transform_indices = @transform_28, window_bounds = array<i64: 32, 64>}, {pipeline_mode = #tpu.pipeline_mode<synchronous>, transform_indices = @transform_29, window_bounds = array<i64: 1, 64>}, {pipeline_mode = #tpu.pipeline_mode<synchronous>, transform_indices = @transform_30, window_bounds = array<i64: 32, 64>}]} {
    %c0_i32 = arith.constant 0 : i32
    %0 = arith.cmpi eq, %arg0, %c0_i32 : i32
    %1 = arith.extui %0 : i1 to i32
    %c0_i32_0 = arith.constant 0 : i32
    %2 = arith.cmpi ne, %1, %c0_i32_0 : i32
    scf.if %2 {
      %c0_309 = arith.constant 0 : index
      %c0_310 = arith.constant 0 : index
      %866 = vector.load %arg1[%c0_309, %c0_310] : memref<32x32xf32, #tpu.memory_space<vmem>>, vector<32x32xf32>
      %c0_311 = arith.constant 0 : index
      %c0_312 = arith.constant 0 : index
      %867 = vector.load %arg32[%c0_311, %c0_312] : memref<32x32xf32, #tpu.memory_space<vmem>>, vector<32x32xf32>
      tpu.vector_store %arg32[%c0_311, %c0_312], %866 {strides = array<i32>} : memref<32x32xf32, #tpu.memory_space<vmem>>, vector<32x32xf32>,
    } else {
    }
    %c0 = arith.constant 0 : index
    %c0_1 = arith.constant 0 : index
    %3 = vector.load %arg32[%c0, %c0_1] : memref<32x32xf32, #tpu.memory_space<vmem>>, vector<32x32xf32>
    %c0_2 = arith.constant 0 : index
    %c0_3 = arith.constant 0 : index
    %c0_4 = arith.constant 0 : index
    %4 = vector.load %arg2[%c0_2, %c0_3, %c0_4] : memref<1x1x32xf32, #tpu.memory_space<vmem>>, vector<1x1x32xf32>
    %5 = vector.shape_cast %4 : vector<1x1x32xf32> to vector<1x32xf32>
    %c0_5 = arith.constant 0 : index
    %c0_6 = arith.constant 0 : index
    %c0_7 = arith.constant 0 : index
    %6 = vector.load %arg3[%c0_5, %c0_6, %c0_7] : memref<1x1x32xf32, #tpu.memory_space<vmem>>, vector<1x1x32xf32>
    %7 = vector.shape_cast %6 : vector<1x1x32xf32> to vector<1x32xf32>
    %cst = arith.constant dense<0.000000e+00> : vector<32xf32>
    %8 = vector.multi_reduction <add>, %3, %cst [1] : vector<32x32xf32> to vector<32xf32>
    %9 = vector.shape_cast %8 : vector<32xf32> to vector<32x1xf32>
    %cst_8 = arith.constant 3.200000e+01 : f32
    %10 = vector.broadcast %cst_8 : f32 to vector<32x1xf32>
    %11 = arith.divf %9, %10 : vector<32x1xf32>
    %12 = vector.broadcast %11 : vector<32x1xf32> to vector<32x32xf32>
    %13 = arith.subf %3, %12 : vector<32x32xf32>
    %14 = arith.mulf %13, %13 : vector<32x32xf32>
    %cst_9 = arith.constant dense<0.000000e+00> : vector<32xf32>
    %15 = vector.multi_reduction <add>, %14, %cst_9 [1] : vector<32x32xf32> to vector<32xf32>
    %16 = vector.shape_cast %15 : vector<32xf32> to vector<32x1xf32>
    %cst_10 = arith.constant 3.200000e+01 : f32
    %17 = vector.broadcast %cst_10 : f32 to vector<32x1xf32>
    %18 = arith.divf %16, %17 : vector<32x1xf32>
    %cst_11 = arith.constant 9.99999974E-6 : f32
    %19 = vector.broadcast %cst_11 : f32 to vector<32x1xf32>
    %20 = arith.addf %18, %19 : vector<32x1xf32>
    %21 = math.rsqrt %20 : vector<32x1xf32>
    %22 = vector.broadcast %21 : vector<32x1xf32> to vector<32x32xf32>
    %23 = arith.mulf %13, %22 : vector<32x32xf32>
    %24 = vector.broadcast %5 : vector<1x32xf32> to vector<32x32xf32>
    %25 = arith.mulf %23, %24 : vector<32x32xf32>
    %26 = vector.broadcast %7 : vector<1x32xf32> to vector<32x32xf32>
    %27 = arith.addf %25, %26 : vector<32x32xf32>
    %c0_12 = arith.constant 0 : index
    %c0_13 = arith.constant 0 : index
    %c0_14 = arith.constant 0 : index
    %28 = vector.load %arg4[%c0_12, %c0_13, %c0_14] : memref<1x32x32xf32, #tpu.memory_space<vmem>>, vector<1x32x32xf32>
    %29 = vector.shape_cast %28 : vector<1x32x32xf32> to vector<32x32xf32>
    %cst_15 = arith.constant dense<0.000000e+00> : vector<32x32xf32>
    %30 = tpu.matmul %27, %29, %cst_15 {dimension_numbers = #tpu.dot_dimension_numbers<[1], [0], [0], [1], [0, 0, 1, 1], [], []>} : vector<32x32xf32>, vector<32x32xf32>, vector<32x32xf32> -> vector<32x32xf32>
    %c0_16 = arith.constant 0 : index
    %c0_17 = arith.constant 0 : index
    %c0_18 = arith.constant 0 : index
    %31 = vector.load %arg5[%c0_16, %c0_17, %c0_18] : memref<1x32x32xf32, #tpu.memory_space<vmem>>, vector<1x32x32xf32>
    %32 = vector.shape_cast %31 : vector<1x32x32xf32> to vector<32x32xf32>
    %cst_19 = arith.constant dense<0.000000e+00> : vector<32x32xf32>
    %33 = tpu.matmul %27, %32, %cst_19 {dimension_numbers = #tpu.dot_dimension_numbers<[1], [0], [0], [1], [0, 0, 1, 1], [], []>} : vector<32x32xf32>, vector<32x32xf32>, vector<32x32xf32> -> vector<32x32xf32>
    %c0_20 = arith.constant 0 : index
    %c0_21 = arith.constant 0 : index
    %c0_22 = arith.constant 0 : index
    %34 = vector.load %arg6[%c0_20, %c0_21, %c0_22] : memref<1x32x32xf32, #tpu.memory_space<vmem>>, vector<1x32x32xf32>
    %35 = vector.shape_cast %34 : vector<1x32x32xf32> to vector<32x32xf32>
    %cst_23 = arith.constant dense<0.000000e+00> : vector<32x32xf32>
    %36 = tpu.matmul %27, %35, %cst_23 {dimension_numbers = #tpu.dot_dimension_numbers<[1], [0], [0], [1], [0, 0, 1, 1], [], []>} : vector<32x32xf32>, vector<32x32xf32>, vector<32x32xf32> -> vector<32x32xf32>
    %c0_24 = arith.constant 0 : index
    %c0_25 = arith.constant 0 : index
    %c0_26 = arith.constant 0 : index
    %37 = vector.load %arg7[%c0_24, %c0_25, %c0_26] : memref<1x32x32xf32, #tpu.memory_space<vmem>>, vector<1x32x32xf32>
    %38 = vector.shape_cast %37 : vector<1x32x32xf32> to vector<32x32xf32>
    %c0_27 = arith.constant 0 : index
    %c0_28 = arith.constant 0 : index
    %c0_29 = arith.constant 0 : index
    %39 = vector.load %arg8[%c0_27, %c0_28, %c0_29] : memref<1x1x32xf32, #tpu.memory_space<vmem>>, vector<1x1x32xf32>
    %40 = vector.shape_cast %39 : vector<1x1x32xf32> to vector<1x32xf32>
    %41 = tpu.iota {dimensions = array<i32: 1>} : vector<1x32xi32>
    %c0_i32_30 = arith.constant 0 : i32
    %42 = vector.broadcast %c0_i32_30 : i32 to vector<1x32xi32>
    %43 = arith.cmpi sge, %41, %42 : vector<1x32xi32>
    %c4_i32 = arith.constant 4 : i32
    %44 = vector.broadcast %c4_i32 : i32 to vector<1x32xi32>
    %45 = arith.cmpi slt, %41, %44 : vector<1x32xi32>
    %46 = arith.andi %43, %45 : vector<1x32xi1>
    %47 = arith.extui %46 : vector<1x32xi1> to vector<1x32xi32>
    %48 = arith.sitofp %47 : vector<1x32xi32> to vector<1x32xf32>
    %c4_i32_31 = arith.constant 4 : i32
    %49 = vector.broadcast %c4_i32_31 : i32 to vector<1x32xi32>
    %50 = arith.cmpi sge, %41, %49 : vector<1x32xi32>
    %c8_i32 = arith.constant 8 : i32
    %51 = vector.broadcast %c8_i32 : i32 to vector<1x32xi32>
    %52 = arith.cmpi slt, %41, %51 : vector<1x32xi32>
    %53 = arith.andi %50, %52 : vector<1x32xi1>
    %54 = arith.extui %53 : vector<1x32xi1> to vector<1x32xi32>
    %55 = arith.sitofp %54 : vector<1x32xi32> to vector<1x32xf32>
    %c8_i32_32 = arith.constant 8 : i32
    %56 = vector.broadcast %c8_i32_32 : i32 to vector<1x32xi32>
    %57 = arith.cmpi sge, %41, %56 : vector<1x32xi32>
    %c12_i32 = arith.constant 12 : i32
    %58 = vector.broadcast %c12_i32 : i32 to vector<1x32xi32>
    %59 = arith.cmpi slt, %41, %58 : vector<1x32xi32>
    %60 = arith.andi %57, %59 : vector<1x32xi1>
    %61 = arith.extui %60 : vector<1x32xi1> to vector<1x32xi32>
    %62 = arith.sitofp %61 : vector<1x32xi32> to vector<1x32xf32>
    %c12_i32_33 = arith.constant 12 : i32
    %63 = vector.broadcast %c12_i32_33 : i32 to vector<1x32xi32>
    %64 = arith.cmpi sge, %41, %63 : vector<1x32xi32>
    %c16_i32 = arith.constant 16 : i32
    %65 = vector.broadcast %c16_i32 : i32 to vector<1x32xi32>
    %66 = arith.cmpi slt, %41, %65 : vector<1x32xi32>
    %67 = arith.andi %64, %66 : vector<1x32xi1>
    %68 = arith.extui %67 : vector<1x32xi1> to vector<1x32xi32>
    %69 = arith.sitofp %68 : vector<1x32xi32> to vector<1x32xf32>
    %c16_i32_34 = arith.constant 16 : i32
    %70 = vector.broadcast %c16_i32_34 : i32 to vector<1x32xi32>
    %71 = arith.cmpi sge, %41, %70 : vector<1x32xi32>
    %c20_i32 = arith.constant 20 : i32
    %72 = vector.broadcast %c20_i32 : i32 to vector<1x32xi32>
    %73 = arith.cmpi slt, %41, %72 : vector<1x32xi32>
    %74 = arith.andi %71, %73 : vector<1x32xi1>
    %75 = arith.extui %74 : vector<1x32xi1> to vector<1x32xi32>
    %76 = arith.sitofp %75 : vector<1x32xi32> to vector<1x32xf32>
    %c20_i32_35 = arith.constant 20 : i32
    %77 = vector.broadcast %c20_i32_35 : i32 to vector<1x32xi32>
    %78 = arith.cmpi sge, %41, %77 : vector<1x32xi32>
    %c24_i32 = arith.constant 24 : i32
    %79 = vector.broadcast %c24_i32 : i32 to vector<1x32xi32>
    %80 = arith.cmpi slt, %41, %79 : vector<1x32xi32>
    %81 = arith.andi %78, %80 : vector<1x32xi1>
    %82 = arith.extui %81 : vector<1x32xi1> to vector<1x32xi32>
    %83 = arith.sitofp %82 : vector<1x32xi32> to vector<1x32xf32>
    %c24_i32_36 = arith.constant 24 : i32
    %84 = vector.broadcast %c24_i32_36 : i32 to vector<1x32xi32>
    %85 = arith.cmpi sge, %41, %84 : vector<1x32xi32>
    %c28_i32 = arith.constant 28 : i32
    %86 = vector.broadcast %c28_i32 : i32 to vector<1x32xi32>
    %87 = arith.cmpi slt, %41, %86 : vector<1x32xi32>
    %88 = arith.andi %85, %87 : vector<1x32xi1>
    %89 = arith.extui %88 : vector<1x32xi1> to vector<1x32xi32>
    %90 = arith.sitofp %89 : vector<1x32xi32> to vector<1x32xf32>
    %c28_i32_37 = arith.constant 28 : i32
    %91 = vector.broadcast %c28_i32_37 : i32 to vector<1x32xi32>
    %92 = arith.cmpi sge, %41, %91 : vector<1x32xi32>
    %c32_i32 = arith.constant 32 : i32
    %93 = vector.broadcast %c32_i32 : i32 to vector<1x32xi32>
    %94 = arith.cmpi slt, %41, %93 : vector<1x32xi32>
    %95 = arith.andi %92, %94 : vector<1x32xi1>
    %96 = arith.extui %95 : vector<1x32xi1> to vector<1x32xi32>
    %97 = arith.sitofp %96 : vector<1x32xi32> to vector<1x32xf32>
    %98 = vector.extract_strided_slice %30 {offsets = [0, 0], sizes = [16, 32], strides = [1, 1]} : vector<32x32xf32> to vector<16x32xf32>
    %99 = vector.extract_strided_slice %33 {offsets = [0, 0], sizes = [16, 32], strides = [1, 1]} : vector<32x32xf32> to vector<16x32xf32>
    %100 = vector.extract_strided_slice %36 {offsets = [0, 0], sizes = [16, 32], strides = [1, 1]} : vector<32x32xf32> to vector<16x32xf32>
    %cst_38 = arith.constant 0.000000e+00 : f32
    %101 = vector.broadcast %cst_38 : f32 to vector<16x32xf32>
    %102 = vector.broadcast %48 : vector<1x32xf32> to vector<16x32xf32>
    %103 = arith.mulf %98, %102 : vector<16x32xf32>
    %cst_39 = arith.constant dense<0.000000e+00> : vector<16x16xf32>
    %104 = tpu.matmul %103, %99, %cst_39 {dimension_numbers = #tpu.dot_dimension_numbers<[1], [1], [0], [0], [0, 0, 1, 0], [], []>} : vector<16x32xf32>, vector<16x32xf32>, vector<16x16xf32> -> vector<16x16xf32>
    %cst_40 = arith.constant 5.000000e-01 : f32
    %105 = vector.broadcast %cst_40 : f32 to vector<16x16xf32>
    %106 = arith.mulf %104, %105 : vector<16x16xf32>
    %cst_41 = arith.constant dense<0xFF800000> : vector<16xf32>
    %107 = vector.multi_reduction <maximumf>, %106, %cst_41 [1] : vector<16x16xf32> to vector<16xf32>
    %108 = vector.shape_cast %107 : vector<16xf32> to vector<16x1xf32>
    %109 = vector.broadcast %108 : vector<16x1xf32> to vector<16x16xf32>
    %110 = arith.subf %106, %109 : vector<16x16xf32>
    %111 = math.exp %110 : vector<16x16xf32>
    %cst_42 = arith.constant dense<0.000000e+00> : vector<16xf32>
    %112 = vector.multi_reduction <add>, %111, %cst_42 [1] : vector<16x16xf32> to vector<16xf32>
    %113 = vector.shape_cast %112 : vector<16xf32> to vector<16x1xf32>
    %114 = tpu.reciprocal %113 {approx = true} : vector<16x1xf32> -> vector<16x1xf32>
    %115 = vector.broadcast %114 : vector<16x1xf32> to vector<16x16xf32>
    %116 = arith.mulf %111, %115 : vector<16x16xf32>
    %117 = vector.broadcast %48 : vector<1x32xf32> to vector<16x32xf32>
    %118 = arith.mulf %100, %117 : vector<16x32xf32>
    %cst_43 = arith.constant dense<0.000000e+00> : vector<16x32xf32>
    %119 = tpu.matmul %116, %118, %cst_43 {dimension_numbers = #tpu.dot_dimension_numbers<[1], [0], [0], [1], [0, 0, 1, 1], [], []>} : vector<16x16xf32>, vector<16x32xf32>, vector<16x32xf32> -> vector<16x32xf32>
    %120 = arith.addf %101, %119 : vector<16x32xf32>
    %121 = vector.broadcast %55 : vector<1x32xf32> to vector<16x32xf32>
    %122 = arith.mulf %98, %121 : vector<16x32xf32>
    %cst_44 = arith.constant dense<0.000000e+00> : vector<16x16xf32>
    %123 = tpu.matmul %122, %99, %cst_44 {dimension_numbers = #tpu.dot_dimension_numbers<[1], [1], [0], [0], [0, 0, 1, 0], [], []>} : vector<16x32xf32>, vector<16x32xf32>, vector<16x16xf32> -> vector<16x16xf32>
    %cst_45 = arith.constant 5.000000e-01 : f32
    %124 = vector.broadcast %cst_45 : f32 to vector<16x16xf32>
    %125 = arith.mulf %123, %124 : vector<16x16xf32>
    %cst_46 = arith.constant dense<0xFF800000> : vector<16xf32>
    %126 = vector.multi_reduction <maximumf>, %125, %cst_46 [1] : vector<16x16xf32> to vector<16xf32>
    %127 = vector.shape_cast %126 : vector<16xf32> to vector<16x1xf32>
    %128 = vector.broadcast %127 : vector<16x1xf32> to vector<16x16xf32>
    %129 = arith.subf %125, %128 : vector<16x16xf32>
    %130 = math.exp %129 : vector<16x16xf32>
    %cst_47 = arith.constant dense<0.000000e+00> : vector<16xf32>
    %131 = vector.multi_reduction <add>, %130, %cst_47 [1] : vector<16x16xf32> to vector<16xf32>
    %132 = vector.shape_cast %131 : vector<16xf32> to vector<16x1xf32>
    %133 = tpu.reciprocal %132 {approx = true} : vector<16x1xf32> -> vector<16x1xf32>
    %134 = vector.broadcast %133 : vector<16x1xf32> to vector<16x16xf32>
    %135 = arith.mulf %130, %134 : vector<16x16xf32>
    %136 = vector.broadcast %55 : vector<1x32xf32> to vector<16x32xf32>
    %137 = arith.mulf %100, %136 : vector<16x32xf32>
    %cst_48 = arith.constant dense<0.000000e+00> : vector<16x32xf32>
    %138 = tpu.matmul %135, %137, %cst_48 {dimension_numbers = #tpu.dot_dimension_numbers<[1], [0], [0], [1], [0, 0, 1, 1], [], []>} : vector<16x16xf32>, vector<16x32xf32>, vector<16x32xf32> -> vector<16x32xf32>
    %139 = arith.addf %120, %138 : vector<16x32xf32>
    %140 = vector.broadcast %62 : vector<1x32xf32> to vector<16x32xf32>
    %141 = arith.mulf %98, %140 : vector<16x32xf32>
    %cst_49 = arith.constant dense<0.000000e+00> : vector<16x16xf32>
    %142 = tpu.matmul %141, %99, %cst_49 {dimension_numbers = #tpu.dot_dimension_numbers<[1], [1], [0], [0], [0, 0, 1, 0], [], []>} : vector<16x32xf32>, vector<16x32xf32>, vector<16x16xf32> -> vector<16x16xf32>
    %cst_50 = arith.constant 5.000000e-01 : f32
    %143 = vector.broadcast %cst_50 : f32 to vector<16x16xf32>
    %144 = arith.mulf %142, %143 : vector<16x16xf32>
    %cst_51 = arith.constant dense<0xFF800000> : vector<16xf32>
    %145 = vector.multi_reduction <maximumf>, %144, %cst_51 [1] : vector<16x16xf32> to vector<16xf32>
    %146 = vector.shape_cast %145 : vector<16xf32> to vector<16x1xf32>
    %147 = vector.broadcast %146 : vector<16x1xf32> to vector<16x16xf32>
    %148 = arith.subf %144, %147 : vector<16x16xf32>
    %149 = math.exp %148 : vector<16x16xf32>
    %cst_52 = arith.constant dense<0.000000e+00> : vector<16xf32>
    %150 = vector.multi_reduction <add>, %149, %cst_52 [1] : vector<16x16xf32> to vector<16xf32>
    %151 = vector.shape_cast %150 : vector<16xf32> to vector<16x1xf32>
    %152 = tpu.reciprocal %151 {approx = true} : vector<16x1xf32> -> vector<16x1xf32>
    %153 = vector.broadcast %152 : vector<16x1xf32> to vector<16x16xf32>
    %154 = arith.mulf %149, %153 : vector<16x16xf32>
    %155 = vector.broadcast %62 : vector<1x32xf32> to vector<16x32xf32>
    %156 = arith.mulf %100, %155 : vector<16x32xf32>
    %cst_53 = arith.constant dense<0.000000e+00> : vector<16x32xf32>
    %157 = tpu.matmul %154, %156, %cst_53 {dimension_numbers = #tpu.dot_dimension_numbers<[1], [0], [0], [1], [0, 0, 1, 1], [], []>} : vector<16x16xf32>, vector<16x32xf32>, vector<16x32xf32> -> vector<16x32xf32>
    %158 = arith.addf %139, %157 : vector<16x32xf32>
    %159 = vector.broadcast %69 : vector<1x32xf32> to vector<16x32xf32>
    %160 = arith.mulf %98, %159 : vector<16x32xf32>
    %cst_54 = arith.constant dense<0.000000e+00> : vector<16x16xf32>
    %161 = tpu.matmul %160, %99, %cst_54 {dimension_numbers = #tpu.dot_dimension_numbers<[1], [1], [0], [0], [0, 0, 1, 0], [], []>} : vector<16x32xf32>, vector<16x32xf32>, vector<16x16xf32> -> vector<16x16xf32>
    %cst_55 = arith.constant 5.000000e-01 : f32
    %162 = vector.broadcast %cst_55 : f32 to vector<16x16xf32>
    %163 = arith.mulf %161, %162 : vector<16x16xf32>
    %cst_56 = arith.constant dense<0xFF800000> : vector<16xf32>
    %164 = vector.multi_reduction <maximumf>, %163, %cst_56 [1] : vector<16x16xf32> to vector<16xf32>
    %165 = vector.shape_cast %164 : vector<16xf32> to vector<16x1xf32>
    %166 = vector.broadcast %165 : vector<16x1xf32> to vector<16x16xf32>
    %167 = arith.subf %163, %166 : vector<16x16xf32>
    %168 = math.exp %167 : vector<16x16xf32>
    %cst_57 = arith.constant dense<0.000000e+00> : vector<16xf32>
    %169 = vector.multi_reduction <add>, %168, %cst_57 [1] : vector<16x16xf32> to vector<16xf32>
    %170 = vector.shape_cast %169 : vector<16xf32> to vector<16x1xf32>
    %171 = tpu.reciprocal %170 {approx = true} : vector<16x1xf32> -> vector<16x1xf32>
    %172 = vector.broadcast %171 : vector<16x1xf32> to vector<16x16xf32>
    %173 = arith.mulf %168, %172 : vector<16x16xf32>
    %174 = vector.broadcast %69 : vector<1x32xf32> to vector<16x32xf32>
    %175 = arith.mulf %100, %174 : vector<16x32xf32>
    %cst_58 = arith.constant dense<0.000000e+00> : vector<16x32xf32>
    %176 = tpu.matmul %173, %175, %cst_58 {dimension_numbers = #tpu.dot_dimension_numbers<[1], [0], [0], [1], [0, 0, 1, 1], [], []>} : vector<16x16xf32>, vector<16x32xf32>, vector<16x32xf32> -> vector<16x32xf32>
    %177 = arith.addf %158, %176 : vector<16x32xf32>
    %178 = vector.broadcast %76 : vector<1x32xf32> to vector<16x32xf32>
    %179 = arith.mulf %98, %178 : vector<16x32xf32>
    %cst_59 = arith.constant dense<0.000000e+00> : vector<16x16xf32>
    %180 = tpu.matmul %179, %99, %cst_59 {dimension_numbers = #tpu.dot_dimension_numbers<[1], [1], [0], [0], [0, 0, 1, 0], [], []>} : vector<16x32xf32>, vector<16x32xf32>, vector<16x16xf32> -> vector<16x16xf32>
    %cst_60 = arith.constant 5.000000e-01 : f32
    %181 = vector.broadcast %cst_60 : f32 to vector<16x16xf32>
    %182 = arith.mulf %180, %181 : vector<16x16xf32>
    %cst_61 = arith.constant dense<0xFF800000> : vector<16xf32>
    %183 = vector.multi_reduction <maximumf>, %182, %cst_61 [1] : vector<16x16xf32> to vector<16xf32>
    %184 = vector.shape_cast %183 : vector<16xf32> to vector<16x1xf32>
    %185 = vector.broadcast %184 : vector<16x1xf32> to vector<16x16xf32>
    %186 = arith.subf %182, %185 : vector<16x16xf32>
    %187 = math.exp %186 : vector<16x16xf32>
    %cst_62 = arith.constant dense<0.000000e+00> : vector<16xf32>
    %188 = vector.multi_reduction <add>, %187, %cst_62 [1] : vector<16x16xf32> to vector<16xf32>
    %189 = vector.shape_cast %188 : vector<16xf32> to vector<16x1xf32>
    %190 = tpu.reciprocal %189 {approx = true} : vector<16x1xf32> -> vector<16x1xf32>
    %191 = vector.broadcast %190 : vector<16x1xf32> to vector<16x16xf32>
    %192 = arith.mulf %187, %191 : vector<16x16xf32>
    %193 = vector.broadcast %76 : vector<1x32xf32> to vector<16x32xf32>
    %194 = arith.mulf %100, %193 : vector<16x32xf32>
    %cst_63 = arith.constant dense<0.000000e+00> : vector<16x32xf32>
    %195 = tpu.matmul %192, %194, %cst_63 {dimension_numbers = #tpu.dot_dimension_numbers<[1], [0], [0], [1], [0, 0, 1, 1], [], []>} : vector<16x16xf32>, vector<16x32xf32>, vector<16x32xf32> -> vector<16x32xf32>
    %196 = arith.addf %177, %195 : vector<16x32xf32>
    %197 = vector.broadcast %83 : vector<1x32xf32> to vector<16x32xf32>
    %198 = arith.mulf %98, %197 : vector<16x32xf32>
    %cst_64 = arith.constant dense<0.000000e+00> : vector<16x16xf32>
    %199 = tpu.matmul %198, %99, %cst_64 {dimension_numbers = #tpu.dot_dimension_numbers<[1], [1], [0], [0], [0, 0, 1, 0], [], []>} : vector<16x32xf32>, vector<16x32xf32>, vector<16x16xf32> -> vector<16x16xf32>
    %cst_65 = arith.constant 5.000000e-01 : f32
    %200 = vector.broadcast %cst_65 : f32 to vector<16x16xf32>
    %201 = arith.mulf %199, %200 : vector<16x16xf32>
    %cst_66 = arith.constant dense<0xFF800000> : vector<16xf32>
    %202 = vector.multi_reduction <maximumf>, %201, %cst_66 [1] : vector<16x16xf32> to vector<16xf32>
    %203 = vector.shape_cast %202 : vector<16xf32> to vector<16x1xf32>
    %204 = vector.broadcast %203 : vector<16x1xf32> to vector<16x16xf32>
    %205 = arith.subf %201, %204 : vector<16x16xf32>
    %206 = math.exp %205 : vector<16x16xf32>
    %cst_67 = arith.constant dense<0.000000e+00> : vector<16xf32>
    %207 = vector.multi_reduction <add>, %206, %cst_67 [1] : vector<16x16xf32> to vector<16xf32>
    %208 = vector.shape_cast %207 : vector<16xf32> to vector<16x1xf32>
    %209 = tpu.reciprocal %208 {approx = true} : vector<16x1xf32> -> vector<16x1xf32>
    %210 = vector.broadcast %209 : vector<16x1xf32> to vector<16x16xf32>
    %211 = arith.mulf %206, %210 : vector<16x16xf32>
    %212 = vector.broadcast %83 : vector<1x32xf32> to vector<16x32xf32>
    %213 = arith.mulf %100, %212 : vector<16x32xf32>
    %cst_68 = arith.constant dense<0.000000e+00> : vector<16x32xf32>
    %214 = tpu.matmul %211, %213, %cst_68 {dimension_numbers = #tpu.dot_dimension_numbers<[1], [0], [0], [1], [0, 0, 1, 1], [], []>} : vector<16x16xf32>, vector<16x32xf32>, vector<16x32xf32> -> vector<16x32xf32>
    %215 = arith.addf %196, %214 : vector<16x32xf32>
    %216 = vector.broadcast %90 : vector<1x32xf32> to vector<16x32xf32>
    %217 = arith.mulf %98, %216 : vector<16x32xf32>
    %cst_69 = arith.constant dense<0.000000e+00> : vector<16x16xf32>
    %218 = tpu.matmul %217, %99, %cst_69 {dimension_numbers = #tpu.dot_dimension_numbers<[1], [1], [0], [0], [0, 0, 1, 0], [], []>} : vector<16x32xf32>, vector<16x32xf32>, vector<16x16xf32> -> vector<16x16xf32>
    %cst_70 = arith.constant 5.000000e-01 : f32
    %219 = vector.broadcast %cst_70 : f32 to vector<16x16xf32>
    %220 = arith.mulf %218, %219 : vector<16x16xf32>
    %cst_71 = arith.constant dense<0xFF800000> : vector<16xf32>
    %221 = vector.multi_reduction <maximumf>, %220, %cst_71 [1] : vector<16x16xf32> to vector<16xf32>
    %222 = vector.shape_cast %221 : vector<16xf32> to vector<16x1xf32>
    %223 = vector.broadcast %222 : vector<16x1xf32> to vector<16x16xf32>
    %224 = arith.subf %220, %223 : vector<16x16xf32>
    %225 = math.exp %224 : vector<16x16xf32>
    %cst_72 = arith.constant dense<0.000000e+00> : vector<16xf32>
    %226 = vector.multi_reduction <add>, %225, %cst_72 [1] : vector<16x16xf32> to vector<16xf32>
    %227 = vector.shape_cast %226 : vector<16xf32> to vector<16x1xf32>
    %228 = tpu.reciprocal %227 {approx = true} : vector<16x1xf32> -> vector<16x1xf32>
    %229 = vector.broadcast %228 : vector<16x1xf32> to vector<16x16xf32>
    %230 = arith.mulf %225, %229 : vector<16x16xf32>
    %231 = vector.broadcast %90 : vector<1x32xf32> to vector<16x32xf32>
    %232 = arith.mulf %100, %231 : vector<16x32xf32>
    %cst_73 = arith.constant dense<0.000000e+00> : vector<16x32xf32>
    %233 = tpu.matmul %230, %232, %cst_73 {dimension_numbers = #tpu.dot_dimension_numbers<[1], [0], [0], [1], [0, 0, 1, 1], [], []>} : vector<16x16xf32>, vector<16x32xf32>, vector<16x32xf32> -> vector<16x32xf32>
    %234 = arith.addf %215, %233 : vector<16x32xf32>
    %235 = vector.broadcast %97 : vector<1x32xf32> to vector<16x32xf32>
    %236 = arith.mulf %98, %235 : vector<16x32xf32>
    %cst_74 = arith.constant dense<0.000000e+00> : vector<16x16xf32>
    %237 = tpu.matmul %236, %99, %cst_74 {dimension_numbers = #tpu.dot_dimension_numbers<[1], [1], [0], [0], [0, 0, 1, 0], [], []>} : vector<16x32xf32>, vector<16x32xf32>, vector<16x16xf32> -> vector<16x16xf32>
    %cst_75 = arith.constant 5.000000e-01 : f32
    %238 = vector.broadcast %cst_75 : f32 to vector<16x16xf32>
    %239 = arith.mulf %237, %238 : vector<16x16xf32>
    %cst_76 = arith.constant dense<0xFF800000> : vector<16xf32>
    %240 = vector.multi_reduction <maximumf>, %239, %cst_76 [1] : vector<16x16xf32> to vector<16xf32>
    %241 = vector.shape_cast %240 : vector<16xf32> to vector<16x1xf32>
    %242 = vector.broadcast %241 : vector<16x1xf32> to vector<16x16xf32>
    %243 = arith.subf %239, %242 : vector<16x16xf32>
    %244 = math.exp %243 : vector<16x16xf32>
    %cst_77 = arith.constant dense<0.000000e+00> : vector<16xf32>
    %245 = vector.multi_reduction <add>, %244, %cst_77 [1] : vector<16x16xf32> to vector<16xf32>
    %246 = vector.shape_cast %245 : vector<16xf32> to vector<16x1xf32>
    %247 = tpu.reciprocal %246 {approx = true} : vector<16x1xf32> -> vector<16x1xf32>
    %248 = vector.broadcast %247 : vector<16x1xf32> to vector<16x16xf32>
    %249 = arith.mulf %244, %248 : vector<16x16xf32>
    %250 = vector.broadcast %97 : vector<1x32xf32> to vector<16x32xf32>
    %251 = arith.mulf %100, %250 : vector<16x32xf32>
    %cst_78 = arith.constant dense<0.000000e+00> : vector<16x32xf32>
    %252 = tpu.matmul %249, %251, %cst_78 {dimension_numbers = #tpu.dot_dimension_numbers<[1], [0], [0], [1], [0, 0, 1, 1], [], []>} : vector<16x16xf32>, vector<16x32xf32>, vector<16x32xf32> -> vector<16x32xf32>
    %253 = arith.addf %234, %252 : vector<16x32xf32>
    %cst_79 = arith.constant dense<0.000000e+00> : vector<16x32xf32>
    %254 = tpu.matmul %253, %38, %cst_79 {dimension_numbers = #tpu.dot_dimension_numbers<[1], [0], [0], [1], [0, 0, 1, 1], [], []>} : vector<16x32xf32>, vector<32x32xf32>, vector<16x32xf32> -> vector<16x32xf32>
    %255 = vector.broadcast %40 : vector<1x32xf32> to vector<16x32xf32>
    %256 = arith.addf %254, %255 : vector<16x32xf32>
    %257 = vector.extract_strided_slice %3 {offsets = [0, 0], sizes = [16, 32], strides = [1, 1]} : vector<32x32xf32> to vector<16x32xf32>
    %258 = arith.addf %257, %256 : vector<16x32xf32>
    %c0_80 = arith.constant 0 : index
    %c0_81 = arith.constant 0 : index
    %259 = vector.load %arg32[%c0_80, %c0_81] : memref<32x32xf32, #tpu.memory_space<vmem>>, vector<16x32xf32>
    tpu.vector_store %arg32[%c0_80, %c0_81], %258 {strides = array<i32>} : memref<32x32xf32, #tpu.memory_space<vmem>>, vector<16x32xf32>,
    %260 = vector.extract_strided_slice %30 {offsets = [16, 0], sizes = [16, 32], strides = [1, 1]} : vector<32x32xf32> to vector<16x32xf32>
    %261 = vector.extract_strided_slice %33 {offsets = [16, 0], sizes = [16, 32], strides = [1, 1]} : vector<32x32xf32> to vector<16x32xf32>
    %262 = vector.extract_strided_slice %36 {offsets = [16, 0], sizes = [16, 32], strides = [1, 1]} : vector<32x32xf32> to vector<16x32xf32>
    %cst_82 = arith.constant 0.000000e+00 : f32
    %263 = vector.broadcast %cst_82 : f32 to vector<16x32xf32>
    %264 = vector.broadcast %48 : vector<1x32xf32> to vector<16x32xf32>
    %265 = arith.mulf %260, %264 : vector<16x32xf32>
    %cst_83 = arith.constant dense<0.000000e+00> : vector<16x16xf32>
    %266 = tpu.matmul %265, %261, %cst_83 {dimension_numbers = #tpu.dot_dimension_numbers<[1], [1], [0], [0], [0, 0, 1, 0], [], []>} : vector<16x32xf32>, vector<16x32xf32>, vector<16x16xf32> -> vector<16x16xf32>
    %cst_84 = arith.constant 5.000000e-01 : f32
    %267 = vector.broadcast %cst_84 : f32 to vector<16x16xf32>
    %268 = arith.mulf %266, %267 : vector<16x16xf32>
    %cst_85 = arith.constant dense<0xFF800000> : vector<16xf32>
    %269 = vector.multi_reduction <maximumf>, %268, %cst_85 [1] : vector<16x16xf32> to vector<16xf32>
    %270 = vector.shape_cast %269 : vector<16xf32> to vector<16x1xf32>
    %271 = vector.broadcast %270 : vector<16x1xf32> to vector<16x16xf32>
    %272 = arith.subf %268, %271 : vector<16x16xf32>
    %273 = math.exp %272 : vector<16x16xf32>
    %cst_86 = arith.constant dense<0.000000e+00> : vector<16xf32>
    %274 = vector.multi_reduction <add>, %273, %cst_86 [1] : vector<16x16xf32> to vector<16xf32>
    %275 = vector.shape_cast %274 : vector<16xf32> to vector<16x1xf32>
    %276 = tpu.reciprocal %275 {approx = true} : vector<16x1xf32> -> vector<16x1xf32>
    %277 = vector.broadcast %276 : vector<16x1xf32> to vector<16x16xf32>
    %278 = arith.mulf %273, %277 : vector<16x16xf32>
    %279 = vector.broadcast %48 : vector<1x32xf32> to vector<16x32xf32>
    %280 = arith.mulf %262, %279 : vector<16x32xf32>
    %cst_87 = arith.constant dense<0.000000e+00> : vector<16x32xf32>
    %281 = tpu.matmul %278, %280, %cst_87 {dimension_numbers = #tpu.dot_dimension_numbers<[1], [0], [0], [1], [0, 0, 1, 1], [], []>} : vector<16x16xf32>, vector<16x32xf32>, vector<16x32xf32> -> vector<16x32xf32>
    %282 = arith.addf %263, %281 : vector<16x32xf32>
    %283 = vector.broadcast %55 : vector<1x32xf32> to vector<16x32xf32>
    %284 = arith.mulf %260, %283 : vector<16x32xf32>
    %cst_88 = arith.constant dense<0.000000e+00> : vector<16x16xf32>
    %285 = tpu.matmul %284, %261, %cst_88 {dimension_numbers = #tpu.dot_dimension_numbers<[1], [1], [0], [0], [0, 0, 1, 0], [], []>} : vector<16x32xf32>, vector<16x32xf32>, vector<16x16xf32> -> vector<16x16xf32>
    %cst_89 = arith.constant 5.000000e-01 : f32
    %286 = vector.broadcast %cst_89 : f32 to vector<16x16xf32>
    %287 = arith.mulf %285, %286 : vector<16x16xf32>
    %cst_90 = arith.constant dense<0xFF800000> : vector<16xf32>
    %288 = vector.multi_reduction <maximumf>, %287, %cst_90 [1] : vector<16x16xf32> to vector<16xf32>
    %289 = vector.shape_cast %288 : vector<16xf32> to vector<16x1xf32>
    %290 = vector.broadcast %289 : vector<16x1xf32> to vector<16x16xf32>
    %291 = arith.subf %287, %290 : vector<16x16xf32>
    %292 = math.exp %291 : vector<16x16xf32>
    %cst_91 = arith.constant dense<0.000000e+00> : vector<16xf32>
    %293 = vector.multi_reduction <add>, %292, %cst_91 [1] : vector<16x16xf32> to vector<16xf32>
    %294 = vector.shape_cast %293 : vector<16xf32> to vector<16x1xf32>
    %295 = tpu.reciprocal %294 {approx = true} : vector<16x1xf32> -> vector<16x1xf32>
    %296 = vector.broadcast %295 : vector<16x1xf32> to vector<16x16xf32>
    %297 = arith.mulf %292, %296 : vector<16x16xf32>
    %298 = vector.broadcast %55 : vector<1x32xf32> to vector<16x32xf32>
    %299 = arith.mulf %262, %298 : vector<16x32xf32>
    %cst_92 = arith.constant dense<0.000000e+00> : vector<16x32xf32>
    %300 = tpu.matmul %297, %299, %cst_92 {dimension_numbers = #tpu.dot_dimension_numbers<[1], [0], [0], [1], [0, 0, 1, 1], [], []>} : vector<16x16xf32>, vector<16x32xf32>, vector<16x32xf32> -> vector<16x32xf32>
    %301 = arith.addf %282, %300 : vector<16x32xf32>
    %302 = vector.broadcast %62 : vector<1x32xf32> to vector<16x32xf32>
    %303 = arith.mulf %260, %302 : vector<16x32xf32>
    %cst_93 = arith.constant dense<0.000000e+00> : vector<16x16xf32>
    %304 = tpu.matmul %303, %261, %cst_93 {dimension_numbers = #tpu.dot_dimension_numbers<[1], [1], [0], [0], [0, 0, 1, 0], [], []>} : vector<16x32xf32>, vector<16x32xf32>, vector<16x16xf32> -> vector<16x16xf32>
    %cst_94 = arith.constant 5.000000e-01 : f32
    %305 = vector.broadcast %cst_94 : f32 to vector<16x16xf32>
    %306 = arith.mulf %304, %305 : vector<16x16xf32>
    %cst_95 = arith.constant dense<0xFF800000> : vector<16xf32>
    %307 = vector.multi_reduction <maximumf>, %306, %cst_95 [1] : vector<16x16xf32> to vector<16xf32>
    %308 = vector.shape_cast %307 : vector<16xf32> to vector<16x1xf32>
    %309 = vector.broadcast %308 : vector<16x1xf32> to vector<16x16xf32>
    %310 = arith.subf %306, %309 : vector<16x16xf32>
    %311 = math.exp %310 : vector<16x16xf32>
    %cst_96 = arith.constant dense<0.000000e+00> : vector<16xf32>
    %312 = vector.multi_reduction <add>, %311, %cst_96 [1] : vector<16x16xf32> to vector<16xf32>
    %313 = vector.shape_cast %312 : vector<16xf32> to vector<16x1xf32>
    %314 = tpu.reciprocal %313 {approx = true} : vector<16x1xf32> -> vector<16x1xf32>
    %315 = vector.broadcast %314 : vector<16x1xf32> to vector<16x16xf32>
    %316 = arith.mulf %311, %315 : vector<16x16xf32>
    %317 = vector.broadcast %62 : vector<1x32xf32> to vector<16x32xf32>
    %318 = arith.mulf %262, %317 : vector<16x32xf32>
    %cst_97 = arith.constant dense<0.000000e+00> : vector<16x32xf32>
    %319 = tpu.matmul %316, %318, %cst_97 {dimension_numbers = #tpu.dot_dimension_numbers<[1], [0], [0], [1], [0, 0, 1, 1], [], []>} : vector<16x16xf32>, vector<16x32xf32>, vector<16x32xf32> -> vector<16x32xf32>
    %320 = arith.addf %301, %319 : vector<16x32xf32>
    %321 = vector.broadcast %69 : vector<1x32xf32> to vector<16x32xf32>
    %322 = arith.mulf %260, %321 : vector<16x32xf32>
    %cst_98 = arith.constant dense<0.000000e+00> : vector<16x16xf32>
    %323 = tpu.matmul %322, %261, %cst_98 {dimension_numbers = #tpu.dot_dimension_numbers<[1], [1], [0], [0], [0, 0, 1, 0], [], []>} : vector<16x32xf32>, vector<16x32xf32>, vector<16x16xf32> -> vector<16x16xf32>
    %cst_99 = arith.constant 5.000000e-01 : f32
    %324 = vector.broadcast %cst_99 : f32 to vector<16x16xf32>
    %325 = arith.mulf %323, %324 : vector<16x16xf32>
    %cst_100 = arith.constant dense<0xFF800000> : vector<16xf32>
    %326 = vector.multi_reduction <maximumf>, %325, %cst_100 [1] : vector<16x16xf32> to vector<16xf32>
    %327 = vector.shape_cast %326 : vector<16xf32> to vector<16x1xf32>
    %328 = vector.broadcast %327 : vector<16x1xf32> to vector<16x16xf32>
    %329 = arith.subf %325, %328 : vector<16x16xf32>
    %330 = math.exp %329 : vector<16x16xf32>
    %cst_101 = arith.constant dense<0.000000e+00> : vector<16xf32>
    %331 = vector.multi_reduction <add>, %330, %cst_101 [1] : vector<16x16xf32> to vector<16xf32>
    %332 = vector.shape_cast %331 : vector<16xf32> to vector<16x1xf32>
    %333 = tpu.reciprocal %332 {approx = true} : vector<16x1xf32> -> vector<16x1xf32>
    %334 = vector.broadcast %333 : vector<16x1xf32> to vector<16x16xf32>
    %335 = arith.mulf %330, %334 : vector<16x16xf32>
    %336 = vector.broadcast %69 : vector<1x32xf32> to vector<16x32xf32>
    %337 = arith.mulf %262, %336 : vector<16x32xf32>
    %cst_102 = arith.constant dense<0.000000e+00> : vector<16x32xf32>
    %338 = tpu.matmul %335, %337, %cst_102 {dimension_numbers = #tpu.dot_dimension_numbers<[1], [0], [0], [1], [0, 0, 1, 1], [], []>} : vector<16x16xf32>, vector<16x32xf32>, vector<16x32xf32> -> vector<16x32xf32>
    %339 = arith.addf %320, %338 : vector<16x32xf32>
    %340 = vector.broadcast %76 : vector<1x32xf32> to vector<16x32xf32>
    %341 = arith.mulf %260, %340 : vector<16x32xf32>
    %cst_103 = arith.constant dense<0.000000e+00> : vector<16x16xf32>
    %342 = tpu.matmul %341, %261, %cst_103 {dimension_numbers = #tpu.dot_dimension_numbers<[1], [1], [0], [0], [0, 0, 1, 0], [], []>} : vector<16x32xf32>, vector<16x32xf32>, vector<16x16xf32> -> vector<16x16xf32>
    %cst_104 = arith.constant 5.000000e-01 : f32
    %343 = vector.broadcast %cst_104 : f32 to vector<16x16xf32>
    %344 = arith.mulf %342, %343 : vector<16x16xf32>
    %cst_105 = arith.constant dense<0xFF800000> : vector<16xf32>
    %345 = vector.multi_reduction <maximumf>, %344, %cst_105 [1] : vector<16x16xf32> to vector<16xf32>
    %346 = vector.shape_cast %345 : vector<16xf32> to vector<16x1xf32>
    %347 = vector.broadcast %346 : vector<16x1xf32> to vector<16x16xf32>
    %348 = arith.subf %344, %347 : vector<16x16xf32>
    %349 = math.exp %348 : vector<16x16xf32>
    %cst_106 = arith.constant dense<0.000000e+00> : vector<16xf32>
    %350 = vector.multi_reduction <add>, %349, %cst_106 [1] : vector<16x16xf32> to vector<16xf32>
    %351 = vector.shape_cast %350 : vector<16xf32> to vector<16x1xf32>
    %352 = tpu.reciprocal %351 {approx = true} : vector<16x1xf32> -> vector<16x1xf32>
    %353 = vector.broadcast %352 : vector<16x1xf32> to vector<16x16xf32>
    %354 = arith.mulf %349, %353 : vector<16x16xf32>
    %355 = vector.broadcast %76 : vector<1x32xf32> to vector<16x32xf32>
    %356 = arith.mulf %262, %355 : vector<16x32xf32>
    %cst_107 = arith.constant dense<0.000000e+00> : vector<16x32xf32>
    %357 = tpu.matmul %354, %356, %cst_107 {dimension_numbers = #tpu.dot_dimension_numbers<[1], [0], [0], [1], [0, 0, 1, 1], [], []>} : vector<16x16xf32>, vector<16x32xf32>, vector<16x32xf32> -> vector<16x32xf32>
    %358 = arith.addf %339, %357 : vector<16x32xf32>
    %359 = vector.broadcast %83 : vector<1x32xf32> to vector<16x32xf32>
    %360 = arith.mulf %260, %359 : vector<16x32xf32>
    %cst_108 = arith.constant dense<0.000000e+00> : vector<16x16xf32>
    %361 = tpu.matmul %360, %261, %cst_108 {dimension_numbers = #tpu.dot_dimension_numbers<[1], [1], [0], [0], [0, 0, 1, 0], [], []>} : vector<16x32xf32>, vector<16x32xf32>, vector<16x16xf32> -> vector<16x16xf32>
    %cst_109 = arith.constant 5.000000e-01 : f32
    %362 = vector.broadcast %cst_109 : f32 to vector<16x16xf32>
    %363 = arith.mulf %361, %362 : vector<16x16xf32>
    %cst_110 = arith.constant dense<0xFF800000> : vector<16xf32>
    %364 = vector.multi_reduction <maximumf>, %363, %cst_110 [1] : vector<16x16xf32> to vector<16xf32>
    %365 = vector.shape_cast %364 : vector<16xf32> to vector<16x1xf32>
    %366 = vector.broadcast %365 : vector<16x1xf32> to vector<16x16xf32>
    %367 = arith.subf %363, %366 : vector<16x16xf32>
    %368 = math.exp %367 : vector<16x16xf32>
    %cst_111 = arith.constant dense<0.000000e+00> : vector<16xf32>
    %369 = vector.multi_reduction <add>, %368, %cst_111 [1] : vector<16x16xf32> to vector<16xf32>
    %370 = vector.shape_cast %369 : vector<16xf32> to vector<16x1xf32>
    %371 = tpu.reciprocal %370 {approx = true} : vector<16x1xf32> -> vector<16x1xf32>
    %372 = vector.broadcast %371 : vector<16x1xf32> to vector<16x16xf32>
    %373 = arith.mulf %368, %372 : vector<16x16xf32>
    %374 = vector.broadcast %83 : vector<1x32xf32> to vector<16x32xf32>
    %375 = arith.mulf %262, %374 : vector<16x32xf32>
    %cst_112 = arith.constant dense<0.000000e+00> : vector<16x32xf32>
    %376 = tpu.matmul %373, %375, %cst_112 {dimension_numbers = #tpu.dot_dimension_numbers<[1], [0], [0], [1], [0, 0, 1, 1], [], []>} : vector<16x16xf32>, vector<16x32xf32>, vector<16x32xf32> -> vector<16x32xf32>
    %377 = arith.addf %358, %376 : vector<16x32xf32>
    %378 = vector.broadcast %90 : vector<1x32xf32> to vector<16x32xf32>
    %379 = arith.mulf %260, %378 : vector<16x32xf32>
    %cst_113 = arith.constant dense<0.000000e+00> : vector<16x16xf32>
    %380 = tpu.matmul %379, %261, %cst_113 {dimension_numbers = #tpu.dot_dimension_numbers<[1], [1], [0], [0], [0, 0, 1, 0], [], []>} : vector<16x32xf32>, vector<16x32xf32>, vector<16x16xf32> -> vector<16x16xf32>
    %cst_114 = arith.constant 5.000000e-01 : f32
    %381 = vector.broadcast %cst_114 : f32 to vector<16x16xf32>
    %382 = arith.mulf %380, %381 : vector<16x16xf32>
    %cst_115 = arith.constant dense<0xFF800000> : vector<16xf32>
    %383 = vector.multi_reduction <maximumf>, %382, %cst_115 [1] : vector<16x16xf32> to vector<16xf32>
    %384 = vector.shape_cast %383 : vector<16xf32> to vector<16x1xf32>
    %385 = vector.broadcast %384 : vector<16x1xf32> to vector<16x16xf32>
    %386 = arith.subf %382, %385 : vector<16x16xf32>
    %387 = math.exp %386 : vector<16x16xf32>
    %cst_116 = arith.constant dense<0.000000e+00> : vector<16xf32>
    %388 = vector.multi_reduction <add>, %387, %cst_116 [1] : vector<16x16xf32> to vector<16xf32>
    %389 = vector.shape_cast %388 : vector<16xf32> to vector<16x1xf32>
    %390 = tpu.reciprocal %389 {approx = true} : vector<16x1xf32> -> vector<16x1xf32>
    %391 = vector.broadcast %390 : vector<16x1xf32> to vector<16x16xf32>
    %392 = arith.mulf %387, %391 : vector<16x16xf32>
    %393 = vector.broadcast %90 : vector<1x32xf32> to vector<16x32xf32>
    %394 = arith.mulf %262, %393 : vector<16x32xf32>
    %cst_117 = arith.constant dense<0.000000e+00> : vector<16x32xf32>
    %395 = tpu.matmul %392, %394, %cst_117 {dimension_numbers = #tpu.dot_dimension_numbers<[1], [0], [0], [1], [0, 0, 1, 1], [], []>} : vector<16x16xf32>, vector<16x32xf32>, vector<16x32xf32> -> vector<16x32xf32>
    %396 = arith.addf %377, %395 : vector<16x32xf32>
    %397 = vector.broadcast %97 : vector<1x32xf32> to vector<16x32xf32>
    %398 = arith.mulf %260, %397 : vector<16x32xf32>
    %cst_118 = arith.constant dense<0.000000e+00> : vector<16x16xf32>
    %399 = tpu.matmul %398, %261, %cst_118 {dimension_numbers = #tpu.dot_dimension_numbers<[1], [1], [0], [0], [0, 0, 1, 0], [], []>} : vector<16x32xf32>, vector<16x32xf32>, vector<16x16xf32> -> vector<16x16xf32>
    %cst_119 = arith.constant 5.000000e-01 : f32
    %400 = vector.broadcast %cst_119 : f32 to vector<16x16xf32>
    %401 = arith.mulf %399, %400 : vector<16x16xf32>
    %cst_120 = arith.constant dense<0xFF800000> : vector<16xf32>
    %402 = vector.multi_reduction <maximumf>, %401, %cst_120 [1] : vector<16x16xf32> to vector<16xf32>
    %403 = vector.shape_cast %402 : vector<16xf32> to vector<16x1xf32>
    %404 = vector.broadcast %403 : vector<16x1xf32> to vector<16x16xf32>
    %405 = arith.subf %401, %404 : vector<16x16xf32>
    %406 = math.exp %405 : vector<16x16xf32>
    %cst_121 = arith.constant dense<0.000000e+00> : vector<16xf32>
    %407 = vector.multi_reduction <add>, %406, %cst_121 [1] : vector<16x16xf32> to vector<16xf32>
    %408 = vector.shape_cast %407 : vector<16xf32> to vector<16x1xf32>
    %409 = tpu.reciprocal %408 {approx = true} : vector<16x1xf32> -> vector<16x1xf32>
    %410 = vector.broadcast %409 : vector<16x1xf32> to vector<16x16xf32>
    %411 = arith.mulf %406, %410 : vector<16x16xf32>
    %412 = vector.broadcast %97 : vector<1x32xf32> to vector<16x32xf32>
    %413 = arith.mulf %262, %412 : vector<16x32xf32>
    %cst_122 = arith.constant dense<0.000000e+00> : vector<16x32xf32>
    %414 = tpu.matmul %411, %413, %cst_122 {dimension_numbers = #tpu.dot_dimension_numbers<[1], [0], [0], [1], [0, 0, 1, 1], [], []>} : vector<16x16xf32>, vector<16x32xf32>, vector<16x32xf32> -> vector<16x32xf32>
    %415 = arith.addf %396, %414 : vector<16x32xf32>
    %cst_123 = arith.constant dense<0.000000e+00> : vector<16x32xf32>
    %416 = tpu.matmul %415, %38, %cst_123 {dimension_numbers = #tpu.dot_dimension_numbers<[1], [0], [0], [1], [0, 0, 1, 1], [], []>} : vector<16x32xf32>, vector<32x32xf32>, vector<16x32xf32> -> vector<16x32xf32>
    %417 = vector.broadcast %40 : vector<1x32xf32> to vector<16x32xf32>
    %418 = arith.addf %416, %417 : vector<16x32xf32>
    %419 = vector.extract_strided_slice %3 {offsets = [16, 0], sizes = [16, 32], strides = [1, 1]} : vector<32x32xf32> to vector<16x32xf32>
    %420 = arith.addf %419, %418 : vector<16x32xf32>
    %c16 = arith.constant 16 : index
    %c0_124 = arith.constant 0 : index
    %421 = vector.load %arg32[%c16, %c0_124] : memref<32x32xf32, #tpu.memory_space<vmem>>, vector<16x32xf32>
    tpu.vector_store %arg32[%c16, %c0_124], %420 {strides = array<i32>} : memref<32x32xf32, #tpu.memory_space<vmem>>, vector<16x32xf32>,
    %c0_125 = arith.constant 0 : index
    %c0_126 = arith.constant 0 : index
    %422 = vector.load %arg32[%c0_125, %c0_126] : memref<32x32xf32, #tpu.memory_space<vmem>>, vector<32x32xf32>
    %c0_127 = arith.constant 0 : index
    %c0_128 = arith.constant 0 : index
    %c0_129 = arith.constant 0 : index
    %423 = vector.load %arg9[%c0_127, %c0_128, %c0_129] : memref<1x1x32xf32, #tpu.memory_space<vmem>>, vector<1x1x32xf32>
    %424 = vector.shape_cast %423 : vector<1x1x32xf32> to vector<1x32xf32>
    %c0_130 = arith.constant 0 : index
    %c0_131 = arith.constant 0 : index
    %c0_132 = arith.constant 0 : index
    %425 = vector.load %arg10[%c0_130, %c0_131, %c0_132] : memref<1x1x32xf32, #tpu.memory_space<vmem>>, vector<1x1x32xf32>
    %426 = vector.shape_cast %425 : vector<1x1x32xf32> to vector<1x32xf32>
    %cst_133 = arith.constant dense<0.000000e+00> : vector<32xf32>
    %427 = vector.multi_reduction <add>, %422, %cst_133 [1] : vector<32x32xf32> to vector<32xf32>
    %428 = vector.shape_cast %427 : vector<32xf32> to vector<32x1xf32>
    %cst_134 = arith.constant 3.200000e+01 : f32
    %429 = vector.broadcast %cst_134 : f32 to vector<32x1xf32>
    %430 = arith.divf %428, %429 : vector<32x1xf32>
    %431 = vector.broadcast %430 : vector<32x1xf32> to vector<32x32xf32>
    %432 = arith.subf %422, %431 : vector<32x32xf32>
    %433 = arith.mulf %432, %432 : vector<32x32xf32>
    %cst_135 = arith.constant dense<0.000000e+00> : vector<32xf32>
    %434 = vector.multi_reduction <add>, %433, %cst_135 [1] : vector<32x32xf32> to vector<32xf32>
    %435 = vector.shape_cast %434 : vector<32xf32> to vector<32x1xf32>
    %cst_136 = arith.constant 3.200000e+01 : f32
    %436 = vector.broadcast %cst_136 : f32 to vector<32x1xf32>
    %437 = arith.divf %435, %436 : vector<32x1xf32>
    %cst_137 = arith.constant 9.99999974E-6 : f32
    %438 = vector.broadcast %cst_137 : f32 to vector<32x1xf32>
    %439 = arith.addf %437, %438 : vector<32x1xf32>
    %440 = math.rsqrt %439 : vector<32x1xf32>
    %441 = vector.broadcast %440 : vector<32x1xf32> to vector<32x32xf32>
    %442 = arith.mulf %432, %441 : vector<32x32xf32>
    %443 = vector.broadcast %424 : vector<1x32xf32> to vector<32x32xf32>
    %444 = arith.mulf %442, %443 : vector<32x32xf32>
    %445 = vector.broadcast %426 : vector<1x32xf32> to vector<32x32xf32>
    %446 = arith.addf %444, %445 : vector<32x32xf32>
    %c0_138 = arith.constant 0 : index
    %c0_139 = arith.constant 0 : index
    %c0_140 = arith.constant 0 : index
    %447 = vector.load %arg11[%c0_138, %c0_139, %c0_140] : memref<1x32x64xf32, #tpu.memory_space<vmem>>, vector<1x32x64xf32>
    %448 = vector.shape_cast %447 : vector<1x32x64xf32> to vector<32x64xf32>
    %cst_141 = arith.constant dense<0.000000e+00> : vector<32x64xf32>
    %449 = tpu.matmul %446, %448, %cst_141 {dimension_numbers = #tpu.dot_dimension_numbers<[1], [0], [0], [1], [0, 0, 1, 1], [], []>} : vector<32x32xf32>, vector<32x64xf32>, vector<32x64xf32> -> vector<32x64xf32>
    %c0_142 = arith.constant 0 : index
    %c0_143 = arith.constant 0 : index
    %c0_144 = arith.constant 0 : index
    %450 = vector.load %arg12[%c0_142, %c0_143, %c0_144] : memref<1x1x64xf32, #tpu.memory_space<vmem>>, vector<1x1x64xf32>
    %451 = vector.shape_cast %450 : vector<1x1x64xf32> to vector<1x64xf32>
    %452 = vector.broadcast %451 : vector<1x64xf32> to vector<32x64xf32>
    %453 = arith.addf %449, %452 : vector<32x64xf32>
    %cst_145 = arith.constant 5.000000e-01 : f32
    %454 = vector.broadcast %cst_145 : f32 to vector<32x64xf32>
    %455 = arith.mulf %454, %453 : vector<32x64xf32>
    %cst_146 = arith.constant 0.707106769 : f32
    %456 = vector.broadcast %cst_146 : f32 to vector<32x64xf32>
    %457 = arith.mulf %453, %456 : vector<32x64xf32>
    %cst_147 = arith.constant 0.000000e+00 : f32
    %458 = vector.broadcast %cst_147 : f32 to vector<32x64xf32>
    %459 = arith.cmpf oge, %457, %458 : vector<32x64xf32>
    %cst_148 = arith.constant 1.000000e+00 : f32
    %cst_149 = arith.constant -1.000000e+00 : f32
    %460 = vector.broadcast %cst_148 : f32 to vector<32x64xf32>
    %461 = vector.broadcast %cst_149 : f32 to vector<32x64xf32>
    %462 = arith.select %459, %460, %461 : vector<32x64xi1>, vector<32x64xf32>
    %463 = math.absf %457 : vector<32x64xf32>
    %cst_150 = arith.constant 0.327591091 : f32
    %464 = vector.broadcast %cst_150 : f32 to vector<32x64xf32>
    %465 = arith.mulf %464, %463 : vector<32x64xf32>
    %cst_151 = arith.constant 1.000000e+00 : f32
    %466 = vector.broadcast %cst_151 : f32 to vector<32x64xf32>
    %467 = arith.addf %466, %465 : vector<32x64xf32>
    %cst_152 = arith.constant 1.000000e+00 : f32
    %468 = vector.broadcast %cst_152 : f32 to vector<32x64xf32>
    %469 = arith.divf %468, %467 : vector<32x64xf32>
    %cst_153 = arith.constant 1.06140542 : f32
    %470 = vector.broadcast %cst_153 : f32 to vector<32x64xf32>
    %471 = arith.mulf %470, %469 : vector<32x64xf32>
    %cst_154 = arith.constant -1.45315206 : f32
    %472 = vector.broadcast %cst_154 : f32 to vector<32x64xf32>
    %473 = arith.addf %471, %472 : vector<32x64xf32>
    %474 = arith.mulf %473, %469 : vector<32x64xf32>
    %cst_155 = arith.constant 1.42141378 : f32
    %475 = vector.broadcast %cst_155 : f32 to vector<32x64xf32>
    %476 = arith.addf %474, %475 : vector<32x64xf32>
    %477 = arith.mulf %476, %469 : vector<32x64xf32>
    %cst_156 = arith.constant -0.284496725 : f32
    %478 = vector.broadcast %cst_156 : f32 to vector<32x64xf32>
    %479 = arith.addf %477, %478 : vector<32x64xf32>
    %480 = arith.mulf %479, %469 : vector<32x64xf32>
    %cst_157 = arith.constant 0.254829586 : f32
    %481 = vector.broadcast %cst_157 : f32 to vector<32x64xf32>
    %482 = arith.addf %480, %481 : vector<32x64xf32>
    %483 = arith.mulf %482, %469 : vector<32x64xf32>
    %cst_158 = arith.constant 0.000000e+00 : f32
    %484 = vector.broadcast %cst_158 : f32 to vector<32x64xf32>
    %485 = arith.subf %484, %463 : vector<32x64xf32>
    %486 = arith.mulf %485, %463 : vector<32x64xf32>
    %487 = math.exp %486 : vector<32x64xf32>
    %488 = arith.mulf %483, %487 : vector<32x64xf32>
    %cst_159 = arith.constant 1.000000e+00 : f32
    %489 = vector.broadcast %cst_159 : f32 to vector<32x64xf32>
    %490 = arith.subf %489, %488 : vector<32x64xf32>
    %491 = arith.mulf %462, %490 : vector<32x64xf32>
    %cst_160 = arith.constant 1.000000e+00 : f32
    %492 = vector.broadcast %cst_160 : f32 to vector<32x64xf32>
    %493 = arith.addf %492, %491 : vector<32x64xf32>
    %494 = arith.mulf %455, %493 : vector<32x64xf32>
    %c0_161 = arith.constant 0 : index
    %c0_162 = arith.constant 0 : index
    %c0_163 = arith.constant 0 : index
    %495 = vector.load %arg13[%c0_161, %c0_162, %c0_163] : memref<1x64x32xf32, #tpu.memory_space<vmem>>, vector<1x64x32xf32>
    %496 = vector.shape_cast %495 : vector<1x64x32xf32> to vector<64x32xf32>
    %cst_164 = arith.constant dense<0.000000e+00> : vector<32x32xf32>
    %497 = tpu.matmul %494, %496, %cst_164 {dimension_numbers = #tpu.dot_dimension_numbers<[1], [0], [0], [1], [0, 0, 1, 1], [], []>} : vector<32x64xf32>, vector<64x32xf32>, vector<32x32xf32> -> vector<32x32xf32>
    %c0_165 = arith.constant 0 : index
    %c0_166 = arith.constant 0 : index
    %c0_167 = arith.constant 0 : index
    %498 = vector.load %arg14[%c0_165, %c0_166, %c0_167] : memref<1x1x32xf32, #tpu.memory_space<vmem>>, vector<1x1x32xf32>
    %499 = vector.shape_cast %498 : vector<1x1x32xf32> to vector<1x32xf32>
    %500 = vector.broadcast %499 : vector<1x32xf32> to vector<32x32xf32>
    %501 = arith.addf %497, %500 : vector<32x32xf32>
    %c0_168 = arith.constant 0 : index
    %c0_169 = arith.constant 0 : index
    %c0_170 = arith.constant 0 : index
    %502 = vector.load %arg15[%c0_168, %c0_169, %c0_170] : memref<1x1x32xf32, #tpu.memory_space<vmem>>, vector<1x1x32xf32>
    %503 = vector.shape_cast %502 : vector<1x1x32xf32> to vector<1x32xf32>
    %c0_171 = arith.constant 0 : index
    %c0_172 = arith.constant 0 : index
    %c0_173 = arith.constant 0 : index
    %504 = vector.load %arg16[%c0_171, %c0_172, %c0_173] : memref<1x1x32xf32, #tpu.memory_space<vmem>>, vector<1x1x32xf32>
    %505 = vector.shape_cast %504 : vector<1x1x32xf32> to vector<1x32xf32>
    %cst_174 = arith.constant dense<0.000000e+00> : vector<32xf32>
    %506 = vector.multi_reduction <add>, %501, %cst_174 [1] : vector<32x32xf32> to vector<32xf32>
    %507 = vector.shape_cast %506 : vector<32xf32> to vector<32x1xf32>
    %cst_175 = arith.constant 3.200000e+01 : f32
    %508 = vector.broadcast %cst_175 : f32 to vector<32x1xf32>
    %509 = arith.divf %507, %508 : vector<32x1xf32>
    %510 = vector.broadcast %509 : vector<32x1xf32> to vector<32x32xf32>
    %511 = arith.subf %501, %510 : vector<32x32xf32>
    %512 = arith.mulf %511, %511 : vector<32x32xf32>
    %cst_176 = arith.constant dense<0.000000e+00> : vector<32xf32>
    %513 = vector.multi_reduction <add>, %512, %cst_176 [1] : vector<32x32xf32> to vector<32xf32>
    %514 = vector.shape_cast %513 : vector<32xf32> to vector<32x1xf32>
    %cst_177 = arith.constant 3.200000e+01 : f32
    %515 = vector.broadcast %cst_177 : f32 to vector<32x1xf32>
    %516 = arith.divf %514, %515 : vector<32x1xf32>
    %cst_178 = arith.constant 9.99999974E-6 : f32
    %517 = vector.broadcast %cst_178 : f32 to vector<32x1xf32>
    %518 = arith.addf %516, %517 : vector<32x1xf32>
    %519 = math.rsqrt %518 : vector<32x1xf32>
    %520 = vector.broadcast %519 : vector<32x1xf32> to vector<32x32xf32>
    %521 = arith.mulf %511, %520 : vector<32x32xf32>
    %522 = vector.broadcast %503 : vector<1x32xf32> to vector<32x32xf32>
    %523 = arith.mulf %521, %522 : vector<32x32xf32>
    %524 = vector.broadcast %505 : vector<1x32xf32> to vector<32x32xf32>
    %525 = arith.addf %523, %524 : vector<32x32xf32>
    %c0_179 = arith.constant 0 : index
    %c0_180 = arith.constant 0 : index
    %c0_181 = arith.constant 0 : index
    %526 = vector.load %arg17[%c0_179, %c0_180, %c0_181] : memref<1x32x64xf32, #tpu.memory_space<vmem>>, vector<1x32x64xf32>
    %527 = vector.shape_cast %526 : vector<1x32x64xf32> to vector<32x64xf32>
    %c0_182 = arith.constant 0 : index
    %c0_183 = arith.constant 0 : index
    %c0_184 = arith.constant 0 : index
    %528 = vector.load %arg18[%c0_182, %c0_183, %c0_184] : memref<1x1x64xf32, #tpu.memory_space<vmem>>, vector<1x1x64xf32>
    %529 = vector.shape_cast %528 : vector<1x1x64xf32> to vector<1x64xf32>
    %c0_185 = arith.constant 0 : index
    %c0_186 = arith.constant 0 : index
    %c0_187 = arith.constant 0 : index
    %530 = vector.load %arg19[%c0_185, %c0_186, %c0_187] : memref<1x1x64xf32, #tpu.memory_space<vmem>>, vector<1x1x64xf32>
    %531 = vector.shape_cast %530 : vector<1x1x64xf32> to vector<1x64xf32>
    %c0_188 = arith.constant 0 : index
    %c0_189 = arith.constant 0 : index
    %c0_190 = arith.constant 0 : index
    %532 = vector.load %arg20[%c0_188, %c0_189, %c0_190] : memref<1x1x1xf32, #tpu.memory_space<vmem>>, vector<1x1x1xf32>
    %533 = vector.shape_cast %532 : vector<1x1x1xf32> to vector<1x1xf32>
    %534 = tpu.iota {dimensions = array<i32: 0>} : vector<32x32xi32>
    %535 = tpu.iota {dimensions = array<i32: 1>} : vector<32x32xi32>
    %536 = arith.cmpi eq, %534, %535 : vector<32x32xi32>
    %537 = arith.extui %536 : vector<32x32xi1> to vector<32x32xi32>
    %538 = arith.sitofp %537 : vector<32x32xi32> to vector<32x32xf32>
    %539 = vector.extract_strided_slice %525 {offsets = [0, 0], sizes = [16, 32], strides = [1, 1]} : vector<32x32xf32> to vector<16x32xf32>
    %cst_191 = arith.constant dense<0.000000e+00> : vector<32xf32>
    %540 = vector.multi_reduction <add>, %539, %cst_191 [0] : vector<16x32xf32> to vector<32xf32>
    %541 = vector.shape_cast %540 : vector<32xf32> to vector<1x32xf32>
    %cst_192 = arith.constant 1.600000e+01 : f32
    %542 = vector.broadcast %cst_192 : f32 to vector<1x32xf32>
    %543 = arith.divf %541, %542 : vector<1x32xf32>
    %cst_193 = arith.constant dense<0.000000e+00> : vector<1x64xf32>
    %544 = tpu.matmul %543, %527, %cst_193 {dimension_numbers = #tpu.dot_dimension_numbers<[1], [0], [0], [1], [0, 0, 1, 1], [], []>} : vector<1x32xf32>, vector<32x64xf32>, vector<1x64xf32> -> vector<1x64xf32>
    %545 = arith.addf %544, %529 : vector<1x64xf32>
    %cst_194 = arith.constant 0.000000e+00 : f32
    %546 = vector.broadcast %cst_194 : f32 to vector<1x64xf32>
    %547 = arith.maximumf %545, %546 : vector<1x64xf32>
    %548 = arith.mulf %547, %531 : vector<1x64xf32>
    %cst_195 = arith.constant dense<0.000000e+00> : vector<1xf32>
    %549 = vector.multi_reduction <add>, %548, %cst_195 [1] : vector<1x64xf32> to vector<1xf32>
    %550 = vector.shape_cast %549 : vector<1xf32> to vector<1x1xf32>
    %551 = arith.addf %550, %533 : vector<1x1xf32>
    %cst_196 = arith.constant 0.000000e+00 : f32
    %552 = vector.broadcast %cst_196 : f32 to vector<1x1xf32>
    %553 = arith.maximumf %551, %552 : vector<1x1xf32>
    %554 = math.absf %551 : vector<1x1xf32>
    %cst_197 = arith.constant 0.000000e+00 : f32
    %555 = vector.broadcast %cst_197 : f32 to vector<1x1xf32>
    %556 = arith.subf %555, %554 : vector<1x1xf32>
    %557 = math.exp %556 : vector<1x1xf32>
    %cst_198 = arith.constant 1.000000e+00 : f32
    %558 = vector.broadcast %cst_198 : f32 to vector<1x1xf32>
    %559 = arith.addf %558, %557 : vector<1x1xf32>
    %560 = math.log %559 : vector<1x1xf32>
    %561 = arith.addf %553, %560 : vector<1x1xf32>
    %cst_199 = arith.constant dense<0.000000e+00> : vector<32x32xf32>
    %562 = tpu.matmul %539, %539, %cst_199 {dimension_numbers = #tpu.dot_dimension_numbers<[0], [0], [1], [1], [0, 1, 1, 1], [], []>} : vector<16x32xf32>, vector<16x32xf32>, vector<32x32xf32> -> vector<32x32xf32>
    %563 = vector.broadcast %561 : vector<1x1xf32> to vector<32x32xf32>
    %564 = arith.mulf %538, %563 : vector<32x32xf32>
    %565 = arith.addf %562, %564 : vector<32x32xf32>
    %cst_200 = arith.constant dense<0.000000e+00> : vector<32x32xf32>
    %566 = tpu.matmul %256, %539, %cst_200 {dimension_numbers = #tpu.dot_dimension_numbers<[0], [0], [1], [1], [0, 1, 1, 1], [], []>} : vector<16x32xf32>, vector<16x32xf32>, vector<32x32xf32> -> vector<32x32xf32>
    %cst_201 = arith.constant 0.000000e+00 : f32
    %567 = vector.broadcast %cst_201 : f32 to vector<32x32xf32>
    %cst_202 = arith.constant dense<0.000000e+00> : vector<32x32xf32>
    %568 = tpu.matmul %566, %565, %cst_202 {dimension_numbers = #tpu.dot_dimension_numbers<[1], [1], [0], [0], [0, 0, 1, 0], [], []>} : vector<32x32xf32>, vector<32x32xf32>, vector<32x32xf32> -> vector<32x32xf32>
    %569 = arith.mulf %566, %566 : vector<32x32xf32>
    %cst_203 = arith.constant dense<0.000000e+00> : vector<32xf32>
    %570 = vector.multi_reduction <add>, %569, %cst_203 [1] : vector<32x32xf32> to vector<32xf32>
    %571 = vector.shape_cast %570 : vector<32xf32> to vector<32x1xf32>
    %572 = arith.mulf %566, %568 : vector<32x32xf32>
    %cst_204 = arith.constant dense<0.000000e+00> : vector<32xf32>
    %573 = vector.multi_reduction <add>, %572, %cst_204 [1] : vector<32x32xf32> to vector<32xf32>
    %574 = vector.shape_cast %573 : vector<32xf32> to vector<32x1xf32>
    %cst_205 = arith.constant 9.99999993E-9 : f32
    %575 = vector.broadcast %cst_205 : f32 to vector<32x1xf32>
    %576 = arith.addf %574, %575 : vector<32x1xf32>
    %577 = arith.divf %571, %576 : vector<32x1xf32>
    %578 = vector.broadcast %577 : vector<32x1xf32> to vector<32x32xf32>
    %579 = arith.mulf %578, %566 : vector<32x32xf32>
    %580 = arith.addf %567, %579 : vector<32x32xf32>
    %581 = vector.broadcast %577 : vector<32x1xf32> to vector<32x32xf32>
    %582 = arith.mulf %581, %568 : vector<32x32xf32>
    %583 = arith.subf %566, %582 : vector<32x32xf32>
    %584 = arith.mulf %583, %583 : vector<32x32xf32>
    %cst_206 = arith.constant dense<0.000000e+00> : vector<32xf32>
    %585 = vector.multi_reduction <add>, %584, %cst_206 [1] : vector<32x32xf32> to vector<32xf32>
    %586 = vector.shape_cast %585 : vector<32xf32> to vector<32x1xf32>
    %cst_207 = arith.constant 9.99999993E-9 : f32
    %587 = vector.broadcast %cst_207 : f32 to vector<32x1xf32>
    %588 = arith.addf %571, %587 : vector<32x1xf32>
    %589 = arith.divf %586, %588 : vector<32x1xf32>
    %590 = vector.broadcast %589 : vector<32x1xf32> to vector<32x32xf32>
    %591 = arith.mulf %590, %566 : vector<32x32xf32>
    %592 = arith.addf %583, %591 : vector<32x32xf32>
    %cst_208 = arith.constant dense<0.000000e+00> : vector<32x32xf32>
    %593 = tpu.matmul %592, %565, %cst_208 {dimension_numbers = #tpu.dot_dimension_numbers<[1], [1], [0], [0], [0, 0, 1, 0], [], []>} : vector<32x32xf32>, vector<32x32xf32>, vector<32x32xf32> -> vector<32x32xf32>
    %594 = arith.mulf %583, %583 : vector<32x32xf32>
    %cst_209 = arith.constant dense<0.000000e+00> : vector<32xf32>
    %595 = vector.multi_reduction <add>, %594, %cst_209 [1] : vector<32x32xf32> to vector<32xf32>
    %596 = vector.shape_cast %595 : vector<32xf32> to vector<32x1xf32>
    %597 = arith.mulf %592, %593 : vector<32x32xf32>
    %cst_210 = arith.constant dense<0.000000e+00> : vector<32xf32>
    %598 = vector.multi_reduction <add>, %597, %cst_210 [1] : vector<32x32xf32> to vector<32xf32>
    %599 = vector.shape_cast %598 : vector<32xf32> to vector<32x1xf32>
    %cst_211 = arith.constant 9.99999993E-9 : f32
    %600 = vector.broadcast %cst_211 : f32 to vector<32x1xf32>
    %601 = arith.addf %599, %600 : vector<32x1xf32>
    %602 = arith.divf %596, %601 : vector<32x1xf32>
    %603 = vector.broadcast %602 : vector<32x1xf32> to vector<32x32xf32>
    %604 = arith.mulf %603, %592 : vector<32x32xf32>
    %605 = arith.addf %580, %604 : vector<32x32xf32>
    %606 = vector.broadcast %602 : vector<32x1xf32> to vector<32x32xf32>
    %607 = arith.mulf %606, %593 : vector<32x32xf32>
    %608 = arith.subf %583, %607 : vector<32x32xf32>
    %609 = arith.mulf %608, %608 : vector<32x32xf32>
    %cst_212 = arith.constant dense<0.000000e+00> : vector<32xf32>
    %610 = vector.multi_reduction <add>, %609, %cst_212 [1] : vector<32x32xf32> to vector<32xf32>
    %611 = vector.shape_cast %610 : vector<32xf32> to vector<32x1xf32>
    %cst_213 = arith.constant 9.99999993E-9 : f32
    %612 = vector.broadcast %cst_213 : f32 to vector<32x1xf32>
    %613 = arith.addf %596, %612 : vector<32x1xf32>
    %614 = arith.divf %611, %613 : vector<32x1xf32>
    %615 = vector.broadcast %614 : vector<32x1xf32> to vector<32x32xf32>
    %616 = arith.mulf %615, %592 : vector<32x32xf32>
    %617 = arith.addf %608, %616 : vector<32x32xf32>
    %cst_214 = arith.constant dense<0.000000e+00> : vector<32x32xf32>
    %618 = tpu.matmul %617, %565, %cst_214 {dimension_numbers = #tpu.dot_dimension_numbers<[1], [1], [0], [0], [0, 0, 1, 0], [], []>} : vector<32x32xf32>, vector<32x32xf32>, vector<32x32xf32> -> vector<32x32xf32>
    %619 = arith.mulf %608, %608 : vector<32x32xf32>
    %cst_215 = arith.constant dense<0.000000e+00> : vector<32xf32>
    %620 = vector.multi_reduction <add>, %619, %cst_215 [1] : vector<32x32xf32> to vector<32xf32>
    %621 = vector.shape_cast %620 : vector<32xf32> to vector<32x1xf32>
    %622 = arith.mulf %617, %618 : vector<32x32xf32>
    %cst_216 = arith.constant dense<0.000000e+00> : vector<32xf32>
    %623 = vector.multi_reduction <add>, %622, %cst_216 [1] : vector<32x32xf32> to vector<32xf32>
    %624 = vector.shape_cast %623 : vector<32xf32> to vector<32x1xf32>
    %cst_217 = arith.constant 9.99999993E-9 : f32
    %625 = vector.broadcast %cst_217 : f32 to vector<32x1xf32>
    %626 = arith.addf %624, %625 : vector<32x1xf32>
    %627 = arith.divf %621, %626 : vector<32x1xf32>
    %628 = vector.broadcast %627 : vector<32x1xf32> to vector<32x32xf32>
    %629 = arith.mulf %628, %617 : vector<32x32xf32>
    %630 = arith.addf %605, %629 : vector<32x32xf32>
    %631 = vector.broadcast %627 : vector<32x1xf32> to vector<32x32xf32>
    %632 = arith.mulf %631, %618 : vector<32x32xf32>
    %633 = arith.subf %608, %632 : vector<32x32xf32>
    %634 = arith.mulf %633, %633 : vector<32x32xf32>
    %cst_218 = arith.constant dense<0.000000e+00> : vector<32xf32>
    %635 = vector.multi_reduction <add>, %634, %cst_218 [1] : vector<32x32xf32> to vector<32xf32>
    %636 = vector.shape_cast %635 : vector<32xf32> to vector<32x1xf32>
    %cst_219 = arith.constant 9.99999993E-9 : f32
    %637 = vector.broadcast %cst_219 : f32 to vector<32x1xf32>
    %638 = arith.addf %621, %637 : vector<32x1xf32>
    %639 = arith.divf %636, %638 : vector<32x1xf32>
    %640 = vector.broadcast %639 : vector<32x1xf32> to vector<32x32xf32>
    %641 = arith.mulf %640, %617 : vector<32x32xf32>
    %642 = arith.addf %633, %641 : vector<32x32xf32>
    %cst_220 = arith.constant dense<0.000000e+00> : vector<32x32xf32>
    %643 = tpu.matmul %642, %565, %cst_220 {dimension_numbers = #tpu.dot_dimension_numbers<[1], [1], [0], [0], [0, 0, 1, 0], [], []>} : vector<32x32xf32>, vector<32x32xf32>, vector<32x32xf32> -> vector<32x32xf32>
    %644 = arith.mulf %633, %633 : vector<32x32xf32>
    %cst_221 = arith.constant dense<0.000000e+00> : vector<32xf32>
    %645 = vector.multi_reduction <add>, %644, %cst_221 [1] : vector<32x32xf32> to vector<32xf32>
    %646 = vector.shape_cast %645 : vector<32xf32> to vector<32x1xf32>
    %647 = arith.mulf %642, %643 : vector<32x32xf32>
    %cst_222 = arith.constant dense<0.000000e+00> : vector<32xf32>
    %648 = vector.multi_reduction <add>, %647, %cst_222 [1] : vector<32x32xf32> to vector<32xf32>
    %649 = vector.shape_cast %648 : vector<32xf32> to vector<32x1xf32>
    %cst_223 = arith.constant 9.99999993E-9 : f32
    %650 = vector.broadcast %cst_223 : f32 to vector<32x1xf32>
    %651 = arith.addf %649, %650 : vector<32x1xf32>
    %652 = arith.divf %646, %651 : vector<32x1xf32>
    %653 = vector.broadcast %652 : vector<32x1xf32> to vector<32x32xf32>
    %654 = arith.mulf %653, %642 : vector<32x32xf32>
    %655 = arith.addf %630, %654 : vector<32x32xf32>
    %cst_224 = arith.constant dense<0.000000e+00> : vector<16x32xf32>
    %656 = tpu.matmul %539, %655, %cst_224 {dimension_numbers = #tpu.dot_dimension_numbers<[1], [1], [0], [0], [0, 0, 1, 0], [], []>} : vector<16x32xf32>, vector<32x32xf32>, vector<16x32xf32> -> vector<16x32xf32>
    %657 = vector.extract_strided_slice %422 {offsets = [0, 0], sizes = [16, 32], strides = [1, 1]} : vector<32x32xf32> to vector<16x32xf32>
    %658 = arith.addf %657, %656 : vector<16x32xf32>
    %c0_225 = arith.constant 0 : index
    %c0_226 = arith.constant 0 : index
    %659 = vector.load %arg32[%c0_225, %c0_226] : memref<32x32xf32, #tpu.memory_space<vmem>>, vector<16x32xf32>
    tpu.vector_store %arg32[%c0_225, %c0_226], %658 {strides = array<i32>} : memref<32x32xf32, #tpu.memory_space<vmem>>, vector<16x32xf32>,
    %660 = vector.extract_strided_slice %525 {offsets = [16, 0], sizes = [16, 32], strides = [1, 1]} : vector<32x32xf32> to vector<16x32xf32>
    %cst_227 = arith.constant dense<0.000000e+00> : vector<32xf32>
    %661 = vector.multi_reduction <add>, %660, %cst_227 [0] : vector<16x32xf32> to vector<32xf32>
    %662 = vector.shape_cast %661 : vector<32xf32> to vector<1x32xf32>
    %cst_228 = arith.constant 1.600000e+01 : f32
    %663 = vector.broadcast %cst_228 : f32 to vector<1x32xf32>
    %664 = arith.divf %662, %663 : vector<1x32xf32>
    %cst_229 = arith.constant dense<0.000000e+00> : vector<1x64xf32>
    %665 = tpu.matmul %664, %527, %cst_229 {dimension_numbers = #tpu.dot_dimension_numbers<[1], [0], [0], [1], [0, 0, 1, 1], [], []>} : vector<1x32xf32>, vector<32x64xf32>, vector<1x64xf32> -> vector<1x64xf32>
    %666 = arith.addf %665, %529 : vector<1x64xf32>
    %cst_230 = arith.constant 0.000000e+00 : f32
    %667 = vector.broadcast %cst_230 : f32 to vector<1x64xf32>
    %668 = arith.maximumf %666, %667 : vector<1x64xf32>
    %669 = arith.mulf %668, %531 : vector<1x64xf32>
    %cst_231 = arith.constant dense<0.000000e+00> : vector<1xf32>
    %670 = vector.multi_reduction <add>, %669, %cst_231 [1] : vector<1x64xf32> to vector<1xf32>
    %671 = vector.shape_cast %670 : vector<1xf32> to vector<1x1xf32>
    %672 = arith.addf %671, %533 : vector<1x1xf32>
    %cst_232 = arith.constant 0.000000e+00 : f32
    %673 = vector.broadcast %cst_232 : f32 to vector<1x1xf32>
    %674 = arith.maximumf %672, %673 : vector<1x1xf32>
    %675 = math.absf %672 : vector<1x1xf32>
    %cst_233 = arith.constant 0.000000e+00 : f32
    %676 = vector.broadcast %cst_233 : f32 to vector<1x1xf32>
    %677 = arith.subf %676, %675 : vector<1x1xf32>
    %678 = math.exp %677 : vector<1x1xf32>
    %cst_234 = arith.constant 1.000000e+00 : f32
    %679 = vector.broadcast %cst_234 : f32 to vector<1x1xf32>
    %680 = arith.addf %679, %678 : vector<1x1xf32>
    %681 = math.log %680 : vector<1x1xf32>
    %682 = arith.addf %674, %681 : vector<1x1xf32>
    %cst_235 = arith.constant dense<0.000000e+00> : vector<32x32xf32>
    %683 = tpu.matmul %660, %660, %cst_235 {dimension_numbers = #tpu.dot_dimension_numbers<[0], [0], [1], [1], [0, 1, 1, 1], [], []>} : vector<16x32xf32>, vector<16x32xf32>, vector<32x32xf32> -> vector<32x32xf32>
    %684 = vector.broadcast %682 : vector<1x1xf32> to vector<32x32xf32>
    %685 = arith.mulf %538, %684 : vector<32x32xf32>
    %686 = arith.addf %683, %685 : vector<32x32xf32>
    %cst_236 = arith.constant dense<0.000000e+00> : vector<32x32xf32>
    %687 = tpu.matmul %418, %660, %cst_236 {dimension_numbers = #tpu.dot_dimension_numbers<[0], [0], [1], [1], [0, 1, 1, 1], [], []>} : vector<16x32xf32>, vector<16x32xf32>, vector<32x32xf32> -> vector<32x32xf32>
    %cst_237 = arith.constant 0.000000e+00 : f32
    %688 = vector.broadcast %cst_237 : f32 to vector<32x32xf32>
    %cst_238 = arith.constant dense<0.000000e+00> : vector<32x32xf32>
    %689 = tpu.matmul %687, %686, %cst_238 {dimension_numbers = #tpu.dot_dimension_numbers<[1], [1], [0], [0], [0, 0, 1, 0], [], []>} : vector<32x32xf32>, vector<32x32xf32>, vector<32x32xf32> -> vector<32x32xf32>
    %690 = arith.mulf %687, %687 : vector<32x32xf32>
    %cst_239 = arith.constant dense<0.000000e+00> : vector<32xf32>
    %691 = vector.multi_reduction <add>, %690, %cst_239 [1] : vector<32x32xf32> to vector<32xf32>
    %692 = vector.shape_cast %691 : vector<32xf32> to vector<32x1xf32>
    %693 = arith.mulf %687, %689 : vector<32x32xf32>
    %cst_240 = arith.constant dense<0.000000e+00> : vector<32xf32>
    %694 = vector.multi_reduction <add>, %693, %cst_240 [1] : vector<32x32xf32> to vector<32xf32>
    %695 = vector.shape_cast %694 : vector<32xf32> to vector<32x1xf32>
    %cst_241 = arith.constant 9.99999993E-9 : f32
    %696 = vector.broadcast %cst_241 : f32 to vector<32x1xf32>
    %697 = arith.addf %695, %696 : vector<32x1xf32>
    %698 = arith.divf %692, %697 : vector<32x1xf32>
    %699 = vector.broadcast %698 : vector<32x1xf32> to vector<32x32xf32>
    %700 = arith.mulf %699, %687 : vector<32x32xf32>
    %701 = arith.addf %688, %700 : vector<32x32xf32>
    %702 = vector.broadcast %698 : vector<32x1xf32> to vector<32x32xf32>
    %703 = arith.mulf %702, %689 : vector<32x32xf32>
    %704 = arith.subf %687, %703 : vector<32x32xf32>
    %705 = arith.mulf %704, %704 : vector<32x32xf32>
    %cst_242 = arith.constant dense<0.000000e+00> : vector<32xf32>
    %706 = vector.multi_reduction <add>, %705, %cst_242 [1] : vector<32x32xf32> to vector<32xf32>
    %707 = vector.shape_cast %706 : vector<32xf32> to vector<32x1xf32>
    %cst_243 = arith.constant 9.99999993E-9 : f32
    %708 = vector.broadcast %cst_243 : f32 to vector<32x1xf32>
    %709 = arith.addf %692, %708 : vector<32x1xf32>
    %710 = arith.divf %707, %709 : vector<32x1xf32>
    %711 = vector.broadcast %710 : vector<32x1xf32> to vector<32x32xf32>
    %712 = arith.mulf %711, %687 : vector<32x32xf32>
    %713 = arith.addf %704, %712 : vector<32x32xf32>
    %cst_244 = arith.constant dense<0.000000e+00> : vector<32x32xf32>
    %714 = tpu.matmul %713, %686, %cst_244 {dimension_numbers = #tpu.dot_dimension_numbers<[1], [1], [0], [0], [0, 0, 1, 0], [], []>} : vector<32x32xf32>, vector<32x32xf32>, vector<32x32xf32> -> vector<32x32xf32>
    %715 = arith.mulf %704, %704 : vector<32x32xf32>
    %cst_245 = arith.constant dense<0.000000e+00> : vector<32xf32>
    %716 = vector.multi_reduction <add>, %715, %cst_245 [1] : vector<32x32xf32> to vector<32xf32>
    %717 = vector.shape_cast %716 : vector<32xf32> to vector<32x1xf32>
    %718 = arith.mulf %713, %714 : vector<32x32xf32>
    %cst_246 = arith.constant dense<0.000000e+00> : vector<32xf32>
    %719 = vector.multi_reduction <add>, %718, %cst_246 [1] : vector<32x32xf32> to vector<32xf32>
    %720 = vector.shape_cast %719 : vector<32xf32> to vector<32x1xf32>
    %cst_247 = arith.constant 9.99999993E-9 : f32
    %721 = vector.broadcast %cst_247 : f32 to vector<32x1xf32>
    %722 = arith.addf %720, %721 : vector<32x1xf32>
    %723 = arith.divf %717, %722 : vector<32x1xf32>
    %724 = vector.broadcast %723 : vector<32x1xf32> to vector<32x32xf32>
    %725 = arith.mulf %724, %713 : vector<32x32xf32>
    %726 = arith.addf %701, %725 : vector<32x32xf32>
    %727 = vector.broadcast %723 : vector<32x1xf32> to vector<32x32xf32>
    %728 = arith.mulf %727, %714 : vector<32x32xf32>
    %729 = arith.subf %704, %728 : vector<32x32xf32>
    %730 = arith.mulf %729, %729 : vector<32x32xf32>
    %cst_248 = arith.constant dense<0.000000e+00> : vector<32xf32>
    %731 = vector.multi_reduction <add>, %730, %cst_248 [1] : vector<32x32xf32> to vector<32xf32>
    %732 = vector.shape_cast %731 : vector<32xf32> to vector<32x1xf32>
    %cst_249 = arith.constant 9.99999993E-9 : f32
    %733 = vector.broadcast %cst_249 : f32 to vector<32x1xf32>
    %734 = arith.addf %717, %733 : vector<32x1xf32>
    %735 = arith.divf %732, %734 : vector<32x1xf32>
    %736 = vector.broadcast %735 : vector<32x1xf32> to vector<32x32xf32>
    %737 = arith.mulf %736, %713 : vector<32x32xf32>
    %738 = arith.addf %729, %737 : vector<32x32xf32>
    %cst_250 = arith.constant dense<0.000000e+00> : vector<32x32xf32>
    %739 = tpu.matmul %738, %686, %cst_250 {dimension_numbers = #tpu.dot_dimension_numbers<[1], [1], [0], [0], [0, 0, 1, 0], [], []>} : vector<32x32xf32>, vector<32x32xf32>, vector<32x32xf32> -> vector<32x32xf32>
    %740 = arith.mulf %729, %729 : vector<32x32xf32>
    %cst_251 = arith.constant dense<0.000000e+00> : vector<32xf32>
    %741 = vector.multi_reduction <add>, %740, %cst_251 [1] : vector<32x32xf32> to vector<32xf32>
    %742 = vector.shape_cast %741 : vector<32xf32> to vector<32x1xf32>
    %743 = arith.mulf %738, %739 : vector<32x32xf32>
    %cst_252 = arith.constant dense<0.000000e+00> : vector<32xf32>
    %744 = vector.multi_reduction <add>, %743, %cst_252 [1] : vector<32x32xf32> to vector<32xf32>
    %745 = vector.shape_cast %744 : vector<32xf32> to vector<32x1xf32>
    %cst_253 = arith.constant 9.99999993E-9 : f32
    %746 = vector.broadcast %cst_253 : f32 to vector<32x1xf32>
    %747 = arith.addf %745, %746 : vector<32x1xf32>
    %748 = arith.divf %742, %747 : vector<32x1xf32>
    %749 = vector.broadcast %748 : vector<32x1xf32> to vector<32x32xf32>
    %750 = arith.mulf %749, %738 : vector<32x32xf32>
    %751 = arith.addf %726, %750 : vector<32x32xf32>
    %752 = vector.broadcast %748 : vector<32x1xf32> to vector<32x32xf32>
    %753 = arith.mulf %752, %739 : vector<32x32xf32>
    %754 = arith.subf %729, %753 : vector<32x32xf32>
    %755 = arith.mulf %754, %754 : vector<32x32xf32>
    %cst_254 = arith.constant dense<0.000000e+00> : vector<32xf32>
    %756 = vector.multi_reduction <add>, %755, %cst_254 [1] : vector<32x32xf32> to vector<32xf32>
    %757 = vector.shape_cast %756 : vector<32xf32> to vector<32x1xf32>
    %cst_255 = arith.constant 9.99999993E-9 : f32
    %758 = vector.broadcast %cst_255 : f32 to vector<32x1xf32>
    %759 = arith.addf %742, %758 : vector<32x1xf32>
    %760 = arith.divf %757, %759 : vector<32x1xf32>
    %761 = vector.broadcast %760 : vector<32x1xf32> to vector<32x32xf32>
    %762 = arith.mulf %761, %738 : vector<32x32xf32>
    %763 = arith.addf %754, %762 : vector<32x32xf32>
    %cst_256 = arith.constant dense<0.000000e+00> : vector<32x32xf32>
    %764 = tpu.matmul %763, %686, %cst_256 {dimension_numbers = #tpu.dot_dimension_numbers<[1], [1], [0], [0], [0, 0, 1, 0], [], []>} : vector<32x32xf32>, vector<32x32xf32>, vector<32x32xf32> -> vector<32x32xf32>
    %765 = arith.mulf %754, %754 : vector<32x32xf32>
    %cst_257 = arith.constant dense<0.000000e+00> : vector<32xf32>
    %766 = vector.multi_reduction <add>, %765, %cst_257 [1] : vector<32x32xf32> to vector<32xf32>
    %767 = vector.shape_cast %766 : vector<32xf32> to vector<32x1xf32>
    %768 = arith.mulf %763, %764 : vector<32x32xf32>
    %cst_258 = arith.constant dense<0.000000e+00> : vector<32xf32>
    %769 = vector.multi_reduction <add>, %768, %cst_258 [1] : vector<32x32xf32> to vector<32xf32>
    %770 = vector.shape_cast %769 : vector<32xf32> to vector<32x1xf32>
    %cst_259 = arith.constant 9.99999993E-9 : f32
    %771 = vector.broadcast %cst_259 : f32 to vector<32x1xf32>
    %772 = arith.addf %770, %771 : vector<32x1xf32>
    %773 = arith.divf %767, %772 : vector<32x1xf32>
    %774 = vector.broadcast %773 : vector<32x1xf32> to vector<32x32xf32>
    %775 = arith.mulf %774, %763 : vector<32x32xf32>
    %776 = arith.addf %751, %775 : vector<32x32xf32>
    %cst_260 = arith.constant dense<0.000000e+00> : vector<16x32xf32>
    %777 = tpu.matmul %660, %776, %cst_260 {dimension_numbers = #tpu.dot_dimension_numbers<[1], [1], [0], [0], [0, 0, 1, 0], [], []>} : vector<16x32xf32>, vector<32x32xf32>, vector<16x32xf32> -> vector<16x32xf32>
    %778 = vector.extract_strided_slice %422 {offsets = [16, 0], sizes = [16, 32], strides = [1, 1]} : vector<32x32xf32> to vector<16x32xf32>
    %779 = arith.addf %778, %777 : vector<16x32xf32>
    %c16_261 = arith.constant 16 : index
    %c0_262 = arith.constant 0 : index
    %780 = vector.load %arg32[%c16_261, %c0_262] : memref<32x32xf32, #tpu.memory_space<vmem>>, vector<16x32xf32>
    tpu.vector_store %arg32[%c16_261, %c0_262], %779 {strides = array<i32>} : memref<32x32xf32, #tpu.memory_space<vmem>>, vector<16x32xf32>,
    %c0_263 = arith.constant 0 : index
    %c0_264 = arith.constant 0 : index
    %781 = vector.load %arg32[%c0_263, %c0_264] : memref<32x32xf32, #tpu.memory_space<vmem>>, vector<32x32xf32>
    %c0_265 = arith.constant 0 : index
    %c0_266 = arith.constant 0 : index
    %c0_267 = arith.constant 0 : index
    %782 = vector.load %arg21[%c0_265, %c0_266, %c0_267] : memref<1x1x32xf32, #tpu.memory_space<vmem>>, vector<1x1x32xf32>
    %783 = vector.shape_cast %782 : vector<1x1x32xf32> to vector<1x32xf32>
    %c0_268 = arith.constant 0 : index
    %c0_269 = arith.constant 0 : index
    %c0_270 = arith.constant 0 : index
    %784 = vector.load %arg22[%c0_268, %c0_269, %c0_270] : memref<1x1x32xf32, #tpu.memory_space<vmem>>, vector<1x1x32xf32>
    %785 = vector.shape_cast %784 : vector<1x1x32xf32> to vector<1x32xf32>
    %cst_271 = arith.constant dense<0.000000e+00> : vector<32xf32>
    %786 = vector.multi_reduction <add>, %781, %cst_271 [1] : vector<32x32xf32> to vector<32xf32>
    %787 = vector.shape_cast %786 : vector<32xf32> to vector<32x1xf32>
    %cst_272 = arith.constant 3.200000e+01 : f32
    %788 = vector.broadcast %cst_272 : f32 to vector<32x1xf32>
    %789 = arith.divf %787, %788 : vector<32x1xf32>
    %790 = vector.broadcast %789 : vector<32x1xf32> to vector<32x32xf32>
    %791 = arith.subf %781, %790 : vector<32x32xf32>
    %792 = arith.mulf %791, %791 : vector<32x32xf32>
    %cst_273 = arith.constant dense<0.000000e+00> : vector<32xf32>
    %793 = vector.multi_reduction <add>, %792, %cst_273 [1] : vector<32x32xf32> to vector<32xf32>
    %794 = vector.shape_cast %793 : vector<32xf32> to vector<32x1xf32>
    %cst_274 = arith.constant 3.200000e+01 : f32
    %795 = vector.broadcast %cst_274 : f32 to vector<32x1xf32>
    %796 = arith.divf %794, %795 : vector<32x1xf32>
    %cst_275 = arith.constant 9.99999974E-6 : f32
    %797 = vector.broadcast %cst_275 : f32 to vector<32x1xf32>
    %798 = arith.addf %796, %797 : vector<32x1xf32>
    %799 = math.rsqrt %798 : vector<32x1xf32>
    %800 = vector.broadcast %799 : vector<32x1xf32> to vector<32x32xf32>
    %801 = arith.mulf %791, %800 : vector<32x32xf32>
    %802 = vector.broadcast %783 : vector<1x32xf32> to vector<32x32xf32>
    %803 = arith.mulf %801, %802 : vector<32x32xf32>
    %804 = vector.broadcast %785 : vector<1x32xf32> to vector<32x32xf32>
    %805 = arith.addf %803, %804 : vector<32x32xf32>
    %c0_276 = arith.constant 0 : index
    %c0_277 = arith.constant 0 : index
    %c0_278 = arith.constant 0 : index
    %806 = vector.load %arg23[%c0_276, %c0_277, %c0_278] : memref<1x32x128xf32, #tpu.memory_space<vmem>>, vector<1x32x128xf32>
    %807 = vector.shape_cast %806 : vector<1x32x128xf32> to vector<32x128xf32>
    %cst_279 = arith.constant dense<0.000000e+00> : vector<32x128xf32>
    %808 = tpu.matmul %805, %807, %cst_279 {dimension_numbers = #tpu.dot_dimension_numbers<[1], [0], [0], [1], [0, 0, 1, 1], [], []>} : vector<32x32xf32>, vector<32x128xf32>, vector<32x128xf32> -> vector<32x128xf32>
    %c0_280 = arith.constant 0 : index
    %c0_281 = arith.constant 0 : index
    %c0_282 = arith.constant 0 : index
    %809 = vector.load %arg24[%c0_280, %c0_281, %c0_282] : memref<1x1x128xf32, #tpu.memory_space<vmem>>, vector<1x1x128xf32>
    %810 = vector.shape_cast %809 : vector<1x1x128xf32> to vector<1x128xf32>
    %811 = vector.broadcast %810 : vector<1x128xf32> to vector<32x128xf32>
    %812 = arith.addf %808, %811 : vector<32x128xf32>
    %cst_283 = arith.constant 5.000000e-01 : f32
    %813 = vector.broadcast %cst_283 : f32 to vector<32x128xf32>
    %814 = arith.mulf %813, %812 : vector<32x128xf32>
    %cst_284 = arith.constant 0.707106769 : f32
    %815 = vector.broadcast %cst_284 : f32 to vector<32x128xf32>
    %816 = arith.mulf %812, %815 : vector<32x128xf32>
    %cst_285 = arith.constant 0.000000e+00 : f32
    %817 = vector.broadcast %cst_285 : f32 to vector<32x128xf32>
    %818 = arith.cmpf oge, %816, %817 : vector<32x128xf32>
    %cst_286 = arith.constant 1.000000e+00 : f32
    %cst_287 = arith.constant -1.000000e+00 : f32
    %819 = vector.broadcast %cst_286 : f32 to vector<32x128xf32>
    %820 = vector.broadcast %cst_287 : f32 to vector<32x128xf32>
    %821 = arith.select %818, %819, %820 : vector<32x128xi1>, vector<32x128xf32>
    %822 = math.absf %816 : vector<32x128xf32>
    %cst_288 = arith.constant 0.327591091 : f32
    %823 = vector.broadcast %cst_288 : f32 to vector<32x128xf32>
    %824 = arith.mulf %823, %822 : vector<32x128xf32>
    %cst_289 = arith.constant 1.000000e+00 : f32
    %825 = vector.broadcast %cst_289 : f32 to vector<32x128xf32>
    %826 = arith.addf %825, %824 : vector<32x128xf32>
    %cst_290 = arith.constant 1.000000e+00 : f32
    %827 = vector.broadcast %cst_290 : f32 to vector<32x128xf32>
    %828 = arith.divf %827, %826 : vector<32x128xf32>
    %cst_291 = arith.constant 1.06140542 : f32
    %829 = vector.broadcast %cst_291 : f32 to vector<32x128xf32>
    %830 = arith.mulf %829, %828 : vector<32x128xf32>
    %cst_292 = arith.constant -1.45315206 : f32
    %831 = vector.broadcast %cst_292 : f32 to vector<32x128xf32>
    %832 = arith.addf %830, %831 : vector<32x128xf32>
    %833 = arith.mulf %832, %828 : vector<32x128xf32>
    %cst_293 = arith.constant 1.42141378 : f32
    %834 = vector.broadcast %cst_293 : f32 to vector<32x128xf32>
    %835 = arith.addf %833, %834 : vector<32x128xf32>
    %836 = arith.mulf %835, %828 : vector<32x128xf32>
    %cst_294 = arith.constant -0.284496725 : f32
    %837 = vector.broadcast %cst_294 : f32 to vector<32x128xf32>
    %838 = arith.addf %836, %837 : vector<32x128xf32>
    %839 = arith.mulf %838, %828 : vector<32x128xf32>
    %cst_295 = arith.constant 0.254829586 : f32
    %840 = vector.broadcast %cst_295 : f32 to vector<32x128xf32>
    %841 = arith.addf %839, %840 : vector<32x128xf32>
    %842 = arith.mulf %841, %828 : vector<32x128xf32>
    %cst_296 = arith.constant 0.000000e+00 : f32
    %843 = vector.broadcast %cst_296 : f32 to vector<32x128xf32>
    %844 = arith.subf %843, %822 : vector<32x128xf32>
    %845 = arith.mulf %844, %822 : vector<32x128xf32>
    %846 = math.exp %845 : vector<32x128xf32>
    %847 = arith.mulf %842, %846 : vector<32x128xf32>
    %cst_297 = arith.constant 1.000000e+00 : f32
    %848 = vector.broadcast %cst_297 : f32 to vector<32x128xf32>
    %849 = arith.subf %848, %847 : vector<32x128xf32>
    %850 = arith.mulf %821, %849 : vector<32x128xf32>
    %cst_298 = arith.constant 1.000000e+00 : f32
    %851 = vector.broadcast %cst_298 : f32 to vector<32x128xf32>
    %852 = arith.addf %851, %850 : vector<32x128xf32>
    %853 = arith.mulf %814, %852 : vector<32x128xf32>
    %c0_299 = arith.constant 0 : index
    %c0_300 = arith.constant 0 : index
    %c0_301 = arith.constant 0 : index
    %854 = vector.load %arg25[%c0_299, %c0_300, %c0_301] : memref<1x128x32xf32, #tpu.memory_space<vmem>>, vector<1x128x32xf32>
    %855 = vector.shape_cast %854 : vector<1x128x32xf32> to vector<128x32xf32>
    %cst_302 = arith.constant dense<0.000000e+00> : vector<32x32xf32>
    %856 = tpu.matmul %853, %855, %cst_302 {dimension_numbers = #tpu.dot_dimension_numbers<[1], [0], [0], [1], [0, 0, 1, 1], [], []>} : vector<32x128xf32>, vector<128x32xf32>, vector<32x32xf32> -> vector<32x32xf32>
    %c0_303 = arith.constant 0 : index
    %c0_304 = arith.constant 0 : index
    %c0_305 = arith.constant 0 : index
    %857 = vector.load %arg26[%c0_303, %c0_304, %c0_305] : memref<1x1x32xf32, #tpu.memory_space<vmem>>, vector<1x1x32xf32>
    %858 = vector.shape_cast %857 : vector<1x1x32xf32> to vector<1x32xf32>
    %859 = vector.broadcast %858 : vector<1x32xf32> to vector<32x32xf32>
    %860 = arith.addf %856, %859 : vector<32x32xf32>
    %861 = arith.addf %781, %860 : vector<32x32xf32>
    %c0_306 = arith.constant 0 : index
    %c0_307 = arith.constant 0 : index
    %862 = vector.load %arg32[%c0_306, %c0_307] : memref<32x32xf32, #tpu.memory_space<vmem>>, vector<32x32xf32>
    tpu.vector_store %arg32[%c0_306, %c0_307], %861 {strides = array<i32>} : memref<32x32xf32, #tpu.memory_space<vmem>>, vector<32x32xf32>,
    %c1_i32 = arith.constant 1 : i32
    %863 = arith.cmpi eq, %arg0, %c1_i32 : i32
    %864 = arith.extui %863 : i1 to i32
    %c0_i32_308 = arith.constant 0 : i32
    %865 = arith.cmpi ne, %864, %c0_i32_308 : i32
    scf.if %865 {
      %c0_309 = arith.constant 0 : index
      %c0_310 = arith.constant 0 : index
      %866 = vector.load %arg27[%c0_309, %c0_310] : memref<1x32xf32, #tpu.memory_space<vmem>>, vector<1x32xf32>
      %c0_311 = arith.constant 0 : index
      %c0_312 = arith.constant 0 : index
      %867 = vector.load %arg28[%c0_311, %c0_312] : memref<1x32xf32, #tpu.memory_space<vmem>>, vector<1x32xf32>
      %cst_313 = arith.constant dense<0.000000e+00> : vector<32xf32>
      %868 = vector.multi_reduction <add>, %861, %cst_313 [1] : vector<32x32xf32> to vector<32xf32>
      %869 = vector.shape_cast %868 : vector<32xf32> to vector<32x1xf32>
      %cst_314 = arith.constant 3.200000e+01 : f32
      %870 = vector.broadcast %cst_314 : f32 to vector<32x1xf32>
      %871 = arith.divf %869, %870 : vector<32x1xf32>
      %872 = vector.broadcast %871 : vector<32x1xf32> to vector<32x32xf32>
      %873 = arith.subf %861, %872 : vector<32x32xf32>
      %874 = arith.mulf %873, %873 : vector<32x32xf32>
      %cst_315 = arith.constant dense<0.000000e+00> : vector<32xf32>
      %875 = vector.multi_reduction <add>, %874, %cst_315 [1] : vector<32x32xf32> to vector<32xf32>
      %876 = vector.shape_cast %875 : vector<32xf32> to vector<32x1xf32>
      %cst_316 = arith.constant 3.200000e+01 : f32
      %877 = vector.broadcast %cst_316 : f32 to vector<32x1xf32>
      %878 = arith.divf %876, %877 : vector<32x1xf32>
      %cst_317 = arith.constant 9.99999974E-6 : f32
      %879 = vector.broadcast %cst_317 : f32 to vector<32x1xf32>
      %880 = arith.addf %878, %879 : vector<32x1xf32>
      %881 = math.rsqrt %880 : vector<32x1xf32>
      %882 = vector.broadcast %881 : vector<32x1xf32> to vector<32x32xf32>
      %883 = arith.mulf %873, %882 : vector<32x32xf32>
      %884 = vector.broadcast %866 : vector<1x32xf32> to vector<32x32xf32>
      %885 = arith.mulf %883, %884 : vector<32x32xf32>
      %886 = vector.broadcast %867 : vector<1x32xf32> to vector<32x32xf32>
      %887 = arith.addf %885, %886 : vector<32x32xf32>
      %c0_318 = arith.constant 0 : index
      %c0_319 = arith.constant 0 : index
      %888 = vector.load %arg29[%c0_318, %c0_319] : memref<32x64xf32, #tpu.memory_space<vmem>>, vector<32x64xf32>
      %cst_320 = arith.constant dense<0.000000e+00> : vector<32x64xf32>
      %889 = tpu.matmul %887, %888, %cst_320 {dimension_numbers = #tpu.dot_dimension_numbers<[1], [0], [0], [1], [0, 0, 1, 1], [], []>} : vector<32x32xf32>, vector<32x64xf32>, vector<32x64xf32> -> vector<32x64xf32>
      %c0_321 = arith.constant 0 : index
      %c0_322 = arith.constant 0 : index
      %890 = vector.load %arg30[%c0_321, %c0_322] : memref<1x64xf32, #tpu.memory_space<vmem>>, vector<1x64xf32>
      %891 = vector.broadcast %890 : vector<1x64xf32> to vector<32x64xf32>
      %892 = arith.addf %889, %891 : vector<32x64xf32>
      %c0_323 = arith.constant 0 : index
      %c0_324 = arith.constant 0 : index
      %893 = vector.load %arg31[%c0_323, %c0_324] : memref<32x64xf32, #tpu.memory_space<vmem>>, vector<32x64xf32>
      tpu.vector_store %arg31[%c0_323, %c0_324], %892 {strides = array<i32>} : memref<32x64xf32, #tpu.memory_space<vmem>>, vector<32x64xf32>,
    } else {
    }
    return
  }
  func.func @transform_0(%arg0: i32) -> (i32, i32) {
    %c0_i32 = arith.constant 0 : i32
    %c0_i32_0 = arith.constant 0 : i32
    %c0_i32_1 = arith.constant 0 : i32
    return %c0_i32, %c0_i32_0 : i32, i32
  }
  func.func @transform_1(%arg0: i32) -> (i32, i32, i32) {
    %c0_i32 = arith.constant 0 : i32
    %c0_i32_0 = arith.constant 0 : i32
    %c0_i32_1 = arith.constant 0 : i32
    return %arg0, %c0_i32, %c0_i32_0 : i32, i32, i32
  }
  func.func @transform_2(%arg0: i32) -> (i32, i32, i32) {
    %c0_i32 = arith.constant 0 : i32
    %c0_i32_0 = arith.constant 0 : i32
    %c0_i32_1 = arith.constant 0 : i32
    return %arg0, %c0_i32, %c0_i32_0 : i32, i32, i32
  }
  func.func @transform_3(%arg0: i32) -> (i32, i32, i32) {
    %c0_i32 = arith.constant 0 : i32
    %c0_i32_0 = arith.constant 0 : i32
    %c0_i32_1 = arith.constant 0 : i32
    return %arg0, %c0_i32, %c0_i32_0 : i32, i32, i32
  }
  func.func @transform_4(%arg0: i32) -> (i32, i32, i32) {
    %c0_i32 = arith.constant 0 : i32
    %c0_i32_0 = arith.constant 0 : i32
    %c0_i32_1 = arith.constant 0 : i32
    return %arg0, %c0_i32, %c0_i32_0 : i32, i32, i32
  }
  func.func @transform_5(%arg0: i32) -> (i32, i32, i32) {
    %c0_i32 = arith.constant 0 : i32
    %c0_i32_0 = arith.constant 0 : i32
    %c0_i32_1 = arith.constant 0 : i32
    return %arg0, %c0_i32, %c0_i32_0 : i32, i32, i32
  }
  func.func @transform_6(%arg0: i32) -> (i32, i32, i32) {
    %c0_i32 = arith.constant 0 : i32
    %c0_i32_0 = arith.constant 0 : i32
    %c0_i32_1 = arith.constant 0 : i32
    return %arg0, %c0_i32, %c0_i32_0 : i32, i32, i32
  }
  func.func @transform_7(%arg0: i32) -> (i32, i32, i32) {
    %c0_i32 = arith.constant 0 : i32
    %c0_i32_0 = arith.constant 0 : i32
    %c0_i32_1 = arith.constant 0 : i32
    return %arg0, %c0_i32, %c0_i32_0 : i32, i32, i32
  }
  func.func @transform_8(%arg0: i32) -> (i32, i32, i32) {
    %c0_i32 = arith.constant 0 : i32
    %c0_i32_0 = arith.constant 0 : i32
    %c0_i32_1 = arith.constant 0 : i32
    return %arg0, %c0_i32, %c0_i32_0 : i32, i32, i32
  }
  func.func @transform_9(%arg0: i32) -> (i32, i32, i32) {
    %c0_i32 = arith.constant 0 : i32
    %c0_i32_0 = arith.constant 0 : i32
    %c0_i32_1 = arith.constant 0 : i32
    return %arg0, %c0_i32, %c0_i32_0 : i32, i32, i32
  }
  func.func @transform_10(%arg0: i32) -> (i32, i32, i32) {
    %c0_i32 = arith.constant 0 : i32
    %c0_i32_0 = arith.constant 0 : i32
    %c0_i32_1 = arith.constant 0 : i32
    return %arg0, %c0_i32, %c0_i32_0 : i32, i32, i32
  }
  func.func @transform_11(%arg0: i32) -> (i32, i32, i32) {
    %c0_i32 = arith.constant 0 : i32
    %c0_i32_0 = arith.constant 0 : i32
    %c0_i32_1 = arith.constant 0 : i32
    return %arg0, %c0_i32, %c0_i32_0 : i32, i32, i32
  }
  func.func @transform_12(%arg0: i32) -> (i32, i32, i32) {
    %c0_i32 = arith.constant 0 : i32
    %c0_i32_0 = arith.constant 0 : i32
    %c0_i32_1 = arith.constant 0 : i32
    return %arg0, %c0_i32, %c0_i32_0 : i32, i32, i32
  }
  func.func @transform_13(%arg0: i32) -> (i32, i32, i32) {
    %c0_i32 = arith.constant 0 : i32
    %c0_i32_0 = arith.constant 0 : i32
    %c0_i32_1 = arith.constant 0 : i32
    return %arg0, %c0_i32, %c0_i32_0 : i32, i32, i32
  }
  func.func @transform_14(%arg0: i32) -> (i32, i32, i32) {
    %c0_i32 = arith.constant 0 : i32
    %c0_i32_0 = arith.constant 0 : i32
    %c0_i32_1 = arith.constant 0 : i32
    return %arg0, %c0_i32, %c0_i32_0 : i32, i32, i32
  }
  func.func @transform_15(%arg0: i32) -> (i32, i32, i32) {
    %c0_i32 = arith.constant 0 : i32
    %c0_i32_0 = arith.constant 0 : i32
    %c0_i32_1 = arith.constant 0 : i32
    return %arg0, %c0_i32, %c0_i32_0 : i32, i32, i32
  }
  func.func @transform_16(%arg0: i32) -> (i32, i32, i32) {
    %c0_i32 = arith.constant 0 : i32
    %c0_i32_0 = arith.constant 0 : i32
    %c0_i32_1 = arith.constant 0 : i32
    return %arg0, %c0_i32, %c0_i32_0 : i32, i32, i32
  }
  func.func @transform_17(%arg0: i32) -> (i32, i32, i32) {
    %c0_i32 = arith.constant 0 : i32
    %c0_i32_0 = arith.constant 0 : i32
    %c0_i32_1 = arith.constant 0 : i32
    return %arg0, %c0_i32, %c0_i32_0 : i32, i32, i32
  }
  func.func @transform_18(%arg0: i32) -> (i32, i32, i32) {
    %c0_i32 = arith.constant 0 : i32
    %c0_i32_0 = arith.constant 0 : i32
    %c0_i32_1 = arith.constant 0 : i32
    return %arg0, %c0_i32, %c0_i32_0 : i32, i32, i32
  }
  func.func @transform_19(%arg0: i32) -> (i32, i32, i32) {
    %c0_i32 = arith.constant 0 : i32
    %c0_i32_0 = arith.constant 0 : i32
    %c0_i32_1 = arith.constant 0 : i32
    return %arg0, %c0_i32, %c0_i32_0 : i32, i32, i32
  }
  func.func @transform_20(%arg0: i32) -> (i32, i32, i32) {
    %c0_i32 = arith.constant 0 : i32
    %c0_i32_0 = arith.constant 0 : i32
    %c0_i32_1 = arith.constant 0 : i32
    return %arg0, %c0_i32, %c0_i32_0 : i32, i32, i32
  }
  func.func @transform_21(%arg0: i32) -> (i32, i32, i32) {
    %c0_i32 = arith.constant 0 : i32
    %c0_i32_0 = arith.constant 0 : i32
    %c0_i32_1 = arith.constant 0 : i32
    return %arg0, %c0_i32, %c0_i32_0 : i32, i32, i32
  }
  func.func @transform_22(%arg0: i32) -> (i32, i32, i32) {
    %c0_i32 = arith.constant 0 : i32
    %c0_i32_0 = arith.constant 0 : i32
    %c0_i32_1 = arith.constant 0 : i32
    return %arg0, %c0_i32, %c0_i32_0 : i32, i32, i32
  }
  func.func @transform_23(%arg0: i32) -> (i32, i32, i32) {
    %c0_i32 = arith.constant 0 : i32
    %c0_i32_0 = arith.constant 0 : i32
    %c0_i32_1 = arith.constant 0 : i32
    return %arg0, %c0_i32, %c0_i32_0 : i32, i32, i32
  }
  func.func @transform_24(%arg0: i32) -> (i32, i32, i32) {
    %c0_i32 = arith.constant 0 : i32
    %c0_i32_0 = arith.constant 0 : i32
    %c0_i32_1 = arith.constant 0 : i32
    return %arg0, %c0_i32, %c0_i32_0 : i32, i32, i32
  }
  func.func @transform_25(%arg0: i32) -> (i32, i32, i32) {
    %c0_i32 = arith.constant 0 : i32
    %c0_i32_0 = arith.constant 0 : i32
    %c0_i32_1 = arith.constant 0 : i32
    return %arg0, %c0_i32, %c0_i32_0 : i32, i32, i32
  }
  func.func @transform_26(%arg0: i32) -> (i32, i32) {
    %c0_i32 = arith.constant 0 : i32
    %c0_i32_0 = arith.constant 0 : i32
    %c0_i32_1 = arith.constant 0 : i32
    return %c0_i32, %c0_i32_0 : i32, i32
  }
  func.func @transform_27(%arg0: i32) -> (i32, i32) {
    %c0_i32 = arith.constant 0 : i32
    %c0_i32_0 = arith.constant 0 : i32
    %c0_i32_1 = arith.constant 0 : i32
    return %c0_i32, %c0_i32_0 : i32, i32
  }
  func.func @transform_28(%arg0: i32) -> (i32, i32) {
    %c0_i32 = arith.constant 0 : i32
    %c0_i32_0 = arith.constant 0 : i32
    %c0_i32_1 = arith.constant 0 : i32
    return %c0_i32, %c0_i32_0 : i32, i32
  }
  func.func @transform_29(%arg0: i32) -> (i32, i32) {
    %c0_i32 = arith.constant 0 : i32
    %c0_i32_0 = arith.constant 0 : i32
    %c0_i32_1 = arith.constant 0 : i32
    return %c0_i32, %c0_i32_0 : i32, i32
  }
  func.func @transform_30(%arg0: i32) -> (i32, i32) {
    %c0_i32 = arith.constant 0 : i32
    %c0_i32_0 = arith.constant 0 : i32
    %c0_i32_1 = arith.constant 0 : i32
    return %c0_i32, %c0_i32_0 : i32, i32
  }
}

</mosaic_0001>

<bundles_post_ra>
// kernel: forward.1
= control target key start
LH: loop header
LB: loop body
LE: loop exit
PB: predicated region body
PF: predicated region fallthrough
CT: control target
= control target key end

     0   :  { %s10336_s6 = smov 1   ;;  %s10337_s10 = smov 2   ;;  %s12319_s0 = inlined_call_operand.smem [shape: u32[31], index: -1, kind: input, shape index: {}] }
   0x1   :  { %s10380_s5 = sld [smem:[%s12319_s0]]   ;;  %s10338_s14 = smov 3  }
   0x2   :  { %s10385_s9 = sld [smem:[%s12319_s0 + %s10336_s6]]   ;;  %s10339_s18 = smov 4  }
   0x3   :  { %s10390_s13 = sld [smem:[%s12319_s0 + %s10337_s10]]   ;;  %s10340_s22 = smov 5  }
   0x4   :  { %s10395_s17 = sld [smem:[%s12319_s0 + %s10338_s14]]   ;;  %s10341_s26 = smov 6  }
   0x5   :  { %s10400_s21 = sld [smem:[%s12319_s0 + %s10339_s18]]   ;;  %s10342_s30 = smov 7  }
   0x6   :  { %s10405_s25 = sld [smem:[%s12319_s0 + %s10340_s22]]   ;;  %s10343_s4 = smov 8  }
   0x7   :  { %12330 = sst [smem:[#allocation6_spill]] %s10380_s5  ;;  %s10344_s10 = smov 9  }
   0x8   :  { %12331 = sst [smem:[#allocation7_spill]] %s10385_s9  ;;  %s10345_s15 = smov 10  }
   0x9   :  { %12332 = sst [smem:[#allocation8_spill]] %s10390_s13  ;;  %s10346_s20 = smov 11  }
   0xa   :  { %12333 = sst [smem:[#allocation9_spill]] %s10395_s17  ;;  %s10348_s1 = smov 13  }
   0xb   :  { %12334 = sst [smem:[#allocation10_spill]] %s10400_s21  ;;  %s10349_s7 = smov 14  }
   0xc   :  { %12335 = sst [smem:[#allocation11_spill]] %s10405_s25  ;;  %s10351_s22 = smov 16  }
   0xd   :  { %s10410_s29 = sld [smem:[%s12319_s0 + %s10341_s26]]   ;;  %s10347_s26 = smov 12  }
   0xe   :  { %s10415_s3 = sld [smem:[%s12319_s0 + %s10342_s30]]   ;;  %s10352_s28 = smov 17  }
   0xf   :  { %s10420_s8 = sld [smem:[%s12319_s0 + %s10343_s4]]  }
  0x10   :  { %s10425_s14 = sld [smem:[%s12319_s0 + %s10344_s10]]  }
  0x11   :  { %s10430_s19 = sld [smem:[%s12319_s0 + %s10345_s15]]   ;;  %s10350_s15 = smov 15  }
  0x12   :  { %s10435_s24 = sld [smem:[%s12319_s0 + %s10346_s20]]  }
  0x13   :  { %12336 = sst [smem:[#allocation12_spill]] %s10410_s29 }
  0x14   :  { %12337 = sst [smem:[#allocation13_spill]] %s10415_s3 }
  0x15   :  { %12338 = sst [smem:[#allocation14_spill]] %s10420_s8 }
  0x16   :  { %12339 = sst [smem:[#allocation15_spill]] %s10425_s14 }
  0x17   :  { %12340 = sst [smem:[#allocation16_spill]] %s10430_s19 }
  0x18   :  { %12341 = sst [smem:[#allocation17_spill]] %s10435_s24 }
  0x19   :  { %s10440_s30 = sld [smem:[%s12319_s0 + %s10347_s26]]  }
  0x1a   :  { %s10445_s6 = sld [smem:[%s12319_s0 + %s10348_s1]]  }
  0x1b   :  { %s10450_s12 = sld [smem:[%s12319_s0 + %s10349_s7]]   ;;  %s10353_s7 = smov 18  }
  0x1c   :  { %s10455_s20 = sld [smem:[%s12319_s0 + %s10350_s15]]   ;;  %s10354_s15 = smov 19  }
  0x1d   :  { %s10460_s27 = sld [smem:[%s12319_s0 + %s10351_s22]]   ;;  %s10355_s22 = smov 20  }
  0x1e   :  { %s10465_s4 = sld [smem:[%s12319_s0 + %s10352_s28]]   ;;  %s10356_s28 = smov 21  }
  0x1f   :  { %s10470_s5 = sld [smem:[%s12319_s0 + %s10353_s7]]   ;;  %s10357_s7 = smov 22  }
  0x22   :  { %12342 = sst [smem:[#allocation18_spill]] %s10455_s20 }
  0x23   :  { %12343 = sst [smem:[#allocation19_spill]] %s10460_s27 }
  0x24   :  { %12344 = sst [smem:[#allocation20_spill]] %s10465_s4 }
  0x25   :  { %12345 = sst [smem:[#allocation21_spill]] %s10470_s5 }
  0x26   :  { %s10475_s20 = sld [smem:[%s12319_s0 + %s10354_s15]]   ;;  %s10358_s15 = smov 23  }
  0x27   :  { %s10480_s27 = sld [smem:[%s12319_s0 + %s10355_s22]]   ;;  %s10359_s22 = smov 24  }
  0x28   :  { %s10485_s4 = sld [smem:[%s12319_s0 + %s10356_s28]]   ;;  %s10360_s28 = smov 25  }
  0x29   :  { %s10490_s5 = sld [smem:[%s12319_s0 + %s10357_s7]]   ;;  %s10361_s7 = smov 26  }
  0x2c   :  { %12346 = sst [smem:[#allocation22_spill]] %s10475_s20 }
  0x2d   :  { %12347 = sst [smem:[#allocation23_spill]] %s10480_s27 }
  0x2e   :  { %12348 = sst [smem:[#allocation24_spill]] %s10485_s4 }
  0x2f   :  { %12349 = sst [smem:[#allocation25_spill]] %s10490_s5 }
  0x30   :  { %s10495_s20 = sld [smem:[%s12319_s0 + %s10358_s15]]   ;;  %s10362_s15 = smov 27  }
  0x31   :  { %s10500_s27 = sld [smem:[%s12319_s0 + %s10359_s22]]   ;;  %s10363_s22 = smov 28  }
  0x32   :  { %s10505_s4 = sld [smem:[%s12319_s0 + %s10360_s28]]   ;;  %s10364_s28 = smov 29  }
  0x33   :  { %s10510_s5 = sld [smem:[%s12319_s0 + %s10361_s7]]   ;;  %s10365_s7 = smov 30  }
  0x36   :  { %12350 = sst [smem:[#allocation26_spill]] %s10495_s20 }
  0x37   :  { %12351 = sst [smem:[#allocation27_spill]] %s10500_s27 }
  0x38   :  { %12352 = sst [smem:[#allocation28_spill]] %s10505_s4 }
  0x39   :  { %12353 = sst [smem:[#allocation29_spill]] %s10510_s5 }
  0x3a   :  { %s10515_s20 = sld [smem:[%s12319_s0 + %s10362_s15]]  }
  0x3b   :  { %s10520_s27 = sld [smem:[%s12319_s0 + %s10363_s22]]  }
  0x3c   :  { %s10525_s4 = sld [smem:[%s12319_s0 + %s10364_s28]]  }
  0x3d   :  { %s10530_s5 = sld [smem:[%s12319_s0 + %s10365_s7]]  }
  0x40   :  { %12354 = sst [smem:[#allocation30_spill]] %s10515_s20 }
  0x41   :  { %12355 = sst [smem:[#allocation31_spill]] %s10520_s27 }
  0x42   :  { %12356 = sst [smem:[#allocation32_spill]] %s10525_s4 }
  0x43   :  { %12357 = sst [smem:[#allocation33_spill]] %s10530_s5 }
  0x44   :  { %66 = vsyncpa [#allocation4], 0  ;;  %s10532_s15 = smov 0  }
  0x45 LB: > { %12358 = sst [smem:[#allocation34_spill]] %s10334_s15  ;;  %s10538_s16 = sadd.s32 4294967295, %s10334_s15   ;;  %s10334_s15 = sphi %s10532_s15, %s72_s15  }
  0x46   : > { %12359 = sst [smem:[#allocation35_spill]] %s10538_s16  ;;  %p8707_p0 = scmp.ge.s32.totalorder %s10334_s15, 1 }
  0x47   : > { %p1047_p1 = scmp.lt.s32.totalorder %s10334_s15, 3 }
  0x49   : > { %p1048_p2 = pnand %p8707_p0, %p1047_p1 }
  0x4b   : > { %1051 = sbr.rel (%p1048_p2) target bundleno = 14304 (0x37e0), region = 140 }
  0x50   : > { %s12363_s17 = sld [smem:[#allocation9_spill]]  ;;  %p1208_p3 = scmp.lt.s32.totalorder %s10538_s16, 1 }
  0x51   : > { %s12364_s21 = sld [smem:[#allocation10_spill]] }
  0x52   : > { %s12365_s25 = sld [smem:[#allocation11_spill]] }
  0x53   : > { %s12366_s29 = sld [smem:[#allocation12_spill]] }
  0x54   : > { %s12369_s19 = sld [smem:[#allocation16_spill]] }
  0x55   : > { %s10544_s0 = scalar_select %p1208_p3, %s10538_s16, 1 }
  0x56   : > { %s12371_s22 = sld [smem:[#allocation18_spill]] }
  0x57   : > { %s12372_s26 = sld [smem:[#allocation19_spill]]  ;;  %s8982_s28 = sshll.u32 %s10544_s0, 5 }
  0x58   : > { %s12373_s1 = sld [smem:[#allocation20_spill]]  ;;  %s10554_s10 = scalar_lea.vmem %s12363_s17, %s8982_s28 }
  0x59   : > { %s12374_s7 = sld [smem:[#allocation21_spill]]  ;;  %s10557_s15 = scalar_lea.vmem %s12364_s21, %s8982_s28 }
  0x5a   : > { %12375 = sst [smem:[#allocation36_spill]] %s10554_s10  ;;  %s10560_s4 = scalar_lea.vmem %s12365_s25, %s8982_s28 }
  0x5b   : > { %s12376_s11 = sld [smem:[#allocation22_spill]]  ;;  %s10563_s23 = scalar_lea.vmem %s12366_s29, %s8982_s28 }
  0x5c   : > { %12377 = sst [smem:[#allocation37_spill]] %s10557_s15  ;;  %s10570_s17 = scalar_lea.vmem %s12369_s19, %s8982_s28 }
  0x5d   : > { %s12378_s5 = sld [smem:[#allocation23_spill]]  ;;  %s8987_s15 = sshll.u32 %s10544_s0, 6 }
  0x5e   : > { %12379 = sst [smem:[#allocation38_spill]] %s10560_s4  ;;  %s10578_s25 = scalar_lea.vmem %s10440_s30, %s8987_s15 }
  0x5f   : > { %s12380_s18 = sld [smem:[#allocation24_spill]]  ;;  %s1261_s4 = scalar_lea.vmem %s10450_s12, %s10544_s0 }
  0x60   : > { %12381 = sst [smem:[#allocation39_spill]] %s10563_s23  ;;  %s1264_s16 = scalar_lea.vmem %s12371_s22, %s10544_s0 }
  0x61   : > { %s12382_s20 = sld [smem:[#allocation25_spill]]  ;;  %s10585_s29 = scalar_lea.vmem %s12372_s26, %s8982_s28 }
  0x62   : > { %s12383_s2 = sld [smem:[#allocation26_spill]]  ;;  %s10589_s23 = scalar_lea.vmem %s12373_s1, %s10544_s0 }
  0x63   : > { %12384 = sst [smem:[#allocation40_spill]] %s10570_s17  ;;  %s10593_s27 = scalar_lea.vmem %s12374_s7, %s10544_s0 }
  0x64   : > { %s12385_s13 = sld [smem:[#allocation27_spill]]  ;;  %s10597_s3 = scalar_lea.vmem %s12376_s11, %s10544_s0 }
  0x65   : > { %s12386_s21 = sld [smem:[#allocation28_spill]]  ;;  %s1281_s19 = scalar_lea.vmem %s12378_s5, %s10544_s0 }
  0x66   : > { %s1284_s14 = scalar_lea.vmem %s12380_s18, %s10544_s0  ;;  %s8990_s24 = sshll.u32 %s10544_s0, 7 }
  0x67   : > { %s10604_s8 = scalar_lea.vmem %s12382_s20, %s8982_s28  ;;  %s12387_s10 = sld [smem:[#allocation35_spill]] }
  0x68   : > { %s1292_s9 = scalar_lea.vmem %s12383_s2, %s10544_s0 }
  0x6a   : > { %s10610_s17 = scalar_lea.vmem %s12385_s13, %s8990_s24 }
  0x6b   : > { %s1300_s15 = scalar_lea.vmem %s12386_s21, %s10544_s0 }
  0x6d   : > { %p8726_p4 = scmp.ne.s32.totalorder %s12387_s10, 0 }
  0x6e   : > { %s12388_s22 = sld [smem:[#allocation6_spill]] (!%p8726_p4) }
  0x6f   : > { %1304 = sbr.rel (%p8726_p4) target bundleno = 119 (0x77), region = 144 }
  0x74   : > { %v1305_v0 = vld [vmem:[%s12388_s22] sm:$0xff]  ;;  %vm1309_vm0 = vcmask 261120   ;;  %v1306_v1 = vld [vmem:[%s12388_s22 + $0x8] sm:$0xff]  ;;  %v1307_v2 = vld [vmem:[%s12388_s22 + $0x10] sm:$0xff] }
  0x75   : > { %1310 = vst.msk [vmem:[#allocation2] sm:$0xff] %vm1309_vm0, %v1305_v0  ;;  %1311 = vst.msk [vmem:[#allocation2 + $0x8] sm:$0xff] %vm1309_vm0, %v1306_v1  ;;  %v1308_v3 = vld [vmem:[%s12388_s22 + $0x18] sm:$0xff] }
  0x76   : > { %1312 = vst.msk [vmem:[#allocation2 + $0x10] sm:$0xff] %vm1309_vm0, %v1307_v2  ;;  %1313 = vst.msk [vmem:[#allocation2 + $0x18] sm:$0xff] %vm1309_vm0, %v1308_v3 }
  0x77 PF: > { %vm1320_vm1 = vcmask 261120   ;;  %s12389_s5 = sld [smem:[#allocation36_spill]]  ;;  %vm1811_vm12 = vcmask 130048  }
  0x78   : > { %s12390_s13 = sld [smem:[#allocation37_spill]] }
  0x79   : > { %s12391_s21 = sld [smem:[#allocation7_spill]] }
  0x7a   : > { %s12392_s24 = sld [smem:[#allocation8_spill]] }
  0x7b   : > { %s12394_s18 = sld [smem:[#allocation38_spill]] }
  0x7c   : > { %v1314_v4 = vld [vmem:[#allocation2] sm:$0xff]  ;;  %v1315_v5 = vld [vmem:[#allocation2 + $0x8] sm:$0xff]  ;;  %s12396_s28 = sld [smem:[#allocation39_spill]] }
  0x7d   : > { %v1321_v6 = vsel %vm1320_vm1, %v1314_v4, 0.0  ;;  %v1324_v7 = vsel %vm1320_vm1, %v1315_v5, 0.0  ;;  %v1316_v8 = vld [vmem:[#allocation2 + $0x10] sm:$0xff]  ;;  %v1317_v21 = vld [vmem:[#allocation2 + $0x18] sm:$0xff]  ;;  %v1395_v31 = vld [vmem:[%s12389_s5 + $0x8] sm:$0xff]  ;;  %s12397_s1 = sld [smem:[#allocation13_spill]] }
  0x7e   : > { %1322 = vadd.xlane.f32.xlu0 %v1321_v6  ;;  %v1327_v9 = vsel %vm1320_vm1, %v1316_v8, 0.0  ;;  %v1330_v24 = vsel %vm1320_vm1, %v1317_v21, 0.0  ;;  %v1397_v27 = vld [vmem:[%s12389_s5 + $0x18] sm:$0xff]  ;;  %v1396_v29 = vld [vmem:[%s12389_s5 + $0x10] sm:$0xff]  ;;  %v1496_v32 = vld [vmem:[%s12390_s13 + $0x8] sm:$0xff]  ;;  %s12399_s7 = sld [smem:[#allocation40_spill]] }
  0x7f   : > { %v1498_v28 = vld [vmem:[%s12390_s13 + $0x18] sm:$0xff]  ;;  %9321 = vmatprep.subr.mxu0 %v1397_v27  ;;  %v1497_v30 = vld [vmem:[%s12390_s13 + $0x10] sm:$0xff]  ;;  %v1394_v33 = vld [vmem:[%s12389_s5] sm:$0xff]  ;;  %s12393_s20 = scalar_lea.vmem %s12391_s21, %s10544_s0  ;;  %s12400_s10 = sld [smem:[#allocation14_spill]] }
  0x80   : > { %9335 = vmatprep.subr.mxu1 %v1498_v28  ;;  %9322 = vmatpush3.msra.mxu0 %v1397_v27  ;;  %v1495_v34 = vld [vmem:[%s12390_s13] sm:$0xff]  ;;  %s12395_s26 = scalar_lea.vmem %s12392_s24, %s10544_s0  ;;  %s12401_s11 = sld [smem:[#allocation15_spill]] }
  0x81   : > { %9336 = vmatpush3.msra.mxu1 %v1498_v28  ;;  %9323 = vmatprep.subr.mxu0 %v1396_v29  ;;  %v8727_v50 = vld [vmem:[%s12393_s20] ss:$0 sm:$0xff]  ;;  %v1587_v62 = vld [vmem:[%s12394_s18 + $0x18] sm:$0xff]  ;;  %v1586_v0 = vld [vmem:[%s12394_s18 + $0x10] sm:$0xff]  ;;  %s12404_s21 = sld [smem:[#allocation17_spill]] }
  0x82   : > { %1325 = vadd.xlane.f32.xlu0 %v1324_v7  ;;  %9337 = vmatprep.subr.mxu1 %v1497_v30  ;;  %v8728_v52 = vld [vmem:[%s12395_s26] ss:$0 sm:$0xff]  ;;  %v1585_v1 = vld [vmem:[%s12394_s18 + $0x8] sm:$0xff] }
  0x83   : > { %9324 = vmatpush3.msra.mxu0 %v1396_v29  ;;  %9338 = vmatpush3.msra.mxu1 %v1497_v30  ;;  %v1584_v2 = vld [vmem:[%s12394_s18] sm:$0xff]  ;;  %s12398_s2 = scalar_lea.vmem %s12397_s1, %s10544_s0 }
  0x84   : > { %9325 = vmatprep.subr.mxu0 %v1395_v31  ;;  %9339 = vmatprep.subr.mxu1 %v1496_v32 }
  0x85   : > { %9326 = vmatpush3.msra.mxu0 %v1395_v31  ;;  %9340 = vmatpush3.msra.mxu1 %v1496_v32  ;;  %s12402_s5 = scalar_lea.vmem %s12400_s10, %s10544_s0 }
  0x86   : > { %1328 = vadd.xlane.f32.xlu0 %v1327_v9  ;;  %9327 = vmatprep.subr.mxu0 %v1394_v33  ;;  %s12403_s13 = scalar_lea.vmem %s12401_s11, %s10544_s0 }
  0x87   : > { %9341 = vmatprep.subr.mxu1 %v1495_v34  ;;  %9328 = vmatpush3.msra.mxu0 %v1394_v33  ;;  %s12405_s24 = scalar_lea.vmem %s12404_s21, %s10544_s0 }
  0x88   : > { %9342 = vmatpush3.msra.mxu1 %v1495_v34  ;;  %9349 = vmatprep.subr.mxu0 %v1587_v62 }
 0x107   : > { %v1323_v10 = vpop.xlane.xlu0 %1322 }
 0x108   : > { %v1334_v11 = vmul.f32 0.03125, %v1323_v10  ;;  %v1678_v10 = vlaneseq }
 0x10a   : > { %v10622_v12 = vsub.f32 %v1314_v4, %v1334_v11  ;;  %v10668_v11 = vand.u32 127, %v1678_v10 }
 0x10b   : > { %v1326_v13 = vpop.xlane.xlu0 %1325 }
 0x10c   : > { %v1335_v14 = vmul.f32 0.03125, %v1326_v13  ;;  %v1342_v15 = vmul.f32 %v10622_v12, %v10622_v12  ;;  %vm1685_vm2 = vcmp.ge.s32.totalorder %v10668_v11, 4  ;;  %vm1686_vm3 = vcmp.lt.s32.totalorder %v10668_v11, 8 }
 0x10d   : > { %vm1681_vm4 = vcmp.lt.s32.totalorder %v10668_v11, 4  ;;  %vm1687_vm5 = vmand %vm1685_vm2, %vm1686_vm3  ;;  %vm1690_vm6 = vcmp.ge.s32.totalorder %v10668_v11, 8  ;;  %vm1691_vm7 = vcmp.lt.s32.totalorder %v10668_v11, 12  ;;  %vm1695_vm9 = vcmp.ge.s32.totalorder %v10668_v11, 12 }
 0x10e   : > { %v10626_v16 = vsub.f32 %v1315_v5, %v1335_v14  ;;  %v1346_v17 = vsel %vm1320_vm1, %v1342_v15, 0.0  ;;  %vm1692_vm8 = vmand %vm1690_vm6, %vm1691_vm7  ;;  %vm1696_vm10 = vcmp.lt.s32.totalorder %v10668_v11, 16  ;;  %vm1700_vm13 = vcmp.ge.s32.totalorder %v10668_v11, 16 }
 0x10f   : > { %1347 = vadd.xlane.f32.xlu1 %v1346_v17  ;;  %v1329_v18 = vpop.xlane.xlu0 %1328  ;;  %vm1697_vm11 = vmand %vm1695_vm9, %vm1696_vm10  ;;  %vm1701_vm14 = vcmp.lt.s32.totalorder %v10668_v11, 20  ;;  %vm1705_vm0 = vcmp.ge.s32.totalorder %v10668_v11, 20  ;;  %vm1706_vm2 = vcmp.lt.s32.totalorder %v10668_v11, 24  ;;  %vm1715_vm7 = vcmp.ge.s32.totalorder %v10668_v11, 28 }
 0x110   : > { %v1343_v19 = vmul.f32 %v10626_v16, %v10626_v16  ;;  %v1336_v20 = vmul.f32 0.03125, %v1329_v18  ;;  %vm1702_vm15 = vmand %vm1700_vm13, %vm1701_vm14  ;;  %vm5282_vm13 = vcmask 523264  }
 0x111   : > { %vm1707_vm3 = vmand %vm1705_vm0, %vm1706_vm2  ;;  %vm10368_vm0 = vmmov 0   ;;  %vm5564_vm2 = vcmask 516096  }
 0x112   : > { %v1349_v22 = vsel %vm1320_vm1, %v1343_v19, 0.0  ;;  %v1340_v23 = vsub.f32 %v1316_v8, %v1336_v20 }
 0x113   : > { %1350 = vadd.xlane.f32.xlu1 %v1349_v22 }
 0x114   : > { %v1344_v25 = vmul.f32 %v1340_v23, %v1340_v23 }
 0x116   : > { %v1352_v26 = vsel %vm1320_vm1, %v1344_v25, 0.0 }
 0x117   : > { %1331 = vadd.xlane.f32.xlu1 %v1330_v24  ;;  %1353 = vadd.xlane.f32.xlu0 %v1352_v26 }
 0x198   : > { %v1348_v35 = vpop.xlane.xlu1 %1347 }
 0x199   : > { %v1358_v36 = vmul.f32 0.03125, %v1348_v35 }
 0x19b   : > { %v1362_v37 = vadd.f32 1e-05, %v1358_v36 }
 0x19c   : > { %v1351_v38 = vpop.xlane.xlu1 %1350 }
 0x19d   : > { %9969 = vrsqrt.f32 %v1362_v37  ;;  %v1359_v39 = vmul.f32 0.03125, %v1351_v38 }
 0x19f   : > { %v1363_v40 = vadd.f32 1e-05, %v1359_v39 }
 0x1a0   : > { %v1332_v41 = vpop.xlane.xlu1 %1331  ;;  %v1354_v42 = vpop.xlane.xlu0 %1353 }
 0x1a1   : > { %9971 = vrsqrt.f32 %v1363_v40  ;;  %v1337_v43 = vmul.f32 0.03125, %v1332_v41  ;;  %v1360_v44 = vmul.f32 0.03125, %v1354_v42 }
 0x1a3   : > { %v1341_v45 = vsub.f32 %v1317_v21, %v1337_v43  ;;  %v1364_v46 = vadd.f32 1e-05, %v1360_v44 }
 0x1a5   : > { %v1345_v47 = vmul.f32 %v1341_v45, %v1341_v45  ;;  %9973 = vrsqrt.f32 %v1364_v46 }
 0x1a7   : > { %v1355_v48 = vsel %vm1320_vm1, %v1345_v47, 0.0 }
 0x1a8   : > { %1356 = vadd.xlane.f32.xlu1 %v1355_v48 }
 0x1aa   : > { %v9970_v49 = vpop.eup %9969 }
 0x1ab   : > { %v1370_v51 = vmul.f32 %v9970_v49, %v10622_v12 }
 0x1ad   : > { %v1380_v53 = vmul.f32 %v8727_v50, %v1370_v51 }
 0x1ae   : > { %v9972_v54 = vpop.eup %9971 }
 0x1af   : > { %v1390_v55 = vadd.f32 %v8728_v52, %v1380_v53  ;;  %v1371_v56 = vmul.f32 %v9972_v54, %v10626_v16  ;;  %v10366_v16 = vmov 0.0  }
 0x1b0   : > { %v10692_v17 = vsel %vm1681_vm4, 1.0, %v10366_v16  ;;  %v10695_v18 = vsel %vm1687_vm5, 1.0, %v10366_v16  ;;  %v10743_v29 = vsel %vm1697_vm11, 1.0, %v10366_v16  ;;  %vm1710_vm4 = vcmp.ge.s32.totalorder %v10668_v11, 24 }
 0x1b1   : > { %9329 = vmatprep.mubr.msk.f32.mxu0 %vm1320_vm1, %v1390_v55  ;;  %9343 = vmatprep.mubr.msk.f32.mxu1 %vm1320_vm1, %v1390_v55  ;;  %v1381_v57 = vmul.f32 %v8727_v50, %v1371_v56  ;;  %vm1711_vm5 = vcmp.lt.s32.totalorder %v10668_v11, 28 }
 0x1b2   : > { %v9974_v58 = vpop.eup %9973  ;;  %vm1712_vm6 = vmand %vm1710_vm4, %vm1711_vm5 }
 0x1b3   : > { %v1391_v59 = vadd.f32 %v8728_v52, %v1381_v57  ;;  %v1372_v60 = vmul.f32 %v9974_v58, %v1340_v23  ;;  %v10718_v23 = vsel %vm1692_vm8, 1.0, %v10366_v16  ;;  %vm1716_vm8 = vcmp.lt.s32.totalorder %v10668_v11, 32 }
 0x1b4   : > { %vm1717_vm9 = vmand %vm1715_vm7, %vm1716_vm8 }
 0x1b5   : > { %9330 = vmatmul.mubr.msk.f32.vlgmr.msra.gmra.mxu0 %vm1320_vm1, %v1391_v59  ;;  %9344 = vmatmul.mubr.msk.f32.vlgmr.msra.gmra.mxu1 %vm1320_vm1, %v1391_v59  ;;  %v1382_v61 = vmul.f32 %v8727_v50, %v1372_v60 }
 0x1b6   : > { %9350 = vmatpush3.msra.mxu0 %v1587_v62 }
 0x1b7   : > { %v1392_v63 = vadd.f32 %v8728_v52, %v1382_v61  ;;  %9351 = vmatprep.subr.mxu0 %v1586_v0 }
 0x1b8   : > { %9352 = vmatpush3.msra.mxu0 %v1586_v0 }
 0x1b9   : > { %9332 = vmatprep.mubr.msk.f32.mxu0 %vm1320_vm1, %v1392_v63  ;;  %9346 = vmatprep.mubr.msk.f32.mxu1 %vm1320_vm1, %v1392_v63 }
 0x1ba   : > { %9353 = vmatprep.subr.mxu0 %v1585_v1 }
 0x1bb   : > { %9354 = vmatpush3.msra.mxu0 %v1585_v1 }
 0x1bc   : > { %9355 = vmatprep.subr.mxu0 %v1584_v2 }
 0x1bd   : > { %9356 = vmatpush3.msra.mxu0 %v1584_v2 }
 0x231   : > { %v1357_v3 = vpop.xlane.xlu1 %1356 }
 0x232   : > { %v1361_v4 = vmul.f32 0.03125, %v1357_v3 }
 0x234   : > { %v1365_v5 = vadd.f32 1e-05, %v1361_v4 }
 0x236   : > { %9975 = vrsqrt.f32 %v1365_v5 }
 0x243   : > { %v9976_v6 = vpop.eup %9975 }
 0x244   : > { %v1373_v7 = vmul.f32 %v9976_v6, %v1341_v45 }
 0x246   : > { %v1383_v8 = vmul.f32 %v8727_v50, %v1373_v7 }
 0x248   : > { %v1393_v9 = vadd.f32 %v8728_v52, %v1383_v8 }
 0x24a   : > { %9333 = vmatmul.mubr.msk.f32.gmra.mxu0 %vm1320_vm1, %v1393_v9  ;;  %9347 = vmatmul.mubr.msk.f32.gmra.mxu1 %vm1320_vm1, %v1393_v9 }
 0x24b   : > { %9357 = vmatprep.mubr.msk.f32.mxu0 %vm1320_vm1, %v1390_v55 }
 0x24e   : > { %9358 = vmatmul.mubr.msk.f32.vlgmr.msra.gmra.mxu0 %vm1320_vm1, %v1391_v59 }
 0x24f   : > { %9360 = vmatprep.mubr.msk.f32.mxu0 %vm1320_vm1, %v1392_v63 }
 0x252   : > { %9361 = vmatmul.mubr.msk.f32.gmra.mxu0 %vm1320_vm1, %v1393_v9 }
 0x275   : > { %v10673_v12 = vpop.f32.mrf.mxu0  ;;  %v10675_v13 = vpop.f32.mrf.mxu1 }
 0x276   : > { %9363 = vmatprep.subr.msk.mxu1 %vm1320_vm1, %v10675_v13  ;;  %9370 = vmatprep.subr.msk.mxu0 %vm1320_vm1, %v10675_v13  ;;  %v1721_v21 = vmul.f32 %v10673_v12, %v10692_v17  ;;  %v1837_v22 = vmul.f32 %v10673_v12, %v10695_v18  ;;  %v2108_v25 = vmul.f32 %v10673_v12, %v10718_v23 }
 0x277   : > { %v10683_v14 = vpop.f32.mrf.mxu0  ;;  %v10685_v15 = vpop.f32.mrf.mxu1  ;;  %9364 = vmatpush3.xpose.msk.msra.mxu1 %vm1320_vm1, %v10675_v13  ;;  %9371 = vmatpush3.xpose.msk.msra.mxu0 %vm1320_vm1, %v10675_v13 }
 0x278   : > { %9365 = vmatprep.subr.msk.mxu1 %vm1320_vm1, %v10685_v15  ;;  %9372 = vmatprep.subr.msk.mxu0 %vm1320_vm1, %v10685_v15  ;;  %v1720_v19 = vmul.f32 %v10692_v17, %v10683_v14  ;;  %v1836_v20 = vmul.f32 %v10695_v18, %v10683_v14  ;;  %v2107_v24 = vmul.f32 %v10718_v23, %v10683_v14 }
 0x27a   : > { %9367 = vmatprep.mubr.msk.f32.mxu1 %vm1320_vm1, %v1720_v19  ;;  %9374 = vmatprep.mubr.msk.f32.mxu0 %vm1320_vm1, %v1836_v20 }
 0x27b   : > { %9366 = vmatpush3.xpose.msk.msra.mxu1 %vm1320_vm1, %v10685_v15  ;;  %9373 = vmatpush3.xpose.msk.msra.mxu0 %vm1320_vm1, %v10685_v15 }
 0x27c   : > { %9391 = vmatprep.subr.msk.mxu0 %vm1320_vm1, %v10675_v13 }
 0x27e   : > { %9368 = vmatmul.mubr.msk.f32.vlgmr.msra.gmra.mxu1 %vm1320_vm1, %v1721_v21  ;;  %9375 = vmatmul.mubr.msk.f32.vlgmr.msra.gmra.mxu0 %vm1320_vm1, %v1837_v22 }
 0x27f   : > { %9392 = vmatpush3.xpose.msk.msra.mxu0 %vm1320_vm1, %v10675_v13  ;;  %9395 = vmatprep.mubr.msk.f32.mxu0 %vm1320_vm1, %v2107_v24 }
 0x280   : > { %9393 = vmatprep.subr.msk.mxu0 %vm1320_vm1, %v10685_v15 }
 0x283   : > { %9394 = vmatpush3.xpose.msk.msra.mxu0 %vm1320_vm1, %v10685_v15 }
 0x286   : > { %9396 = vmatmul.mubr.msk.f32.vlgmr.msra.gmra.mxu0 %vm1320_vm1, %v2108_v25 }
 0x30a   : > { %v10736_v26 = vpop.f32.mrf.mxu0  ;;  %v10762_v36 = vpop.f32.mrf.mxu1 }
 0x30c   : > { %v10738_v27 = vpop.f32.mrf.mxu0  ;;  %v10766_v38 = vpop.f32.mrf.mxu1 }
 0x30e   : > { %v10740_v28 = vpop.f32.mrf.mxu0 }
 0x30f   : > { %v1944_v30 = vmul.f32 %v10740_v28, %v10695_v18  ;;  %v2407_v31 = vmul.f32 %v10740_v28, %v10743_v29  ;;  %v10757_v35 = vmul.f32 %v10740_v28, %v10692_v17 }
 0x310   : > { %v10749_v32 = vpop.f32.mrf.mxu0 }
 0x311   : > { %9377 = vmatprep.subr.mxu1 %v1944_v30  ;;  %9412 = vmatprep.subr.mxu0 %v2407_v31  ;;  %v1943_v33 = vmul.f32 %v10695_v18, %v10749_v32  ;;  %v2406_v34 = vmul.f32 %v10743_v29, %v10749_v32 }
 0x312   : > { %9378 = vmatpush3.msra.mxu1 %v1944_v30  ;;  %9413 = vmatpush3.msra.mxu0 %v2407_v31  ;;  %v10764_v37 = vpop.f32.mrf.mxu0 }
 0x313   : > { %9379 = vmatprep.subr.mxu1 %v1943_v33  ;;  %9414 = vmatprep.subr.mxu0 %v2406_v34 }
 0x314   : > { %9380 = vmatpush3.msra.mxu1 %v1943_v33  ;;  %9415 = vmatpush3.msra.mxu0 %v2406_v34  ;;  %v10768_v39 = vpop.f32.mrf.mxu0 }
 0x315   : > { %9384 = vmatprep.subr.mxu1 %v10757_v35  ;;  %9419 = vmatprep.subr.msk.mxu0 %vm1320_vm1, %v10675_v13 }
 0x33e   : > { %v9369_v40 = vpop.f32.mrf.mxu1  ;;  %v9376_v41 = vpop.f32.mrf.mxu0 }
 0x33f   : > { %v1920_v42 = vmul.f32 0.5, %v9376_v41  ;;  %v1810_v45 = vmul.f32 0.5, %v9369_v40 }
 0x340   : > { %v1800_v43 = vpop.f32.mrf.mxu1  ;;  %v1910_v44 = vpop.f32.mrf.mxu0 }
 0x341   : > { %v1919_v46 = vmul.f32 0.5, %v1910_v44  ;;  %v1924_v47 = vsel %vm1811_vm12, %v1920_v42, -inf  ;;  %v1809_v48 = vmul.f32 0.5, %v1800_v43  ;;  %v1815_v50 = vsel %vm1811_vm12, %v1810_v45, -inf }
 0x342   : > { %1925 = vmax.xlane.f32.xlu1 %v1924_v47 }
 0x343   : > { %v1921_v49 = vsel %vm1811_vm12, %v1919_v46, -inf  ;;  %v1812_v53 = vsel %vm1811_vm12, %v1809_v48, -inf }
 0x344   : > { %1922 = vmax.xlane.f32.xlu0 %v1921_v49 }
 0x346   : > { %1816 = vmax.xlane.f32.xlu1 %v1815_v50  ;;  %v9397_v51 = vpop.f32.mrf.mxu0 }
 0x347   : > { %v2191_v52 = vmul.f32 0.5, %v9397_v51 }
 0x348   : > { %v2181_v54 = vpop.f32.mrf.mxu0  ;;  %1813 = vmax.xlane.f32.xlu0 %v1812_v53 }
 0x349   : > { %v2190_v55 = vmul.f32 0.5, %v2181_v54  ;;  %v2195_v56 = vsel %vm1811_vm12, %v2191_v52, -inf }
 0x34a   : > { %2196 = vmax.xlane.f32.xlu1 %v2195_v56  ;;  %v1834_v56 = vmul.f32 %v10692_v17, %v10749_v32 }
 0x34b   : > { %v2192_v57 = vsel %vm1811_vm12, %v2190_v55, -inf }
 0x34c   : > { %2193 = vmax.xlane.f32.xlu0 %v2192_v57 }
 0x3cb   : > { %v1926_v58 = vpop.xlane.xlu1 %1925 }
 0x3cc   : > { %v1928_v59 = vsub.f32 %v1920_v42, %v1926_v58  ;;  %v2215_v58 = vmul.f32 %v10740_v28, %v10718_v23 }
 0x3cd   : > { %v1923_v60 = vpop.xlane.xlu0 %1922 }
 0x3ce   : > { %v1931_v61 = vmul.f32 1.442695, %v1928_v59  ;;  %v1927_v62 = vsub.f32 %v1919_v46, %v1923_v60 }
 0x3cf   : > { %v1817_v63 = vpop.xlane.xlu1 %1816 }
 0x3d0   : > { %9977 = vpow2.f32 %v1931_v61  ;;  %v1929_v0 = vmul.f32 1.442695, %v1927_v62  ;;  %v1819_v1 = vsub.f32 %v1810_v45, %v1817_v63  ;;  %v2214_v62 = vmul.f32 %v10718_v23, %v10749_v32 }
 0x3d1   : > { %v1814_v2 = vpop.xlane.xlu0 %1813 }
 0x3d2   : > { %9979 = vpow2.f32 %v1929_v0  ;;  %v1822_v3 = vmul.f32 1.442695, %v1819_v1  ;;  %v1818_v4 = vsub.f32 %v1809_v48, %v1814_v2  ;;  %v2299_v0 = vmul.f32 %v10743_v29, %v10683_v14 }
 0x3d3   : > { %v2197_v5 = vpop.xlane.xlu1 %2196  ;;  %v10807_v1 = vsel %vm1702_vm15, 1.0, %v10366_v16 }
 0x3d4   : > { %9981 = vpow2.f32 %v1822_v3  ;;  %v1820_v6 = vmul.f32 1.442695, %v1818_v4  ;;  %v2199_v7 = vsub.f32 %v2191_v52, %v2197_v5  ;;  %v2599_v2 = vmul.f32 %v10740_v28, %v10807_v1 }
 0x3d5   : > { %v2194_v8 = vpop.xlane.xlu0 %2193  ;;  %v2300_v3 = vmul.f32 %v10673_v12, %v10743_v29  ;;  %v2598_v4 = vmul.f32 %v10807_v1, %v10749_v32 }
 0x3d6   : > { %9983 = vpow2.f32 %v1820_v6  ;;  %v2202_v9 = vmul.f32 1.442695, %v2199_v7  ;;  %v2198_v19 = vsub.f32 %v2190_v55, %v2194_v8 }
 0x3d8   : > { %9985 = vpow2.f32 %v2202_v9  ;;  %v2200_v20 = vmul.f32 1.442695, %v2198_v19 }
 0x3da   : > { %9987 = vpow2.f32 %v2200_v20 }
 0x3dd   : > { %v9978_v21 = vpop.eup %9977 }
 0x3de   : > { %v1936_v22 = vsel %vm1811_vm12, %v9978_v21, 0.0 }
 0x3df   : > { %v9980_v24 = vpop.eup %9979  ;;  %1937 = vadd.xlane.f32.xlu1 %v1936_v22 }
 0x3e0   : > { %v1933_v25 = vsel %vm1811_vm12, %v9980_v24, 0.0 }
 0x3e1   : > { %v9982_v30 = vpop.eup %9981  ;;  %1934 = vadd.xlane.f32.xlu0 %v1933_v25 }
 0x3e2   : > { %v1827_v31 = vsel %vm1811_vm12, %v9982_v30, 0.0 }
 0x3e3   : > { %v9984_v33 = vpop.eup %9983  ;;  %1828 = vadd.xlane.f32.xlu1 %v1827_v31 }
 0x3e4   : > { %v1824_v34 = vsel %vm1811_vm12, %v9984_v33, 0.0 }
 0x3e5   : > { %v9986_v40 = vpop.eup %9985  ;;  %1825 = vadd.xlane.f32.xlu0 %v1824_v34 }
 0x3e6   : > { %v2207_v41 = vsel %vm1811_vm12, %v9986_v40, 0.0 }
 0x3e7   : > { %v9988_v42 = vpop.eup %9987  ;;  %2208 = vadd.xlane.f32.xlu1 %v2207_v41 }
 0x3e8   : > { %v2204_v43 = vsel %vm1811_vm12, %v9988_v42, 0.0 }
 0x3e9   : > { %2205 = vadd.xlane.f32.xlu0 %v2204_v43 }
 0x468   : > { %v1938_v44 = vpop.xlane.xlu1 %1937 }
 0x469   : > { %9989 = vrcp.f32 %v1938_v44 }
 0x46a   : > { %v1935_v45 = vpop.xlane.xlu0 %1934 }
 0x46b   : > { %9991 = vrcp.f32 %v1935_v45 }
 0x46c   : > { %v1829_v46 = vpop.xlane.xlu1 %1828 }
 0x46d   : > { %9993 = vrcp.f32 %v1829_v46 }
 0x46e   : > { %v1826_v47 = vpop.xlane.xlu0 %1825 }
 0x46f   : > { %9995 = vrcp.f32 %v1826_v47 }
 0x470   : > { %v2209_v48 = vpop.xlane.xlu1 %2208 }
 0x471   : > { %9997 = vrcp.f32 %v2209_v48 }
 0x472   : > { %v2206_v49 = vpop.xlane.xlu0 %2205 }
 0x473   : > { %9999 = vrcp.f32 %v2206_v49 }
 0x476   : > { %v9990_v50 = vpop.eup %9989 }
 0x477   : > { %v1942_v53 = vmul.f32 %v9990_v50, %v9978_v21 }
 0x478   : > { %v9992_v51 = vpop.eup %9991 }
 0x479   : > { %v1941_v52 = vmul.f32 %v9992_v51, %v9980_v24 }
 0x47a   : > { %v9994_v54 = vpop.eup %9993 }
 0x47b   : > { %9381 = vmatprep.mubr.msk.f32.mxu1 %vm1811_vm12, %v1941_v52  ;;  %v1833_v59 = vmul.f32 %v9994_v54, %v9982_v30 }
 0x47c   : > { %v9996_v55 = vpop.eup %9995  ;;  %9382 = vmatmul.mubr.msk.f32.vlgmr.msra.gmra.mxu1 %vm1811_vm12, %v1942_v53 }
 0x47d   : > { %9385 = vmatpush3.msra.mxu1 %v10757_v35  ;;  %v1832_v57 = vmul.f32 %v9996_v55, %v9984_v33 }
 0x47e   : > { %9386 = vmatprep.subr.mxu1 %v1834_v56  ;;  %v9998_v60 = vpop.eup %9997 }
 0x47f   : > { %9387 = vmatpush3.msra.mxu1 %v1834_v56  ;;  %9388 = vmatprep.mubr.msk.f32.mxu1 %vm1811_vm12, %v1832_v57  ;;  %v2213_v35 = vmul.f32 %v9998_v60, %v9986_v40  ;;  %v2491_v57 = vmul.f32 %v10807_v1, %v10683_v14  ;;  %v2492_v60 = vmul.f32 %v10673_v12, %v10807_v1 }
 0x480   : > { %v10000_v61 = vpop.eup %9999  ;;  %9398 = vmatprep.subr.mxu1 %v2215_v58  ;;  %9389 = vmatmul.mubr.msk.f32.vlgmr.msra.gmra.mxu1 %vm1811_vm12, %v1833_v59 }
 0x481   : > { %9399 = vmatpush3.msra.mxu1 %v2215_v58  ;;  %v2212_v63 = vmul.f32 %v10000_v61, %v9988_v42  ;;  %v10836_v58 = vsel %vm1707_vm3, 1.0, %v10366_v16 }
 0x482   : > { %9400 = vmatprep.subr.mxu1 %v2214_v62  ;;  %v2791_v59 = vmul.f32 %v10740_v28, %v10836_v58  ;;  %v2790_v61 = vmul.f32 %v10836_v58, %v10749_v32 }
 0x483   : > { %9401 = vmatpush3.msra.mxu1 %v2214_v62  ;;  %9402 = vmatprep.mubr.msk.f32.mxu1 %vm1811_vm12, %v2212_v63 }
 0x484   : > { %9405 = vmatprep.subr.msk.mxu1 %vm1320_vm1, %v10675_v13  ;;  %9403 = vmatmul.mubr.msk.f32.vlgmr.msra.gmra.mxu1 %vm1811_vm12, %v2213_v35 }
 0x485   : > { %9406 = vmatpush3.xpose.msk.msra.mxu1 %vm1320_vm1, %v10675_v13  ;;  %9409 = vmatprep.mubr.msk.f32.mxu1 %vm1320_vm1, %v2299_v0 }
 0x486   : > { %9407 = vmatprep.subr.msk.mxu1 %vm1320_vm1, %v10685_v15 }
 0x489   : > { %9408 = vmatpush3.xpose.msk.msra.mxu1 %vm1320_vm1, %v10685_v15 }
 0x48a   : > { %9426 = vmatprep.subr.mxu1 %v2599_v2 }
 0x48c   : > { %9410 = vmatmul.mubr.msk.f32.vlgmr.msra.gmra.mxu1 %vm1320_vm1, %v2300_v3 }
 0x48d   : > { %9427 = vmatpush3.msra.mxu1 %v2599_v2 }
 0x48e   : > { %9428 = vmatprep.subr.mxu1 %v2598_v4 }
 0x48f   : > { %9429 = vmatpush3.msra.mxu1 %v2598_v4 }
 0x490   : > { %9433 = vmatprep.subr.msk.mxu1 %vm1320_vm1, %v10675_v13 }
 0x53c   : > { %v9383_v5 = vpop.f32.mrf.mxu1 }
 0x53e   : > { %v2017_v6 = vpop.f32.mrf.mxu1 }
 0x540   : > { %v9390_v7 = vpop.f32.mrf.mxu1 }
 0x541   : > { %v2104_v8 = vadd.f32 %v9390_v7, %v9383_v5 }
 0x542   : > { %v2098_v9 = vpop.f32.mrf.mxu1 }
 0x543   : > { %v2099_v19 = vadd.f32 %v2098_v9, %v2017_v6 }
 0x544   : > { %v9404_v20 = vpop.f32.mrf.mxu1 }
 0x545   : > { %v2298_v21 = vadd.f32 %v9404_v20, %v2104_v8 }
 0x546   : > { %v2288_v22 = vpop.f32.mrf.mxu1 }
 0x547   : > { %v2297_v24 = vadd.f32 %v2288_v22, %v2099_v19 }
 0x54c   : > { %v9411_v25 = vpop.f32.mrf.mxu1 }
 0x54d   : > { %v2383_v30 = vmul.f32 0.5, %v9411_v25 }
 0x54e   : > { %v2373_v31 = vpop.f32.mrf.mxu1 }
 0x54f   : > { %v2382_v33 = vmul.f32 0.5, %v2373_v31  ;;  %v2387_v34 = vsel %vm1811_vm12, %v2383_v30, -inf }
 0x550   : > { %2388 = vmax.xlane.f32.xlu1 %v2387_v34 }
 0x551   : > { %v2384_v40 = vsel %vm1811_vm12, %v2382_v33, -inf }
 0x552   : > { %2385 = vmax.xlane.f32.xlu0 %v2384_v40 }
 0x5d9   : > { %v2389_v41 = vpop.xlane.xlu1 %2388 }
 0x5da   : > { %v2391_v42 = vsub.f32 %v2383_v30, %v2389_v41 }
 0x5db   : > { %v2386_v43 = vpop.xlane.xlu0 %2385 }
 0x5dc   : > { %v2394_v44 = vmul.f32 1.442695, %v2391_v42  ;;  %v2390_v45 = vsub.f32 %v2382_v33, %v2386_v43 }
 0x5de   : > { %10001 = vpow2.f32 %v2394_v44  ;;  %v2392_v46 = vmul.f32 1.442695, %v2390_v45  ;;  %v2683_v44 = vmul.f32 %v10836_v58, %v10683_v14  ;;  %v10865_v45 = vsel %vm1712_vm6, 1.0, %v10366_v16 }
 0x5e0   : > { %10003 = vpow2.f32 %v2392_v46  ;;  %v2983_v46 = vmul.f32 %v10740_v28, %v10865_v45 }
 0x5eb   : > { %v10002_v47 = vpop.eup %10001 }
 0x5ec   : > { %v2399_v48 = vsel %vm1811_vm12, %v10002_v47, 0.0 }
 0x5ed   : > { %v10004_v49 = vpop.eup %10003  ;;  %2400 = vadd.xlane.f32.xlu1 %v2399_v48  ;;  %v2982_v48 = vmul.f32 %v10865_v45, %v10749_v32 }
 0x5ee   : > { %v2396_v50 = vsel %vm1811_vm12, %v10004_v49, 0.0 }
 0x5ef   : > { %2397 = vadd.xlane.f32.xlu0 %v2396_v50 }
 0x676   : > { %v2401_v51 = vpop.xlane.xlu1 %2400 }
 0x677   : > { %10005 = vrcp.f32 %v2401_v51 }
 0x678   : > { %v2398_v52 = vpop.xlane.xlu0 %2397 }
 0x679   : > { %10007 = vrcp.f32 %v2398_v52 }
 0x684   : > { %v10006_v53 = vpop.eup %10005 }
 0x685   : > { %v2405_v56 = vmul.f32 %v10006_v53, %v10002_v47  ;;  %v2684_v47 = vmul.f32 %v10673_v12, %v10836_v58 }
 0x686   : > { %v10008_v54 = vpop.eup %10007 }
 0x687   : > { %v2404_v55 = vmul.f32 %v10008_v54, %v10004_v49 }
 0x689   : > { %9416 = vmatprep.mubr.msk.f32.mxu0 %vm1811_vm12, %v2404_v55 }
 0x68a   : > { %9417 = vmatmul.mubr.msk.f32.vlgmr.msra.gmra.mxu0 %vm1811_vm12, %v2405_v56 }
 0x68b   : > { %9420 = vmatpush3.xpose.msk.msra.mxu0 %vm1320_vm1, %v10675_v13  ;;  %9423 = vmatprep.mubr.msk.f32.mxu0 %vm1320_vm1, %v2491_v57 }
 0x68c   : > { %9421 = vmatprep.subr.msk.mxu0 %vm1320_vm1, %v10685_v15 }
 0x68f   : > { %9422 = vmatpush3.xpose.msk.msra.mxu0 %vm1320_vm1, %v10685_v15 }
 0x690   : > { %9440 = vmatprep.subr.mxu0 %v2791_v59 }
 0x692   : > { %9424 = vmatmul.mubr.msk.f32.vlgmr.msra.gmra.mxu0 %vm1320_vm1, %v2492_v60 }
 0x693   : > { %9441 = vmatpush3.msra.mxu0 %v2791_v59 }
 0x694   : > { %9442 = vmatprep.subr.mxu0 %v2790_v61 }
 0x695   : > { %9443 = vmatpush3.msra.mxu0 %v2790_v61 }
 0x696   : > { %9447 = vmatprep.subr.msk.mxu0 %vm1320_vm1, %v10675_v13 }
 0x74a   : > { %v9418_v62 = vpop.f32.mrf.mxu0 }
 0x74b   : > { %v2490_v63 = vadd.f32 %v9418_v62, %v2298_v21 }
 0x74c   : > { %v2480_v35 = vpop.f32.mrf.mxu0 }
 0x74d   : > { %v2489_v0 = vadd.f32 %v2480_v35, %v2297_v24 }
 0x752   : > { %v9425_v2 = vpop.f32.mrf.mxu0 }
 0x753   : > { %v2575_v3 = vmul.f32 0.5, %v9425_v2 }
 0x754   : > { %v2565_v4 = vpop.f32.mrf.mxu0 }
 0x755   : > { %v2574_v5 = vmul.f32 0.5, %v2565_v4  ;;  %v2579_v6 = vsel %vm1811_vm12, %v2575_v3, -inf }
 0x756   : > { %2580 = vmax.xlane.f32.xlu1 %v2579_v6 }
 0x757   : > { %v2576_v7 = vsel %vm1811_vm12, %v2574_v5, -inf }
 0x758   : > { %2577 = vmax.xlane.f32.xlu0 %v2576_v7 }
 0x7df   : > { %v2581_v8 = vpop.xlane.xlu1 %2580 }
 0x7e0   : > { %v2583_v9 = vsub.f32 %v2575_v3, %v2581_v8 }
 0x7e1   : > { %v2578_v19 = vpop.xlane.xlu0 %2577 }
 0x7e2   : > { %v2586_v20 = vmul.f32 1.442695, %v2583_v9  ;;  %v2582_v22 = vsub.f32 %v2574_v5, %v2578_v19 }
 0x7e4   : > { %10009 = vpow2.f32 %v2586_v20  ;;  %v2584_v25 = vmul.f32 1.442695, %v2582_v22  ;;  %v2875_v22 = vmul.f32 %v10865_v45, %v10683_v14 }
 0x7e6   : > { %10011 = vpow2.f32 %v2584_v25  ;;  %v10894_v25 = vsel %vm1717_vm9, 1.0, %v10366_v16 }
 0x7f1   : > { %v10010_v21 = vpop.eup %10009 }
 0x7f2   : > { %v2591_v24 = vsel %vm1811_vm12, %v10010_v21, 0.0 }
 0x7f3   : > { %v10012_v30 = vpop.eup %10011  ;;  %2592 = vadd.xlane.f32.xlu1 %v2591_v24  ;;  %v2876_v24 = vmul.f32 %v10673_v12, %v10865_v45 }
 0x7f4   : > { %v2588_v31 = vsel %vm1811_vm12, %v10012_v30, 0.0 }
 0x7f5   : > { %2589 = vadd.xlane.f32.xlu0 %v2588_v31 }
 0x87c   : > { %v2593_v33 = vpop.xlane.xlu1 %2592 }
 0x87d   : > { %10013 = vrcp.f32 %v2593_v33 }
 0x87e   : > { %v2590_v34 = vpop.xlane.xlu0 %2589 }
 0x87f   : > { %10015 = vrcp.f32 %v2590_v34 }
 0x88a   : > { %v10014_v40 = vpop.eup %10013 }
 0x88b   : > { %v2597_v43 = vmul.f32 %v10014_v40, %v10010_v21  ;;  %v3175_v21 = vmul.f32 %v10740_v28, %v10894_v25 }
 0x88c   : > { %v10016_v41 = vpop.eup %10015 }
 0x88d   : > { %v2596_v42 = vmul.f32 %v10016_v41, %v10012_v30  ;;  %v3174_v30 = vmul.f32 %v10894_v25, %v10749_v32 }
 0x88f   : > { %9430 = vmatprep.mubr.msk.f32.mxu1 %vm1811_vm12, %v2596_v42 }
 0x890   : > { %9431 = vmatmul.mubr.msk.f32.vlgmr.msra.gmra.mxu1 %vm1811_vm12, %v2597_v43 }
 0x891   : > { %9434 = vmatpush3.xpose.msk.msra.mxu1 %vm1320_vm1, %v10675_v13  ;;  %9437 = vmatprep.mubr.msk.f32.mxu1 %vm1320_vm1, %v2683_v44 }
 0x892   : > { %9435 = vmatprep.subr.msk.mxu1 %vm1320_vm1, %v10685_v15 }
 0x895   : > { %9436 = vmatpush3.xpose.msk.msra.mxu1 %vm1320_vm1, %v10685_v15 }
 0x896   : > { %9454 = vmatprep.subr.mxu1 %v2983_v46 }
 0x898   : > { %9438 = vmatmul.mubr.msk.f32.vlgmr.msra.gmra.mxu1 %vm1320_vm1, %v2684_v47 }
 0x899   : > { %9455 = vmatpush3.msra.mxu1 %v2983_v46 }
 0x89a   : > { %9456 = vmatprep.subr.mxu1 %v2982_v48 }
 0x89b   : > { %9457 = vmatpush3.msra.mxu1 %v2982_v48 }
 0x89c   : > { %9461 = vmatprep.subr.msk.mxu1 %vm1320_vm1, %v10675_v13 }
 0x950   : > { %v9432_v49 = vpop.f32.mrf.mxu1 }
 0x951   : > { %v2682_v50 = vadd.f32 %v9432_v49, %v2490_v63 }
 0x952   : > { %v2672_v51 = vpop.f32.mrf.mxu1 }
 0x953   : > { %v2681_v52 = vadd.f32 %v2672_v51, %v2489_v0 }
 0x958   : > { %v9439_v53 = vpop.f32.mrf.mxu1 }
 0x959   : > { %v2767_v54 = vmul.f32 0.5, %v9439_v53 }
 0x95a   : > { %v2757_v55 = vpop.f32.mrf.mxu1 }
 0x95b   : > { %v2766_v56 = vmul.f32 0.5, %v2757_v55  ;;  %v2771_v57 = vsel %vm1811_vm12, %v2767_v54, -inf }
 0x95c   : > { %2772 = vmax.xlane.f32.xlu1 %v2771_v57 }
 0x95d   : > { %v2768_v59 = vsel %vm1811_vm12, %v2766_v56, -inf }
 0x95e   : > { %2769 = vmax.xlane.f32.xlu0 %v2768_v59 }
 0x9e5   : > { %v2773_v60 = vpop.xlane.xlu1 %2772 }
 0x9e6   : > { %v2775_v61 = vsub.f32 %v2767_v54, %v2773_v60 }
 0x9e7   : > { %v2770_v62 = vpop.xlane.xlu0 %2769 }
 0x9e8   : > { %v2778_v35 = vmul.f32 1.442695, %v2775_v61  ;;  %v2774_v2 = vsub.f32 %v2766_v56, %v2770_v62 }
 0x9ea   : > { %10017 = vpow2.f32 %v2778_v35  ;;  %v2776_v3 = vmul.f32 1.442695, %v2774_v2  ;;  %v3067_v35 = vmul.f32 %v10894_v25, %v10683_v14  ;;  %v3068_v2 = vmul.f32 %v10673_v12, %v10894_v25 }
 0x9eb   : > { %v3350_v14 = vmul.f32 %v10692_v17, %v10738_v27  ;;  %v3351_v12 = vmul.f32 %v10736_v26, %v10692_v17 }
 0x9ec   : > { %10019 = vpow2.f32 %v2776_v3  ;;  %v10943_v3 = vmul.f32 %v10764_v37, %v10692_v17 }
 0x9f7   : > { %v10018_v63 = vpop.eup %10017 }
 0x9f8   : > { %v2783_v0 = vsel %vm1811_vm12, %v10018_v63, 0.0 }
 0x9f9   : > { %v10020_v4 = vpop.eup %10019  ;;  %2784 = vadd.xlane.f32.xlu1 %v2783_v0 }
 0x9fa   : > { %v2780_v5 = vsel %vm1811_vm12, %v10020_v4, 0.0 }
 0x9fb   : > { %2781 = vadd.xlane.f32.xlu0 %v2780_v5 }
 0xa82   : > { %v2785_v6 = vpop.xlane.xlu1 %2784 }
 0xa83   : > { %10021 = vrcp.f32 %v2785_v6 }
 0xa84   : > { %v2782_v7 = vpop.xlane.xlu0 %2781 }
 0xa85   : > { %10023 = vrcp.f32 %v2782_v7 }
 0xa90   : > { %v10022_v8 = vpop.eup %10021 }
 0xa91   : > { %v2789_v20 = vmul.f32 %v10022_v8, %v10018_v63 }
 0xa92   : > { %v10024_v9 = vpop.eup %10023 }
 0xa93   : > { %v2788_v19 = vmul.f32 %v10024_v9, %v10020_v4 }
 0xa95   : > { %9444 = vmatprep.mubr.msk.f32.mxu0 %vm1811_vm12, %v2788_v19 }
 0xa96   : > { %9445 = vmatmul.mubr.msk.f32.vlgmr.msra.gmra.mxu0 %vm1811_vm12, %v2789_v20 }
 0xa97   : > { %9448 = vmatpush3.xpose.msk.msra.mxu0 %vm1320_vm1, %v10675_v13  ;;  %9451 = vmatprep.mubr.msk.f32.mxu0 %vm1320_vm1, %v2875_v22 }
 0xa98   : > { %9449 = vmatprep.subr.msk.mxu0 %vm1320_vm1, %v10685_v15 }
 0xa9b   : > { %9450 = vmatpush3.xpose.msk.msra.mxu0 %vm1320_vm1, %v10685_v15 }
 0xa9c   : > { %9468 = vmatprep.subr.mxu0 %v3175_v21 }
 0xa9e   : > { %9452 = vmatmul.mubr.msk.f32.vlgmr.msra.gmra.mxu0 %vm1320_vm1, %v2876_v24 }
 0xa9f   : > { %9469 = vmatpush3.msra.mxu0 %v3175_v21 }
 0xaa0   : > { %9470 = vmatprep.subr.mxu0 %v3174_v30 }
 0xaa1   : > { %9471 = vmatpush3.msra.mxu0 %v3174_v30 }
 0xb56   : > { %v9446_v31 = vpop.f32.mrf.mxu0 }
 0xb57   : > { %v2874_v33 = vadd.f32 %v9446_v31, %v2682_v50 }
 0xb58   : > { %v2864_v34 = vpop.f32.mrf.mxu0 }
 0xb59   : > { %v2873_v40 = vadd.f32 %v2864_v34, %v2681_v52 }
 0xb5e   : > { %v9453_v28 = vpop.f32.mrf.mxu0 }
 0xb5f   : > { %v2959_v41 = vmul.f32 0.5, %v9453_v28 }
 0xb60   : > { %v2949_v42 = vpop.f32.mrf.mxu0 }
 0xb61   : > { %v2958_v43 = vmul.f32 0.5, %v2949_v42  ;;  %v2963_v44 = vsel %vm1811_vm12, %v2959_v41, -inf  ;;  %v10951_v42 = vld [vmem:[%s12396_s28 + $0x18] sm:$0xff] }
 0xb62   : > { %2964 = vmax.xlane.f32.xlu1 %v2963_v44  ;;  %9475 = vmatprep.subr.mxu0 %v10951_v42 }
 0xb63   : > { %v2960_v46 = vsel %vm1811_vm12, %v2958_v43, -inf }
 0xb64   : > { %2961 = vmax.xlane.f32.xlu0 %v2960_v46 }
 0xbeb   : > { %v2965_v47 = vpop.xlane.xlu1 %2964 }
 0xbec   : > { %v2967_v48 = vsub.f32 %v2959_v41, %v2965_v47 }
 0xbed   : > { %v2962_v32 = vpop.xlane.xlu0 %2961 }
 0xbee   : > { %v2970_v49 = vmul.f32 1.442695, %v2967_v48  ;;  %v2966_v51 = vsub.f32 %v2958_v43, %v2962_v32 }
 0xbf0   : > { %10025 = vpow2.f32 %v2970_v49  ;;  %v2968_v53 = vmul.f32 1.442695, %v2966_v51  ;;  %v10956_v49 = vld [vmem:[%s12396_s28 + $0x10] sm:$0xff]  ;;  %v10961_v51 = vld [vmem:[%s12396_s28 + $0x8] sm:$0xff] }
 0xbf2   : > { %10027 = vpow2.f32 %v2968_v53  ;;  %v10966_v53 = vld [vmem:[%s12396_s28] sm:$0xff] }
 0xbfd   : > { %v10026_v50 = vpop.eup %10025 }
 0xbfe   : > { %v2975_v52 = vsel %vm1811_vm12, %v10026_v50, 0.0 }
 0xbff   : > { %v10028_v54 = vpop.eup %10027  ;;  %2976 = vadd.xlane.f32.xlu1 %v2975_v52 }
 0xc00   : > { %v2972_v55 = vsel %vm1811_vm12, %v10028_v54, 0.0 }
 0xc01   : > { %2973 = vadd.xlane.f32.xlu0 %v2972_v55 }
 0xc88   : > { %v2977_v56 = vpop.xlane.xlu1 %2976 }
 0xc89   : > { %10029 = vrcp.f32 %v2977_v56  ;;  %v3465_v56 = vmul.f32 %v10695_v18, %v10738_v27 }
 0xc8a   : > { %v2974_v57 = vpop.xlane.xlu0 %2973 }
 0xc8b   : > { %10031 = vrcp.f32 %v2974_v57  ;;  %v3466_v57 = vmul.f32 %v10736_v26, %v10695_v18 }
 0xc96   : > { %v10030_v59 = vpop.eup %10029 }
 0xc97   : > { %v2981_v62 = vmul.f32 %v10030_v59, %v10026_v50  ;;  %v3736_v59 = vmul.f32 %v10718_v23, %v10738_v27 }
 0xc98   : > { %v10032_v60 = vpop.eup %10031 }
 0xc99   : > { %v2980_v61 = vmul.f32 %v10032_v60, %v10028_v54  ;;  %v4036_v60 = vmul.f32 %v10764_v37, %v10743_v29 }
 0xc9b   : > { %9458 = vmatprep.mubr.msk.f32.mxu1 %vm1811_vm12, %v2980_v61  ;;  %v4035_v61 = vmul.f32 %v10743_v29, %v10768_v39 }
 0xc9c   : > { %9459 = vmatmul.mubr.msk.f32.vlgmr.msra.gmra.mxu1 %vm1811_vm12, %v2981_v62  ;;  %v11011_v62 = vld [vmem:[%s12398_s2] ss:$0 sm:$0xff] }
 0xc9d   : > { %9462 = vmatpush3.xpose.msk.msra.mxu1 %vm1320_vm1, %v10675_v13  ;;  %9465 = vmatprep.mubr.msk.f32.mxu1 %vm1320_vm1, %v3067_v35  ;;  %v3573_v13 = vmul.f32 %v10764_v37, %v10695_v18 }
 0xc9e   : > { %9463 = vmatprep.subr.msk.mxu1 %vm1320_vm1, %v10685_v15 }
 0xca1   : > { %9464 = vmatpush3.xpose.msk.msra.mxu1 %vm1320_vm1, %v10685_v15  ;;  %v3572_v15 = vmul.f32 %v10695_v18, %v10768_v39  ;;  %v3737_v18 = vmul.f32 %v10736_v26, %v10718_v23 }
 0xca2   : > { %9486 = vmatprep.subr.msk.mxu1 %vm1320_vm1, %v10762_v36 }
 0xca4   : > { %9466 = vmatmul.mubr.msk.f32.vlgmr.msra.gmra.mxu1 %vm1320_vm1, %v3068_v2 }
 0xca5   : > { %9487 = vmatpush3.xpose.msk.msra.mxu1 %vm1320_vm1, %v10762_v36  ;;  %9490 = vmatprep.mubr.msk.f32.mxu1 %vm1320_vm1, %v3350_v14 }
 0xca6   : > { %9488 = vmatprep.subr.msk.mxu1 %vm1320_vm1, %v10766_v38 }
 0xca9   : > { %9489 = vmatpush3.xpose.msk.msra.mxu1 %vm1320_vm1, %v10766_v38 }
 0xcaa   : > { %9500 = vmatprep.subr.mxu1 %v3573_v13 }
 0xcac   : > { %9491 = vmatmul.mubr.msk.f32.vlgmr.msra.gmra.mxu1 %vm1320_vm1, %v3351_v12 }
 0xcad   : > { %9501 = vmatpush3.msra.mxu1 %v3573_v13  ;;  %v10281_v13 = vld [vmem:[#allocation2 + $0x8] sm:$0xff] }
 0xcae   : > { %9502 = vmatprep.subr.mxu1 %v3572_v15 }
 0xcaf   : > { %9503 = vmatpush3.msra.mxu1 %v3572_v15 }
 0xcb0   : > { %9507 = vmatprep.subr.mxu1 %v10943_v3 }
 0xd5c   : > { %v9460_v63 = vpop.f32.mrf.mxu1 }
 0xd5d   : > { %v3066_v0 = vadd.f32 %v9460_v63, %v2874_v33  ;;  %v10282_v63 = vld [vmem:[#allocation2] sm:$0xff] }
 0xd5e   : > { %v3056_v4 = vpop.f32.mrf.mxu1 }
 0xd5f   : > { %v3065_v5 = vadd.f32 %v3056_v4, %v2873_v40 }
 0xd64   : > { %v9467_v6 = vpop.f32.mrf.mxu1 }
 0xd65   : > { %v3151_v7 = vmul.f32 0.5, %v9467_v6 }
 0xd66   : > { %v3141_v8 = vpop.f32.mrf.mxu1 }
 0xd67   : > { %v3150_v9 = vmul.f32 0.5, %v3141_v8  ;;  %v3155_v19 = vsel %vm1811_vm12, %v3151_v7, -inf }
 0xd68   : > { %3156 = vmax.xlane.f32.xlu1 %v3155_v19 }
 0xd69   : > { %v3152_v20 = vsel %vm1811_vm12, %v3150_v9, -inf }
 0xd6a   : > { %3153 = vmax.xlane.f32.xlu0 %v3152_v20 }
 0xd6c   : > { %v9492_v4 = vpop.f32.mrf.mxu1 }
 0xdf1   : > { %v3157_v22 = vpop.xlane.xlu1 %3156 }
 0xdf2   : > { %v3159_v21 = vsub.f32 %v3151_v7, %v3157_v22  ;;  %v3430_v7 = vpop.f32.mrf.mxu1 }
 0xdf3   : > { %v3154_v24 = vpop.xlane.xlu0 %3153  ;;  %v3439_v22 = vmul.f32 0.5, %v3430_v7 }
 0xdf4   : > { %v3162_v30 = vmul.f32 1.442695, %v3159_v21  ;;  %v3158_v31 = vsub.f32 %v3150_v9, %v3154_v24  ;;  %v3440_v9 = vmul.f32 0.5, %v9492_v4 }
 0xdf6   : > { %10033 = vpow2.f32 %v3162_v30  ;;  %v3160_v33 = vmul.f32 1.442695, %v3158_v31  ;;  %v3444_v24 = vsel %vm1811_vm12, %v3440_v9, -inf }
 0xdf8   : > { %10035 = vpow2.f32 %v3160_v33  ;;  %v3441_v33 = vsel %vm1811_vm12, %v3439_v22, -inf }
 0xe03   : > { %v10034_v34 = vpop.eup %10033 }
 0xe04   : > { %v3167_v40 = vsel %vm1811_vm12, %v10034_v34, 0.0 }
 0xe05   : > { %v10036_v28 = vpop.eup %10035  ;;  %3168 = vadd.xlane.f32.xlu1 %v3167_v40 }
 0xe06   : > { %v3164_v41 = vsel %vm1811_vm12, %v10036_v28, 0.0 }
 0xe07   : > { %3165 = vadd.xlane.f32.xlu0 %v3164_v41 }
 0xe8e   : > { %v3169_v43 = vpop.xlane.xlu1 %3168 }
 0xe8f   : > { %10037 = vrcp.f32 %v3169_v43 }
 0xe90   : > { %v3166_v44 = vpop.xlane.xlu0 %3165 }
 0xe91   : > { %10039 = vrcp.f32 %v3166_v44 }
 0xe9c   : > { %v10038_v46 = vpop.eup %10037 }
 0xe9d   : > { %v3173_v32 = vmul.f32 %v10038_v46, %v10034_v34 }
 0xe9e   : > { %v10040_v47 = vpop.eup %10039 }
 0xe9f   : > { %v3172_v48 = vmul.f32 %v10040_v47, %v10036_v28 }
 0xea1   : > { %9472 = vmatprep.mubr.msk.f32.mxu0 %vm1811_vm12, %v3172_v48 }
 0xea2   : > { %9473 = vmatmul.mubr.msk.f32.vlgmr.msra.gmra.mxu0 %vm1811_vm12, %v3173_v32 }
 0xea3   : > { %9476 = vmatpush3.msra.mxu0 %v10951_v42 }
 0xea4   : > { %9477 = vmatprep.subr.mxu0 %v10956_v49 }
 0xea5   : > { %9478 = vmatpush3.msra.mxu0 %v10956_v49 }
 0xea6   : > { %9479 = vmatprep.subr.mxu0 %v10961_v51 }
 0xea7   : > { %9480 = vmatpush3.msra.mxu0 %v10961_v51 }
 0xea8   : > { %9481 = vmatprep.subr.mxu0 %v10966_v53 }
 0xea9   : > { %9482 = vmatpush3.msra.mxu0 %v10966_v53 }
 0xeaa   : > { %9493 = vmatprep.subr.msk.mxu0 %vm1320_vm1, %v10762_v36 }
 0xf62   : > { %v9474_v50 = vpop.f32.mrf.mxu0 }
 0xf63   : > { %v3258_v55 = vadd.f32 %v9474_v50, %v3066_v0 }
 0xf64   : > { %v3248_v52 = vpop.f32.mrf.mxu0 }
 0xf65   : > { %v3257_v54 = vadd.f32 %v3248_v52, %v3065_v5 }
 0xf67   : > { %9483 = vmatprep.mubr.msk.f32.mxu0 %vm1320_vm1, %v3257_v54 }
 0xf68   : > { %9484 = vmatmul.mubr.msk.f32.vlgmr.msra.gmra.mxu0 %vm1320_vm1, %v3258_v55 }
 0xf69   : > { %9494 = vmatpush3.xpose.msk.msra.mxu0 %vm1320_vm1, %v10762_v36  ;;  %9497 = vmatprep.mubr.msk.f32.mxu0 %vm1320_vm1, %v3465_v56 }
 0xf6a   : > { %9495 = vmatprep.subr.msk.mxu0 %vm1320_vm1, %v10766_v38 }
 0xf6d   : > { %9496 = vmatpush3.xpose.msk.msra.mxu0 %vm1320_vm1, %v10766_v38 }
 0xf6e   : > { %9514 = vmatprep.subr.msk.mxu0 %vm1320_vm1, %v10762_v36 }
 0xf70   : > { %9498 = vmatmul.mubr.msk.f32.vlgmr.msra.gmra.mxu0 %vm1320_vm1, %v3466_v57 }
 0xf71   : > { %9515 = vmatpush3.xpose.msk.msra.mxu0 %vm1320_vm1, %v10762_v36  ;;  %9518 = vmatprep.mubr.msk.f32.mxu0 %vm1320_vm1, %v3736_v59 }
 0xf72   : > { %9516 = vmatprep.subr.msk.mxu0 %vm1320_vm1, %v10766_v38 }
 0xf75   : > { %9517 = vmatpush3.xpose.msk.msra.mxu0 %vm1320_vm1, %v10766_v38 }
 0xf76   : > { %9535 = vmatprep.subr.mxu0 %v4036_v60 }
 0xf78   : > { %9519 = vmatmul.mubr.msk.f32.vlgmr.msra.gmra.mxu0 %vm1320_vm1, %v3737_v18 }
 0xf79   : > { %9536 = vmatpush3.msra.mxu0 %v4036_v60 }
 0xf7a   : > { %9537 = vmatprep.subr.mxu0 %v4035_v61 }
 0xf7b   : > { %9538 = vmatpush3.msra.mxu0 %v4035_v61 }
 0xf7c   : > { %9542 = vmatprep.subr.msk.mxu0 %vm1320_vm1, %v10762_v36 }
0x1028   : > { %v9485_v35 = vpop.f32.mrf.mxu0 }
0x1029   : > { %v11014_v2 = vadd.f32 %v9485_v35, %v11011_v62 }
0x102a   : > { %v3337_v14 = vpop.f32.mrf.mxu0 }
0x102b   : > { %v3347_v12 = vadd.f32 %v10281_v13, %v11014_v2  ;;  %v11018_v15 = vadd.f32 %v11011_v62, %v3337_v14 }
0x102d   : > { %3349 = vst.msk [vmem:[#allocation2 + $0x8] sm:$0xff] %vm1320_vm1, %v3347_v12  ;;  %v3346_v0 = vadd.f32 %v10282_v63, %v11018_v15 }
0x102f   : > { %3348 = vst.msk [vmem:[#allocation2] sm:$0xff] %vm1320_vm1, %v3346_v0 }
0x1030   : > { %v9499_v5 = vpop.f32.mrf.mxu0 }
0x1031   : > { %v3549_v6 = vmul.f32 0.5, %v9499_v5 }
0x1032   : > { %v3539_v8 = vpop.f32.mrf.mxu0 }
0x1033   : > { %v3548_v19 = vmul.f32 0.5, %v3539_v8  ;;  %v3553_v20 = vsel %vm1811_vm12, %v3549_v6, -inf }
0x1034   : > { %3554 = vmax.xlane.f32.xlu1 %v3553_v20 }
0x1035   : > { %v3550_v21 = vsel %vm1811_vm12, %v3548_v19, -inf }
0x1036   : > { %3551 = vmax.xlane.f32.xlu0 %v3550_v21 }
0x1038   : > { %3445 = vmax.xlane.f32.xlu1 %v3444_v24  ;;  %v9520_v30 = vpop.f32.mrf.mxu0 }
0x1039   : > { %v3820_v31 = vmul.f32 0.5, %v9520_v30 }
0x103a   : > { %v3810_v34 = vpop.f32.mrf.mxu0  ;;  %3442 = vmax.xlane.f32.xlu0 %v3441_v33 }
0x103b   : > { %v3819_v40 = vmul.f32 0.5, %v3810_v34  ;;  %v3824_v28 = vsel %vm1811_vm12, %v3820_v31, -inf }
0x103c   : > { %3825 = vmax.xlane.f32.xlu1 %v3824_v28 }
0x103d   : > { %v3821_v41 = vsel %vm1811_vm12, %v3819_v40, -inf }
0x103e   : > { %3822 = vmax.xlane.f32.xlu0 %v3821_v41 }
0x10bd   : > { %v3555_v43 = vpop.xlane.xlu1 %3554 }
0x10be   : > { %v3557_v44 = vsub.f32 %v3549_v6, %v3555_v43 }
0x10bf   : > { %v3552_v46 = vpop.xlane.xlu0 %3551 }
0x10c0   : > { %v3560_v47 = vmul.f32 1.442695, %v3557_v44  ;;  %v3556_v48 = vsub.f32 %v3548_v19, %v3552_v46  ;;  %v3463_v46 = vmul.f32 %v10692_v17, %v10768_v39 }
0x10c1   : > { %v3446_v32 = vpop.xlane.xlu1 %3445 }
0x10c2   : > { %10041 = vpow2.f32 %v3560_v47  ;;  %v3558_v50 = vmul.f32 1.442695, %v3556_v48  ;;  %v3448_v52 = vsub.f32 %v3440_v9, %v3446_v32  ;;  %v3844_v48 = vmul.f32 %v10764_v37, %v10718_v23 }
0x10c3   : > { %v3443_v54 = vpop.xlane.xlu0 %3442 }
0x10c4   : > { %10043 = vpow2.f32 %v3558_v50  ;;  %v3451_v55 = vmul.f32 1.442695, %v3448_v52  ;;  %v3447_v56 = vsub.f32 %v3439_v22, %v3443_v54  ;;  %v3843_v54 = vmul.f32 %v10718_v23, %v10768_v39 }
0x10c5   : > { %v3826_v57 = vpop.xlane.xlu1 %3825  ;;  %v4228_v23 = vmul.f32 %v10764_v37, %v10807_v1 }
0x10c6   : > { %10045 = vpow2.f32 %v3451_v55  ;;  %v3449_v59 = vmul.f32 1.442695, %v3447_v56  ;;  %v3828_v60 = vsub.f32 %v3820_v31, %v3826_v57  ;;  %v3928_v55 = vmul.f32 %v10743_v29, %v10738_v27 }
0x10c7   : > { %v3823_v18 = vpop.xlane.xlu0 %3822  ;;  %v3929_v56 = vmul.f32 %v10736_v26, %v10743_v29  ;;  %v4227_v57 = vmul.f32 %v10807_v1, %v10768_v39 }
0x10c8   : > { %10047 = vpow2.f32 %v3449_v59  ;;  %v3831_v61 = vmul.f32 1.442695, %v3828_v60  ;;  %v3827_v35 = vsub.f32 %v3819_v40, %v3823_v18 }
0x10ca   : > { %10049 = vpow2.f32 %v3831_v61  ;;  %v3829_v14 = vmul.f32 1.442695, %v3827_v35 }
0x10cc   : > { %10051 = vpow2.f32 %v3829_v14 }
0x10cf   : > { %v10042_v13 = vpop.eup %10041 }
0x10d0   : > { %v3565_v12 = vsel %vm1811_vm12, %v10042_v13, 0.0 }
0x10d1   : > { %v10044_v63 = vpop.eup %10043  ;;  %3566 = vadd.xlane.f32.xlu1 %v3565_v12 }
0x10d2   : > { %v3562_v0 = vsel %vm1811_vm12, %v10044_v63, 0.0 }
0x10d3   : > { %v10046_v4 = vpop.eup %10045  ;;  %3563 = vadd.xlane.f32.xlu0 %v3562_v0 }
0x10d4   : > { %v3456_v5 = vsel %vm1811_vm12, %v10046_v4, 0.0 }
0x10d5   : > { %v10048_v6 = vpop.eup %10047  ;;  %3457 = vadd.xlane.f32.xlu1 %v3456_v5 }
0x10d6   : > { %v3453_v7 = vsel %vm1811_vm12, %v10048_v6, 0.0 }
0x10d7   : > { %v10050_v8 = vpop.eup %10049  ;;  %3454 = vadd.xlane.f32.xlu0 %v3453_v7 }
0x10d8   : > { %v3836_v9 = vsel %vm1811_vm12, %v10050_v8, 0.0 }
0x10d9   : > { %v10052_v19 = vpop.eup %10051  ;;  %3837 = vadd.xlane.f32.xlu1 %v3836_v9 }
0x10da   : > { %v3833_v20 = vsel %vm1811_vm12, %v10052_v19, 0.0 }
0x10db   : > { %3834 = vadd.xlane.f32.xlu0 %v3833_v20 }
0x115a   : > { %v3567_v22 = vpop.xlane.xlu1 %3566 }
0x115b   : > { %10053 = vrcp.f32 %v3567_v22 }
0x115c   : > { %v3564_v21 = vpop.xlane.xlu0 %3563 }
0x115d   : > { %10055 = vrcp.f32 %v3564_v21 }
0x115e   : > { %v3458_v24 = vpop.xlane.xlu1 %3457 }
0x115f   : > { %10057 = vrcp.f32 %v3458_v24 }
0x1160   : > { %v3455_v30 = vpop.xlane.xlu0 %3454 }
0x1161   : > { %10059 = vrcp.f32 %v3455_v30 }
0x1162   : > { %v3838_v31 = vpop.xlane.xlu1 %3837 }
0x1163   : > { %10061 = vrcp.f32 %v3838_v31 }
0x1164   : > { %v3835_v33 = vpop.xlane.xlu0 %3834 }
0x1165   : > { %10063 = vrcp.f32 %v3835_v33 }
0x1168   : > { %v10054_v34 = vpop.eup %10053 }
0x1169   : > { %v3571_v41 = vmul.f32 %v10054_v34, %v10042_v13 }
0x116a   : > { %v10056_v40 = vpop.eup %10055 }
0x116b   : > { %v3570_v28 = vmul.f32 %v10056_v40, %v10044_v63 }
0x116c   : > { %v10058_v43 = vpop.eup %10057 }
0x116d   : > { %9504 = vmatprep.mubr.msk.f32.mxu1 %vm1811_vm12, %v3570_v28  ;;  %v3462_v32 = vmul.f32 %v10058_v43, %v10046_v4 }
0x116e   : > { %v10060_v44 = vpop.eup %10059  ;;  %9505 = vmatmul.mubr.msk.f32.vlgmr.msra.gmra.mxu1 %vm1811_vm12, %v3571_v41 }
0x116f   : > { %9508 = vmatpush3.msra.mxu1 %v10943_v3  ;;  %v3461_v47 = vmul.f32 %v10060_v44, %v10048_v6 }
0x1170   : > { %9509 = vmatprep.subr.mxu1 %v3463_v46  ;;  %v10062_v50 = vpop.eup %10061 }
0x1171   : > { %9510 = vmatpush3.msra.mxu1 %v3463_v46  ;;  %9511 = vmatprep.mubr.msk.f32.mxu1 %vm1811_vm12, %v3461_v47  ;;  %v3842_v3 = vmul.f32 %v10062_v50, %v10050_v8  ;;  %v4120_v47 = vmul.f32 %v10807_v1, %v10738_v27  ;;  %v4419_v50 = vmul.f32 %v10836_v58, %v10768_v39 }
0x1172   : > { %v10064_v52 = vpop.eup %10063  ;;  %9521 = vmatprep.subr.mxu1 %v3844_v48  ;;  %9512 = vmatmul.mubr.msk.f32.vlgmr.msra.gmra.mxu1 %vm1811_vm12, %v3462_v32  ;;  %v4121_v32 = vmul.f32 %v10736_v26, %v10807_v1 }
0x1173   : > { %9522 = vmatpush3.msra.mxu1 %v3844_v48  ;;  %v3841_v17 = vmul.f32 %v10064_v52, %v10052_v19  ;;  %v4420_v48 = vmul.f32 %v10764_v37, %v10836_v58 }
0x1174   : > { %9523 = vmatprep.subr.mxu1 %v3843_v54 }
0x1175   : > { %9524 = vmatpush3.msra.mxu1 %v3843_v54  ;;  %9525 = vmatprep.mubr.msk.f32.mxu1 %vm1811_vm12, %v3841_v17 }
0x1176   : > { %9528 = vmatprep.subr.msk.mxu1 %vm1320_vm1, %v10762_v36  ;;  %9526 = vmatmul.mubr.msk.f32.vlgmr.msra.gmra.mxu1 %vm1811_vm12, %v3842_v3 }
0x1177   : > { %9529 = vmatpush3.xpose.msk.msra.mxu1 %vm1320_vm1, %v10762_v36  ;;  %9532 = vmatprep.mubr.msk.f32.mxu1 %vm1320_vm1, %v3928_v55 }
0x1178   : > { %9530 = vmatprep.subr.msk.mxu1 %vm1320_vm1, %v10766_v38 }
0x117b   : > { %9531 = vmatpush3.xpose.msk.msra.mxu1 %vm1320_vm1, %v10766_v38 }
0x117c   : > { %9549 = vmatprep.subr.mxu1 %v4228_v23 }
0x117e   : > { %9533 = vmatmul.mubr.msk.f32.vlgmr.msra.gmra.mxu1 %vm1320_vm1, %v3929_v56 }
0x117f   : > { %9550 = vmatpush3.msra.mxu1 %v4228_v23 }
0x1180   : > { %9551 = vmatprep.subr.mxu1 %v4227_v57 }
0x1181   : > { %9552 = vmatpush3.msra.mxu1 %v4227_v57 }
0x1182   : > { %9556 = vmatprep.subr.msk.mxu1 %vm1320_vm1, %v10762_v36 }
0x122e   : > { %v9506_v59 = vpop.f32.mrf.mxu1 }
0x1230   : > { %v3646_v60 = vpop.f32.mrf.mxu1 }
0x1232   : > { %v9513_v18 = vpop.f32.mrf.mxu1 }
0x1233   : > { %v3733_v61 = vadd.f32 %v9513_v18, %v9506_v59 }
0x1234   : > { %v3727_v35 = vpop.f32.mrf.mxu1 }
0x1235   : > { %v3728_v14 = vadd.f32 %v3727_v35, %v3646_v60 }
0x1236   : > { %v9527_v13 = vpop.f32.mrf.mxu1 }
0x1237   : > { %v3927_v12 = vadd.f32 %v9527_v13, %v3733_v61 }
0x1238   : > { %v3917_v29 = vpop.f32.mrf.mxu1 }
0x1239   : > { %v3926_v63 = vadd.f32 %v3917_v29, %v3728_v14 }
0x123e   : > { %v9534_v0 = vpop.f32.mrf.mxu1 }
0x123f   : > { %v4012_v4 = vmul.f32 0.5, %v9534_v0 }
0x1240   : > { %v4002_v5 = vpop.f32.mrf.mxu1 }
0x1241   : > { %v4011_v6 = vmul.f32 0.5, %v4002_v5  ;;  %v4016_v7 = vsel %vm1811_vm12, %v4012_v4, -inf }
0x1242   : > { %4017 = vmax.xlane.f32.xlu1 %v4016_v7 }
0x1243   : > { %v4013_v8 = vsel %vm1811_vm12, %v4011_v6, -inf }
0x1244   : > { %4014 = vmax.xlane.f32.xlu0 %v4013_v8 }
0x12cb   : > { %v4018_v9 = vpop.xlane.xlu1 %4017 }
0x12cc   : > { %v4020_v19 = vsub.f32 %v4012_v4, %v4018_v9 }
0x12cd   : > { %v4015_v20 = vpop.xlane.xlu0 %4014 }
0x12ce   : > { %v4023_v22 = vmul.f32 1.442695, %v4020_v19  ;;  %v4019_v21 = vsub.f32 %v4011_v6, %v4015_v20  ;;  %v4312_v19 = vmul.f32 %v10836_v58, %v10738_v27  ;;  %v4612_v20 = vmul.f32 %v10764_v37, %v10865_v45 }
0x12d0   : > { %10065 = vpow2.f32 %v4023_v22  ;;  %v4021_v24 = vmul.f32 1.442695, %v4019_v21  ;;  %v4313_v22 = vmul.f32 %v10736_v26, %v10836_v58  ;;  %v4611_v21 = vmul.f32 %v10865_v45, %v10768_v39 }
0x12d2   : > { %10067 = vpow2.f32 %v4021_v24 }
0x12dd   : > { %v10066_v30 = vpop.eup %10065 }
0x12de   : > { %v4028_v31 = vsel %vm1811_vm12, %v10066_v30, 0.0 }
0x12df   : > { %v10068_v33 = vpop.eup %10067  ;;  %4029 = vadd.xlane.f32.xlu1 %v4028_v31 }
0x12e0   : > { %v4025_v34 = vsel %vm1811_vm12, %v10068_v33, 0.0 }
0x12e1   : > { %4026 = vadd.xlane.f32.xlu0 %v4025_v34 }
0x1368   : > { %v4030_v40 = vpop.xlane.xlu1 %4029 }
0x1369   : > { %10069 = vrcp.f32 %v4030_v40 }
0x136a   : > { %v4027_v28 = vpop.xlane.xlu0 %4026 }
0x136b   : > { %10071 = vrcp.f32 %v4027_v28 }
0x1376   : > { %v10070_v41 = vpop.eup %10069 }
0x1377   : > { %v4034_v46 = vmul.f32 %v10070_v41, %v10066_v30 }
0x1378   : > { %v10072_v43 = vpop.eup %10071 }
0x1379   : > { %v4033_v44 = vmul.f32 %v10072_v43, %v10068_v33 }
0x137b   : > { %9539 = vmatprep.mubr.msk.f32.mxu0 %vm1811_vm12, %v4033_v44 }
0x137c   : > { %9540 = vmatmul.mubr.msk.f32.vlgmr.msra.gmra.mxu0 %vm1811_vm12, %v4034_v46 }
0x137d   : > { %9543 = vmatpush3.xpose.msk.msra.mxu0 %vm1320_vm1, %v10762_v36  ;;  %9546 = vmatprep.mubr.msk.f32.mxu0 %vm1320_vm1, %v4120_v47 }
0x137e   : > { %9544 = vmatprep.subr.msk.mxu0 %vm1320_vm1, %v10766_v38 }
0x1381   : > { %9545 = vmatpush3.xpose.msk.msra.mxu0 %vm1320_vm1, %v10766_v38 }
0x1382   : > { %9563 = vmatprep.subr.mxu0 %v4420_v48 }
0x1384   : > { %9547 = vmatmul.mubr.msk.f32.vlgmr.msra.gmra.mxu0 %vm1320_vm1, %v4121_v32 }
0x1385   : > { %9564 = vmatpush3.msra.mxu0 %v4420_v48 }
0x1386   : > { %9565 = vmatprep.subr.mxu0 %v4419_v50 }
0x1387   : > { %9566 = vmatpush3.msra.mxu0 %v4419_v50 }
0x1388   : > { %9570 = vmatprep.subr.msk.mxu0 %vm1320_vm1, %v10762_v36 }
0x143c   : > { %v9541_v52 = vpop.f32.mrf.mxu0 }
0x143d   : > { %v4119_v54 = vadd.f32 %v9541_v52, %v3927_v12 }
0x143e   : > { %v4109_v17 = vpop.f32.mrf.mxu0 }
0x143f   : > { %v4118_v3 = vadd.f32 %v4109_v17, %v3926_v63 }
0x1444   : > { %v9548_v55 = vpop.f32.mrf.mxu0 }
0x1445   : > { %v4204_v23 = vmul.f32 0.5, %v9548_v55 }
0x1446   : > { %v4194_v56 = vpop.f32.mrf.mxu0 }
0x1447   : > { %v4203_v57 = vmul.f32 0.5, %v4194_v56  ;;  %v4208_v1 = vsel %vm1811_vm12, %v4204_v23, -inf }
0x1448   : > { %4209 = vmax.xlane.f32.xlu1 %v4208_v1 }
0x1449   : > { %v4205_v59 = vsel %vm1811_vm12, %v4203_v57, -inf }
0x144a   : > { %4206 = vmax.xlane.f32.xlu0 %v4205_v59 }
0x14d1   : > { %v4210_v60 = vpop.xlane.xlu1 %4209 }
0x14d2   : > { %v4212_v18 = vsub.f32 %v4204_v23, %v4210_v60  ;;  %v4504_v60 = vmul.f32 %v10865_v45, %v10738_v27 }
0x14d3   : > { %v4207_v61 = vpop.xlane.xlu0 %4206 }
0x14d4   : > { %v4215_v35 = vmul.f32 1.442695, %v4212_v18  ;;  %v4211_v14 = vsub.f32 %v4203_v57, %v4207_v61  ;;  %v4804_v18 = vmul.f32 %v10764_v37, %v10894_v25  ;;  %v4505_v61 = vmul.f32 %v10736_v26, %v10865_v45 }
0x14d6   : > { %10073 = vpow2.f32 %v4215_v35  ;;  %v4213_v13 = vmul.f32 1.442695, %v4211_v14  ;;  %v4803_v35 = vmul.f32 %v10894_v25, %v10768_v39 }
0x14d8   : > { %10075 = vpow2.f32 %v4213_v13 }
0x14e3   : > { %v10074_v12 = vpop.eup %10073 }
0x14e4   : > { %v4220_v29 = vsel %vm1811_vm12, %v10074_v12, 0.0 }
0x14e5   : > { %v10076_v63 = vpop.eup %10075  ;;  %4221 = vadd.xlane.f32.xlu1 %v4220_v29 }
0x14e6   : > { %v4217_v0 = vsel %vm1811_vm12, %v10076_v63, 0.0 }
0x14e7   : > { %4218 = vadd.xlane.f32.xlu0 %v4217_v0 }
0x156e   : > { %v4222_v4 = vpop.xlane.xlu1 %4221 }
0x156f   : > { %10077 = vrcp.f32 %v4222_v4 }
0x1570   : > { %v4219_v5 = vpop.xlane.xlu0 %4218 }
0x1571   : > { %10079 = vrcp.f32 %v4219_v5 }
0x157c   : > { %v10078_v6 = vpop.eup %10077 }
0x157d   : > { %v4226_v9 = vmul.f32 %v10078_v6, %v10074_v12 }
0x157e   : > { %v10080_v7 = vpop.eup %10079 }
0x157f   : > { %v4225_v8 = vmul.f32 %v10080_v7, %v10076_v63 }
0x1581   : > { %9553 = vmatprep.mubr.msk.f32.mxu1 %vm1811_vm12, %v4225_v8 }
0x1582   : > { %9554 = vmatmul.mubr.msk.f32.vlgmr.msra.gmra.mxu1 %vm1811_vm12, %v4226_v9 }
0x1583   : > { %9557 = vmatpush3.xpose.msk.msra.mxu1 %vm1320_vm1, %v10762_v36  ;;  %9560 = vmatprep.mubr.msk.f32.mxu1 %vm1320_vm1, %v4312_v19 }
0x1584   : > { %9558 = vmatprep.subr.msk.mxu1 %vm1320_vm1, %v10766_v38 }
0x1587   : > { %9559 = vmatpush3.xpose.msk.msra.mxu1 %vm1320_vm1, %v10766_v38 }
0x1588   : > { %9577 = vmatprep.subr.mxu1 %v4612_v20 }
0x158a   : > { %9561 = vmatmul.mubr.msk.f32.vlgmr.msra.gmra.mxu1 %vm1320_vm1, %v4313_v22 }
0x158b   : > { %9578 = vmatpush3.msra.mxu1 %v4612_v20 }
0x158c   : > { %9579 = vmatprep.subr.mxu1 %v4611_v21 }
0x158d   : > { %9580 = vmatpush3.msra.mxu1 %v4611_v21 }
0x158e   : > { %9584 = vmatprep.subr.msk.mxu1 %vm1320_vm1, %v10762_v36 }
0x1642   : > { %v9555_v24 = vpop.f32.mrf.mxu1 }
0x1643   : > { %v4311_v30 = vadd.f32 %v9555_v24, %v4119_v54 }
0x1644   : > { %v4301_v31 = vpop.f32.mrf.mxu1 }
0x1645   : > { %v4310_v33 = vadd.f32 %v4301_v31, %v4118_v3 }
0x164a   : > { %v9562_v34 = vpop.f32.mrf.mxu1 }
0x164b   : > { %v4396_v40 = vmul.f32 0.5, %v9562_v34 }
0x164c   : > { %v4386_v28 = vpop.f32.mrf.mxu1 }
0x164d   : > { %v4395_v41 = vmul.f32 0.5, %v4386_v28  ;;  %v4400_v58 = vsel %vm1811_vm12, %v4396_v40, -inf }
0x164e   : > { %4401 = vmax.xlane.f32.xlu1 %v4400_v58  ;;  %v4697_v58 = vmul.f32 %v10736_v26, %v10894_v25 }
0x164f   : > { %v4397_v43 = vsel %vm1811_vm12, %v4395_v41, -inf }
0x1650   : > { %4398 = vmax.xlane.f32.xlu0 %v4397_v43 }
0x16d7   : > { %v4402_v44 = vpop.xlane.xlu1 %4401 }
0x16d8   : > { %v4404_v46 = vsub.f32 %v4396_v40, %v4402_v44 }
0x16d9   : > { %v4399_v47 = vpop.xlane.xlu0 %4398 }
0x16da   : > { %v4407_v48 = vmul.f32 1.442695, %v4404_v46  ;;  %v4403_v32 = vsub.f32 %v4395_v41, %v4399_v47  ;;  %v4696_v41 = vmul.f32 %v10894_v25, %v10738_v27 }
0x16dc   : > { %10081 = vpow2.f32 %v4407_v48  ;;  %v4405_v50 = vmul.f32 1.442695, %v4403_v32 }
0x16de   : > { %10083 = vpow2.f32 %v4405_v50 }
0x16e9   : > { %v10082_v52 = vpop.eup %10081 }
0x16ea   : > { %v4412_v54 = vsel %vm1811_vm12, %v10082_v52, 0.0 }
0x16eb   : > { %v10084_v17 = vpop.eup %10083  ;;  %4413 = vadd.xlane.f32.xlu1 %v4412_v54 }
0x16ec   : > { %v4409_v3 = vsel %vm1811_vm12, %v10084_v17, 0.0 }
0x16ed   : > { %4410 = vadd.xlane.f32.xlu0 %v4409_v3 }
0x1774   : > { %v4414_v55 = vpop.xlane.xlu1 %4413 }
0x1775   : > { %10085 = vrcp.f32 %v4414_v55 }
0x1776   : > { %v4411_v23 = vpop.xlane.xlu0 %4410 }
0x1777   : > { %10087 = vrcp.f32 %v4411_v23 }
0x1782   : > { %v10086_v56 = vpop.eup %10085 }
0x1783   : > { %v4418_v59 = vmul.f32 %v10086_v56, %v10082_v52 }
0x1784   : > { %v10088_v57 = vpop.eup %10087 }
0x1785   : > { %v4417_v1 = vmul.f32 %v10088_v57, %v10084_v17  ;;  %v4974_v57 = vld [vmem:[#allocation2 + $0x8] sm:$0xff] }
0x1787   : > { %9567 = vmatprep.mubr.msk.f32.mxu0 %vm1811_vm12, %v4417_v1 }
0x1788   : > { %9568 = vmatmul.mubr.msk.f32.vlgmr.msra.gmra.mxu0 %vm1811_vm12, %v4418_v59  ;;  %v4973_v59 = vld [vmem:[#allocation2] sm:$0xff] }
0x1789   : > { %9571 = vmatpush3.xpose.msk.msra.mxu0 %vm1320_vm1, %v10762_v36  ;;  %9574 = vmatprep.mubr.msk.f32.mxu0 %vm1320_vm1, %v4504_v60  ;;  %v4982_v60 = vsel %vm1320_vm1, %v4974_v57, 0.0 }
0x178a   : > { %9572 = vmatprep.subr.msk.mxu0 %vm1320_vm1, %v10766_v38 }
0x178d   : > { %9573 = vmatpush3.xpose.msk.msra.mxu0 %vm1320_vm1, %v10766_v38 }
0x178e   : > { %9591 = vmatprep.subr.mxu0 %v4804_v18 }
0x1790   : > { %9575 = vmatmul.mubr.msk.f32.vlgmr.msra.gmra.mxu0 %vm1320_vm1, %v4505_v61 }
0x1791   : > { %9592 = vmatpush3.msra.mxu0 %v4804_v18  ;;  %v4979_v18 = vsel %vm1320_vm1, %v4973_v59, 0.0 }
0x1792   : > { %9593 = vmatprep.subr.mxu0 %v4803_v35 }
0x1793   : > { %9594 = vmatpush3.msra.mxu0 %v4803_v35 }
0x1794   : > { %9598 = vmatprep.subr.mxu0 %v10951_v42 }
0x1848   : > { %v9569_v14 = vpop.f32.mrf.mxu0 }
0x1849   : > { %v4503_v13 = vadd.f32 %v9569_v14, %v4311_v30 }
0x184a   : > { %v4493_v37 = vpop.f32.mrf.mxu0 }
0x184b   : > { %v4502_v12 = vadd.f32 %v4493_v37, %v4310_v33 }
0x1850   : > { %v9576_v29 = vpop.f32.mrf.mxu0 }
0x1851   : > { %v4588_v63 = vmul.f32 0.5, %v9576_v29 }
0x1852   : > { %v4578_v0 = vpop.f32.mrf.mxu0 }
0x1853   : > { %v4587_v4 = vmul.f32 0.5, %v4578_v0  ;;  %v4592_v45 = vsel %vm1811_vm12, %v4588_v63, -inf }
0x1854   : > { %4593 = vmax.xlane.f32.xlu1 %v4592_v45 }
0x1855   : > { %v4589_v5 = vsel %vm1811_vm12, %v4587_v4, -inf }
0x1856   : > { %4590 = vmax.xlane.f32.xlu0 %v4589_v5 }
0x18dd   : > { %v4594_v39 = vpop.xlane.xlu1 %4593 }
0x18de   : > { %v4596_v6 = vsub.f32 %v4588_v63, %v4594_v39 }
0x18df   : > { %v4591_v7 = vpop.xlane.xlu0 %4590 }
0x18e0   : > { %v4599_v8 = vmul.f32 1.442695, %v4596_v6  ;;  %v4595_v9 = vsub.f32 %v4587_v4, %v4591_v7 }
0x18e2   : > { %10089 = vpow2.f32 %v4599_v8  ;;  %v4597_v19 = vmul.f32 1.442695, %v4595_v9  ;;  %v5054_v9 = vld [vmem:[%s12399_s7 + $0x18] sm:$0xff] }
0x18e4   : > { %10091 = vpow2.f32 %v4597_v19  ;;  %v5053_v19 = vld [vmem:[%s12399_s7 + $0x10] sm:$0xff] }
0x18ef   : > { %v10090_v20 = vpop.eup %10089 }
0x18f0   : > { %v4604_v22 = vsel %vm1811_vm12, %v10090_v20, 0.0 }
0x18f1   : > { %v10092_v21 = vpop.eup %10091  ;;  %4605 = vadd.xlane.f32.xlu1 %v4604_v22 }
0x18f2   : > { %v4601_v24 = vsel %vm1811_vm12, %v10092_v21, 0.0 }
0x18f3   : > { %4602 = vadd.xlane.f32.xlu0 %v4601_v24 }
0x197a   : > { %v4606_v30 = vpop.xlane.xlu1 %4605 }
0x197b   : > { %10093 = vrcp.f32 %v4606_v30 }
0x197c   : > { %v4603_v31 = vpop.xlane.xlu0 %4602 }
0x197d   : > { %10095 = vrcp.f32 %v4603_v31  ;;  %v11185_v31 = vld [vmem:[%s12402_s5] ss:$0 sm:$0xff] }
0x1988   : > { %v10094_v33 = vpop.eup %10093 }
0x1989   : > { %v4610_v28 = vmul.f32 %v10094_v33, %v10090_v20  ;;  %v5052_v20 = vld [vmem:[%s12399_s7 + $0x8] sm:$0xff] }
0x198a   : > { %v10096_v34 = vpop.eup %10095 }
0x198b   : > { %v4609_v40 = vmul.f32 %v10096_v34, %v10092_v21 }
0x198d   : > { %9581 = vmatprep.mubr.msk.f32.mxu1 %vm1811_vm12, %v4609_v40 }
0x198e   : > { %9582 = vmatmul.mubr.msk.f32.vlgmr.msra.gmra.mxu1 %vm1811_vm12, %v4610_v28 }
0x198f   : > { %9585 = vmatpush3.xpose.msk.msra.mxu1 %vm1320_vm1, %v10762_v36  ;;  %9588 = vmatprep.mubr.msk.f32.mxu1 %vm1320_vm1, %v4696_v41  ;;  %v11191_v41 = vld [vmem:[%s12403_s13] ss:$0 sm:$0xff] }
0x1990   : > { %9586 = vmatprep.subr.msk.mxu1 %vm1320_vm1, %v10766_v38 }
0x1993   : > { %9587 = vmatpush3.xpose.msk.msra.mxu1 %vm1320_vm1, %v10766_v38 }
0x1994   : > { %9609 = vmatprep.subr.mxu1 %v5054_v9 }
0x1996   : > { %9589 = vmatmul.mubr.msk.f32.vlgmr.msra.gmra.mxu1 %vm1320_vm1, %v4697_v58 }
0x1997   : > { %9610 = vmatpush3.msra.mxu1 %v5054_v9 }
0x1998   : > { %9611 = vmatprep.subr.mxu1 %v5053_v19 }
0x1999   : > { %9612 = vmatpush3.msra.mxu1 %v5053_v19 }
0x199a   : > { %9613 = vmatprep.subr.mxu1 %v5052_v20 }
0x199b   : > { %9614 = vmatpush3.msra.mxu1 %v5052_v20 }
0x1a4e   : > { %v9583_v43 = vpop.f32.mrf.mxu1 }
0x1a4f   : > { %v11157_v27 = vadd.f32 %v9583_v43, %v4503_v13 }
0x1a50   : > { %v4685_v44 = vpop.f32.mrf.mxu1 }
0x1a51   : > { %v11159_v46 = vadd.f32 %v4685_v44, %v4502_v12 }
0x1a56   : > { %v9590_v36 = vpop.f32.mrf.mxu1 }
0x1a57   : > { %v4780_v47 = vmul.f32 0.5, %v9590_v36 }
0x1a58   : > { %v4770_v48 = vpop.f32.mrf.mxu1 }
0x1a59   : > { %v4779_v32 = vmul.f32 0.5, %v4770_v48  ;;  %v4784_v50 = vsel %vm1811_vm12, %v4780_v47, -inf }
0x1a5a   : > { %4785 = vmax.xlane.f32.xlu1 %v4784_v50 }
0x1a5b   : > { %v4781_v38 = vsel %vm1811_vm12, %v4779_v32, -inf }
0x1a5c   : > { %4782 = vmax.xlane.f32.xlu0 %v4781_v38 }
0x1ae3   : > { %v4786_v52 = vpop.xlane.xlu1 %4785 }
0x1ae4   : > { %v4788_v26 = vsub.f32 %v4780_v47, %v4786_v52 }
0x1ae5   : > { %v4783_v25 = vpop.xlane.xlu0 %4782 }
0x1ae6   : > { %v4791_v54 = vmul.f32 1.442695, %v4788_v26  ;;  %v4787_v17 = vsub.f32 %v4779_v32, %v4783_v25  ;;  %v10283_v26 = vld [vmem:[#allocation2 + $0x18] sm:$0xff] }
0x1ae8   : > { %10097 = vpow2.f32 %v4791_v54  ;;  %v4789_v3 = vmul.f32 1.442695, %v4787_v17 }
0x1aea   : > { %10099 = vpow2.f32 %v4789_v3 }
0x1af5   : > { %v10098_v55 = vpop.eup %10097 }
0x1af6   : > { %v4796_v23 = vsel %vm1811_vm12, %v10098_v55, 0.0 }
0x1af7   : > { %v10100_v56 = vpop.eup %10099  ;;  %4797 = vadd.xlane.f32.xlu1 %v4796_v23 }
0x1af8   : > { %v4793_v1 = vsel %vm1811_vm12, %v10100_v56, 0.0 }
0x1af9   : > { %4794 = vadd.xlane.f32.xlu0 %v4793_v1 }
0x1afb   : > { %4983 = vadd.xlane.f32.xlu1 %v4982_v60 }
0x1afd   : > { %4980 = vadd.xlane.f32.xlu0 %v4979_v18 }
0x1b80   : > { %v4798_v61 = vpop.xlane.xlu1 %4797 }
0x1b81   : > { %10101 = vrcp.f32 %v4798_v61 }
0x1b82   : > { %v4795_v35 = vpop.xlane.xlu0 %4794 }
0x1b83   : > { %10103 = vrcp.f32 %v4795_v35 }
0x1b84   : > { %v4984_v14 = vpop.xlane.xlu1 %4983 }
0x1b85   : > { %v4992_v13 = vmul.f32 0.03125, %v4984_v14 }
0x1b86   : > { %v4981_v37 = vpop.xlane.xlu0 %4980 }
0x1b87   : > { %v4996_v12 = vsub.f32 %v4974_v57, %v4992_v13  ;;  %v4991_v29 = vmul.f32 0.03125, %v4981_v37  ;;  %v5274_v13 = vld [vmem:[%s10578_s25 + $0x38] sm:$0xff]  ;;  %v5273_v37 = vld [vmem:[%s10578_s25 + $0x30] sm:$0xff] }
0x1b89   : > { %v4995_v63 = vsub.f32 %v4973_v59, %v4991_v29  ;;  %v5000_v0 = vmul.f32 %v4996_v12, %v4996_v12  ;;  %v5271_v29 = vld [vmem:[%s10578_s25 + $0x20] sm:$0xff] }
0x1b8b   : > { %v5006_v4 = vsel %vm1320_vm1, %v5000_v0, 0.0  ;;  %v4999_v45 = vmul.f32 %v4995_v63, %v4995_v63  ;;  %v5269_v0 = vld [vmem:[%s10578_s25 + $0x10] sm:$0xff] }
0x1b8c   : > { %5007 = vadd.xlane.f32.xlu1 %v5006_v4  ;;  %v5268_v4 = vld [vmem:[%s10578_s25 + $0x8] sm:$0xff] }
0x1b8d   : > { %v5003_v5 = vsel %vm1320_vm1, %v4999_v45, 0.0  ;;  %v5267_v45 = vld [vmem:[%s10578_s25] sm:$0xff] }
0x1b8e   : > { %5004 = vadd.xlane.f32.xlu0 %v5003_v5  ;;  %v10102_v39 = vpop.eup %10101 }
0x1b8f   : > { %v4802_v8 = vmul.f32 %v10102_v39, %v10098_v55 }
0x1b90   : > { %v10104_v6 = vpop.eup %10103 }
0x1b91   : > { %v4801_v7 = vmul.f32 %v10104_v6, %v10100_v56  ;;  %v11236_v6 = vld [vmem:[%s12405_s24] ss:$0 sm:$0xff] }
0x1b93   : > { %9595 = vmatprep.mubr.msk.f32.mxu0 %vm1811_vm12, %v4801_v7 }
0x1b94   : > { %9596 = vmatmul.mubr.msk.f32.vlgmr.msra.gmra.mxu0 %vm1811_vm12, %v4802_v8 }
0x1b95   : > { %9599 = vmatpush3.msra.mxu0 %v10951_v42  ;;  %v5051_v42 = vld [vmem:[%s12399_s7] sm:$0xff] }
0x1b96   : > { %9600 = vmatprep.subr.mxu0 %v10956_v49  ;;  %9615 = vmatprep.subr.mxu1 %v5051_v42 }
0x1b97   : > { %9601 = vmatpush3.msra.mxu0 %v10956_v49  ;;  %9616 = vmatpush3.msra.mxu1 %v5051_v42 }
0x1b98   : > { %9602 = vmatprep.subr.mxu0 %v10961_v51  ;;  %9623 = vmatprep.subr.mxu1 %v5274_v13 }
0x1b99   : > { %9603 = vmatpush3.msra.mxu0 %v10961_v51 }
0x1b9a   : > { %9604 = vmatprep.subr.mxu0 %v10966_v53 }
0x1b9b   : > { %9605 = vmatpush3.msra.mxu0 %v10966_v53 }
0x1c15   : > { %v5008_v49 = vpop.xlane.xlu1 %5007 }
0x1c16   : > { %v5016_v51 = vmul.f32 0.03125, %v5008_v49 }
0x1c17   : > { %v5005_v22 = vpop.xlane.xlu0 %5004 }
0x1c18   : > { %v5020_v53 = vadd.f32 1e-05, %v5016_v51  ;;  %v5015_v21 = vmul.f32 0.03125, %v5005_v22 }
0x1c1a   : > { %10105 = vrsqrt.f32 %v5020_v53  ;;  %v5019_v24 = vadd.f32 1e-05, %v5015_v21 }
0x1c1c   : > { %10107 = vrsqrt.f32 %v5019_v24 }
0x1c27   : > { %v10106_v30 = vpop.eup %10105 }
0x1c28   : > { %v5028_v33 = vmul.f32 %v10106_v30, %v4996_v12  ;;  %v5272_v12 = vld [vmem:[%s10578_s25 + $0x28] sm:$0xff] }
0x1c29   : > { %v10108_v34 = vpop.eup %10107 }
0x1c2a   : > { %v5027_v40 = vmul.f32 %v10108_v34, %v4995_v63  ;;  %v5038_v28 = vmul.f32 %v11185_v31, %v5028_v33  ;;  %v5270_v63 = vld [vmem:[%s10578_s25 + $0x18] sm:$0xff]  ;;  %s12406_s25 = scalar_lea.vmem %s10445_s6, %s10544_s0 }
0x1c2c   : > { %v5037_v58 = vmul.f32 %v11185_v31, %v5027_v40  ;;  %v5048_v44 = vadd.f32 %v11191_v41, %v5038_v28 }
0x1c2e   : > { %v5047_v43 = vadd.f32 %v11191_v41, %v5037_v58 }
0x1c30   : > { %9617 = vmatprep.mubr.msk.f32.mxu1 %vm1320_vm1, %v5047_v43 }
0x1c31   : > { %9618 = vmatmul.mubr.msk.f32.vlgmr.msra.gmra.mxu1 %vm1320_vm1, %v5048_v44 }
0x1c32   : > { %9624 = vmatpush3.msra.mxu1 %v5274_v13 }
0x1c33   : > { %9625 = vmatprep.subr.mxu1 %v5273_v37 }
0x1c34   : > { %9626 = vmatpush3.msra.mxu1 %v5273_v37 }
0x1c35   : > { %9627 = vmatprep.subr.mxu1 %v5272_v12 }
0x1c36   : > { %9628 = vmatpush3.msra.mxu1 %v5272_v12 }
0x1c37   : > { %9629 = vmatprep.subr.mxu1 %v5271_v29 }
0x1c38   : > { %9630 = vmatpush3.msra.mxu1 %v5271_v29 }
0x1c39   : > { %9631 = vmatprep.subr.mxu1 %v5270_v63 }
0x1c3a   : > { %9632 = vmatpush3.msra.mxu1 %v5270_v63 }
0x1c3b   : > { %9633 = vmatprep.subr.mxu1 %v5269_v0 }
0x1c3c   : > { %9634 = vmatpush3.msra.mxu1 %v5269_v0 }
0x1c3d   : > { %9635 = vmatprep.subr.mxu1 %v5268_v4 }
0x1c3e   : > { %9636 = vmatpush3.msra.mxu1 %v5268_v4 }
0x1c3f   : > { %9637 = vmatprep.subr.mxu1 %v5267_v45 }
0x1c40   : > { %9638 = vmatpush3.msra.mxu1 %v5267_v45  ;;  %v10367_v45 = vmov -1.0  }
0x1c41   : > { %9645 = vmatprep.subr.mxu1 %v10366_v16 }
0x1c54   : > { %v9597_v36 = vpop.f32.mrf.mxu0 }
0x1c55   : > { %v4887_v32 = vadd.f32 %v9597_v36, %v11157_v27 }
0x1c56   : > { %v4877_v47 = vpop.f32.mrf.mxu0 }
0x1c57   : > { %v4886_v48 = vadd.f32 %v4877_v47, %v11159_v46  ;;  %v10284_v46 = vld [vmem:[#allocation2 + $0x10] sm:$0xff] }
0x1c59   : > { %9606 = vmatprep.mubr.msk.f32.mxu0 %vm1320_vm1, %v4886_v48 }
0x1c5a   : > { %9607 = vmatmul.mubr.msk.f32.vlgmr.msra.gmra.mxu0 %vm1320_vm1, %v4887_v32 }
0x1cf1   : > { %v9619_v5 = vpop.f32.mrf.mxu1 }
0x1cf2   : > { %v11242_v8 = vadd.f32 %v9619_v5, %v11236_v6 }
0x1cf3   : > { %v5140_v39 = vpop.f32.mrf.mxu1 }
0x1cf4   : > { %v11239_v7 = vadd.f32 %v11236_v6, %v5140_v39  ;;  %v5164_v19 = vmul.f32 0.70710677, %v11242_v8 }
0x1cf6   : > { %v5163_v9 = vmul.f32 0.70710677, %v11239_v7  ;;  %v5176_v42 = vand.u32 2147483647, %v5164_v19  ;;  %vm5168_vm11 = vcmp.ge.f32.partialorder %v5164_v19, 0.0  ;;  %v5159_v19 = vmul.f32 0.5, %v11239_v7 }
0x1cf8   : > { %v5175_v20 = vand.u32 2147483647, %v5163_v9  ;;  %v5180_v51 = vmul.f32 0.3275911, %v5176_v42  ;;  %v5232_v36 = vsub.f32 0.0, %v5176_v42  ;;  %vm5167_vm10 = vcmp.ge.f32.partialorder %v5163_v9, 0.0 }
0x1cf9   : > { %v5171_v5 = vsel %vm5167_vm10, 1.0, %v10367_v45 }
0x1cfa   : > { %v5179_v49 = vmul.f32 0.3275911, %v5175_v20  ;;  %v5184_v53 = vadd.f32 1.0, %v5180_v51  ;;  %v5231_v58 = vsub.f32 0.0, %v5175_v20 }
0x1cfc   : > { %v5183_v22 = vadd.f32 1.0, %v5179_v49  ;;  %v5235_v47 = vmul.f32 %v5231_v58, %v5175_v20  ;;  %v5172_v49 = vsel %vm5168_vm11, 1.0, %v10367_v45  ;;  %v11268_v58 = vld [vmem:[%s12406_s25] ss:$0 sm:$0xff] }
0x1cfe   : > { %10109 = vrcp.f32 %v5183_v22 }
0x1cff   : > { %10111 = vrcp.f32 %v5184_v53 }
0x1d0b   : > { %v10110_v21 = vpop.eup %10109 }
0x1d0c   : > { %v10112_v24 = vpop.eup %10111  ;;  %v5195_v30 = vmul.f32 1.0614054, %v10110_v21 }
0x1d0d   : > { %v5196_v33 = vmul.f32 1.0614054, %v10112_v24 }
0x1d0e   : > { %v5199_v34 = vadd.f32 -1.4531521, %v5195_v30 }
0x1d0f   : > { %v5200_v40 = vadd.f32 -1.4531521, %v5196_v33 }
0x1d10   : > { %v5203_v28 = vmul.f32 %v10110_v21, %v5199_v34 }
0x1d11   : > { %v5204_v43 = vmul.f32 %v10112_v24, %v5200_v40 }
0x1d12   : > { %v5207_v44 = vadd.f32 1.4214138, %v5203_v28 }
0x1d13   : > { %v5208_v48 = vadd.f32 1.4214138, %v5204_v43 }
0x1d14   : > { %v5211_v32 = vmul.f32 %v10110_v21, %v5207_v44 }
0x1d1a   : > { %v9608_v50 = vpop.f32.mrf.mxu0 }
0x1d1b   : > { %v11203_v38 = vadd.f32 %v9608_v50, %v11011_v62  ;;  %v5236_v50 = vmul.f32 %v5232_v36, %v5176_v42 }
0x1d1c   : > { %v4960_v52 = vpop.f32.mrf.mxu0 }
0x1d1d   : > { %v4970_v25 = vadd.f32 %v10283_v26, %v11203_v38  ;;  %v11207_v54 = vadd.f32 %v11011_v62, %v4960_v52  ;;  %v5239_v52 = vmul.f32 1.442695, %v5235_v47  ;;  %v5212_v26 = vmul.f32 %v10112_v24, %v5208_v48 }
0x1d1f   : > { %4972 = vst.msk [vmem:[#allocation2 + $0x18] sm:$0xff] %vm1320_vm1, %v4970_v25  ;;  %v4969_v27 = vadd.f32 %v10284_v46, %v11207_v54  ;;  %v5215_v25 = vadd.f32 -0.28449672, %v5211_v32  ;;  %v5241_v46 = vmul.f32 1.442695, %v5236_v50  ;;  %10113 = vpow2.f32 %v5239_v52 }
0x1d21   : > { %4971 = vst.msk [vmem:[#allocation2 + $0x10] sm:$0xff] %vm1320_vm1, %v4969_v27  ;;  %v5216_v27 = vadd.f32 -0.28449672, %v5212_v26  ;;  %10115 = vpow2.f32 %v5241_v46 }
0x1d26   : > { %v4976_v17 = vld [vmem:[#allocation2 + $0x18] sm:$0xff] }
0x1d27   : > { %v4988_v3 = vsel %vm1320_vm1, %v4976_v17, 0.0 }
0x1d28   : > { %4989 = vadd.xlane.f32.xlu1 %v4988_v3  ;;  %v4975_v55 = vld [vmem:[#allocation2 + $0x10] sm:$0xff] }
0x1d29   : > { %v4985_v23 = vsel %vm1320_vm1, %v4975_v55, 0.0 }
0x1d2a   : > { %4986 = vadd.xlane.f32.xlu0 %v4985_v23  ;;  %v5220_v23 = vmul.f32 %v10112_v24, %v5216_v27 }
0x1db1   : > { %v4990_v56 = vpop.xlane.xlu1 %4989 }
0x1db2   : > { %v4994_v62 = vmul.f32 0.03125, %v4990_v56 }
0x1db3   : > { %v4987_v57 = vpop.xlane.xlu0 %4986 }
0x1db4   : > { %v11214_v1 = vsub.f32 %v4976_v17, %v4994_v62  ;;  %v4993_v59 = vmul.f32 0.03125, %v4987_v57  ;;  %v5219_v17 = vmul.f32 %v10110_v21, %v5215_v25 }
0x1db6   : > { %v11216_v60 = vsub.f32 %v4975_v55, %v4993_v59  ;;  %v5002_v18 = vmul.f32 %v11214_v1, %v11214_v1  ;;  %v5223_v62 = vadd.f32 0.2548296, %v5219_v17 }
0x1db8   : > { %v5012_v61 = vsel %vm1320_vm1, %v5002_v18, 0.0  ;;  %v5001_v35 = vmul.f32 %v11216_v60, %v11216_v60 }
0x1db9   : > { %5013 = vadd.xlane.f32.xlu1 %v5012_v61  ;;  %v5224_v61 = vadd.f32 0.2548296, %v5220_v23 }
0x1dba   : > { %v5009_v14 = vsel %vm1320_vm1, %v5001_v35, 0.0  ;;  %v5227_v35 = vmul.f32 %v10110_v21, %v5223_v62 }
0x1dbb   : > { %5010 = vadd.xlane.f32.xlu0 %v5009_v14  ;;  %v10114_v14 = vpop.eup %10113  ;;  %v5228_v13 = vmul.f32 %v10112_v24, %v5224_v61 }
0x1dbc   : > { %v5247_v37 = vmul.f32 %v10114_v14, %v5227_v35  ;;  %v10116_v12 = vpop.eup %10115 }
0x1dbd   : > { %v5248_v29 = vmul.f32 %v10116_v12, %v5228_v13 }
0x1dbe   : > { %v5251_v63 = vsub.f32 1.0, %v5247_v37 }
0x1dbf   : > { %v5252_v4 = vsub.f32 1.0, %v5248_v29 }
0x1dc0   : > { %v5255_v39 = vmul.f32 %v5251_v63, %v5171_v5 }
0x1dc1   : > { %v5256_v22 = vmul.f32 %v5252_v4, %v5172_v49 }
0x1dc2   : > { %v5259_v21 = vadd.f32 1.0, %v5255_v39 }
0x1dc3   : > { %v5260_v30 = vadd.f32 1.0, %v5256_v22 }
0x1dc4   : > { %v5263_v33 = vmul.f32 %v5259_v21, %v5159_v19 }
0x1e42   : > { %v5014_v3 = vpop.xlane.xlu1 %5013 }
0x1e43   : > { %v5018_v55 = vmul.f32 0.03125, %v5014_v3 }
0x1e44   : > { %v5011_v56 = vpop.xlane.xlu0 %5010 }
0x1e45   : > { %v5022_v57 = vadd.f32 1e-05, %v5018_v55  ;;  %v5017_v59 = vmul.f32 0.03125, %v5011_v56 }
0x1e47   : > { %10117 = vrsqrt.f32 %v5022_v57  ;;  %v5021_v18 = vadd.f32 1e-05, %v5017_v59 }
0x1e49   : > { %10119 = vrsqrt.f32 %v5021_v18 }
0x1e54   : > { %v10118_v0 = vpop.eup %10117 }
0x1e55   : > { %v5030_v20 = vmul.f32 %v10118_v0, %v11214_v1 }
0x1e56   : > { %v10120_v42 = vpop.eup %10119 }
0x1e57   : > { %v5029_v51 = vmul.f32 %v10120_v42, %v11216_v60  ;;  %v5040_v53 = vmul.f32 %v11185_v31, %v5030_v20  ;;  %v5160_v60 = vmul.f32 0.5, %v11242_v8 }
0x1e59   : > { %v5039_v9 = vmul.f32 %v11185_v31, %v5029_v51  ;;  %v5050_v1 = vadd.f32 %v11191_v41, %v5040_v53  ;;  %v5264_v31 = vmul.f32 %v5260_v30, %v5160_v60 }
0x1e5b   : > { %v5049_v24 = vadd.f32 %v11191_v41, %v5039_v9 }
0x1e5d   : > { %9620 = vmatprep.mubr.msk.f32.mxu1 %vm1320_vm1, %v5049_v24 }
0x1e5e   : > { %9621 = vmatmul.mubr.msk.f32.gmra.mxu1 %vm1320_vm1, %v5050_v1 }
0x1e5f   : > { %9639 = vmatprep.mubr.msk.f32.mxu1 %vm5282_vm13, %v5263_v33 }
0x1e62   : > { %9640 = vmatmul.mubr.msk.f32.vlgmr.msra.gmra.mxu1 %vm5282_vm13, %v5264_v31 }
0x1f1e   : > { %v9622_v7 = vpop.f32.mrf.mxu1 }
0x1f1f   : > { %v11261_v34 = vadd.f32 %v9622_v7, %v11236_v6 }
0x1f20   : > { %v5150_v40 = vpop.f32.mrf.mxu1 }
0x1f21   : > { %v5166_v41 = vmul.f32 0.70710677, %v11261_v34  ;;  %v5151_v28 = vadd.f32 %v11236_v6, %v5150_v40 }
0x1f22   : > { %v9641_v8 = vpop.f32.mrf.mxu1 }
0x1f23   : > { %v5178_v43 = vand.u32 2147483647, %v5166_v41  ;;  %v5165_v44 = vmul.f32 0.70710677, %v5151_v28  ;;  %v11271_v36 = vadd.f32 %v9641_v8, %v11268_v58  ;;  %vm5170_vm14 = vcmp.ge.f32.partialorder %v5166_v41, 0.0 }
0x1f24   : > { %v5361_v47 = vpop.f32.mrf.mxu1  ;;  %v5174_v19 = vsel %vm5170_vm14, 1.0, %v10367_v45  ;;  %v5161_v7 = vmul.f32 0.5, %v5151_v28  ;;  %v5162_v8 = vmul.f32 0.5, %v11261_v34 }
0x1f25   : > { %v5182_v48 = vmul.f32 0.3275911, %v5178_v43  ;;  %v5177_v32 = vand.u32 2147483647, %v5165_v44  ;;  %v11274_v50 = vadd.f32 %v11268_v58, %v5361_v47  ;;  %v5385_v52 = vsel %vm1320_vm1, %v11271_v36, 0.0 }
0x1f26   : > { %5386 = vadd.xlane.f32.xlu1 %v5385_v52  ;;  %v5234_v27 = vsub.f32 0.0, %v5178_v43  ;;  %vm5169_vm15 = vcmp.ge.f32.partialorder %v5165_v44, 0.0 }
0x1f27   : > { %v5186_v26 = vadd.f32 1.0, %v5182_v48  ;;  %v5181_v6 = vmul.f32 0.3275911, %v5177_v32  ;;  %v5382_v25 = vsel %vm1320_vm1, %v11274_v50, 0.0  ;;  %v5233_v17 = vsub.f32 0.0, %v5177_v32 }
0x1f28   : > { %5383 = vadd.xlane.f32.xlu0 %v5382_v25  ;;  %v5238_v3 = vmul.f32 %v5234_v27, %v5178_v43  ;;  %v5173_v33 = vsel %vm5169_vm15, 1.0, %v10367_v45  ;;  %v11295_v27 = vld [vmem:[%s10585_s29 + $0x10] sm:$0xff] }
0x1f29   : > { %10121 = vrcp.f32 %v5186_v26  ;;  %v5185_v46 = vadd.f32 1.0, %v5181_v6  ;;  %v5237_v23 = vmul.f32 %v5233_v17, %v5177_v32 }
0x1f2a   : > { %v5245_v62 = vmul.f32 1.442695, %v5238_v3 }
0x1f2b   : > { %10123 = vrcp.f32 %v5185_v46  ;;  %v5243_v61 = vmul.f32 1.442695, %v5237_v23  ;;  %v11290_v46 = vld [vmem:[%s10585_s29 + $0x18] sm:$0xff] }
0x1f2c   : > { %10125 = vpow2.f32 %v5245_v62  ;;  %9646 = vmatpush3.msra.mxu1 %v11290_v46 }
0x1f2d   : > { %10127 = vpow2.f32 %v5243_v61  ;;  %9647 = vmatprep.subr.mxu1 %v10366_v16 }
0x1f2e   : > { %9648 = vmatpush3.msra.mxu1 %v11295_v27 }
0x1f2f   : > { %9649 = vmatprep.subr.mxu1 %v10366_v16 }
0x1f36   : > { %v10122_v55 = vpop.eup %10121 }
0x1f37   : > { %v5198_v56 = vmul.f32 1.0614054, %v10122_v55 }
0x1f38   : > { %v10124_v57 = vpop.eup %10123 }
0x1f39   : > { %v5202_v59 = vadd.f32 -1.4531521, %v5198_v56  ;;  %v5197_v18 = vmul.f32 1.0614054, %v10124_v57  ;;  %v10126_v49 = vpop.eup %10125 }
0x1f3a   : > { %v10128_v21 = vpop.eup %10127 }
0x1f3b   : > { %v5206_v35 = vmul.f32 %v10122_v55, %v5202_v59  ;;  %v5201_v14 = vadd.f32 -1.4531521, %v5197_v18  ;;  %v11315_v59 = vld [vmem:[%s1261_s4] ss:$0 sm:$0xff] }
0x1f3d   : > { %v5210_v13 = vadd.f32 1.4214138, %v5206_v35  ;;  %v5205_v37 = vmul.f32 %v10124_v57, %v5201_v14  ;;  %v11320_v35 = vld [vmem:[%s1264_s16] ss:$0 sm:$0xff] }
0x1f3f   : > { %v5214_v12 = vmul.f32 %v10122_v55, %v5210_v13  ;;  %v5209_v29 = vadd.f32 1.4214138, %v5205_v37 }
0x1f41   : > { %v5218_v63 = vadd.f32 -0.28449672, %v5214_v12  ;;  %v5213_v0 = vmul.f32 %v10124_v57, %v5209_v29 }
0x1f43   : > { %v5222_v4 = vmul.f32 %v10122_v55, %v5218_v63  ;;  %v5217_v5 = vadd.f32 -0.28449672, %v5213_v0 }
0x1f45   : > { %v5226_v39 = vadd.f32 0.2548296, %v5222_v4  ;;  %v5221_v20 = vmul.f32 %v10124_v57, %v5217_v5 }
0x1f47   : > { %v5230_v42 = vmul.f32 %v10122_v55, %v5226_v39  ;;  %v5225_v51 = vadd.f32 0.2548296, %v5221_v20 }
0x1f49   : > { %v5250_v22 = vmul.f32 %v10126_v49, %v5230_v42  ;;  %v5229_v53 = vmul.f32 %v10124_v57, %v5225_v51 }
0x1f4b   : > { %v5254_v9 = vsub.f32 1.0, %v5250_v22  ;;  %v5249_v24 = vmul.f32 %v10128_v21, %v5229_v53 }
0x1f4d   : > { %v5258_v30 = vmul.f32 %v5254_v9, %v5174_v19  ;;  %v5253_v1 = vsub.f32 1.0, %v5249_v24 }
0x1f4f   : > { %v5257_v60 = vmul.f32 %v5253_v1, %v5173_v33  ;;  %v5262_v31 = vadd.f32 1.0, %v5258_v30 }
0x1f51   : > { %v5261_v40 = vadd.f32 1.0, %v5257_v60  ;;  %v5266_v41 = vmul.f32 %v5262_v31, %v5162_v8  ;;  %v5458_v60 = vld [vmem:[%s10589_s23] sm:$0x1] }
0x1f52   : > { %v5459_v8 = vld [vmem:[%s10593_s27] sm:$0x1] }
0x1f53   : > { %v5265_v43 = vmul.f32 %v5261_v40, %v5161_v7 }
0x1f55   : > { %9642 = vmatprep.mubr.msk.f32.mxu1 %vm5282_vm13, %v5265_v43 }
0x1f56   : > { %9643 = vmatmul.mubr.msk.f32.gmra.mxu1 %vm5282_vm13, %v5266_v41 }
0x1f57   : > { %9653 = vmatprep.mubr.msk.f32.mxu1 %vm10368_vm0, %v10366_v16 }
0x1faf   : > { %v5387_v44 = vpop.xlane.xlu1 %5386 }
0x1fb0   : > { %v5395_v47 = vmul.f32 0.03125, %v5387_v44 }
0x1fb1   : > { %v5384_v48 = vpop.xlane.xlu0 %5383 }
0x1fb2   : > { %v5399_v32 = vsub.f32 %v11271_v36, %v5395_v47  ;;  %v5394_v52 = vmul.f32 0.03125, %v5384_v48  ;;  %v11300_v36 = vld [vmem:[%s10585_s29 + $0x8] sm:$0xff] }
0x1fb3   : > { %9650 = vmatpush3.msra.mxu1 %v11300_v36 }
0x1fb4   : > { %v5398_v28 = vsub.f32 %v11274_v50, %v5394_v52  ;;  %v5403_v26 = vmul.f32 %v5399_v32, %v5399_v32  ;;  %9651 = vmatprep.subr.mxu1 %v10366_v16  ;;  %v11305_v50 = vld [vmem:[%s10585_s29] sm:$0xff] }
0x1fb5   : > { %9652 = vmatpush3.msra.mxu1 %v11305_v50 }
0x1fb6   : > { %v5409_v34 = vsel %vm1320_vm1, %v5403_v26, 0.0  ;;  %v5402_v6 = vmul.f32 %v5398_v28, %v5398_v28 }
0x1fb7   : > { %5410 = vadd.xlane.f32.xlu1 %v5409_v34  ;;  %v5460_v34 = vld [vmem:[%s10597_s3] sm:$0x1] }
0x1fb8   : > { %v5406_v25 = vsel %vm1320_vm1, %v5402_v6, 0.0 }
0x1fb9   : > { %5407 = vadd.xlane.f32.xlu0 %v5406_v25 }
0x1fea   : > { %5715 = vxpose.xlu1.b32.start [1/2] (short) (narrow) %v11018_v15, 32 }
0x1fee   : > { %5716 = vxpose.xlu1.b32.end [2/2] (short) (narrow) %v11014_v2, 32 }
0x2016   : > { %v11353_v1 = vpop.f32.mrf.mxu1 }
0x2018   : > { %v11355_v33 = vpop.f32.mrf.mxu1 }
0x2040   : > { %v5411_v17 = vpop.xlane.xlu1 %5410 }
0x2041   : > { %v5419_v3 = vmul.f32 0.03125, %v5411_v17 }
0x2042   : > { %v5408_v55 = vpop.xlane.xlu0 %5407 }
0x2043   : > { %v5423_v23 = vadd.f32 1e-05, %v5419_v3  ;;  %v5418_v56 = vmul.f32 0.03125, %v5408_v55 }
0x2045   : > { %10129 = vrsqrt.f32 %v5423_v23  ;;  %v5422_v62 = vadd.f32 1e-05, %v5418_v56 }
0x2047   : > { %10131 = vrsqrt.f32 %v5422_v62 }
0x2052   : > { %v10130_v57 = vpop.eup %10129 }
0x2053   : > { %v5431_v18 = vmul.f32 %v10130_v57, %v5399_v32 }
0x2054   : > { %v10132_v61 = vpop.eup %10131 }
0x2055   : > { %v5441_v15 = vmul.f32 %v11315_v59, %v5431_v18  ;;  %v5430_v2 = vmul.f32 %v10132_v61, %v5398_v28 }
0x2057   : > { %v11324_v14 = vadd.f32 %v11320_v35, %v5441_v15  ;;  %v5440_v13 = vmul.f32 %v11315_v59, %v5430_v2  ;;  %v5462_v15 = vshrl.u32 %v1678_v10, 7 }
0x2059   : > { %v11328_v37 = vadd.f32 %v11320_v35, %v5440_v13  ;;  %9656 = vmatprep.subr.mxu1 %v11324_v14  ;;  %v5479_v29 = vsel %vm1320_vm1, %v11324_v14, 0.0  ;;  %v5465_v2 = vadd.s32 24, %v5462_v15  ;;  %v5464_v13 = vadd.s32 16, %v5462_v15 }
0x205a   : > { %vm5466_vm6 = vcmp.eq.s32.totalorder %v5462_v15, %v10668_v11 }
0x205b   : > { %5586 = vxpose.xlu0.b32.start [1/2] (short) (narrow) %v11328_v37, 32  ;;  %v5478_v12 = vsel %vm1320_vm1, %v11328_v37, 0.0  ;;  %vm5469_vm3 = vcmp.eq.s32.totalorder %v5465_v2, %v10668_v11  ;;  %vm5468_vm4 = vcmp.eq.s32.totalorder %v5464_v13, %v10668_v11 }
0x205c   : > { %v5480_v63 = vadd.f32 %v5479_v29, %v5478_v12  ;;  %v5463_v12 = vadd.s32 8, %v5462_v15  ;;  %v11371_v29 = vsel %vm5469_vm3, 1.0, %v10366_v16 }
0x205e   : > { %v5481_v0 = vrot.slane %v5480_v63, 4  ;;  %vm5467_vm5 = vcmp.eq.s32.totalorder %v5463_v12, %v10668_v11 }
0x205f   : > { %5587 = vxpose.xlu0.b32.end [2/2] (short) (narrow) %v11324_v14, 32 }
0x2060   : > { %v5482_v4 = vadd.f32 %v5481_v0, %v5480_v63  ;;  %v11374_v63 = vsel %vm5468_vm4, 1.0, %v10366_v16 }
0x2062   : > { %v5483_v5 = vrot.slane %v5482_v4, 2 }
0x2064   : > { %v5484_v39 = vadd.f32 %v5483_v5, %v5482_v4  ;;  %v11380_v5 = vsel %vm5467_vm5, 1.0, %v10366_v16 }
0x2066   : > { %v5485_v20 = vrot.slane %v5484_v39, 1  ;;  %v5731_v22 = vpop.trf.xlu1 }
0x2068   : > { %v5486_v42 = vadd.f32 %v5485_v20, %v5484_v39 }
0x206a   : > { %v5488_v49 = vmul.f32 0.0625, %v5486_v42  ;;  %v5732_v21 = vpop.trf.xlu1 }
0x206c   : > { %9654 = vmatmul.mubr.msk.f32.vlgmr.msra.gmra.mxu1 %vm1320_vm1, %v5488_v49  ;;  %v11393_v49 = vsel %vm5466_vm6, 1.0, %v10366_v16 }
0x206d   : > { %9657 = vmatpush3.msra.mxu1 %v11324_v14 }
0x206e   : > { %9658 = vmatprep.subr.mxu1 %v11328_v37  ;;  %v5733_v24 = vpop.trf.xlu1 }
0x206f   : > { %9659 = vmatpush3.msra.mxu1 %v11328_v37 }
0x2070   : > { %9666 = vmatprep.subr.mxu1 %v11324_v14 }
0x2072   : > { %v5734_v30 = vpop.trf.xlu1 }
0x20d7   : > { %v5602_v51 = vpop.trf.xlu0 }
0x20d8   : > { %9660 = vmatprep.mubr.msk.f32.mxu1 %vm1811_vm12, %v5602_v51 }
0x20db   : > { %v5603_v53 = vpop.trf.xlu0 }
0x20dc   : > { %9661 = vmatmul.mubr.msk.f32.vlgmr.msra.gmra.mxu1 %vm1811_vm12, %v5603_v53 }
0x20dd   : > { %9667 = vmatpush3.msra.mxu1 %v11324_v14 }
0x20de   : > { %9668 = vmatprep.subr.mxu1 %v11328_v37 }
0x20df   : > { %9669 = vmatpush3.msra.mxu1 %v11328_v37  ;;  %v5604_v9 = vpop.trf.xlu0 }
0x20e0   : > { %9663 = vmatprep.mubr.msk.f32.mxu1 %vm1811_vm12, %v5604_v9 }
0x20e3   : > { %v5605_v19 = vpop.trf.xlu0 }
0x20e4   : > { %9664 = vmatmul.mubr.msk.f32.gmra.mxu1 %vm1811_vm12, %v5605_v19 }
0x20e5   : > { %9670 = vmatprep.mubr.msk.f32.mxu1 %vm1811_vm12, %v5731_v22 }
0x20e8   : > { %9671 = vmatmul.mubr.msk.f32.vlgmr.msra.gmra.mxu1 %vm1811_vm12, %v5732_v21 }
0x20e9   : > { %9673 = vmatprep.mubr.msk.f32.mxu1 %vm1811_vm12, %v5733_v24 }
0x20ec   : > { %9674 = vmatmul.mubr.msk.f32.gmra.mxu1 %vm1811_vm12, %v5734_v30 }
0x212c   : > { %v5558_v31 = vpop.f32.mrf.mxu1 }
0x212d   : > { %v5559_v7 = vadd.f32 %v5558_v31, %v5458_v60 }
0x212e   : > { %v9655_v40 = vpop.f32.mrf.mxu1 }
0x212f   : > { %v5562_v43 = vmax.f32 %v5559_v7, 0.0 }
0x2131   : > { %v5563_v41 = vmul.f32 %v5562_v43, %v5459_v8 }
0x2133   : > { %v5565_v44 = vsel %vm5564_vm2, %v5563_v41, 0.0 }
0x2134   : > { %5566 = vadd.xlane.f32.xlu0 %v5565_v44 }
0x219c   : > { %v9662_v47 = vpop.f32.mrf.mxu1 }
0x219e   : > { %v5696_v48 = vpop.f32.mrf.mxu1 }
0x21a4   : > { %v9665_v32 = vpop.f32.mrf.mxu1 }
0x21a6   : > { %v5706_v52 = vpop.f32.mrf.mxu1 }
0x21a8   : > { %v11360_v28 = vpop.f32.mrf.mxu1 }
0x21a9   : > { %v5954_v44 = vmul.f32 %v11360_v28, %v11360_v28 }
0x21aa   : > { %v11362_v26 = vpop.f32.mrf.mxu1 }
0x21ab   : > { %9684 = vmatprep.mubr.msk.f32.mxu0 %vm1320_vm1, %v11362_v26 }
0x21ac   : > { %v11424_v53 = vpop.f32.mrf.mxu1 }
0x21ae   : > { %v11434_v21 = vpop.f32.mrf.mxu1 }
0x21bd   : > { %v5567_v6 = vpop.xlane.xlu0 %5566 }
0x21be   : > { %v5568_v25 = vadd.f32 %v5567_v6, %v5460_v34  ;;  %v5955_v6 = vmul.f32 %v11434_v21, %v11434_v21 }
0x21c0   : > { %v5570_v17 = vand.u32 2147483647, %v5568_v25  ;;  %v5569_v57 = vmax.f32 %v5568_v25, 0.0 }
0x21c2   : > { %v5571_v3 = vsub.f32 0.0, %v5570_v17  ;;  %v5963_v17 = vsel %vm1320_vm1, %v5955_v6, 0.0 }
0x21c4   : > { %v5572_v55 = vmul.f32 1.442695, %v5571_v3 }
0x21c6   : > { %10133 = vpow2.f32 %v5572_v55 }
0x21d3   : > { %v10134_v23 = vpop.eup %10133 }
0x21d4   : > { %v5574_v56 = vadd.f32 1.0, %v10134_v23 }
0x21d6   : > { %10135 = vlog2.f32 %v5574_v56 }
0x21e3   : > { %v10136_v62 = vpop.eup %10135 }
0x21e4   : > { %v5576_v18 = vmul.f32 0.6931472, %v10136_v62 }
0x21e6   : > { %v5577_v61 = vadd.f32 %v5576_v18, %v5569_v57 }
0x21e8   : > { %9915 = vpush %v5577_v61 }
0x2219   : > { %s9916_s29 = spop %9915 }
0x221a   : > { %v5580_v0 = vstv %s9916_s29 }
0x221b   : > { %v5585_v4 = vmul.f32 %v11371_v29, %v5580_v0  ;;  %v5584_v10 = vmul.f32 %v11374_v63, %v5580_v0  ;;  %v5583_v20 = vmul.f32 %v11380_v5, %v5580_v0  ;;  %v5582_v11 = vmul.f32 %v11393_v49, %v5580_v0 }
0x221d   : > { %v11383_v39 = vadd.f32 %v9665_v32, %v5585_v4  ;;  %v11386_v42 = vadd.f32 %v5706_v52, %v5584_v10  ;;  %v11404_v51 = vadd.f32 %v9662_v47, %v5583_v20  ;;  %v11414_v22 = vadd.f32 %v5696_v48, %v5582_v11 }
0x221e   : > { %v5953_v48 = vmul.f32 %v11362_v26, %v11362_v26  ;;  %v5960_v32 = vsel %vm1320_vm1, %v5954_v44, 0.0  ;;  %v5956_v52 = vmul.f32 %v11424_v53, %v11424_v53 }
0x221f   : > { %9676 = vmatprep.subr.msk.mxu0 %vm1320_vm1, %v11383_v39  ;;  %9690 = vmatprep.subr.msk.mxu1 %vm1320_vm1, %v11383_v39 }
0x2220   : > { %9677 = vmatpush3.xpose.msk.msra.mxu0 %vm1320_vm1, %v11383_v39  ;;  %9691 = vmatpush3.xpose.msk.msra.mxu1 %vm1320_vm1, %v11383_v39  ;;  %v5957_v34 = vsel %vm1320_vm1, %v5953_v48, 0.0  ;;  %v5966_v25 = vsel %vm1320_vm1, %v5956_v52, 0.0 }
0x2221   : > { %9678 = vmatprep.subr.msk.mxu0 %vm1320_vm1, %v11386_v42  ;;  %9692 = vmatprep.subr.msk.mxu1 %vm1320_vm1, %v11386_v42 }
0x2224   : > { %9679 = vmatpush3.xpose.msk.msra.mxu0 %vm1320_vm1, %v11386_v42  ;;  %9693 = vmatpush3.xpose.msk.msra.mxu1 %vm1320_vm1, %v11386_v42 }
0x2225   : > { %9680 = vmatprep.subr.msk.mxu0 %vm1320_vm1, %v11404_v51  ;;  %9694 = vmatprep.subr.msk.mxu1 %vm1320_vm1, %v11404_v51 }
0x2228   : > { %9681 = vmatpush3.xpose.msk.msra.mxu0 %vm1320_vm1, %v11404_v51  ;;  %9695 = vmatpush3.xpose.msk.msra.mxu1 %vm1320_vm1, %v11404_v51 }
0x2229   : > { %9682 = vmatprep.subr.msk.mxu0 %vm1320_vm1, %v11414_v22  ;;  %9696 = vmatprep.subr.msk.mxu1 %vm1320_vm1, %v11414_v22 }
0x222c   : > { %9683 = vmatpush3.xpose.msk.msra.mxu0 %vm1320_vm1, %v11414_v22  ;;  %9697 = vmatpush3.xpose.msk.msra.mxu1 %vm1320_vm1, %v11414_v22 }
0x222d   : > { %9704 = vmatprep.subr.msk.mxu0 %vm1320_vm1, %v11383_v39  ;;  %9718 = vmatprep.subr.msk.mxu1 %vm1320_vm1, %v11383_v39 }
0x222f   : > { %9685 = vmatmul.mubr.msk.f32.vlgmr.msra.gmra.mxu0 %vm1320_vm1, %v11360_v28 }
0x2230   : > { %9705 = vmatpush3.xpose.msk.msra.mxu0 %vm1320_vm1, %v11383_v39  ;;  %9687 = vmatprep.mubr.msk.f32.mxu0 %vm1320_vm1, %v11434_v21 }
0x2231   : > { %9706 = vmatprep.subr.msk.mxu0 %vm1320_vm1, %v11386_v42 }
0x2233   : > { %9688 = vmatmul.mubr.msk.f32.gmra.mxu0 %vm1320_vm1, %v11424_v53 }
0x2234   : > { %9707 = vmatpush3.xpose.msk.msra.mxu0 %vm1320_vm1, %v11386_v42 }
0x2235   : > { %9708 = vmatprep.subr.msk.mxu0 %vm1320_vm1, %v11404_v51 }
0x2238   : > { %9709 = vmatpush3.xpose.msk.msra.mxu0 %vm1320_vm1, %v11404_v51 }
0x2239   : > { %9710 = vmatprep.subr.msk.mxu0 %vm1320_vm1, %v11414_v22 }
0x223c   : > { %9711 = vmatpush3.xpose.msk.msra.mxu0 %vm1320_vm1, %v11414_v22 }
0x22ef   : > { %v9686_v9 = vpop.f32.mrf.mxu0 }
0x22f0   : > { %v5970_v19 = vmul.f32 %v9686_v9, %v11360_v28 }
0x22f1   : > { %v5934_v24 = vpop.f32.mrf.mxu0 }
0x22f2   : > { %v5969_v30 = vmul.f32 %v5934_v24, %v11362_v26  ;;  %v5976_v60 = vsel %vm1320_vm1, %v5970_v19, 0.0 }
0x22f3   : > { %5977 = vadd.xlane.f32.xlu0 %v5976_v60  ;;  %v9689_v31 = vpop.f32.mrf.mxu0 }
0x22f4   : > { %v5972_v7 = vmul.f32 %v9689_v31, %v11424_v53  ;;  %v5973_v40 = vsel %vm1320_vm1, %v5969_v30, 0.0 }
0x22f5   : > { %5974 = vadd.xlane.f32.xlu1 %v5973_v40  ;;  %v5944_v8 = vpop.f32.mrf.mxu0 }
0x22f6   : > { %v5971_v43 = vmul.f32 %v5944_v8, %v11434_v21  ;;  %v5982_v41 = vsel %vm1320_vm1, %v5972_v7, 0.0 }
0x22f7   : > { %5983 = vadd.xlane.f32.xlu0 %v5982_v41 }
0x22f8   : > { %v5979_v47 = vsel %vm1320_vm1, %v5971_v43, 0.0 }
0x22f9   : > { %5980 = vadd.xlane.f32.xlu1 %v5979_v47 }
0x22fb   : > { %5961 = vadd.xlane.f32.xlu0 %v5960_v32 }
0x22fd   : > { %5958 = vadd.xlane.f32.xlu1 %v5957_v34 }
0x22ff   : > { %5967 = vadd.xlane.f32.xlu0 %v5966_v25 }
0x2301   : > { %5964 = vadd.xlane.f32.xlu1 %v5963_v17 }
0x237c   : > { %v5978_v3 = vpop.xlane.xlu0 %5977 }
0x237d   : > { %v5986_v55 = vadd.f32 1e-08, %v5978_v3 }
0x237e   : > { %v5975_v23 = vpop.xlane.xlu1 %5974 }
0x237f   : > { %10137 = vrcp.f32 %v5986_v55  ;;  %v5985_v56 = vadd.f32 1e-08, %v5975_v23 }
0x2380   : > { %v5984_v62 = vpop.xlane.xlu0 %5983 }
0x2381   : > { %10139 = vrcp.f32 %v5985_v56  ;;  %v5988_v57 = vadd.f32 1e-08, %v5984_v62 }
0x2382   : > { %v5981_v18 = vpop.xlane.xlu1 %5980 }
0x2383   : > { %10141 = vrcp.f32 %v5988_v57  ;;  %v5987_v61 = vadd.f32 1e-08, %v5981_v18 }
0x2384   : > { %v5962_v15 = vpop.xlane.xlu0 %5961 }
0x2385   : > { %10143 = vrcp.f32 %v5987_v61  ;;  %v6030_v17 = vadd.f32 1e-08, %v5962_v15 }
0x2386   : > { %v5959_v13 = vpop.xlane.xlu1 %5958 }
0x2387   : > { %v6029_v3 = vadd.f32 1e-08, %v5959_v13  ;;  %10145 = vrcp.f32 %v6030_v17 }
0x2388   : > { %v5968_v11 = vpop.xlane.xlu0 %5967 }
0x2389   : > { %v6032_v55 = vadd.f32 1e-08, %v5968_v11  ;;  %10147 = vrcp.f32 %v6029_v3 }
0x238a   : > { %v5965_v40 = vpop.xlane.xlu1 %5964 }
0x238b   : > { %v6031_v23 = vadd.f32 1e-08, %v5965_v40  ;;  %10149 = vrcp.f32 %v6032_v55 }
0x238c   : > { %v10138_v2 = vpop.eup %10137 }
0x238d   : > { %v11476_v12 = vmul.f32 %v10138_v2, %v5962_v15  ;;  %10151 = vrcp.f32 %v6031_v23 }
0x238e   : > { %v10140_v0 = vpop.eup %10139 }
0x238f   : > { %v6006_v4 = vmul.f32 %v9686_v9, %v11476_v12  ;;  %v11479_v10 = vmul.f32 %v10140_v0, %v5959_v13 }
0x2390   : > { %v10142_v20 = vpop.eup %10141 }
0x2391   : > { %v11482_v19 = vsub.f32 %v11360_v28, %v6006_v4  ;;  %v6005_v30 = vmul.f32 %v11479_v10, %v5934_v24  ;;  %v11485_v60 = vmul.f32 %v10142_v20, %v5968_v11 }
0x2392   : > { %v10144_v7 = vpop.eup %10143 }
0x2393   : > { %v11488_v43 = vsub.f32 %v11362_v26, %v6005_v30  ;;  %v6008_v41 = vmul.f32 %v9689_v31, %v11485_v60  ;;  %v11491_v44 = vmul.f32 %v10144_v7, %v5965_v40  ;;  %v6014_v9 = vmul.f32 %v11482_v19, %v11482_v19 }
0x2394   : > { %v10146_v56 = vpop.eup %10145 }
0x2395   : > { %v11496_v47 = vsub.f32 %v11424_v53, %v6008_v41  ;;  %v6007_v48 = vmul.f32 %v11491_v44, %v5944_v8  ;;  %v6013_v24 = vmul.f32 %v11488_v43, %v11488_v43  ;;  %v6020_v32 = vsel %vm1320_vm1, %v6014_v9, 0.0 }
0x2396   : > { %6021 = vadd.xlane.f32.xlu0 %v6020_v32  ;;  %v10148_v57 = vpop.eup %10147 }
0x2397   : > { %v11503_v52 = vsub.f32 %v11434_v21, %v6007_v48  ;;  %v6017_v31 = vsel %vm1320_vm1, %v6013_v24, 0.0  ;;  %v6016_v34 = vmul.f32 %v11496_v47, %v11496_v47 }
0x2398   : > { %6018 = vadd.xlane.f32.xlu1 %v6017_v31  ;;  %v10150_v15 = vpop.eup %10149 }
0x2399   : > { %v6026_v6 = vsel %vm1320_vm1, %v6016_v34, 0.0  ;;  %v6015_v8 = vmul.f32 %v11503_v52, %v11503_v52 }
0x239a   : > { %6027 = vadd.xlane.f32.xlu0 %v6026_v6  ;;  %v10152_v20 = vpop.eup %10151 }
0x239b   : > { %v6023_v25 = vsel %vm1320_vm1, %v6015_v8, 0.0 }
0x239c   : > { %6024 = vadd.xlane.f32.xlu1 %v6023_v25 }
0x241f   : > { %v11512_v62 = vpop.xlane.xlu0 %6021 }
0x2420   : > { %v6036_v18 = vmul.f32 %v10146_v56, %v11512_v62 }
0x2421   : > { %v11515_v61 = vpop.xlane.xlu1 %6018 }
0x2422   : > { %v6034_v2 = vmul.f32 %v10148_v57, %v11515_v61  ;;  %v6042_v0 = vmul.f32 %v11360_v28, %v6036_v18 }
0x2423   : > { %v11520_v4 = vpop.xlane.xlu0 %6027 }
0x2424   : > { %v6041_v13 = vmul.f32 %v6034_v2, %v11362_v26  ;;  %v6040_v11 = vmul.f32 %v10150_v15, %v11520_v4  ;;  %v11530_v41 = vadd.f32 %v6042_v0, %v11482_v19 }
0x2425   : > { %v11523_v30 = vpop.xlane.xlu1 %6024 }
0x2426   : > { %v6038_v7 = vmul.f32 %v10152_v20, %v11523_v30  ;;  %v11527_v40 = vadd.f32 %v6041_v13, %v11488_v43  ;;  %v6044_v9 = vmul.f32 %v11424_v53, %v6040_v11 }
0x2428   : > { %v6043_v48 = vmul.f32 %v6038_v7, %v11434_v21  ;;  %9698 = vmatprep.mubr.msk.f32.mxu1 %vm1320_vm1, %v11527_v40  ;;  %v11546_v32 = vadd.f32 %v6044_v9, %v11496_v47  ;;  %v5998_v9 = vmul.f32 %v11360_v28, %v11476_v12 }
0x2429   : > { %9699 = vmatmul.mubr.msk.f32.vlgmr.msra.gmra.mxu1 %vm1320_vm1, %v11530_v41 }
0x242a   : > { %9719 = vmatpush3.xpose.msk.msra.mxu1 %vm1320_vm1, %v11383_v39  ;;  %v11541_v24 = vadd.f32 %v6043_v48, %v11503_v52 }
0x242b   : > { %9720 = vmatprep.subr.msk.mxu1 %vm1320_vm1, %v11386_v42 }
0x242c   : > { %9701 = vmatprep.mubr.msk.f32.mxu1 %vm1320_vm1, %v11541_v24 }
0x242d   : > { %9702 = vmatmul.mubr.msk.f32.gmra.mxu1 %vm1320_vm1, %v11546_v32 }
0x242e   : > { %9721 = vmatpush3.xpose.msk.msra.mxu1 %vm1320_vm1, %v11386_v42 }
0x242f   : > { %9722 = vmatprep.subr.msk.mxu1 %vm1320_vm1, %v11404_v51 }
0x2432   : > { %9723 = vmatpush3.xpose.msk.msra.mxu1 %vm1320_vm1, %v11404_v51 }
0x2433   : > { %9724 = vmatprep.subr.msk.mxu1 %vm1320_vm1, %v11414_v22 }
0x2436   : > { %9725 = vmatpush3.xpose.msk.msra.mxu1 %vm1320_vm1, %v11414_v22 }
0x2437   : > { %9743 = vmatprep.subr.mxu1 %v10366_v16 }
0x24e9   : > { %v9700_v39 = vpop.f32.mrf.mxu1 }
0x24ea   : > { %v6147_v31 = vmul.f32 %v9700_v39, %v11530_v41 }
0x24eb   : > { %v6127_v34 = vpop.f32.mrf.mxu1 }
0x24ec   : > { %v6146_v42 = vmul.f32 %v6127_v34, %v11527_v40  ;;  %v6153_v6 = vsel %vm1320_vm1, %v6147_v31, 0.0 }
0x24ed   : > { %6154 = vadd.xlane.f32.xlu0 %v6153_v6  ;;  %v9703_v8 = vpop.f32.mrf.mxu1 }
0x24ee   : > { %v6149_v51 = vmul.f32 %v9703_v8, %v11546_v32  ;;  %v6150_v25 = vsel %vm1320_vm1, %v6146_v42, 0.0 }
0x24ef   : > { %6151 = vadd.xlane.f32.xlu1 %v6150_v25  ;;  %v6137_v17 = vpop.f32.mrf.mxu1 }
0x24f0   : > { %v6148_v22 = vmul.f32 %v6137_v17, %v11541_v24  ;;  %v6159_v3 = vsel %vm1320_vm1, %v6149_v51, 0.0 }
0x24f1   : > { %6160 = vadd.xlane.f32.xlu0 %v6159_v3 }
0x24f2   : > { %v6156_v55 = vsel %vm1320_vm1, %v6148_v22, 0.0 }
0x24f3   : > { %6157 = vadd.xlane.f32.xlu1 %v6156_v55 }
0x2576   : > { %v6155_v23 = vpop.xlane.xlu0 %6154 }
0x2577   : > { %v6163_v56 = vadd.f32 1e-08, %v6155_v23  ;;  %v5997_v23 = vmul.f32 %v11479_v10, %v11362_v26 }
0x2578   : > { %v6152_v57 = vpop.xlane.xlu1 %6151 }
0x2579   : > { %10153 = vrcp.f32 %v6163_v56  ;;  %v6162_v18 = vadd.f32 1e-08, %v6152_v57 }
0x257a   : > { %v6161_v2 = vpop.xlane.xlu0 %6160 }
0x257b   : > { %10155 = vrcp.f32 %v6162_v18  ;;  %v6165_v0 = vadd.f32 1e-08, %v6161_v2 }
0x257c   : > { %v6158_v15 = vpop.xlane.xlu1 %6157 }
0x257d   : > { %10157 = vrcp.f32 %v6165_v0  ;;  %v6164_v13 = vadd.f32 1e-08, %v6158_v15 }
0x257f   : > { %10159 = vrcp.f32 %v6164_v13 }
0x2586   : > { %v10154_v20 = vpop.eup %10153 }
0x2587   : > { %v6169_v11 = vmul.f32 %v10154_v20, %v11512_v62  ;;  %v6207_v20 = vadd.f32 1e-08, %v11512_v62 }
0x2588   : > { %v10156_v7 = vpop.eup %10155 }
0x2589   : > { %v6183_v48 = vmul.f32 %v9700_v39, %v6169_v11  ;;  %v6167_v31 = vmul.f32 %v10156_v7, %v11515_v61  ;;  %v6175_v42 = vmul.f32 %v6169_v11, %v11530_v41  ;;  %v6206_v11 = vadd.f32 1e-08, %v11515_v61 }
0x258a   : > { %v10158_v6 = vpop.eup %10157  ;;  %10161 = vrcp.f32 %v6207_v20  ;;  %v6208_v7 = vadd.f32 1e-08, %v11523_v30 }
0x258b   : > { %v11577_v51 = vsub.f32 %v11482_v19, %v6183_v48  ;;  %v6182_v25 = vmul.f32 %v6167_v31, %v6127_v34  ;;  %v6173_v22 = vmul.f32 %v10158_v6, %v11520_v4  ;;  %v11580_v3 = vadd.f32 %v6175_v42, %v5998_v9 }
0x258c   : > { %v10160_v55 = vpop.eup %10159  ;;  %v6174_v28 = vmul.f32 %v6167_v31, %v11527_v40  ;;  %v6000_v34 = vmul.f32 %v11424_v53, %v11485_v60  ;;  %10163 = vrcp.f32 %v6206_v11 }
0x258d   : > { %v6191_v12 = vmul.f32 %v11577_v51, %v11577_v51  ;;  %v11588_v39 = vsub.f32 %v11488_v43, %v6182_v25  ;;  %v6185_v56 = vmul.f32 %v9703_v8, %v6173_v22  ;;  %v6171_v19 = vmul.f32 %v10160_v55, %v11523_v30 }
0x258e   : > { %v6177_v57 = vmul.f32 %v6173_v22, %v11546_v32  ;;  %v11594_v18 = vadd.f32 %v6174_v28, %v5997_v23  ;;  %v5999_v8 = vmul.f32 %v11491_v44, %v11434_v21 }
0x258f   : > { %v6197_v26 = vsel %vm1320_vm1, %v6191_v12, 0.0  ;;  %v6190_v10 = vmul.f32 %v11588_v39, %v11588_v39  ;;  %v11600_v2 = vsub.f32 %v11496_v47, %v6185_v56  ;;  %v6184_v43 = vmul.f32 %v6171_v19, %v6137_v17 }
0x2590   : > { %6198 = vadd.xlane.f32.xlu0 %v6197_v26  ;;  %v11604_v0 = vadd.f32 %v6177_v57, %v6000_v34  ;;  %v6176_v53 = vmul.f32 %v6171_v19, %v11541_v24 }
0x2591   : > { %v6194_v60 = vsel %vm1320_vm1, %v6190_v10, 0.0  ;;  %v6193_v15 = vmul.f32 %v11600_v2, %v11600_v2  ;;  %v11611_v13 = vsub.f32 %v11503_v52, %v6184_v43  ;;  %v6209_v52 = vadd.f32 1e-08, %v11520_v4 }
0x2592   : > { %6195 = vadd.xlane.f32.xlu1 %v6194_v60  ;;  %v11613_v47 = vadd.f32 %v6176_v53, %v5999_v8 }
0x2593   : > { %v6203_v17 = vsel %vm1320_vm1, %v6193_v15, 0.0  ;;  %v6192_v21 = vmul.f32 %v11611_v13, %v11611_v13  ;;  %10165 = vrcp.f32 %v6209_v52 }
0x2594   : > { %6204 = vadd.xlane.f32.xlu0 %v6203_v17  ;;  %10167 = vrcp.f32 %v6208_v7 }
0x2595   : > { %v6200_v44 = vsel %vm1320_vm1, %v6192_v21, 0.0 }
0x2596   : > { %6201 = vadd.xlane.f32.xlu1 %v6200_v44 }
0x2597   : > { %v10162_v9 = vpop.eup %10161 }
0x2599   : > { %v10164_v42 = vpop.eup %10163 }
0x25a0   : > { %v10166_v25 = vpop.eup %10165 }
0x25a1   : > { %v10168_v55 = vpop.eup %10167 }
0x2619   : > { %v11623_v48 = vpop.xlane.xlu0 %6198 }
0x261a   : > { %v6213_v31 = vmul.f32 %v10162_v9, %v11623_v48 }
0x261b   : > { %v11626_v6 = vpop.xlane.xlu1 %6195 }
0x261c   : > { %v6211_v62 = vmul.f32 %v10164_v42, %v11626_v6  ;;  %v6219_v61 = vmul.f32 %v6213_v31, %v11530_v41 }
0x261d   : > { %v11630_v22 = vpop.xlane.xlu0 %6204 }
0x261e   : > { %v6218_v4 = vmul.f32 %v6211_v62, %v11527_v40  ;;  %v6217_v30 = vmul.f32 %v10166_v25, %v11630_v22  ;;  %v11641_v56 = vadd.f32 %v6219_v61, %v11577_v51 }
0x261f   : > { %v11634_v23 = vpop.xlane.xlu1 %6201 }
0x2620   : > { %v6215_v28 = vmul.f32 %v10168_v55, %v11634_v23  ;;  %v11638_v12 = vadd.f32 %v6218_v4, %v11588_v39  ;;  %v6221_v19 = vmul.f32 %v6217_v30, %v11546_v32 }
0x2622   : > { %v6220_v41 = vmul.f32 %v6215_v28, %v11541_v24  ;;  %9712 = vmatprep.mubr.msk.f32.mxu0 %vm1320_vm1, %v11638_v12  ;;  %v11653_v34 = vadd.f32 %v6221_v19, %v11600_v2 }
0x2623   : > { %9713 = vmatmul.mubr.msk.f32.vlgmr.msra.gmra.mxu0 %vm1320_vm1, %v11641_v56 }
0x2624   : > { %v11650_v40 = vadd.f32 %v6220_v41, %v11611_v13 }
0x2626   : > { %9715 = vmatprep.mubr.msk.f32.mxu0 %vm1320_vm1, %v11650_v40 }
0x2627   : > { %9716 = vmatmul.mubr.msk.f32.gmra.mxu0 %vm1320_vm1, %v11653_v34 }
0x2628   : > { %9740 = vmatprep.mubr.msk.f32.mxu0 %vm1320_vm1, %v11328_v37 }
0x26e3   : > { %v9714_v24 = vpop.f32.mrf.mxu0 }
0x26e4   : > { %v6324_v32 = vmul.f32 %v9714_v24, %v11641_v56 }
0x26e5   : > { %v6304_v57 = vpop.f32.mrf.mxu0 }
0x26e6   : > { %v6323_v26 = vmul.f32 %v6304_v57, %v11638_v12  ;;  %v6330_v10 = vsel %vm1320_vm1, %v6324_v32, 0.0 }
0x26e7   : > { %6331 = vadd.xlane.f32.xlu0 %v6330_v10  ;;  %v9717_v43 = vpop.f32.mrf.mxu0 }
0x26e8   : > { %v6326_v8 = vmul.f32 %v9717_v43, %v11653_v34  ;;  %v6327_v53 = vsel %vm1320_vm1, %v6323_v26, 0.0 }
0x26e9   : > { %6328 = vadd.xlane.f32.xlu1 %v6327_v53  ;;  %v6314_v60 = vpop.f32.mrf.mxu0 }
0x26ea   : > { %v6325_v15 = vmul.f32 %v6314_v60, %v11650_v40  ;;  %v6336_v37 = vsel %vm1320_vm1, %v6326_v8, 0.0 }
0x26eb   : > { %6337 = vadd.xlane.f32.xlu0 %v6336_v37 }
0x26ec   : > { %v6333_v17 = vsel %vm1320_vm1, %v6325_v15, 0.0 }
0x26ed   : > { %6334 = vadd.xlane.f32.xlu1 %v6333_v17 }
0x2770   : > { %v6332_v21 = vpop.xlane.xlu0 %6331 }
0x2771   : > { %v6340_v44 = vadd.f32 1e-08, %v6332_v21 }
0x2772   : > { %v6329_v20 = vpop.xlane.xlu1 %6328 }
0x2773   : > { %10169 = vrcp.f32 %v6340_v44  ;;  %v6339_v11 = vadd.f32 1e-08, %v6329_v20 }
0x2774   : > { %v6338_v52 = vpop.xlane.xlu0 %6337 }
0x2775   : > { %10171 = vrcp.f32 %v6339_v11  ;;  %v6342_v7 = vadd.f32 1e-08, %v6338_v52  ;;  %v5377_v52 = vadd.f32 %v11353_v1, %v11268_v58  ;;  %v6383_v1 = vadd.f32 1e-08, %v11626_v6 }
0x2776   : > { %v6335_v9 = vpop.xlane.xlu1 %6334 }
0x2777   : > { %10173 = vrcp.f32 %v6342_v7  ;;  %v6341_v31 = vadd.f32 1e-08, %v6335_v9  ;;  %v5391_v9 = vsel %vm1320_vm1, %v5377_v52, 0.0 }
0x2779   : > { %10175 = vrcp.f32 %v6341_v31  ;;  %v6386_v31 = vadd.f32 1e-08, %v11630_v22 }
0x2780   : > { %v10170_v42 = vpop.eup %10169 }
0x2781   : > { %v6346_v62 = vmul.f32 %v10170_v42, %v11623_v48  ;;  %v6385_v42 = vadd.f32 1e-08, %v11634_v23 }
0x2782   : > { %v10172_v25 = vpop.eup %10171 }
0x2783   : > { %v6360_v61 = vmul.f32 %v9714_v24, %v6346_v62  ;;  %v6344_v4 = vmul.f32 %v10172_v25, %v11626_v6  ;;  %v6352_v30 = vmul.f32 %v6346_v62, %v11641_v56 }
0x2784   : > { %v10174_v55 = vpop.eup %10173 }
0x2785   : > { %v6364_v28 = vsub.f32 %v11577_v51, %v6360_v61  ;;  %v6359_v19 = vmul.f32 %v6344_v4, %v6304_v57  ;;  %v6350_v41 = vmul.f32 %v10174_v55, %v11630_v22  ;;  %v11675_v32 = vadd.f32 %v6352_v30, %v11580_v3 }
0x2786   : > { %v10176_v26 = vpop.eup %10175  ;;  %v6351_v10 = vmul.f32 %v6344_v4, %v11638_v12 }
0x2787   : > { %v6368_v8 = vmul.f32 %v6364_v28, %v6364_v28  ;;  %v6363_v53 = vsub.f32 %v11588_v39, %v6359_v19  ;;  %v6362_v24 = vmul.f32 %v9717_v43, %v6350_v41  ;;  %v6348_v15 = vmul.f32 %v10176_v26, %v11634_v23 }
0x2788   : > { %v6354_v37 = vmul.f32 %v6350_v41, %v11653_v34  ;;  %v11682_v17 = vadd.f32 %v6351_v10, %v11594_v18 }
0x2789   : > { %v6374_v51 = vsel %vm1320_vm1, %v6368_v8, 0.0  ;;  %v6367_v57 = vmul.f32 %v6363_v53, %v6363_v53  ;;  %v6366_v3 = vsub.f32 %v11600_v2, %v6362_v24  ;;  %v6361_v21 = vmul.f32 %v6348_v15, %v6314_v60 }
0x278a   : > { %6375 = vadd.xlane.f32.xlu0 %v6374_v51  ;;  %v11687_v44 = vadd.f32 %v6354_v37, %v11604_v0  ;;  %v6353_v39 = vmul.f32 %v6348_v15, %v11650_v40  ;;  %v5372_v0 = vadd.f32 %v11268_v58, %v11355_v33 }
0x278b   : > { %v6371_v43 = vsel %vm1320_vm1, %v6367_v57, 0.0  ;;  %v6370_v20 = vmul.f32 %v6366_v3, %v6366_v3  ;;  %v6365_v11 = vsub.f32 %v11611_v13, %v6361_v21 }
0x278c   : > { %6372 = vadd.xlane.f32.xlu1 %v6371_v43  ;;  %v11693_v18 = vadd.f32 %v6353_v39, %v11613_v47  ;;  %v5388_v13 = vsel %vm1320_vm1, %v5372_v0, 0.0  ;;  %v6384_v47 = vadd.f32 1e-08, %v11623_v48 }
0x278d   : > { %v6380_v2 = vsel %vm1320_vm1, %v6370_v20, 0.0  ;;  %v6369_v60 = vmul.f32 %v6365_v11, %v6365_v11 }
0x278e   : > { %6381 = vadd.xlane.f32.xlu0 %v6380_v2  ;;  %10177 = vrcp.f32 %v6384_v47 }
0x278f   : > { %v6377_v7 = vsel %vm1320_vm1, %v6369_v60, 0.0  ;;  %10179 = vrcp.f32 %v6383_v1 }
0x2790   : > { %6378 = vadd.xlane.f32.xlu1 %v6377_v7  ;;  %10181 = vrcp.f32 %v6386_v31 }
0x2791   : > { %10183 = vrcp.f32 %v6385_v42 }
0x2792   : > { %5392 = vadd.xlane.f32.xlu0 %v5391_v9 }
0x2794   : > { %5389 = vadd.xlane.f32.xlu1 %v5388_v13 }
0x279b   : > { %v10178_v58 = vpop.eup %10177 }
0x279c   : > { %v10180_v25 = vpop.eup %10179 }
0x279d   : > { %v10182_v4 = vpop.eup %10181 }
0x279e   : > { %v10184_v55 = vpop.eup %10183 }
0x2813   : > { %v11707_v33 = vpop.xlane.xlu0 %6375 }
0x2814   : > { %v6390_v62 = vmul.f32 %v10178_v58, %v11707_v33 }
0x2815   : > { %v11710_v61 = vpop.xlane.xlu1 %6372 }
0x2816   : > { %v6388_v48 = vmul.f32 %v10180_v25, %v11710_v61  ;;  %v6396_v6 = vmul.f32 %v6390_v62, %v11641_v56 }
0x2817   : > { %v11714_v30 = vpop.xlane.xlu0 %6381 }
0x2818   : > { %v6395_v22 = vmul.f32 %v6388_v48, %v11638_v12  ;;  %v6394_v23 = vmul.f32 %v10182_v4, %v11714_v30  ;;  %v11723_v10 = vadd.f32 %v6396_v6, %v6364_v28 }
0x2819   : > { %v11718_v19 = vpop.xlane.xlu1 %6378 }
0x281a   : > { %v11720_v41 = vadd.f32 %v6395_v22, %v6363_v53  ;;  %v6392_v26 = vmul.f32 %v10184_v55, %v11718_v19  ;;  %v6398_v8 = vmul.f32 %v6394_v23, %v11653_v34 }
0x281b   : > { %v5393_v24 = vpop.xlane.xlu0 %5392 }
0x281c   : > { %v6397_v56 = vmul.f32 %v6392_v26, %v11650_v40  ;;  %v5397_v15 = vmul.f32 0.03125, %v5393_v24  ;;  %9726 = vmatprep.mubr.msk.f32.mxu1 %vm1320_vm1, %v11720_v41  ;;  %v11734_v28 = vadd.f32 %v6398_v8, %v6366_v3 }
0x281d   : > { %9727 = vmatmul.mubr.msk.f32.vlgmr.msra.gmra.mxu1 %vm1320_vm1, %v11723_v10  ;;  %v5390_v12 = vpop.xlane.xlu1 %5389 }
0x281e   : > { %v11731_v37 = vadd.f32 %v6397_v56, %v6365_v11  ;;  %v5401_v53 = vsub.f32 %v5377_v52, %v5397_v15  ;;  %v5396_v51 = vmul.f32 0.03125, %v5390_v12  ;;  %9744 = vmatpush3.msra.mxu1 %v11290_v46 }
0x281f   : > { %9745 = vmatprep.subr.mxu1 %v10366_v16 }
0x2820   : > { %v5400_v34 = vsub.f32 %v5372_v0, %v5396_v51  ;;  %9729 = vmatprep.mubr.msk.f32.mxu1 %vm1320_vm1, %v11731_v37  ;;  %v5405_v40 = vmul.f32 %v5401_v53, %v5401_v53  ;;  %9746 = vmatpush3.msra.mxu1 %v11295_v27 }
0x2821   : > { %9730 = vmatmul.mubr.msk.f32.gmra.mxu1 %vm1320_vm1, %v11734_v28  ;;  %9747 = vmatprep.subr.mxu1 %v10366_v16 }
0x2822   : > { %v5415_v57 = vsel %vm1320_vm1, %v5405_v40, 0.0  ;;  %v5404_v21 = vmul.f32 %v5400_v34, %v5400_v34  ;;  %9748 = vmatpush3.msra.mxu1 %v11300_v36  ;;  %9751 = vmatprep.mubr.msk.f32.mxu1 %vm10368_vm0, %v10366_v16 }
0x2823   : > { %5416 = vadd.xlane.f32.xlu0 %v5415_v57  ;;  %9749 = vmatprep.subr.mxu1 %v10366_v16 }
0x2824   : > { %v5412_v46 = vsel %vm1320_vm1, %v5404_v21, 0.0  ;;  %9750 = vmatpush3.msra.mxu1 %v11305_v50 }
0x2825   : > { %5413 = vadd.xlane.f32.xlu1 %v5412_v46 }
0x28ac   : > { %v5417_v27 = vpop.xlane.xlu0 %5416 }
0x28ad   : > { %v5421_v3 = vmul.f32 0.03125, %v5417_v27 }
0x28ae   : > { %v5414_v39 = vpop.xlane.xlu1 %5413 }
0x28af   : > { %v5425_v43 = vadd.f32 1e-05, %v5421_v3  ;;  %v5420_v20 = vmul.f32 0.03125, %v5414_v39 }
0x28b1   : > { %10185 = vrsqrt.f32 %v5425_v43  ;;  %v5424_v11 = vadd.f32 1e-05, %v5420_v20 }
0x28b3   : > { %10187 = vrsqrt.f32 %v5424_v11 }
0x28be   : > { %v10186_v36 = vpop.eup %10185 }
0x28bf   : > { %v5433_v52 = vmul.f32 %v10186_v36, %v5401_v53 }
0x28c0   : > { %v10188_v2 = vpop.eup %10187 }
0x28c1   : > { %v5443_v60 = vmul.f32 %v11315_v59, %v5433_v52  ;;  %v5432_v0 = vmul.f32 %v10188_v2, %v5400_v34 }
0x28c3   : > { %v11752_v16 = vadd.f32 %v11320_v35, %v5443_v60  ;;  %v5442_v50 = vmul.f32 %v11315_v59, %v5432_v0  ;;  %v10286_v0 = vld [vmem:[%s10593_s27] sm:$0x1] }
0x28c5   : > { %v11756_v7 = vadd.f32 %v11320_v35, %v5442_v50  ;;  %9754 = vmatprep.subr.mxu1 %v11752_v16  ;;  %v6634_v13 = vsel %vm1320_vm1, %v11752_v16, 0.0 }
0x28c7   : > { %v6633_v9 = vsel %vm1320_vm1, %v11756_v7, 0.0 }
0x28c8   : > { %v6635_v47 = vadd.f32 %v6634_v13, %v6633_v9 }
0x28ca   : > { %v6636_v1 = vrot.slane %v6635_v47, 4 }
0x28cc   : > { %v6637_v31 = vadd.f32 %v6636_v1, %v6635_v47 }
0x28ce   : > { %v6638_v42 = vrot.slane %v6637_v31, 2 }
0x28d0   : > { %v6639_v58 = vadd.f32 %v6638_v42, %v6637_v31 }
0x28d2   : > { %v6640_v62 = vrot.slane %v6639_v58, 1 }
0x28d4   : > { %v6641_v25 = vadd.f32 %v6640_v62, %v6639_v58  ;;  %v10287_v58 = vld [vmem:[%s10597_s3] sm:$0x1] }
0x28d6   : > { %v6642_v48 = vmul.f32 0.0625, %v6641_v25 }
0x28d8   : > { %9752 = vmatmul.mubr.msk.f32.vlgmr.msra.gmra.mxu1 %vm1320_vm1, %v6642_v48 }
0x28d9   : > { %9755 = vmatpush3.msra.mxu1 %v11752_v16 }
0x28da   : > { %9756 = vmatprep.subr.mxu1 %v11756_v7 }
0x28db   : > { %9757 = vmatpush3.msra.mxu1 %v11756_v7 }
0x28dd   : > { %v9728_v59 = vpop.f32.mrf.mxu1 }
0x28de   : > { %v6501_v23 = vmul.f32 %v9728_v59, %v11723_v10 }
0x28df   : > { %v6481_v35 = vpop.f32.mrf.mxu1 }
0x28e0   : > { %v6500_v8 = vmul.f32 %v6481_v35, %v11720_v41  ;;  %v6507_v56 = vsel %vm1320_vm1, %v6501_v23, 0.0 }
0x28e1   : > { %v9731_v4 = vpop.f32.mrf.mxu1 }
0x28e2   : > { %v6503_v6 = vmul.f32 %v9731_v4, %v11734_v28  ;;  %v6504_v15 = vsel %vm1320_vm1, %v6500_v8, 0.0  ;;  %v10288_v8 = vld [vmem:[#allocation2 + $0x8] sm:$0xff] }
0x28e3   : > { %v6491_v22 = vpop.f32.mrf.mxu1 }
0x28e4   : > { %v6502_v55 = vmul.f32 %v6491_v22, %v11731_v37  ;;  %v6513_v26 = vsel %vm1320_vm1, %v6503_v6, 0.0 }
0x28e5   : > { %6514 = vadd.xlane.f32.xlu1 %v6513_v26 }
0x28e6   : > { %v6510_v24 = vsel %vm1320_vm1, %v6502_v55, 0.0 }
0x28e7   : > { %6511 = vadd.xlane.f32.xlu0 %v6510_v24 }
0x28e9   : > { %6508 = vadd.xlane.f32.xlu1 %v6507_v56 }
0x28eb   : > { %6505 = vadd.xlane.f32.xlu0 %v6504_v15  ;;  %v10289_v15 = vld [vmem:[#allocation2] sm:$0xff] }
0x2918   : > { %6868 = vxpose.xlu0.b32.start [1/2] (short) (narrow) %v11207_v54, 32 }
0x291c   : > { %6869 = vxpose.xlu0.b32.end [2/2] (short) (narrow) %v11203_v38, 32  ;;  %6739 = vxpose.xlu1.b32.start [1/2] (short) (narrow) %v11756_v7, 32 }
0x2920   : > { %6740 = vxpose.xlu1.b32.end [2/2] (short) (narrow) %v11752_v16, 32 }
0x296e   : > { %v6515_v12 = vpop.xlane.xlu1 %6514 }
0x296f   : > { %v6519_v53 = vadd.f32 1e-08, %v6515_v12 }
0x2970   : > { %v6512_v51 = vpop.xlane.xlu0 %6511 }
0x2971   : > { %10189 = vrcp.f32 %v6519_v53  ;;  %v6518_v34 = vadd.f32 1e-08, %v6512_v51 }
0x2972   : > { %v6509_v40 = vpop.xlane.xlu1 %6508 }
0x2973   : > { %10191 = vrcp.f32 %v6518_v34  ;;  %v6517_v57 = vadd.f32 1e-08, %v6509_v40 }
0x2974   : > { %v6506_v21 = vpop.xlane.xlu0 %6505 }
0x2975   : > { %10193 = vrcp.f32 %v6517_v57  ;;  %v6516_v46 = vadd.f32 1e-08, %v6506_v21 }
0x2977   : > { %10195 = vrcp.f32 %v6516_v46 }
0x297e   : > { %v10190_v27 = vpop.eup %10189 }
0x297f   : > { %v6527_v54 = vmul.f32 %v10190_v27, %v11714_v30 }
0x2980   : > { %v10192_v38 = vpop.eup %10191 }
0x2981   : > { %v6531_v3 = vmul.f32 %v6527_v54, %v11734_v28  ;;  %v6525_v39 = vmul.f32 %v10192_v38, %v11718_v19 }
0x2982   : > { %v10194_v43 = vpop.eup %10193 }
0x2983   : > { %v6535_v20 = vadd.f32 %v6531_v3, %v11687_v44  ;;  %v6530_v11 = vmul.f32 %v6525_v39, %v11731_v37  ;;  %v6523_v36 = vmul.f32 %v10194_v43, %v11707_v33 }
0x2984   : > { %v10196_v52 = vpop.eup %10195 }
0x2985   : > { %9732 = vmatprep.subr.msk.mxu0 %vm1320_vm1, %v6535_v20  ;;  %v6534_v2 = vadd.f32 %v6530_v11, %v11693_v18  ;;  %v6529_v60 = vmul.f32 %v6523_v36, %v11723_v10  ;;  %v6521_v30 = vmul.f32 %v10196_v52, %v11710_v61  ;;  %v10285_v61 = vld [vmem:[%s10589_s23] sm:$0x1] }
0x2986   : > { %9733 = vmatpush3.xpose.msk.msra.mxu0 %vm1320_vm1, %v6535_v20 }
0x2987   : > { %9734 = vmatprep.subr.msk.mxu0 %vm1320_vm1, %v6534_v2  ;;  %v6533_v19 = vadd.f32 %v6529_v60, %v11675_v32  ;;  %v6528_v44 = vmul.f32 %v6521_v30, %v11720_v41 }
0x2989   : > { %v6532_v33 = vadd.f32 %v6528_v44, %v11682_v17 }
0x298a   : > { %9735 = vmatpush3.xpose.msk.msra.mxu0 %vm1320_vm1, %v6534_v2 }
0x298b   : > { %9736 = vmatprep.subr.msk.mxu0 %vm1320_vm1, %v6533_v19 }
0x298e   : > { %9737 = vmatpush3.xpose.msk.msra.mxu0 %vm1320_vm1, %v6533_v19 }
0x298f   : > { %9738 = vmatprep.subr.msk.mxu0 %vm1320_vm1, %v6532_v33 }
0x2992   : > { %9739 = vmatpush3.xpose.msk.msra.mxu0 %vm1320_vm1, %v6532_v33 }
0x2993   : > { %9764 = vmatprep.subr.mxu0 %v11752_v16 }
0x2994   : > { %v6884_v18 = vpop.trf.xlu0 }
0x2995   : > { %9741 = vmatmul.mubr.msk.f32.vlgmr.msra.gmra.mxu0 %vm1320_vm1, %v11324_v14 }
0x2996   : > { %9765 = vmatpush3.msra.mxu0 %v11752_v16  ;;  %9768 = vmatprep.mubr.msk.f32.mxu0 %vm1811_vm12, %v6884_v18 }
0x2997   : > { %9766 = vmatprep.subr.mxu0 %v11756_v7 }
0x2998   : > { %v6712_v32 = vpop.f32.mrf.mxu1  ;;  %9767 = vmatpush3.msra.mxu0 %v11756_v7  ;;  %v6755_v17 = vpop.trf.xlu1 }
0x2999   : > { %v6713_v41 = vadd.f32 %v10285_v61, %v6712_v32  ;;  %9758 = vmatprep.mubr.msk.f32.mxu1 %vm1811_vm12, %v6755_v17  ;;  %v6885_v10 = vpop.trf.xlu0 }
0x299a   : > { %v9753_v37 = vpop.f32.mrf.mxu1  ;;  %9769 = vmatmul.mubr.msk.f32.vlgmr.msra.gmra.mxu0 %vm1811_vm12, %v6885_v10 }
0x299b   : > { %v6716_v28 = vmax.f32 %v6713_v41, 0.0 }
0x299c   : > { %v6756_v14 = vpop.trf.xlu1 }
0x299d   : > { %v6717_v50 = vmul.f32 %v10286_v0, %v6716_v28  ;;  %9759 = vmatmul.mubr.msk.f32.vlgmr.msra.gmra.mxu1 %vm1811_vm12, %v6756_v14  ;;  %v6886_v9 = vpop.trf.xlu0 }
0x299e   : > { %9771 = vmatprep.mubr.msk.f32.mxu0 %vm1811_vm12, %v6886_v9 }
0x299f   : > { %v6718_v13 = vsel %vm5564_vm2, %v6717_v50, 0.0 }
0x29a0   : > { %6719 = vadd.xlane.f32.xlu0 %v6718_v13  ;;  %v6757_v47 = vpop.trf.xlu1 }
0x29a1   : > { %9761 = vmatprep.mubr.msk.f32.mxu1 %vm1811_vm12, %v6757_v47  ;;  %v6887_v1 = vpop.trf.xlu0 }
0x29a2   : > { %9772 = vmatmul.mubr.msk.f32.gmra.mxu0 %vm1811_vm12, %v6887_v1 }
0x29a4   : > { %v6758_v31 = vpop.trf.xlu1 }
0x29a5   : > { %9762 = vmatmul.mubr.msk.f32.gmra.mxu1 %vm1811_vm12, %v6758_v31 }
0x2a29   : > { %v6720_v42 = vpop.xlane.xlu0 %6719 }
0x2a2a   : > { %v6721_v62 = vadd.f32 %v10287_v58, %v6720_v42 }
0x2a2c   : > { %v6723_v25 = vand.u32 2147483647, %v6721_v62  ;;  %v6722_v22 = vmax.f32 %v6721_v62, 0.0 }
0x2a2e   : > { %v6724_v48 = vsub.f32 0.0, %v6723_v25 }
0x2a30   : > { %v6725_v59 = vmul.f32 1.442695, %v6724_v48 }
0x2a32   : > { %10197 = vpow2.f32 %v6725_v59 }
0x2a3f   : > { %v10198_v35 = vpop.eup %10197 }
0x2a40   : > { %v6727_v4 = vadd.f32 1.0, %v10198_v35 }
0x2a42   : > { %10199 = vlog2.f32 %v6727_v4 }
0x2a4f   : > { %v10200_v6 = vpop.eup %10199 }
0x2a50   : > { %v6729_v23 = vmul.f32 0.6931472, %v10200_v6 }
0x2a52   : > { %v6730_v55 = vadd.f32 %v6729_v23, %v6722_v22 }
0x2a54   : > { %9917 = vpush %v6730_v55 }
0x2a55   : > { %v9742_v26 = vpop.f32.mrf.mxu0 }
0x2a56   : > { %v6630_v24 = vadd.f32 %v10288_v8, %v9742_v26 }
0x2a57   : > { %v6620_v56 = vpop.f32.mrf.mxu0 }
0x2a58   : > { %6632 = vst.msk [vmem:[#allocation2 + $0x8] sm:$0xff] %vm1320_vm1, %v6630_v24  ;;  %v6629_v12 = vadd.f32 %v10289_v15, %v6620_v56 }
0x2a5a   : > { %6631 = vst.msk [vmem:[#allocation2] sm:$0xff] %vm1320_vm1, %v6629_v12  ;;  %v11819_v53 = vpop.f32.mrf.mxu0 }
0x2a5b   : > { %v7107_v41 = vmul.f32 %v11819_v53, %v11819_v53 }
0x2a5c   : > { %v11821_v51 = vpop.f32.mrf.mxu0 }
0x2a5d   : > { %9782 = vmatprep.mubr.msk.f32.mxu1 %vm1320_vm1, %v11821_v51  ;;  %v9760_v34 = vpop.f32.mrf.mxu1  ;;  %v7106_v32 = vmul.f32 %v11821_v51, %v11821_v51  ;;  %v7113_v37 = vsel %vm1320_vm1, %v7107_v41, 0.0 }
0x2a5f   : > { %v6849_v40 = vpop.f32.mrf.mxu1  ;;  %v7110_v61 = vsel %vm1320_vm1, %v7106_v32, 0.0 }
0x2a65   : > { %v9763_v57 = vpop.f32.mrf.mxu1 }
0x2a67   : > { %v6859_v54 = vpop.f32.mrf.mxu1 }
0x2a85   : > { %s9918_s3 = spop %9917 }
0x2a86   : > { %v6733_v21 = vstv %s9918_s3 }
0x2a87   : > { %v6738_v46 = vmul.f32 %v11371_v29, %v6733_v21  ;;  %v6737_v27 = vmul.f32 %v11374_v63, %v6733_v21  ;;  %v6736_v3 = vmul.f32 %v11380_v5, %v6733_v21  ;;  %v6735_v29 = vmul.f32 %v11393_v49, %v6733_v21  ;;  %v11865_v49 = vpop.f32.mrf.mxu0 }
0x2a88   : > { %v7109_v14 = vmul.f32 %v11865_v49, %v11865_v49 }
0x2a89   : > { %v11827_v38 = vadd.f32 %v9763_v57, %v6738_v46  ;;  %v11830_v39 = vadd.f32 %v6859_v54, %v6737_v27  ;;  %v11845_v63 = vadd.f32 %v9760_v34, %v6736_v3  ;;  %v11855_v5 = vadd.f32 %v6849_v40, %v6735_v29  ;;  %v11875_v43 = vpop.f32.mrf.mxu0 }
0x2a8a   : > { %v7108_v10 = vmul.f32 %v11875_v43, %v11875_v43  ;;  %v7119_v0 = vsel %vm1320_vm1, %v7109_v14, 0.0 }
0x2a8b   : > { %9774 = vmatprep.subr.msk.mxu1 %vm1320_vm1, %v11827_v38  ;;  %9788 = vmatprep.subr.msk.mxu0 %vm1320_vm1, %v11827_v38 }
0x2a8c   : > { %9775 = vmatpush3.xpose.msk.msra.mxu1 %vm1320_vm1, %v11827_v38  ;;  %9789 = vmatpush3.xpose.msk.msra.mxu0 %vm1320_vm1, %v11827_v38  ;;  %v7116_v28 = vsel %vm1320_vm1, %v7108_v10, 0.0 }
0x2a8d   : > { %9776 = vmatprep.subr.msk.mxu1 %vm1320_vm1, %v11830_v39  ;;  %9790 = vmatprep.subr.msk.mxu0 %vm1320_vm1, %v11830_v39 }
0x2a90   : > { %9777 = vmatpush3.xpose.msk.msra.mxu1 %vm1320_vm1, %v11830_v39  ;;  %9791 = vmatpush3.xpose.msk.msra.mxu0 %vm1320_vm1, %v11830_v39 }
0x2a91   : > { %9778 = vmatprep.subr.msk.mxu1 %vm1320_vm1, %v11845_v63  ;;  %9792 = vmatprep.subr.msk.mxu0 %vm1320_vm1, %v11845_v63 }
0x2a94   : > { %9779 = vmatpush3.xpose.msk.msra.mxu1 %vm1320_vm1, %v11845_v63  ;;  %9793 = vmatpush3.xpose.msk.msra.mxu0 %vm1320_vm1, %v11845_v63 }
0x2a95   : > { %9780 = vmatprep.subr.msk.mxu1 %vm1320_vm1, %v11855_v5  ;;  %9794 = vmatprep.subr.msk.mxu0 %vm1320_vm1, %v11855_v5 }
0x2a98   : > { %9781 = vmatpush3.xpose.msk.msra.mxu1 %vm1320_vm1, %v11855_v5  ;;  %9795 = vmatpush3.xpose.msk.msra.mxu0 %vm1320_vm1, %v11855_v5 }
0x2a99   : > { %9802 = vmatprep.subr.msk.mxu1 %vm1320_vm1, %v11827_v38  ;;  %9816 = vmatprep.subr.msk.mxu0 %vm1320_vm1, %v11827_v38 }
0x2a9b   : > { %9783 = vmatmul.mubr.msk.f32.vlgmr.msra.gmra.mxu1 %vm1320_vm1, %v11819_v53 }
0x2a9c   : > { %9803 = vmatpush3.xpose.msk.msra.mxu1 %vm1320_vm1, %v11827_v38  ;;  %9785 = vmatprep.mubr.msk.f32.mxu1 %vm1320_vm1, %v11875_v43 }
0x2a9d   : > { %9804 = vmatprep.subr.msk.mxu1 %vm1320_vm1, %v11830_v39 }
0x2a9f   : > { %9786 = vmatmul.mubr.msk.f32.gmra.mxu1 %vm1320_vm1, %v11865_v49 }
0x2aa0   : > { %9805 = vmatpush3.xpose.msk.msra.mxu1 %vm1320_vm1, %v11830_v39 }
0x2aa1   : > { %9806 = vmatprep.subr.msk.mxu1 %vm1320_vm1, %v11845_v63 }
0x2aa4   : > { %9807 = vmatpush3.xpose.msk.msra.mxu1 %vm1320_vm1, %v11845_v63 }
0x2aa5   : > { %9808 = vmatprep.subr.msk.mxu1 %vm1320_vm1, %v11855_v5 }
0x2aa8   : > { %9809 = vmatpush3.xpose.msk.msra.mxu1 %vm1320_vm1, %v11855_v5 }
0x2b5b   : > { %v9784_v20 = vpop.f32.mrf.mxu1 }
0x2b5c   : > { %v7123_v2 = vmul.f32 %v9784_v20, %v11819_v53 }
0x2b5d   : > { %v7087_v11 = vpop.f32.mrf.mxu1 }
0x2b5e   : > { %v7122_v36 = vmul.f32 %v7087_v11, %v11821_v51  ;;  %v7129_v33 = vsel %vm1320_vm1, %v7123_v2, 0.0 }
0x2b5f   : > { %v9787_v52 = vpop.f32.mrf.mxu1 }
0x2b60   : > { %v7126_v60 = vsel %vm1320_vm1, %v7122_v36, 0.0  ;;  %v7125_v44 = vmul.f32 %v9787_v52, %v11865_v49 }
0x2b61   : > { %7127 = vadd.xlane.f32.xlu1 %v7126_v60  ;;  %v7097_v30 = vpop.f32.mrf.mxu1 }
0x2b62   : > { %v7124_v19 = vmul.f32 %v7097_v30, %v11875_v43  ;;  %v7135_v17 = vsel %vm1320_vm1, %v7125_v44, 0.0 }
0x2b64   : > { %v7132_v18 = vsel %vm1320_vm1, %v7124_v19, 0.0 }
0x2b65   : > { %7130 = vadd.xlane.f32.xlu1 %v7129_v33  ;;  %7133 = vadd.xlane.f32.xlu0 %v7132_v18 }
0x2b69   : > { %7136 = vadd.xlane.f32.xlu1 %v7135_v17  ;;  %7111 = vadd.xlane.f32.xlu0 %v7110_v61 }
0x2b6d   : > { %7114 = vadd.xlane.f32.xlu1 %v7113_v37  ;;  %7117 = vadd.xlane.f32.xlu0 %v7116_v28 }
0x2b71   : > { %7120 = vadd.xlane.f32.xlu1 %v7119_v0 }
0x2bea   : > { %v7128_v50 = vpop.xlane.xlu1 %7127 }
0x2beb   : > { %v7138_v9 = vadd.f32 1e-08, %v7128_v50 }
0x2bed   : > { %10201 = vrcp.f32 %v7138_v9 }
0x2bee   : > { %v7131_v13 = vpop.xlane.xlu1 %7130  ;;  %v7134_v47 = vpop.xlane.xlu0 %7133 }
0x2bef   : > { %v7139_v1 = vadd.f32 1e-08, %v7131_v13  ;;  %v7140_v31 = vadd.f32 1e-08, %v7134_v47 }
0x2bf1   : > { %10203 = vrcp.f32 %v7139_v1 }
0x2bf2   : > { %10205 = vrcp.f32 %v7140_v31  ;;  %v7137_v42 = vpop.xlane.xlu1 %7136  ;;  %v7112_v62 = vpop.xlane.xlu0 %7111 }
0x2bf3   : > { %v7141_v58 = vadd.f32 1e-08, %v7137_v42 }
0x2bf5   : > { %10207 = vrcp.f32 %v7141_v58 }
0x2bf6   : > { %v7115_v59 = vpop.xlane.xlu1 %7114  ;;  %v7118_v55 = vpop.xlane.xlu0 %7117 }
0x2bf7   : > { %v7183_v2 = vadd.f32 1e-08, %v7115_v59  ;;  %v7184_v60 = vadd.f32 1e-08, %v7118_v55 }
0x2bfa   : > { %v10202_v25 = vpop.eup %10201  ;;  %v7121_v12 = vpop.xlane.xlu1 %7120 }
0x2bfb   : > { %v11917_v48 = vmul.f32 %v10202_v25, %v7112_v62 }
0x2bfd   : > { %v7158_v35 = vmul.f32 %v11917_v48, %v7087_v11 }
0x2bfe   : > { %v10204_v4 = vpop.eup %10203 }
0x2bff   : > { %v10206_v6 = vpop.eup %10205  ;;  %v11921_v22 = vsub.f32 %v11821_v51, %v7158_v35  ;;  %v11923_v23 = vmul.f32 %v10204_v4, %v7115_v59 }
0x2c00   : > { %v11925_v26 = vmul.f32 %v10206_v6, %v7118_v55 }
0x2c01   : > { %v7159_v8 = vmul.f32 %v9784_v20, %v11923_v23  ;;  %v7166_v24 = vmul.f32 %v11921_v22, %v11921_v22 }
0x2c02   : > { %v10208_v56 = vpop.eup %10207  ;;  %v7160_v15 = vmul.f32 %v11925_v26, %v7097_v30  ;;  %v7185_v30 = vadd.f32 1e-08, %v7121_v12 }
0x2c03   : > { %v11932_v34 = vsub.f32 %v11819_v53, %v7159_v8  ;;  %v11934_v40 = vmul.f32 %v10208_v56, %v7121_v12  ;;  %v7170_v57 = vsel %vm1320_vm1, %v7166_v24, 0.0 }
0x2c04   : > { %v11938_v21 = vsub.f32 %v11875_v43, %v7160_v15  ;;  %7171 = vadd.xlane.f32.xlu0 %v7170_v57 }
0x2c05   : > { %v7161_v46 = vmul.f32 %v9787_v52, %v11934_v40  ;;  %v7167_v27 = vmul.f32 %v11932_v34, %v11932_v34  ;;  %v7182_v52 = vadd.f32 1e-08, %v7112_v62 }
0x2c06   : > { %v7168_v54 = vmul.f32 %v11938_v21, %v11938_v21 }
0x2c07   : > { %v11946_v3 = vsub.f32 %v11865_v49, %v7161_v46  ;;  %v7173_v29 = vsel %vm1320_vm1, %v7167_v27, 0.0  ;;  %10209 = vrcp.f32 %v7182_v52 }
0x2c08   : > { %7174 = vadd.xlane.f32.xlu1 %v7173_v29  ;;  %v7176_v20 = vsel %vm1320_vm1, %v7168_v54, 0.0  ;;  %10211 = vrcp.f32 %v7183_v2 }
0x2c09   : > { %7177 = vadd.xlane.f32.xlu0 %v7176_v20  ;;  %v7169_v11 = vmul.f32 %v11946_v3, %v11946_v3  ;;  %10213 = vrcp.f32 %v7184_v60 }
0x2c0a   : > { %10215 = vrcp.f32 %v7185_v30 }
0x2c0b   : > { %v7179_v36 = vsel %vm1320_vm1, %v7169_v11, 0.0  ;;  %v7151_v11 = vmul.f32 %v11819_v53, %v11923_v23 }
0x2c0c   : > { %7180 = vadd.xlane.f32.xlu1 %v7179_v36 }
0x2c14   : > { %v10210_v19 = vpop.eup %10209 }
0x2c15   : > { %v10212_v32 = vpop.eup %10211 }
0x2c16   : > { %v10214_v61 = vpop.eup %10213 }
0x2c17   : > { %v10216_v0 = vpop.eup %10215 }
0x2c8d   : > { %v11953_v44 = vpop.xlane.xlu0 %7171 }
0x2c8e   : > { %v7187_v33 = vmul.f32 %v10210_v19, %v11953_v44 }
0x2c90   : > { %v7194_v18 = vmul.f32 %v7187_v33, %v11821_v51 }
0x2c91   : > { %v11957_v17 = vpop.xlane.xlu1 %7174 }
0x2c92   : > { %v7189_v41 = vmul.f32 %v10212_v32, %v11957_v17  ;;  %v11960_v10 = vpop.xlane.xlu0 %7177  ;;  %v11963_v37 = vadd.f32 %v7194_v18, %v11921_v22 }
0x2c93   : > { %v7191_v28 = vmul.f32 %v10214_v61, %v11960_v10  ;;  %v7150_v61 = vmul.f32 %v11917_v48, %v11821_v51 }
0x2c94   : > { %v7195_v14 = vmul.f32 %v11819_v53, %v7189_v41  ;;  %9796 = vmatprep.mubr.msk.f32.mxu0 %vm1320_vm1, %v11963_v37 }
0x2c95   : > { %v7196_v50 = vmul.f32 %v7191_v28, %v11875_v43  ;;  %v11970_v9 = vpop.xlane.xlu1 %7180 }
0x2c96   : > { %v11973_v13 = vadd.f32 %v7195_v14, %v11932_v34  ;;  %v7193_v47 = vmul.f32 %v10216_v0, %v11970_v9  ;;  %v7153_v14 = vmul.f32 %v11865_v49, %v11934_v40 }
0x2c97   : > { %v11977_v1 = vadd.f32 %v7196_v50, %v11938_v21 }
0x2c98   : > { %v7197_v31 = vmul.f32 %v11865_v49, %v7193_v47  ;;  %9797 = vmatmul.mubr.msk.f32.vlgmr.msra.gmra.mxu0 %vm1320_vm1, %v11973_v13 }
0x2c99   : > { %9817 = vmatpush3.xpose.msk.msra.mxu0 %vm1320_vm1, %v11827_v38  ;;  %9799 = vmatprep.mubr.msk.f32.mxu0 %vm1320_vm1, %v11977_v1 }
0x2c9a   : > { %9818 = vmatprep.subr.msk.mxu0 %vm1320_vm1, %v11830_v39  ;;  %v11989_v42 = vadd.f32 %v7197_v31, %v11946_v3  ;;  %v7152_v31 = vmul.f32 %v11925_v26, %v11875_v43 }
0x2c9c   : > { %9800 = vmatmul.mubr.msk.f32.gmra.mxu0 %vm1320_vm1, %v11989_v42 }
0x2c9d   : > { %9819 = vmatpush3.xpose.msk.msra.mxu0 %vm1320_vm1, %v11830_v39 }
0x2c9e   : > { %9820 = vmatprep.subr.msk.mxu0 %vm1320_vm1, %v11845_v63 }
0x2ca1   : > { %9821 = vmatpush3.xpose.msk.msra.mxu0 %vm1320_vm1, %v11845_v63 }
0x2ca2   : > { %9822 = vmatprep.subr.msk.mxu0 %vm1320_vm1, %v11855_v5 }
0x2ca5   : > { %9823 = vmatpush3.xpose.msk.msra.mxu0 %vm1320_vm1, %v11855_v5 }
0x2d58   : > { %v9798_v38 = vpop.f32.mrf.mxu0 }
0x2d59   : > { %v7300_v58 = vmul.f32 %v9798_v38, %v11973_v13 }
0x2d5a   : > { %v7280_v62 = vpop.f32.mrf.mxu0 }
0x2d5b   : > { %v7299_v25 = vmul.f32 %v7280_v62, %v11963_v37  ;;  %v7306_v39 = vsel %vm1320_vm1, %v7300_v58, 0.0 }
0x2d5c   : > { %7307 = vadd.xlane.f32.xlu1 %v7306_v39  ;;  %v9801_v59 = vpop.f32.mrf.mxu0  ;;  %v7360_v39 = vadd.f32 1e-08, %v11957_v17 }
0x2d5d   : > { %v7302_v35 = vmul.f32 %v9801_v59, %v11989_v42  ;;  %v7303_v63 = vsel %vm1320_vm1, %v7299_v25, 0.0 }
0x2d5e   : > { %7304 = vadd.xlane.f32.xlu0 %v7303_v63  ;;  %v7290_v4 = vpop.f32.mrf.mxu0 }
0x2d5f   : > { %v7301_v6 = vmul.f32 %v7290_v4, %v11977_v1  ;;  %v7312_v5 = vsel %vm1320_vm1, %v7302_v35, 0.0  ;;  %v7361_v35 = vadd.f32 1e-08, %v11960_v10 }
0x2d60   : > { %7313 = vadd.xlane.f32.xlu1 %v7312_v5 }
0x2d61   : > { %v7309_v55 = vsel %vm1320_vm1, %v7301_v6, 0.0 }
0x2d62   : > { %7310 = vadd.xlane.f32.xlu0 %v7309_v55 }
0x2de5   : > { %v7308_v8 = vpop.xlane.xlu1 %7307 }
0x2de6   : > { %v7316_v24 = vadd.f32 1e-08, %v7308_v8 }
0x2de7   : > { %v7305_v56 = vpop.xlane.xlu0 %7304 }
0x2de8   : > { %10217 = vrcp.f32 %v7316_v24  ;;  %v7315_v15 = vadd.f32 1e-08, %v7305_v56 }
0x2de9   : > { %v7314_v12 = vpop.xlane.xlu1 %7313 }
0x2dea   : > { %10219 = vrcp.f32 %v7315_v15  ;;  %v7318_v57 = vadd.f32 1e-08, %v7314_v12 }
0x2deb   : > { %v7311_v46 = vpop.xlane.xlu0 %7310 }
0x2dec   : > { %10221 = vrcp.f32 %v7318_v57  ;;  %v7317_v27 = vadd.f32 1e-08, %v7311_v46 }
0x2dee   : > { %10223 = vrcp.f32 %v7317_v27 }
0x2def   : > { %10225 = vrcp.f32 %v7360_v39 }
0x2df5   : > { %v10218_v54 = vpop.eup %10217 }
0x2df6   : > { %v7322_v29 = vmul.f32 %v10218_v54, %v11957_v17 }
0x2df7   : > { %v10220_v20 = vpop.eup %10219 }
0x2df8   : > { %v7336_v36 = vmul.f32 %v9798_v38, %v7322_v29  ;;  %v7320_v52 = vmul.f32 %v10220_v20, %v11953_v44  ;;  %v7328_v2 = vmul.f32 %v7322_v29, %v11973_v13 }
0x2df9   : > { %v10222_v60 = vpop.eup %10221 }
0x2dfa   : > { %v12017_v30 = vsub.f32 %v11932_v34, %v7336_v36  ;;  %v7335_v19 = vmul.f32 %v7320_v52, %v7280_v62  ;;  %v7326_v33 = vmul.f32 %v10222_v60, %v11970_v9  ;;  %v12020_v18 = vadd.f32 %v7328_v2, %v7151_v11 }
0x2dfb   : > { %v10224_v32 = vpop.eup %10223  ;;  %v7327_v53 = vmul.f32 %v7320_v52, %v11963_v37 }
0x2dfc   : > { %v7344_v23 = vmul.f32 %v12017_v30, %v12017_v30  ;;  %v12028_v41 = vsub.f32 %v11921_v22, %v7335_v19  ;;  %v7338_v28 = vmul.f32 %v9801_v59, %v7326_v33  ;;  %v7324_v34 = vmul.f32 %v10224_v32, %v11960_v10  ;;  %v10226_v63 = vpop.eup %10225 }
0x2dfd   : > { %v7330_v0 = vmul.f32 %v7326_v33, %v11989_v42  ;;  %v12034_v50 = vadd.f32 %v7327_v53, %v7150_v61  ;;  %v7359_v59 = vadd.f32 1e-08, %v11953_v44 }
0x2dfe   : > { %v7350_v51 = vsel %vm1320_vm1, %v7344_v23, 0.0  ;;  %v7343_v48 = vmul.f32 %v12028_v41, %v12028_v41  ;;  %v12040_v47 = vsub.f32 %v11946_v3, %v7338_v28  ;;  %v7337_v22 = vmul.f32 %v7324_v34, %v7290_v4 }
0x2dff   : > { %7351 = vadd.xlane.f32.xlu1 %v7350_v51  ;;  %v12044_v38 = vadd.f32 %v7330_v0, %v7153_v14  ;;  %v7329_v49 = vmul.f32 %v7324_v34, %v11977_v1  ;;  %10227 = vrcp.f32 %v7359_v59 }
0x2e00   : > { %v7347_v40 = vsel %vm1320_vm1, %v7343_v48, 0.0  ;;  %v7346_v58 = vmul.f32 %v12040_v47, %v12040_v47  ;;  %v12051_v62 = vsub.f32 %v11938_v21, %v7337_v22  ;;  %v7362_v21 = vadd.f32 1e-08, %v11970_v9 }
0x2e01   : > { %7348 = vadd.xlane.f32.xlu0 %v7347_v40  ;;  %v12053_v3 = vadd.f32 %v7329_v49, %v7152_v31 }
0x2e02   : > { %v7356_v25 = vsel %vm1320_vm1, %v7346_v58, 0.0  ;;  %v7345_v43 = vmul.f32 %v12051_v62, %v12051_v62  ;;  %10229 = vrcp.f32 %v7362_v21 }
0x2e03   : > { %7357 = vadd.xlane.f32.xlu1 %v7356_v25  ;;  %10231 = vrcp.f32 %v7361_v35 }
0x2e04   : > { %v7353_v26 = vsel %vm1320_vm1, %v7345_v43, 0.0 }
0x2e05   : > { %7354 = vadd.xlane.f32.xlu0 %v7353_v26 }
0x2e0c   : > { %v10228_v5 = vpop.eup %10227 }
0x2e0f   : > { %v10230_v8 = vpop.eup %10229 }
0x2e10   : > { %v10232_v56 = vpop.eup %10231 }
0x2e88   : > { %v12063_v4 = vpop.xlane.xlu1 %7351 }
0x2e89   : > { %v7366_v6 = vmul.f32 %v10226_v63, %v12063_v4 }
0x2e8a   : > { %v12066_v55 = vpop.xlane.xlu0 %7348 }
0x2e8b   : > { %v7364_v17 = vmul.f32 %v10228_v5, %v12066_v55  ;;  %v7372_v44 = vmul.f32 %v7366_v6, %v11973_v13 }
0x2e8c   : > { %v12070_v24 = vpop.xlane.xlu1 %7357 }
0x2e8d   : > { %v7371_v9 = vmul.f32 %v7364_v17, %v11963_v37  ;;  %v7370_v10 = vmul.f32 %v10230_v8, %v12070_v24  ;;  %v12081_v46 = vadd.f32 %v7372_v44, %v12017_v30 }
0x2e8e   : > { %v12074_v15 = vpop.xlane.xlu0 %7354 }
0x2e8f   : > { %v7368_v12 = vmul.f32 %v10232_v56, %v12074_v15  ;;  %v12078_v57 = vadd.f32 %v7371_v9, %v12028_v41  ;;  %v7374_v27 = vmul.f32 %v7370_v10, %v11989_v42 }
0x2e91   : > { %v7373_v13 = vmul.f32 %v7368_v12, %v11977_v1  ;;  %9810 = vmatprep.mubr.msk.f32.mxu1 %vm1320_vm1, %v12078_v57  ;;  %v12093_v54 = vadd.f32 %v7374_v27, %v12040_v47 }
0x2e92   : > { %9811 = vmatmul.mubr.msk.f32.vlgmr.msra.gmra.mxu1 %vm1320_vm1, %v12081_v46 }
0x2e93   : > { %v12090_v37 = vadd.f32 %v7373_v13, %v12051_v62 }
0x2e95   : > { %9813 = vmatprep.mubr.msk.f32.mxu1 %vm1320_vm1, %v12090_v37 }
0x2e96   : > { %9814 = vmatmul.mubr.msk.f32.gmra.mxu1 %vm1320_vm1, %v12093_v54 }
0x2e97   : > { %9838 = vmatprep.mubr.msk.f32.mxu1 %vm1320_vm1, %v11756_v7 }
0x2f52   : > { %v9812_v1 = vpop.f32.mrf.mxu1 }
0x2f53   : > { %v7477_v42 = vmul.f32 %v9812_v1, %v12081_v46 }
0x2f54   : > { %v7457_v29 = vpop.f32.mrf.mxu1 }
0x2f55   : > { %v7476_v20 = vmul.f32 %v7457_v29, %v12078_v57  ;;  %v7483_v11 = vsel %vm1320_vm1, %v7477_v42, 0.0  ;;  %v7536_v42 = vadd.f32 1e-08, %v12066_v55 }
0x2f56   : > { %7484 = vadd.xlane.f32.xlu1 %v7483_v11  ;;  %v9815_v36 = vpop.f32.mrf.mxu1 }
0x2f57   : > { %v7479_v52 = vmul.f32 %v9815_v36, %v12093_v54  ;;  %v7480_v2 = vsel %vm1320_vm1, %v7476_v20, 0.0 }
0x2f58   : > { %7481 = vadd.xlane.f32.xlu0 %v7480_v2  ;;  %v7467_v60 = vpop.f32.mrf.mxu1 }
0x2f59   : > { %v7478_v19 = vmul.f32 %v7467_v60, %v12090_v37  ;;  %v7489_v7 = vsel %vm1320_vm1, %v7479_v52, 0.0 }
0x2f5a   : > { %7490 = vadd.xlane.f32.xlu1 %v7489_v7 }
0x2f5b   : > { %v7486_v33 = vsel %vm1320_vm1, %v7478_v19, 0.0 }
0x2f5c   : > { %7487 = vadd.xlane.f32.xlu0 %v7486_v33 }
0x2fdf   : > { %v7485_v32 = vpop.xlane.xlu1 %7484 }
0x2fe0   : > { %v7493_v61 = vadd.f32 1e-08, %v7485_v32 }
0x2fe1   : > { %v7482_v53 = vpop.xlane.xlu0 %7481 }
0x2fe2   : > { %10233 = vrcp.f32 %v7493_v61  ;;  %v7492_v23 = vadd.f32 1e-08, %v7482_v53 }
0x2fe3   : > { %v7491_v28 = vpop.xlane.xlu1 %7490 }
0x2fe4   : > { %10235 = vrcp.f32 %v7492_v23  ;;  %v7495_v34 = vadd.f32 1e-08, %v7491_v28 }
0x2fe5   : > { %v7488_v14 = vpop.xlane.xlu0 %7487 }
0x2fe6   : > { %10237 = vrcp.f32 %v7495_v34  ;;  %v7494_v0 = vadd.f32 1e-08, %v7488_v14 }
0x2fe8   : > { %10239 = vrcp.f32 %v7494_v0 }
0x2fef   : > { %v10234_v51 = vpop.eup %10233 }
0x2ff0   : > { %v7499_v48 = vmul.f32 %v10234_v51, %v12063_v4 }
0x2ff1   : > { %v10236_v22 = vpop.eup %10235 }
0x2ff2   : > { %v7513_v31 = vmul.f32 %v9812_v1, %v7499_v48  ;;  %v7497_v49 = vmul.f32 %v10236_v22, %v12066_v55  ;;  %v7505_v40 = vmul.f32 %v7499_v48, %v12081_v46 }
0x2ff3   : > { %v10238_v58 = vpop.eup %10237 }
0x2ff4   : > { %v7517_v25 = vsub.f32 %v12017_v30, %v7513_v31  ;;  %v7512_v43 = vmul.f32 %v7497_v49, %v7457_v29  ;;  %v7503_v26 = vmul.f32 %v10238_v58, %v12070_v24  ;;  %v12115_v39 = vadd.f32 %v7505_v40, %v12020_v18  ;;  %v12158_v40 = vld [vmem:[#allocation2] sm:$0xff] }
0x2ff5   : > { %v10240_v59 = vpop.eup %10239  ;;  %v7504_v21 = vmul.f32 %v7497_v49, %v12078_v57  ;;  %v7539_v29 = vadd.f32 1e-08, %v12070_v24 }
0x2ff6   : > { %v7521_v35 = vmul.f32 %v7517_v25, %v7517_v25  ;;  %v7516_v63 = vsub.f32 %v12028_v41, %v7512_v43  ;;  %v7515_v6 = vmul.f32 %v9815_v36, %v7503_v26  ;;  %v7501_v5 = vmul.f32 %v10240_v59, %v12074_v15 }
0x2ff7   : > { %v7507_v17 = vmul.f32 %v7503_v26, %v12093_v54  ;;  %v12122_v8 = vadd.f32 %v7504_v21, %v12034_v50  ;;  %v7792_v43 = vsel %vm1320_vm1, %v12158_v40, 0.0 }
0x2ff8   : > { %v7527_v30 = vsel %vm1320_vm1, %v7521_v35, 0.0  ;;  %v7520_v44 = vmul.f32 %v7516_v63, %v7516_v63  ;;  %v7519_v18 = vsub.f32 %v12040_v47, %v7515_v6  ;;  %v7514_v9 = vmul.f32 %v7501_v5, %v7467_v60 }
0x2ff9   : > { %7528 = vadd.xlane.f32.xlu1 %v7527_v30  ;;  %v12127_v10 = vadd.f32 %v7507_v17, %v12044_v38  ;;  %v7506_v41 = vmul.f32 %v7501_v5, %v12090_v37  ;;  %v7537_v38 = vadd.f32 1e-08, %v12063_v4 }
0x2ffa   : > { %v7524_v56 = vsel %vm1320_vm1, %v7520_v44, 0.0  ;;  %v7523_v12 = vmul.f32 %v7519_v18, %v7519_v18  ;;  %v7518_v27 = vsub.f32 %v12051_v62, %v7514_v9  ;;  %v7538_v62 = vadd.f32 1e-08, %v12074_v15 }
0x2ffb   : > { %7525 = vadd.xlane.f32.xlu0 %v7524_v56  ;;  %v12133_v50 = vadd.f32 %v7506_v41, %v12053_v3  ;;  %10241 = vrcp.f32 %v7537_v38 }
0x2ffc   : > { %v7533_v13 = vsel %vm1320_vm1, %v7523_v12, 0.0  ;;  %v7522_v1 = vmul.f32 %v7518_v27, %v7518_v27  ;;  %10243 = vrcp.f32 %v7536_v42 }
0x2ffd   : > { %7534 = vadd.xlane.f32.xlu1 %v7533_v13  ;;  %10245 = vrcp.f32 %v7539_v29 }
0x2ffe   : > { %v7530_v47 = vsel %vm1320_vm1, %v7522_v1, 0.0  ;;  %10247 = vrcp.f32 %v7538_v62 }
0x2fff   : > { %7531 = vadd.xlane.f32.xlu0 %v7530_v47 }
0x3008   : > { %v10242_v3 = vpop.eup %10241 }
0x3009   : > { %v10244_v36 = vpop.eup %10243 }
0x300a   : > { %v10246_v2 = vpop.eup %10245 }
0x300b   : > { %v10248_v15 = vpop.eup %10247 }
0x3082   : > { %v12141_v20 = vpop.xlane.xlu1 %7528 }
0x3083   : > { %v7543_v11 = vmul.f32 %v10242_v3, %v12141_v20 }
0x3084   : > { %v12144_v52 = vpop.xlane.xlu0 %7525 }
0x3085   : > { %v7541_v4 = vmul.f32 %v10244_v36, %v12144_v52  ;;  %v7549_v55 = vmul.f32 %v7543_v11, %v12081_v46  ;;  %v10290_v11 = vld [vmem:[#allocation2 + $0x18] sm:$0xff] }
0x3086   : > { %v7535_v60 = vpop.xlane.xlu1 %7534 }
0x3087   : > { %v7548_v24 = vmul.f32 %v7541_v4, %v12078_v57  ;;  %v7547_v19 = vmul.f32 %v10246_v2, %v7535_v60  ;;  %v7553_v61 = vadd.f32 %v7549_v55, %v7517_v25  ;;  %v12161_v25 = vld [vmem:[#allocation2 + $0x8] sm:$0xff]  ;;  %v10291_v2 = vld [vmem:[#allocation2 + $0x10] sm:$0xff] }
0x3088   : > { %v7532_v7 = vpop.xlane.xlu0 %7531  ;;  %v7795_v26 = vsel %vm1320_vm1, %v12161_v25, 0.0 }
0x3089   : > { %v7552_v33 = vadd.f32 %v7548_v24, %v7516_v63  ;;  %v7545_v32 = vmul.f32 %v10248_v15, %v7532_v7  ;;  %v7551_v53 = vmul.f32 %v7547_v19, %v12093_v54 }
0x308b   : > { %v7550_v23 = vmul.f32 %v7545_v32, %v12090_v37  ;;  %9824 = vmatprep.mubr.msk.f32.mxu0 %vm1320_vm1, %v7552_v33  ;;  %v7555_v34 = vadd.f32 %v7551_v53, %v7519_v18 }
0x308c   : > { %9825 = vmatmul.mubr.msk.f32.vlgmr.msra.gmra.mxu0 %vm1320_vm1, %v7553_v61 }
0x308d   : > { %v7554_v28 = vadd.f32 %v7550_v23, %v7518_v27  ;;  %v7867_v23 = vld [vmem:[%s10604_s8 + $0x18] sm:$0xff] }
0x308e   : > { %9841 = vmatprep.subr.mxu0 %v7867_v23 }
0x308f   : > { %9827 = vmatprep.mubr.msk.f32.mxu0 %vm1320_vm1, %v7554_v28  ;;  %9842 = vmatpush3.msra.mxu0 %v7867_v23 }
0x3090   : > { %9828 = vmatmul.mubr.msk.f32.gmra.mxu0 %vm1320_vm1, %v7555_v34 }
0x314c   : > { %v9826_v57 = vpop.f32.mrf.mxu0 }
0x314d   : > { %v7654_v48 = vmul.f32 %v9826_v57, %v7553_v61  ;;  %v7864_v57 = vld [vmem:[%s10604_s8] sm:$0xff] }
0x314e   : > { %v7634_v46 = vpop.f32.mrf.mxu0 }
0x314f   : > { %v7653_v37 = vmul.f32 %v7634_v46, %v7552_v33  ;;  %v7660_v49 = vsel %vm1320_vm1, %v7654_v48, 0.0 }
0x3150   : > { %v9829_v14 = vpop.f32.mrf.mxu0 }
0x3151   : > { %v7656_v0 = vmul.f32 %v9829_v14, %v7555_v34  ;;  %v7657_v58 = vsel %vm1320_vm1, %v7653_v37, 0.0 }
0x3152   : > { %v7644_v51 = vpop.f32.mrf.mxu0 }
0x3153   : > { %v7655_v22 = vmul.f32 %v7644_v51, %v7554_v28  ;;  %v7666_v54 = vsel %vm1320_vm1, %v7656_v0, 0.0 }
0x3154   : > { %7667 = vadd.xlane.f32.xlu0 %v7666_v54 }
0x3155   : > { %v7663_v31 = vsel %vm1320_vm1, %v7655_v22, 0.0 }
0x3156   : > { %7664 = vadd.xlane.f32.xlu1 %v7663_v31 }
0x3158   : > { %7661 = vadd.xlane.f32.xlu0 %v7660_v49 }
0x315a   : > { %7658 = vadd.xlane.f32.xlu1 %v7657_v58 }
0x315c   : > { %7793 = vadd.xlane.f32.xlu0 %v7792_v43 }
0x315e   : > { %7796 = vadd.xlane.f32.xlu1 %v7795_v26 }
0x31dd   : > { %v7668_v59 = vpop.xlane.xlu0 %7667 }
0x31de   : > { %v7672_v21 = vadd.f32 1e-08, %v7668_v59 }
0x31df   : > { %v7665_v35 = vpop.xlane.xlu1 %7664 }
0x31e0   : > { %10249 = vrcp.f32 %v7672_v21  ;;  %v7671_v63 = vadd.f32 1e-08, %v7665_v35 }
0x31e1   : > { %v7662_v6 = vpop.xlane.xlu0 %7661 }
0x31e2   : > { %10251 = vrcp.f32 %v7671_v63  ;;  %v7670_v5 = vadd.f32 1e-08, %v7662_v6 }
0x31e3   : > { %v7659_v17 = vpop.xlane.xlu1 %7658 }
0x31e4   : > { %10253 = vrcp.f32 %v7670_v5  ;;  %v7669_v30 = vadd.f32 1e-08, %v7659_v17  ;;  %v12216_v5 = vld [vmem:[%s1281_s19] ss:$0 sm:$0xff] }
0x31e5   : > { %v7794_v36 = vpop.xlane.xlu0 %7793 }
0x31e6   : > { %10255 = vrcp.f32 %v7669_v30  ;;  %v7804_v55 = vmul.f32 0.03125, %v7794_v36  ;;  %v8082_v36 = vld [vmem:[%s10610_s17 + $0x10] sm:$0xff] }
0x31ed   : > { %v10250_v44 = vpop.eup %10249 }
0x31ee   : > { %v7680_v18 = vmul.f32 %v10250_v44, %v7535_v60 }
0x31ef   : > { %v10252_v9 = vpop.eup %10251 }
0x31f0   : > { %v7684_v41 = vmul.f32 %v7680_v18, %v7555_v34  ;;  %v7678_v56 = vmul.f32 %v10252_v9, %v7532_v7  ;;  %v7865_v34 = vld [vmem:[%s10604_s8 + $0x8] sm:$0xff]  ;;  %v12222_v18 = vld [vmem:[%s1284_s14] ss:$0 sm:$0xff] }
0x31f1   : > { %v10254_v12 = vpop.eup %10253 }
0x31f2   : > { %v7688_v27 = vadd.f32 %v7684_v41, %v12127_v10  ;;  %v7683_v13 = vmul.f32 %v7678_v56, %v7554_v28  ;;  %v7676_v1 = vmul.f32 %v10254_v12, %v12141_v20  ;;  %v7866_v28 = vld [vmem:[%s10604_s8 + $0x10] sm:$0xff]  ;;  %v8095_v12 = vld [vmem:[%s10610_s17 + $0x78] sm:$0xff] }
0x31f3   : > { %v10256_v47 = vpop.eup %10255  ;;  %9843 = vmatprep.subr.mxu0 %v7866_v28 }
0x31f4   : > { %9830 = vmatprep.subr.msk.mxu1 %vm1320_vm1, %v7688_v27  ;;  %v7687_v38 = vadd.f32 %v7683_v13, %v12133_v50  ;;  %v7682_v42 = vmul.f32 %v7676_v1, %v7553_v61  ;;  %v7674_v29 = vmul.f32 %v10256_v47, %v12144_v52  ;;  %v7797_v50 = vpop.xlane.xlu1 %7796  ;;  %9844 = vmatpush3.msra.mxu0 %v7866_v28  ;;  %v8093_v13 = vld [vmem:[%s10610_s17 + $0x68] sm:$0xff]  ;;  %v8092_v1 = vld [vmem:[%s10610_s17 + $0x60] sm:$0xff]  ;;  %v8091_v47 = vld [vmem:[%s10610_s17 + $0x58] sm:$0xff] }
0x31f5   : > { %9831 = vmatpush3.xpose.msk.msra.mxu1 %vm1320_vm1, %v7688_v27  ;;  %v7805_v4 = vmul.f32 0.03125, %v7797_v50  ;;  %9845 = vmatprep.subr.mxu0 %v7865_v34  ;;  %v8094_v27 = vld [vmem:[%s10610_s17 + $0x70] sm:$0xff]  ;;  %v8084_v50 = vld [vmem:[%s10610_s17 + $0x20] sm:$0xff] }
0x31f6   : > { %9832 = vmatprep.subr.msk.mxu1 %vm1320_vm1, %v7687_v38  ;;  %v7686_v62 = vadd.f32 %v7682_v42, %v12115_v39  ;;  %v7681_v3 = vmul.f32 %v7674_v29, %v7552_v33  ;;  %9846 = vmatpush3.msra.mxu0 %v7865_v34  ;;  %v8089_v42 = vld [vmem:[%s10610_s17 + $0x48] sm:$0xff]  ;;  %v8088_v29 = vld [vmem:[%s10610_s17 + $0x40] sm:$0xff] }
0x31f7   : > { %v7809_v60 = vsub.f32 %v12161_v25, %v7805_v4  ;;  %9847 = vmatprep.subr.mxu0 %v7864_v57  ;;  %v8081_v4 = vld [vmem:[%s10610_s17 + $0x8] sm:$0xff]  ;;  %v12256_v28 = vld [vmem:[%s1292_s9] ss:$0 sm:$0xff] }
0x31f8   : > { %v7685_v10 = vadd.f32 %v7681_v3, %v12122_v8  ;;  %9848 = vmatpush3.msra.mxu0 %v7864_v57  ;;  %v8086_v3 = vld [vmem:[%s10610_s17 + $0x30] sm:$0xff] }
0x31f9   : > { %9833 = vmatpush3.xpose.msk.msra.mxu1 %vm1320_vm1, %v7687_v38  ;;  %v7813_v15 = vmul.f32 %v7809_v60, %v7809_v60  ;;  %9855 = vmatprep.subr.mxu0 %v8095_v12  ;;  %v8090_v38 = vld [vmem:[%s10610_s17 + $0x50] sm:$0xff] }
0x31fa   : > { %9834 = vmatprep.subr.msk.mxu1 %vm1320_vm1, %v7686_v62 }
0x31fb   : > { %v7819_v61 = vsel %vm1320_vm1, %v7813_v15, 0.0 }
0x31fd   : > { %9835 = vmatpush3.xpose.msk.msra.mxu1 %vm1320_vm1, %v7686_v62  ;;  %v8087_v62 = vld [vmem:[%s10610_s17 + $0x38] sm:$0xff] }
0x31fe   : > { %9836 = vmatprep.subr.msk.mxu1 %vm1320_vm1, %v7685_v10 }
0x3201   : > { %9837 = vmatpush3.xpose.msk.msra.mxu1 %vm1320_vm1, %v7685_v10  ;;  %v8085_v10 = vld [vmem:[%s10610_s17 + $0x28] sm:$0xff] }
0x3204   : > { %9839 = vmatmul.mubr.msk.f32.vlgmr.msra.gmra.mxu1 %vm1320_vm1, %v11752_v16  ;;  %v7808_v16 = vsub.f32 %v12158_v40, %v7804_v55  ;;  %v8080_v55 = vld [vmem:[%s10610_s17] sm:$0xff] }
0x3206   : > { %v7812_v32 = vmul.f32 %v7808_v16, %v7808_v16 }
0x3208   : > { %v7816_v53 = vsel %vm1320_vm1, %v7812_v32, 0.0 }
0x32c4   : > { %v9840_v20 = vpop.f32.mrf.mxu1 }
0x32c5   : > { %v7783_v39 = vadd.f32 %v10290_v11, %v9840_v20  ;;  %v8083_v20 = vld [vmem:[%s10610_s17 + $0x18] sm:$0xff]  ;;  %s12412_s17 = sld [smem:[#allocation35_spill]] }
0x32c6   : > { %v7773_v52 = vpop.f32.mrf.mxu1 }
0x32c7   : > { %7785 = vst.msk [vmem:[#allocation2 + $0x18] sm:$0xff] %vm1320_vm1, %v7783_v39  ;;  %v7782_v8 = vadd.f32 %v10291_v2, %v7773_v52 }
0x32c9   : > { %7784 = vst.msk [vmem:[#allocation2 + $0x10] sm:$0xff] %vm1320_vm1, %v7782_v8 }
0x32cb   : > { %p8970_p5 = scmp.ne.s32.totalorder %s12412_s17, 1 }
0x32cc   : > { %s12413_s19 = sld [smem:[#allocation31_spill]] (!%p8970_p5) }
0x32cd   : > { %s12414_s4 = sld [smem:[#allocation29_spill]] (!%p8970_p5) }
0x32ce   : > { %v12187_v24 = vld [vmem:[#allocation2 + $0x18] sm:$0xff]  ;;  %s12415_s16 = sld [smem:[#allocation30_spill]] (!%p8970_p5) }
0x32cf   : > { %v7801_v19 = vsel %vm1320_vm1, %v12187_v24, 0.0  ;;  %s12416_s0 = sld [smem:[#allocation32_spill]] (!%p8970_p5) }
0x32d0   : > { %7802 = vadd.xlane.f32.xlu1 %v7801_v19  ;;  %v12191_v7 = vld [vmem:[#allocation2 + $0x10] sm:$0xff] }
0x32d1   : > { %v7798_v33 = vsel %vm1320_vm1, %v12191_v7, 0.0 }
0x32d2   : > { %7799 = vadd.xlane.f32.xlu0 %v7798_v33 }
0x32d4   : > { %7820 = vadd.xlane.f32.xlu1 %v7819_v61 }
0x32d6   : > { %7817 = vadd.xlane.f32.xlu0 %v7816_v53 }
0x3359   : > { %v7803_v46 = vpop.xlane.xlu1 %7802 }
0x335a   : > { %v7807_v14 = vmul.f32 0.03125, %v7803_v46 }
0x335b   : > { %v7800_v0 = vpop.xlane.xlu0 %7799 }
0x335c   : > { %v12202_v51 = vsub.f32 %v12187_v24, %v7807_v14  ;;  %v7806_v48 = vmul.f32 0.03125, %v7800_v0 }
0x335d   : > { %v7821_v22 = vpop.xlane.xlu1 %7820 }
0x335e   : > { %v12205_v54 = vsub.f32 %v12191_v7, %v7806_v48  ;;  %v7829_v37 = vmul.f32 0.03125, %v7821_v22  ;;  %v7815_v31 = vmul.f32 %v12202_v51, %v12202_v51 }
0x335f   : > { %v7818_v49 = vpop.xlane.xlu0 %7817 }
0x3360   : > { %v7833_v58 = vadd.f32 1e-05, %v7829_v37  ;;  %v7828_v43 = vmul.f32 0.03125, %v7818_v49  ;;  %v7825_v26 = vsel %vm1320_vm1, %v7815_v31, 0.0  ;;  %v7814_v59 = vmul.f32 %v12205_v54, %v12205_v54 }
0x3361   : > { %7826 = vadd.xlane.f32.xlu1 %v7825_v26 }
0x3362   : > { %10257 = vrsqrt.f32 %v7833_v58  ;;  %v7832_v21 = vadd.f32 1e-05, %v7828_v43  ;;  %v7822_v35 = vsel %vm1320_vm1, %v7814_v59, 0.0 }
0x3363   : > { %7823 = vadd.xlane.f32.xlu0 %v7822_v35 }
0x3364   : > { %10259 = vrsqrt.f32 %v7832_v21 }
0x336f   : > { %v10258_v63 = vpop.eup %10257 }
0x3370   : > { %v7841_v6 = vmul.f32 %v10258_v63, %v7809_v60 }
0x3371   : > { %v10260_v17 = vpop.eup %10259 }
0x3372   : > { %v7840_v30 = vmul.f32 %v10260_v17, %v7808_v16  ;;  %v7851_v44 = vmul.f32 %v12216_v5, %v7841_v6 }
0x3374   : > { %v7850_v9 = vmul.f32 %v12216_v5, %v7840_v30  ;;  %v7861_v56 = vadd.f32 %v12222_v18, %v7851_v44 }
0x3376   : > { %v7860_v41 = vadd.f32 %v12222_v18, %v7850_v9 }
0x3378   : > { %9849 = vmatprep.mubr.msk.f32.mxu0 %vm1320_vm1, %v7860_v41 }
0x3379   : > { %9850 = vmatmul.mubr.msk.f32.vlgmr.msra.gmra.mxu0 %vm1320_vm1, %v7861_v56 }
0x337a   : > { %9856 = vmatpush3.msra.mxu0 %v8095_v12 }
0x337b   : > { %9857 = vmatprep.subr.mxu0 %v8094_v27 }
0x337c   : > { %9858 = vmatpush3.msra.mxu0 %v8094_v27 }
0x337d   : > { %9859 = vmatprep.subr.mxu0 %v8093_v13 }
0x337e   : > { %9860 = vmatpush3.msra.mxu0 %v8093_v13 }
0x337f   : > { %9861 = vmatprep.subr.mxu0 %v8092_v1 }
0x3380   : > { %9862 = vmatpush3.msra.mxu0 %v8092_v1 }
0x3381   : > { %9863 = vmatprep.subr.mxu0 %v8091_v47 }
0x3382   : > { %9864 = vmatpush3.msra.mxu0 %v8091_v47 }
0x3383   : > { %9865 = vmatprep.subr.mxu0 %v8090_v38 }
0x3384   : > { %9866 = vmatpush3.msra.mxu0 %v8090_v38 }
0x3385   : > { %9867 = vmatprep.subr.mxu0 %v8089_v42 }
0x3386   : > { %9868 = vmatpush3.msra.mxu0 %v8089_v42 }
0x3387   : > { %9869 = vmatprep.subr.mxu0 %v8088_v29 }
0x3388   : > { %9870 = vmatpush3.msra.mxu0 %v8088_v29 }
0x3389   : > { %9871 = vmatprep.subr.mxu0 %v8087_v62 }
0x338a   : > { %9872 = vmatpush3.msra.mxu0 %v8087_v62 }
0x338b   : > { %9873 = vmatprep.subr.mxu0 %v8086_v3 }
0x338c   : > { %9874 = vmatpush3.msra.mxu0 %v8086_v3 }
0x338d   : > { %9875 = vmatprep.subr.mxu0 %v8085_v10 }
0x338e   : > { %9876 = vmatpush3.msra.mxu0 %v8085_v10 }
0x338f   : > { %9877 = vmatprep.subr.mxu0 %v8084_v50 }
0x3390   : > { %9878 = vmatpush3.msra.mxu0 %v8084_v50 }
0x3391   : > { %9879 = vmatprep.subr.mxu0 %v8083_v20 }
0x3392   : > { %9880 = vmatpush3.msra.mxu0 %v8083_v20 }
0x3393   : > { %9881 = vmatprep.subr.mxu0 %v8082_v36 }
0x3394   : > { %9882 = vmatpush3.msra.mxu0 %v8082_v36 }
0x3395   : > { %9883 = vmatprep.subr.mxu0 %v8081_v4 }
0x3396   : > { %9884 = vmatpush3.msra.mxu0 %v8081_v4 }
0x3397   : > { %9885 = vmatprep.subr.mxu0 %v8080_v55 }
0x3398   : > { %9886 = vmatpush3.msra.mxu0 %v8080_v55 }
0x33ea   : > { %v7827_v11 = vpop.xlane.xlu1 %7826 }
0x33eb   : > { %v7831_v39 = vmul.f32 0.03125, %v7827_v11 }
0x33ec   : > { %v7824_v52 = vpop.xlane.xlu0 %7823 }
0x33ed   : > { %v7835_v2 = vadd.f32 1e-05, %v7831_v39  ;;  %v7830_v8 = vmul.f32 0.03125, %v7824_v52 }
0x33ef   : > { %10261 = vrsqrt.f32 %v7835_v2  ;;  %v7834_v60 = vadd.f32 1e-05, %v7830_v8 }
0x33f1   : > { %10263 = vrsqrt.f32 %v7834_v60 }
0x33fc   : > { %v10262_v16 = vpop.eup %10261 }
0x33fd   : > { %v7843_v19 = vmul.f32 %v10262_v16, %v12202_v51 }
0x33fe   : > { %v10264_v15 = vpop.eup %10263 }
0x33ff   : > { %v7842_v33 = vmul.f32 %v10264_v15, %v12205_v54  ;;  %v7853_v32 = vmul.f32 %v12216_v5, %v7843_v19 }
0x3401   : > { %v7852_v61 = vmul.f32 %v12216_v5, %v7842_v33  ;;  %v7863_v23 = vadd.f32 %v12222_v18, %v7853_v32 }
0x3403   : > { %v7862_v53 = vadd.f32 %v12222_v18, %v7852_v61 }
0x3405   : > { %9852 = vmatprep.mubr.msk.f32.mxu0 %vm1320_vm1, %v7862_v53 }
0x3406   : > { %9853 = vmatmul.mubr.msk.f32.gmra.mxu0 %vm1320_vm1, %v7863_v23 }
0x3439   : > { %v9851_v34 = vpop.f32.mrf.mxu0 }
0x343a   : > { %v7959_v57 = vadd.f32 %v9851_v34, %v12256_v28 }
0x343b   : > { %v7953_v46 = vpop.f32.mrf.mxu0 }
0x343c   : > { %v7977_v14 = vmul.f32 0.70710677, %v7959_v57  ;;  %v7954_v0 = vadd.f32 %v12256_v28, %v7953_v46  ;;  %v7973_v19 = vmul.f32 0.5, %v7959_v57 }
0x343e   : > { %v7989_v51 = vand.u32 2147483647, %v7977_v14  ;;  %v7976_v48 = vmul.f32 0.70710677, %v7954_v0  ;;  %vm7981_vm12 = vcmp.ge.f32.partialorder %v7977_v14, 0.0  ;;  %v7972_v60 = vmul.f32 0.5, %v7954_v0 }
0x343f   : > { %v7985_v39 = vsel %vm7981_vm12, 1.0, %v10367_v45 }
0x3440   : > { %v7993_v22 = vmul.f32 0.3275911, %v7989_v51  ;;  %v7988_v54 = vand.u32 2147483647, %v7976_v48  ;;  %v8045_v58 = vsub.f32 0.0, %v7989_v51  ;;  %vm7980_vm7 = vcmp.ge.f32.partialorder %v7976_v48, 0.0 }
0x3441   : > { %v7984_v2 = vsel %vm7980_vm7, 1.0, %v10367_v45 }
0x3442   : > { %v7997_v37 = vadd.f32 1.0, %v7993_v22  ;;  %v7992_v31 = vmul.f32 0.3275911, %v7988_v54  ;;  %v8044_v43 = vsub.f32 0.0, %v7988_v54  ;;  %v8049_v26 = vmul.f32 %v8045_v58, %v7989_v51 }
0x3444   : > { %10265 = vrcp.f32 %v7997_v37  ;;  %v7996_v49 = vadd.f32 1.0, %v7992_v31  ;;  %v8048_v21 = vmul.f32 %v8044_v43, %v7988_v54  ;;  %v8054_v63 = vmul.f32 1.442695, %v8049_v26 }
0x3446   : > { %10267 = vrcp.f32 %v7996_v49  ;;  %v8052_v17 = vmul.f32 1.442695, %v8048_v21 }
0x3447   : > { %10269 = vpow2.f32 %v8054_v63 }
0x3448   : > { %10271 = vpow2.f32 %v8052_v17 }
0x3451   : > { %v10266_v59 = vpop.eup %10265 }
0x3452   : > { %v8009_v35 = vmul.f32 1.0614054, %v10266_v59 }
0x3453   : > { %v10268_v6 = vpop.eup %10267 }
0x3454   : > { %v8013_v5 = vadd.f32 -1.4531521, %v8009_v35  ;;  %v8008_v30 = vmul.f32 1.0614054, %v10268_v6  ;;  %v10270_v62 = vpop.eup %10269 }
0x3455   : > { %v10272_v20 = vpop.eup %10271 }
0x3456   : > { %v8017_v44 = vmul.f32 %v10266_v59, %v8013_v5  ;;  %v8012_v18 = vadd.f32 -1.4531521, %v8008_v30 }
0x3458   : > { %v8021_v9 = vadd.f32 1.4214138, %v8017_v44  ;;  %v8016_v41 = vmul.f32 %v10268_v6, %v8012_v18 }
0x345a   : > { %v8025_v56 = vmul.f32 %v10266_v59, %v8021_v9  ;;  %v8020_v12 = vadd.f32 1.4214138, %v8016_v41 }
0x345c   : > { %v8029_v27 = vadd.f32 -0.28449672, %v8025_v56  ;;  %v8024_v13 = vmul.f32 %v10268_v6, %v8020_v12 }
0x345e   : > { %v8033_v1 = vmul.f32 %v10266_v59, %v8029_v27  ;;  %v8028_v47 = vadd.f32 -0.28449672, %v8024_v13 }
0x3460   : > { %v8037_v38 = vadd.f32 0.2548296, %v8033_v1  ;;  %v8032_v42 = vmul.f32 %v10268_v6, %v8028_v47 }
0x3462   : > { %v8041_v29 = vmul.f32 %v10266_v59, %v8037_v38  ;;  %v8036_v3 = vadd.f32 0.2548296, %v8032_v42 }
0x3464   : > { %v8061_v10 = vmul.f32 %v10270_v62, %v8041_v29  ;;  %v8040_v50 = vmul.f32 %v10268_v6, %v8036_v3 }
0x3466   : > { %v8065_v11 = vsub.f32 1.0, %v8061_v10  ;;  %v8060_v36 = vmul.f32 %v10272_v20, %v8040_v50 }
0x3468   : > { %v8069_v52 = vmul.f32 %v8065_v11, %v7985_v39  ;;  %v8064_v4 = vsub.f32 1.0, %v8060_v36 }
0x346a   : > { %v8068_v8 = vmul.f32 %v8064_v4, %v7984_v2  ;;  %v8073_v55 = vadd.f32 1.0, %v8069_v52 }
0x346c   : > { %v8072_v16 = vadd.f32 1.0, %v8068_v8  ;;  %v8077_v33 = vmul.f32 %v8073_v55, %v7973_v19 }
0x346e   : > { %v8076_v15 = vmul.f32 %v8072_v16, %v7972_v60  ;;  %v8969_v60 = vld [vmem:[%s1300_s15] ss:$0 sm:$0xff] }
0x3470   : > { %9887 = vmatprep.mubr.f32.mxu0 %v8076_v15 }
0x3471   : > { %9888 = vmatmul.mubr.f32.vlgmr.msra.gmra.mxu0 %v8077_v33 }
0x34c6   : > { %v9854_v32 = vpop.f32.mrf.mxu0 }
0x34c7   : > { %v7969_v61 = vadd.f32 %v9854_v32, %v12256_v28 }
0x34c8   : > { %v7963_v53 = vpop.f32.mrf.mxu0 }
0x34c9   : > { %v7979_v23 = vmul.f32 0.70710677, %v7969_v61  ;;  %v7964_v34 = vadd.f32 %v12256_v28, %v7963_v53  ;;  %v7975_v2 = vmul.f32 0.5, %v7969_v61 }
0x34cb   : > { %v7991_v46 = vand.u32 2147483647, %v7979_v23  ;;  %v7978_v14 = vmul.f32 0.70710677, %v7964_v34  ;;  %vm7983_vm8 = vcmp.ge.f32.partialorder %v7979_v23, 0.0  ;;  %v7974_v52 = vmul.f32 0.5, %v7964_v34 }
0x34cc   : > { %v7987_v3 = vsel %vm7983_vm8, 1.0, %v10367_v45 }
0x34cd   : > { %v7995_v51 = vmul.f32 0.3275911, %v7991_v46  ;;  %v7990_v48 = vand.u32 2147483647, %v7978_v14  ;;  %v8047_v57 = vsub.f32 0.0, %v7991_v46  ;;  %vm7982_vm9 = vcmp.ge.f32.partialorder %v7978_v14, 0.0 }
0x34ce   : > { %v7986_v11 = vsel %vm7982_vm9, 1.0, %v10367_v45 }
0x34cf   : > { %v7999_v22 = vadd.f32 1.0, %v7995_v51  ;;  %v7994_v54 = vmul.f32 0.3275911, %v7990_v48  ;;  %v8046_v37 = vsub.f32 0.0, %v7990_v48  ;;  %v8051_v31 = vmul.f32 %v8047_v57, %v7991_v46 }
0x34d1   : > { %10273 = vrcp.f32 %v7999_v22  ;;  %v7998_v0 = vadd.f32 1.0, %v7994_v54  ;;  %v8050_v58 = vmul.f32 %v8046_v37, %v7990_v48  ;;  %v8058_v43 = vmul.f32 1.442695, %v8051_v31 }
0x34d3   : > { %10275 = vrcp.f32 %v7998_v0  ;;  %v8056_v35 = vmul.f32 1.442695, %v8050_v58 }
0x34d4   : > { %10277 = vpow2.f32 %v8058_v43 }
0x34d5   : > { %10279 = vpow2.f32 %v8056_v35 }
0x34de   : > { %v10274_v49 = vpop.eup %10273 }
0x34df   : > { %v8011_v26 = vmul.f32 1.0614054, %v10274_v49 }
0x34e0   : > { %v10276_v59 = vpop.eup %10275 }
0x34e1   : > { %v8015_v21 = vadd.f32 -1.4531521, %v8011_v26  ;;  %v8010_v28 = vmul.f32 1.0614054, %v10276_v59  ;;  %v10278_v1 = vpop.eup %10277 }
0x34e2   : > { %v10280_v29 = vpop.eup %10279 }
0x34e3   : > { %v8019_v63 = vmul.f32 %v10274_v49, %v8015_v21  ;;  %v8014_v6 = vadd.f32 -1.4531521, %v8010_v28 }
0x34e5   : > { %v8023_v5 = vadd.f32 1.4214138, %v8019_v63  ;;  %v8018_v17 = vmul.f32 %v10276_v59, %v8014_v6 }
0x34e7   : > { %v8027_v30 = vmul.f32 %v10274_v49, %v8023_v5  ;;  %v8022_v44 = vadd.f32 1.4214138, %v8018_v17 }
0x34e9   : > { %v8031_v18 = vadd.f32 -0.28449672, %v8027_v30  ;;  %v8026_v9 = vmul.f32 %v10276_v59, %v8022_v44 }
0x34eb   : > { %v8035_v41 = vmul.f32 %v10274_v49, %v8031_v18  ;;  %v8030_v56 = vadd.f32 -0.28449672, %v8026_v9 }
0x34ed   : > { %v8039_v12 = vadd.f32 0.2548296, %v8035_v41  ;;  %v8034_v27 = vmul.f32 %v10276_v59, %v8030_v56 }
0x34ef   : > { %v8043_v13 = vmul.f32 %v10274_v49, %v8039_v12  ;;  %v8038_v47 = vadd.f32 0.2548296, %v8034_v27 }
0x34f1   : > { %v8063_v38 = vmul.f32 %v10278_v1, %v8043_v13  ;;  %v8042_v42 = vmul.f32 %v10276_v59, %v8038_v47 }
0x34f3   : > { %v8067_v62 = vsub.f32 1.0, %v8063_v38  ;;  %v8062_v10 = vmul.f32 %v10280_v29, %v8042_v42 }
0x34f5   : > { %v8071_v50 = vmul.f32 %v8067_v62, %v7987_v3  ;;  %v8066_v20 = vsub.f32 1.0, %v8062_v10 }
0x34f7   : > { %v8070_v39 = vmul.f32 %v8066_v20, %v7986_v11  ;;  %v8075_v36 = vadd.f32 1.0, %v8071_v50 }
0x34f9   : > { %v8074_v4 = vadd.f32 1.0, %v8070_v39  ;;  %v8079_v55 = vmul.f32 %v8075_v36, %v7975_v2 }
0x34fb   : > { %v8078_v8 = vmul.f32 %v8074_v4, %v7974_v52 }
0x34fd   : > { %9890 = vmatprep.mubr.f32.mxu0 %v8078_v8 }
0x34fe   : > { %9891 = vmatmul.mubr.f32.gmra.mxu0 %v8079_v55 }
0x3531   : > { %v9889_v16 = vpop.f32.mrf.mxu0 }
0x3532   : > { %v8175_v19 = vadd.f32 %v9889_v16, %v8969_v60 }
0x3533   : > { %v8169_v15 = vpop.f32.mrf.mxu0 }
0x3534   : > { %v8189_v33 = vadd.f32 %v8175_v19, %v12161_v25  ;;  %v8170_v32 = vadd.f32 %v8969_v60, %v8169_v15 }
0x3536   : > { %8193 = vst.msk [vmem:[#allocation2 + $0x8] sm:$0xff] %vm1320_vm1, %v8189_v33  ;;  %v8188_v45 = vadd.f32 %v8170_v32, %v12158_v40 }
0x3538   : > { %8192 = vst.msk [vmem:[#allocation2] sm:$0xff] %vm1320_vm1, %v8188_v45 }
0x35be   : > { %v9892_v53 = vpop.f32.mrf.mxu0 }
0x35bf   : > { %v8185_v61 = vadd.f32 %v9892_v53, %v8969_v60 }
0x35c0   : > { %v8179_v23 = vpop.f32.mrf.mxu0 }
0x35c1   : > { %v8191_v34 = vadd.f32 %v8185_v61, %v12187_v24  ;;  %v8180_v46 = vadd.f32 %v8969_v60, %v8179_v23  ;;  %8199 = sbr.rel (%p8970_p5) target bundleno = 14280 (0x37c8), region = 148 }
0x35c3   : > { %8195 = vst.msk [vmem:[#allocation2 + $0x18] sm:$0xff] %vm1320_vm1, %v8191_v34  ;;  %v8190_v14 = vadd.f32 %v8180_v46, %v12191_v7 }
0x35c5   : > { %8194 = vst.msk [vmem:[#allocation2 + $0x10] sm:$0xff] %vm1320_vm1, %v8190_v14 }
0x35c6   : > { %v8202_v25 = vsel %vm1320_vm1, %v8188_v45, 0.0  ;;  %v8205_v40 = vsel %vm1320_vm1, %v8189_v33, 0.0  ;;  %v8208_v51 = vsel %vm1320_vm1, %v8190_v14, 0.0  ;;  %v8211_v24 = vsel %vm1320_vm1, %v8191_v34, 0.0  ;;  %v8277_v30 = vld [vmem:[%s12413_s19 + $0x18] sm:$0xff]  ;;  %v8276_v44 = vld [vmem:[%s12413_s19 + $0x10] sm:$0xff] }
0x35c7   : > { %8203 = vadd.xlane.f32.xlu0 %v8202_v25  ;;  %8206 = vadd.xlane.f32.xlu1 %v8205_v40  ;;  %v8275_v18 = vld [vmem:[%s12413_s19 + $0x8] sm:$0xff]  ;;  %v8274_v9 = vld [vmem:[%s12413_s19] sm:$0xff] }
0x35c8   : > { %9893 = vmatprep.subr.mxu0 %v8277_v30  ;;  %9907 = vmatprep.subr.mxu1 %v8277_v30  ;;  %v8971_v50 = vld [vmem:[%s12414_s4] ss:$0 sm:$0xff] }
0x35c9   : > { %9894 = vmatpush3.msra.mxu0 %v8277_v30  ;;  %9911 = vmatpush3.msra.mxu1 %v8277_v30  ;;  %v8972_v11 = vld [vmem:[%s12415_s16] ss:$0 sm:$0xff] }
0x35ca   : > { %9895 = vmatprep.subr.mxu0 %v8276_v44  ;;  %9908 = vmatprep.subr.mxu1 %v8276_v44  ;;  %v8973_v53 = vld [vmem:[%s12416_s0] ss:$0 sm:$0xff] }
0x35cb   : > { %8209 = vadd.xlane.f32.xlu0 %v8208_v51  ;;  %8212 = vadd.xlane.f32.xlu1 %v8211_v24 }
0x35cc   : > { %9896 = vmatpush3.msra.mxu0 %v8276_v44  ;;  %9912 = vmatpush3.msra.mxu1 %v8276_v44 }
0x35cd   : > { %9897 = vmatprep.subr.mxu0 %v8275_v18  ;;  %9909 = vmatprep.subr.mxu1 %v8275_v18 }
0x35ce   : > { %9898 = vmatpush3.msra.mxu0 %v8275_v18  ;;  %9913 = vmatpush3.msra.mxu1 %v8275_v18 }
0x35cf   : > { %9899 = vmatprep.subr.mxu0 %v8274_v9  ;;  %9910 = vmatprep.subr.mxu1 %v8274_v9 }
0x35d0   : > { %9900 = vmatpush3.msra.mxu0 %v8274_v9  ;;  %9914 = vmatpush3.msra.mxu1 %v8274_v9 }
0x3650   : > { %v8204_v48 = vpop.xlane.xlu0 %8203  ;;  %v8207_v22 = vpop.xlane.xlu1 %8206 }
0x3651   : > { %v8214_v7 = vmul.f32 0.03125, %v8204_v48  ;;  %v8215_v54 = vmul.f32 0.03125, %v8207_v22 }
0x3653   : > { %v8218_v0 = vsub.f32 %v8188_v45, %v8214_v7  ;;  %v12282_v57 = vsub.f32 %v8189_v33, %v8215_v54 }
0x3654   : > { %v8210_v37 = vpop.xlane.xlu0 %8209  ;;  %v8213_v31 = vpop.xlane.xlu1 %8212 }
0x3655   : > { %v8216_v49 = vmul.f32 0.03125, %v8210_v37  ;;  %v8217_v58 = vmul.f32 0.03125, %v8213_v31  ;;  %v8222_v43 = vmul.f32 %v8218_v0, %v8218_v0  ;;  %v8223_v26 = vmul.f32 %v12282_v57, %v12282_v57 }
0x3657   : > { %v8220_v59 = vsub.f32 %v8190_v14, %v8216_v49  ;;  %v8221_v21 = vsub.f32 %v8191_v34, %v8217_v58  ;;  %v8226_v35 = vsel %vm1320_vm1, %v8222_v43, 0.0  ;;  %v8229_v28 = vsel %vm1320_vm1, %v8223_v26, 0.0 }
0x3658   : > { %8227 = vadd.xlane.f32.xlu0 %v8226_v35 }
0x3659   : > { %v8224_v63 = vmul.f32 %v8220_v59, %v8220_v59  ;;  %v8225_v6 = vmul.f32 %v8221_v21, %v8221_v21 }
0x365b   : > { %v8232_v5 = vsel %vm1320_vm1, %v8224_v63, 0.0  ;;  %v8235_v17 = vsel %vm1320_vm1, %v8225_v6, 0.0 }
0x365c   : > { %8230 = vadd.xlane.f32.xlu0 %v8229_v28  ;;  %8233 = vadd.xlane.f32.xlu1 %v8232_v5 }
0x3660   : > { %8236 = vadd.xlane.f32.xlu1 %v8235_v17 }
0x36e1   : > { %v8228_v41 = vpop.xlane.xlu0 %8227 }
0x36e2   : > { %v8238_v56 = vmul.f32 0.03125, %v8228_v41 }
0x36e4   : > { %v8242_v12 = vadd.f32 1e-05, %v8238_v56 }
0x36e5   : > { %v8234_v27 = vpop.xlane.xlu1 %8233  ;;  %v8231_v13 = vpop.xlane.xlu0 %8230 }
0x36e6   : > { %10292 = vrsqrt.f32 %v8242_v12  ;;  %v8240_v1 = vmul.f32 0.03125, %v8234_v27  ;;  %v8239_v47 = vmul.f32 0.03125, %v8231_v13 }
0x36e8   : > { %v8244_v38 = vadd.f32 1e-05, %v8240_v1  ;;  %v8243_v42 = vadd.f32 1e-05, %v8239_v47 }
0x36e9   : > { %v8237_v29 = vpop.xlane.xlu1 %8236 }
0x36ea   : > { %10294 = vrsqrt.f32 %v8244_v38  ;;  %v8241_v62 = vmul.f32 0.03125, %v8237_v29 }
0x36eb   : > { %10296 = vrsqrt.f32 %v8243_v42 }
0x36ec   : > { %v8245_v3 = vadd.f32 1e-05, %v8241_v62 }
0x36ee   : > { %10298 = vrsqrt.f32 %v8245_v3 }
0x36f3   : > { %v10293_v10 = vpop.eup %10292 }
0x36f4   : > { %v8250_v20 = vmul.f32 %v10293_v10, %v8218_v0 }
0x36f6   : > { %v8260_v39 = vmul.f32 %v8971_v50, %v8250_v20 }
0x36f7   : > { %v10295_v36 = vpop.eup %10294 }
0x36f8   : > { %v10297_v52 = vpop.eup %10296  ;;  %v8270_v4 = vadd.f32 %v8972_v11, %v8260_v39  ;;  %v8252_v2 = vmul.f32 %v10295_v36, %v8220_v59 }
0x36f9   : > { %v8251_v8 = vmul.f32 %v10297_v52, %v12282_v57 }
0x36fa   : > { %9901 = vmatprep.mubr.msk.f32.mxu0 %vm1320_vm1, %v8270_v4  ;;  %v8262_v55 = vmul.f32 %v8971_v50, %v8252_v2 }
0x36fb   : > { %v10299_v60 = vpop.eup %10298  ;;  %v8261_v16 = vmul.f32 %v8971_v50, %v8251_v8 }
0x36fc   : > { %v8272_v19 = vadd.f32 %v8972_v11, %v8262_v55  ;;  %v8253_v15 = vmul.f32 %v10299_v60, %v8221_v21 }
0x36fd   : > { %v8271_v33 = vadd.f32 %v8972_v11, %v8261_v16 }
0x36fe   : > { %9904 = vmatprep.mubr.msk.f32.mxu1 %vm1320_vm1, %v8272_v19  ;;  %v8263_v32 = vmul.f32 %v8971_v50, %v8253_v15 }
0x36ff   : > { %9902 = vmatmul.mubr.msk.f32.vlgmr.msra.gmra.mxu0 %vm1320_vm1, %v8271_v33 }
0x3700   : > { %v8273_v45 = vadd.f32 %v8972_v11, %v8263_v32 }
0x3702   : > { %9905 = vmatmul.mubr.msk.f32.vlgmr.msra.gmra.mxu1 %vm1320_vm1, %v8273_v45 }
0x37bf   : > { %v9903_v61 = vpop.f32.mrf.mxu0 }
0x37c0   : > { %v8369_v23 = vadd.f32 %v9903_v61, %v8973_v53 }
0x37c1   : > { %v8363_v34 = vpop.f32.mrf.mxu0 }
0x37c2   : > { %8383 = vst.msk [vmem:[#allocation3 + $0x8] sm:$0xff] %vm5282_vm13, %v8369_v23  ;;  %v8364_v46 = vadd.f32 %v8973_v53, %v8363_v34  ;;  %v9906_v14 = vpop.f32.mrf.mxu1 }
0x37c3   : > { %v8379_v25 = vadd.f32 %v9906_v14, %v8973_v53 }
0x37c4   : > { %8382 = vst.msk [vmem:[#allocation3] sm:$0xff] %vm5282_vm13, %v8364_v46  ;;  %v8373_v40 = vpop.f32.mrf.mxu1 }
0x37c5   : > { %8385 = vst.msk [vmem:[#allocation3 + $0x18] sm:$0xff] %vm5282_vm13, %v8379_v25  ;;  %v8374_v51 = vadd.f32 %v8973_v53, %v8373_v40 }
0x37c7   : > { %8384 = vst.msk [vmem:[#allocation3 + $0x10] sm:$0xff] %vm5282_vm13, %v8374_v51 }
0x37c8 PF: > { %s12417_s23 = sld [smem:[#allocation35_spill]]  ;;  %s10369_s15 = smov [#allocation3]  }
0x37c9   : > { %s8392_s18 = sshll.u32 %s10369_s15, 4  ;;  %s8393_s18 = int_to_ptr.vmem [resolvable:$true] %s8392_s18 }
0x37ca   : > { %s10300_s26 = scalar_lea.vmem %s8393_s18, 512  ;;  %p10307_p10 = scmp.lt.s32.totalorder %s8393_s18, %s8393_s18 }
0x37cb   : > { %p10301_p7 = scmp.ne.s32.totalorder %s8393_s18, %s10300_s26  ;;  %p10308_p11 = scmp.lt.s32.totalorder %s10300_s26, %s10300_s26 }
0x37cd   : > { %p10309_p12 = por %p10308_p11, %p10307_p10 }
0x37ce   : > { %p9923_p6 = scmp.eq.s32.totalorder %s12417_s23, 1 }
0x37d0   : > { %p10302_p8 = pnand %p10301_p7, %p9923_p6 }
0x37d2   : > { %p10303_p9 = pneg %p10302_p8 }
0x37d4   : > { %p10310_p13 = pnand %p10309_p12, %p10303_p9 }
0x37d6   : > { %10313 = shalt.err (!%p10310_p13)
}
0x37d7   : > { %s10370_s28 = smov 128   ;;  %s12418_s1 = sld [smem:[#allocation33_spill]] }
0x37d8   : > { %s10371_s2 = smov 8  }
0x37dd   : > { %9920 = dma.vmem_to_hbm [thread:$0]  (%p9923_p6), %s8393_s18, 512, %s12418_s1, [#allocation4], %s10370_s28, %s10370_s28, %s10371_s2  }
0x37de   : > { %10329 = dma.done.wait (%p9923_p6), [#allocation4], 512  }
0x37df   : > { %10331 = vsyncadd (%p9923_p6), [#allocation4], 4294966784 }
0x37e0 PF: > { %s12419_s7 = sld [smem:[#allocation34_spill]] }
0x37e6   : > { %s72_s15 = sadd.s32 1, %s12419_s7  }
0x37e7   : > { %p69_p0 = scmp.ge.s32.totalorder %s72_s15, 4  }
0x37e9   :  { %71 = sbr.rel (!%p69_p0) target bundleno = 69 (0x45), region = 277 }
0x37ee   :  { %8408 = vsyncpa [#allocation4], 1 }
0x37ef   :  { %8410 = vsyncpa [#allocation4 + $0x1], 1 }

</bundles_post_ra>
